<compile_context>
chip_gen: v5e
topology: v5e:2x2
jax: 0.10.0
libtpu: 0.0.40
codegen_flags: <defaults>
</compile_context>

<pallas_src>
import numpy as np
import jax
import jax.numpy as jnp
from jax import lax
from jax.experimental import pallas as pl
from jax.experimental.pallas import tpu as pltpu

KER = 3              # cfg.ker_size
PADD = 0             # cfg.padd_size (SinGAN default: valid convs, shrink by 2/layer)
LRELU_SLOPE = 0.2
BN_EPS = 1e-5
C_PAD = 16           # every channel dim zero-padded to 16


def _round_up(x, m):
    return ((x + m - 1) // m) * m


# ---------------------------------------------------------------------------
# Fused Pallas kernel
# ---------------------------------------------------------------------------
def _make_fused_kernel(n_img, H, W, n_blocks):
    P = n_img * H * W
    P_pad = _round_up(P, 128)

    def conv(act, w_l, col_ref):
        # act:  (C_PAD, P_pad) activation on the full pixel grid (pixels on lanes)
        # w_l:  (C_PAD, 9*C_PAD) packed conv weight
        # out[c, p] = sum_{kh,kw,ci} w[c, ci, kh, kw] * act[ci, p + kh*W + kw]
        for t in range(KER * KER):
            kh, kw = divmod(t, KER)
            s = kh * W + kw
            shifted = act if s == 0 else pltpu.roll(act, P_pad - s, axis=1)
            col_ref[t * C_PAD:(t + 1) * C_PAD, :] = shifted
        return jnp.dot(w_l, col_ref[...], preferred_element_type=jnp.float32)

    def kernel(x_ref, y_ref, w_ref, tb_ref, gamma_ref, beta_ref, mask_ref,
               o_ref, col_ref):
        act = x_ref[...]                                        # (C_PAD, P_pad)
        for l in range(n_blocks):
            acc = conv(act, w_ref[l], col_ref)
            # conv bias skipped: cancels exactly under the BN mean subtraction.
            ho, wo = H - 2 * (l + 1), W - 2 * (l + 1)
            n_valid = float(n_img * ho * wo)
            mask = mask_ref[l:l + 1, :]                         # (1, P_pad)
            mean = jnp.sum(acc * mask, axis=1, keepdims=True) / n_valid
            cen = acc - mean
            var = jnp.sum(cen * cen * mask, axis=1, keepdims=True) / n_valid
            out = cen * lax.rsqrt(var + BN_EPS) * gamma_ref[l] + beta_ref[l]
            act = jnp.where(out > 0, out, LRELU_SLOPE * out)    # LeakyReLU(0.2)
        # tail: conv -> tanh -> + center-cropped y (y already placed on the grid)
        acc = conv(act, w_ref[n_blocks], col_ref) + tb_ref[...]
        o_ref[...] = jnp.tanh(acc) + y_ref[...]

    return kernel, P, P_pad


# ---------------------------------------------------------------------------
# Wrapper: layout plumbing + pallas_call
# ---------------------------------------------------------------------------
def _vmem_spec():
    return pl.BlockSpec(memory_space=pltpu.MemorySpace.VMEM)


def _pack_conv_weight(w):
    # PyTorch OIHW (Cout, Cin, 3, 3) -> (C_PAD, 9*C_PAD); column index
    # (kh*3 + kw)*C_PAD + ci matches the im2col row layout in the kernel.
    cout, cin = w.shape[0], w.shape[1]
    wt = jnp.transpose(w.astype(jnp.float32), (0, 2, 3, 1)).reshape(cout, KER * KER, cin)
    wp = jnp.zeros((C_PAD, KER * KER, C_PAD), jnp.float32)
    wp = wp.at[:cout, :, :cin].set(wt)
    return wp.reshape(C_PAD, KER * KER * C_PAD)


def _pad_chan_vec(v):
    return jnp.pad(v.astype(jnp.float32), (0, C_PAD - v.shape[0]))


def generator_forward(params, x_nchw, y_nchw):
    n, c_img, H, W = x_nchw.shape
    n_blocks = len(params["blocks"])
    n_convs = n_blocks + 1
    out_h, out_w = H - 2 * n_convs, W - 2 * n_convs

    kernel, P, P_pad = _make_fused_kernel(n, H, W, n_blocks)

    # ---- parameter packing (one-time layout plumbing) ----
    w_all = jnp.stack([_pack_conv_weight(w) for (w, _, _, _) in params["blocks"]]
                      + [_pack_conv_weight(params["tail"][0])])        # (n_convs, 16, 144)
    gammas = jnp.stack([_pad_chan_vec(g) for (_, _, g, _) in params["blocks"]])
    betas = jnp.stack([_pad_chan_vec(b) for (_, _, _, b) in params["blocks"]])
    gammas = gammas.reshape(n_blocks, C_PAD, 1)
    betas = betas.reshape(n_blocks, C_PAD, 1)
    tb = _pad_chan_vec(params["tail"][1]).reshape(C_PAD, 1)

    # ---- activations: NCHW -> (C_PAD, n*H*W) with pixels on lanes ----
    def to_grid(a):   # (n, C_PAD, H, W) -> (C_PAD, P_pad)
        g = jnp.transpose(a, (1, 0, 2, 3)).reshape(C_PAD, P)
        return jnp.pad(g, ((0, 0), (0, P_pad - P)))

    x_full = jnp.pad(x_nchw.astype(jnp.float32),
                     ((0, 0), (0, C_PAD - c_img), (0, 0), (0, 0)))
    x_grid = to_grid(x_full)

    # Replicates: ind = int((y.shape[2] - x.shape[2]) / 2); crop both dims by ind.
    ind = (y_nchw.shape[2] - out_h) // 2
    y_crop = y_nchw[:, :, ind:y_nchw.shape[2] - ind,
                    ind:y_nchw.shape[3] - ind].astype(jnp.float32)
    # place the crop at the top-left of the full grid (= the tail's valid pixels)
    y_full = jnp.pad(y_crop, ((0, 0), (0, C_PAD - y_crop.shape[1]),
                              (0, H - y_crop.shape[2]), (0, W - y_crop.shape[3])))
    y_grid = to_grid(y_full)

    # ---- per-layer validity masks for the BatchNorm statistics ----
    masks_np = np.zeros((n_blocks, P_pad), np.float32)
    for l in range(n_blocks):
        ho, wo = H - 2 * (l + 1), W - 2 * (l + 1)
        m = np.zeros((n, H, W), np.float32)
        m[:, :ho, :wo] = 1.0
        masks_np[l, :P] = m.reshape(-1)
    masks = jnp.asarray(masks_np)

    o_grid = pl.pallas_call(
        kernel,
        out_shape=jax.ShapeDtypeStruct((C_PAD, P_pad), jnp.float32),
        in_specs=[_vmem_spec() for _ in range(7)],
        out_specs=_vmem_spec(),
        scratch_shapes=[pltpu.VMEM((KER * KER * C_PAD, P_pad), jnp.float32)],
    )(x_grid, y_grid, w_all, tb, gammas, betas, masks)

    o = o_grid[:, :P].reshape(C_PAD, n, H, W)
    o = jnp.transpose(o, (1, 0, 2, 3))[:, :c_img, :out_h, :out_w]
    return o


# ---------------------------------------------------------------------------
# Deterministic parameter construction (SinGAN-style shapes, synthetic weights)
# ---------------------------------------------------------------------------
def init_params(key, image_channels=3, nfc=16, min_nfc=16, num_layer=5):
    chans = []
    N = nfc
    chans.append((image_channels, N))                       # head
    for _ in range(num_layer - 2):                          # body
        N //= 2
        chans.append((max(2 * N, min_nfc), max(N, min_nfc)))
    tail_in = max(N, min_nfc)

    blocks = []
    for (cin, cout) in chans:
        key, k1, k2, k3 = jax.random.split(key, 4)
        w = 0.02 * jax.random.normal(k1, (cout, cin, KER, KER), jnp.float32)
        b = 0.02 * jax.random.normal(k2, (cout,), jnp.float32)
        gamma = 1.0 + 0.02 * jax.random.normal(k3, (cout,), jnp.float32)
        beta = jnp.zeros((cout,), jnp.float32)
        blocks.append((w, b, gamma, beta))

    key, k1, k2 = jax.random.split(key, 3)
    tw = 0.02 * jax.random.normal(k1, (image_channels, tail_in, KER, KER), jnp.float32)
    tb = 0.02 * jax.random.normal(k2, (image_channels,), jnp.float32)
    return {"blocks": blocks, "tail": (tw, tb)}


# ---------------------------------------------------------------------------
# Pure-JAX reference (for correctness checking only)
# ---------------------------------------------------------------------------
def ref_forward(params, x_nchw, y_nchw):
    dn = ("NCHW", "OIHW", "NCHW")
    x = x_nchw.astype(jnp.float32)
    for (w, b, gamma, beta) in params["blocks"]:
        x = lax.conv_general_dilated(x, w, (1, 1), "VALID", dimension_numbers=dn)
        x = x + b.reshape(1, -1, 1, 1)
        mean = jnp.mean(x, axis=(0, 2, 3), keepdims=True)
        var = jnp.mean((x - mean) ** 2, axis=(0, 2, 3), keepdims=True)
        x = (x - mean) * lax.rsqrt(var + BN_EPS) * gamma.reshape(1, -1, 1, 1) \
            + beta.reshape(1, -1, 1, 1)
        x = jnp.where(x > 0, x, LRELU_SLOPE * x)
    tw, tb = params["tail"]
    x = lax.conv_general_dilated(x, tw, (1, 1), "VALID", dimension_numbers=dn)
    x = jnp.tanh(x + tb.reshape(1, -1, 1, 1))
    ind = (y_nchw.shape[2] - x.shape[2]) // 2
    y = y_nchw.astype(jnp.float32)[:, :, ind:y_nchw.shape[2] - ind,
                                   ind:y_nchw.shape[3] - ind]
    return x + y


if __name__ == "__main__":
    key = jax.random.PRNGKey(0)
    pkey, xkey, ykey = jax.random.split(key, 3)

    # cfg: nfc=16, min_nfc=16, ker_size=3, padd_size=0, num_layer=5, image_channels=3
    params = init_params(pkey, image_channels=3, nfc=16, min_nfc=16, num_layer=5)

    # 5 valid 3x3 convs shrink spatial by 10: 26 -> 16
    x = jax.random.normal(xkey, (2, 3, 26, 26), jnp.float32)
    y = jax.random.normal(ykey, (2, 3, 26, 26), jnp.float32)

    fwd = jax.jit(generator_forward)
    out = jax.block_until_ready(fwd(params, x, y))
    assert out.shape == (2, 3, 16, 16), out.shape

    ref = jax.block_until_ready(ref_forward(params, x, y))
    max_err = float(jnp.max(jnp.abs(out - ref)))
    assert max_err < 2e-2, f"mismatch vs reference: {max_err}"

    print("KERNEL_OK")
</pallas_src>

<mosaic_0001>
module attributes {stable_mosaic.version = 11 : i64} {
  func.func @kernel(%arg0: memref<16x1408xf32, #tpu.memory_space<vmem>>, %arg1: memref<16x1408xf32, #tpu.memory_space<vmem>>, %arg2: memref<5x16x144xf32, #tpu.memory_space<vmem>>, %arg3: memref<16x1xf32, #tpu.memory_space<vmem>>, %arg4: memref<4x16x1xf32, #tpu.memory_space<vmem>>, %arg5: memref<4x16x1xf32, #tpu.memory_space<vmem>>, %arg6: memref<4x1408xf32, #tpu.memory_space<vmem>>, %arg7: memref<16x1408xf32, #tpu.memory_space<vmem>>, %arg8: memref<144x1408xf32, #tpu.memory_space<vmem>>) attributes {dimension_semantics = [], scalar_prefetch = 0 : i64, scratch_operands = 1 : i64, tpu.core_type = #tpu.core_type<tc>} {
    %c0 = arith.constant 0 : index
    %c0_0 = arith.constant 0 : index
    %0 = vector.load %arg0[%c0, %c0_0] : memref<16x1408xf32, #tpu.memory_space<vmem>>, vector<16x1408xf32>
    %c0_1 = arith.constant 0 : index
    %c0_2 = arith.constant 0 : index
    %c0_3 = arith.constant 0 : index
    %1 = vector.load %arg2[%c0_1, %c0_2, %c0_3] : memref<5x16x144xf32, #tpu.memory_space<vmem>>, vector<1x16x144xf32>
    %2 = vector.shape_cast %1 : vector<1x16x144xf32> to vector<16x144xf32>
    %c0_4 = arith.constant 0 : index
    %c0_5 = arith.constant 0 : index
    %3 = vector.load %arg8[%c0_4, %c0_5] : memref<144x1408xf32, #tpu.memory_space<vmem>>, vector<16x1408xf32>
    tpu.vector_store %arg8[%c0_4, %c0_5], %0 {strides = array<i32>} : memref<144x1408xf32, #tpu.memory_space<vmem>>, vector<16x1408xf32>,
    %c1407_i32 = arith.constant 1407 : i32
    %4 = tpu.dynamic_rotate %0 by %c1407_i32 dim 1 : vector<16x1408xf32>, i32 -> vector<16x1408xf32>
    %c16 = arith.constant 16 : index
    %c0_6 = arith.constant 0 : index
    %5 = vector.load %arg8[%c16, %c0_6] : memref<144x1408xf32, #tpu.memory_space<vmem>>, vector<16x1408xf32>
    tpu.vector_store %arg8[%c16, %c0_6], %4 {strides = array<i32>} : memref<144x1408xf32, #tpu.memory_space<vmem>>, vector<16x1408xf32>,
    %c1406_i32 = arith.constant 1406 : i32
    %6 = tpu.dynamic_rotate %0 by %c1406_i32 dim 1 : vector<16x1408xf32>, i32 -> vector<16x1408xf32>
    %c32 = arith.constant 32 : index
    %c0_7 = arith.constant 0 : index
    %7 = vector.load %arg8[%c32, %c0_7] : memref<144x1408xf32, #tpu.memory_space<vmem>>, vector<16x1408xf32>
    tpu.vector_store %arg8[%c32, %c0_7], %6 {strides = array<i32>} : memref<144x1408xf32, #tpu.memory_space<vmem>>, vector<16x1408xf32>,
    %c1382_i32 = arith.constant 1382 : i32
    %8 = tpu.dynamic_rotate %0 by %c1382_i32 dim 1 : vector<16x1408xf32>, i32 -> vector<16x1408xf32>
    %c48 = arith.constant 48 : index
    %c0_8 = arith.constant 0 : index
    %9 = vector.load %arg8[%c48, %c0_8] : memref<144x1408xf32, #tpu.memory_space<vmem>>, vector<16x1408xf32>
    tpu.vector_store %arg8[%c48, %c0_8], %8 {strides = array<i32>} : memref<144x1408xf32, #tpu.memory_space<vmem>>, vector<16x1408xf32>,
    %c1381_i32 = arith.constant 1381 : i32
    %10 = tpu.dynamic_rotate %0 by %c1381_i32 dim 1 : vector<16x1408xf32>, i32 -> vector<16x1408xf32>
    %c64 = arith.constant 64 : index
    %c0_9 = arith.constant 0 : index
    %11 = vector.load %arg8[%c64, %c0_9] : memref<144x1408xf32, #tpu.memory_space<vmem>>, vector<16x1408xf32>
    tpu.vector_store %arg8[%c64, %c0_9], %10 {strides = array<i32>} : memref<144x1408xf32, #tpu.memory_space<vmem>>, vector<16x1408xf32>,
    %c1380_i32 = arith.constant 1380 : i32
    %12 = tpu.dynamic_rotate %0 by %c1380_i32 dim 1 : vector<16x1408xf32>, i32 -> vector<16x1408xf32>
    %c80 = arith.constant 80 : index
    %c0_10 = arith.constant 0 : index
    %13 = vector.load %arg8[%c80, %c0_10] : memref<144x1408xf32, #tpu.memory_space<vmem>>, vector<16x1408xf32>
    tpu.vector_store %arg8[%c80, %c0_10], %12 {strides = array<i32>} : memref<144x1408xf32, #tpu.memory_space<vmem>>, vector<16x1408xf32>,
    %c1356_i32 = arith.constant 1356 : i32
    %14 = tpu.dynamic_rotate %0 by %c1356_i32 dim 1 : vector<16x1408xf32>, i32 -> vector<16x1408xf32>
    %c96 = arith.constant 96 : index
    %c0_11 = arith.constant 0 : index
    %15 = vector.load %arg8[%c96, %c0_11] : memref<144x1408xf32, #tpu.memory_space<vmem>>, vector<16x1408xf32>
    tpu.vector_store %arg8[%c96, %c0_11], %14 {strides = array<i32>} : memref<144x1408xf32, #tpu.memory_space<vmem>>, vector<16x1408xf32>,
    %c1355_i32 = arith.constant 1355 : i32
    %16 = tpu.dynamic_rotate %0 by %c1355_i32 dim 1 : vector<16x1408xf32>, i32 -> vector<16x1408xf32>
    %c112 = arith.constant 112 : index
    %c0_12 = arith.constant 0 : index
    %17 = vector.load %arg8[%c112, %c0_12] : memref<144x1408xf32, #tpu.memory_space<vmem>>, vector<16x1408xf32>
    tpu.vector_store %arg8[%c112, %c0_12], %16 {strides = array<i32>} : memref<144x1408xf32, #tpu.memory_space<vmem>>, vector<16x1408xf32>,
    %c1354_i32 = arith.constant 1354 : i32
    %18 = tpu.dynamic_rotate %0 by %c1354_i32 dim 1 : vector<16x1408xf32>, i32 -> vector<16x1408xf32>
    %c128 = arith.constant 128 : index
    %c0_13 = arith.constant 0 : index
    %19 = vector.load %arg8[%c128, %c0_13] : memref<144x1408xf32, #tpu.memory_space<vmem>>, vector<16x1408xf32>
    tpu.vector_store %arg8[%c128, %c0_13], %18 {strides = array<i32>} : memref<144x1408xf32, #tpu.memory_space<vmem>>, vector<16x1408xf32>,
    %c0_14 = arith.constant 0 : index
    %c0_15 = arith.constant 0 : index
    %20 = vector.load %arg8[%c0_14, %c0_15] : memref<144x1408xf32, #tpu.memory_space<vmem>>, vector<144x1408xf32>
    %cst = arith.constant dense<0.000000e+00> : vector<16x1408xf32>
    %21 = tpu.matmul %2, %20, %cst {dimension_numbers = #tpu.dot_dimension_numbers<[1], [0], [0], [1], [0, 0, 1, 1], [], []>} : vector<16x144xf32>, vector<144x1408xf32>, vector<16x1408xf32> -> vector<16x1408xf32>
    %c0_16 = arith.constant 0 : index
    %c0_17 = arith.constant 0 : index
    %22 = vector.load %arg6[%c0_16, %c0_17] : memref<4x1408xf32, #tpu.memory_space<vmem>>, vector<1x1408xf32>
    %23 = vector.broadcast %22 : vector<1x1408xf32> to vector<16x1408xf32>
    %24 = arith.mulf %21, %23 : vector<16x1408xf32>
    %cst_18 = arith.constant dense<0.000000e+00> : vector<16xf32>
    %25 = vector.multi_reduction <add>, %24, %cst_18 [1] : vector<16x1408xf32> to vector<16xf32>
    %26 = vector.shape_cast %25 : vector<16xf32> to vector<16x1xf32>
    %cst_19 = arith.constant 1.152000e+03 : f32
    %27 = vector.broadcast %cst_19 : f32 to vector<16x1xf32>
    %28 = arith.divf %26, %27 : vector<16x1xf32>
    %29 = vector.broadcast %28 : vector<16x1xf32> to vector<16x1408xf32>
    %30 = arith.subf %21, %29 : vector<16x1408xf32>
    %31 = arith.mulf %30, %30 : vector<16x1408xf32>
    %32 = vector.broadcast %22 : vector<1x1408xf32> to vector<16x1408xf32>
    %33 = arith.mulf %31, %32 : vector<16x1408xf32>
    %cst_20 = arith.constant dense<0.000000e+00> : vector<16xf32>
    %34 = vector.multi_reduction <add>, %33, %cst_20 [1] : vector<16x1408xf32> to vector<16xf32>
    %35 = vector.shape_cast %34 : vector<16xf32> to vector<16x1xf32>
    %cst_21 = arith.constant 1.152000e+03 : f32
    %36 = vector.broadcast %cst_21 : f32 to vector<16x1xf32>
    %37 = arith.divf %35, %36 : vector<16x1xf32>
    %cst_22 = arith.constant 9.99999974E-6 : f32
    %38 = vector.broadcast %cst_22 : f32 to vector<16x1xf32>
    %39 = arith.addf %37, %38 : vector<16x1xf32>
    %40 = math.rsqrt %39 : vector<16x1xf32>
    %41 = vector.broadcast %40 : vector<16x1xf32> to vector<16x1408xf32>
    %42 = arith.mulf %30, %41 : vector<16x1408xf32>
    %c0_23 = arith.constant 0 : index
    %c0_24 = arith.constant 0 : index
    %c0_25 = arith.constant 0 : index
    %43 = vector.load %arg4[%c0_23, %c0_24, %c0_25] : memref<4x16x1xf32, #tpu.memory_space<vmem>>, vector<1x16x1xf32>
    %44 = vector.shape_cast %43 : vector<1x16x1xf32> to vector<16x1xf32>
    %45 = vector.broadcast %44 : vector<16x1xf32> to vector<16x1408xf32>
    %46 = arith.mulf %42, %45 : vector<16x1408xf32>
    %c0_26 = arith.constant 0 : index
    %c0_27 = arith.constant 0 : index
    %c0_28 = arith.constant 0 : index
    %47 = vector.load %arg5[%c0_26, %c0_27, %c0_28] : memref<4x16x1xf32, #tpu.memory_space<vmem>>, vector<1x16x1xf32>
    %48 = vector.shape_cast %47 : vector<1x16x1xf32> to vector<16x1xf32>
    %49 = vector.broadcast %48 : vector<16x1xf32> to vector<16x1408xf32>
    %50 = arith.addf %46, %49 : vector<16x1408xf32>
    %cst_29 = arith.constant 0.000000e+00 : f32
    %51 = vector.broadcast %cst_29 : f32 to vector<16x1408xf32>
    %52 = arith.cmpf ogt, %50, %51 : vector<16x1408xf32>
    %cst_30 = arith.constant 2.000000e-01 : f32
    %53 = vector.broadcast %cst_30 : f32 to vector<16x1408xf32>
    %54 = arith.mulf %53, %50 : vector<16x1408xf32>
    %55 = arith.select %52, %50, %54 : vector<16x1408xi1>, vector<16x1408xf32>
    %c1 = arith.constant 1 : index
    %c0_31 = arith.constant 0 : index
    %c0_32 = arith.constant 0 : index
    %56 = vector.load %arg2[%c1, %c0_31, %c0_32] : memref<5x16x144xf32, #tpu.memory_space<vmem>>, vector<1x16x144xf32>
    %57 = vector.shape_cast %56 : vector<1x16x144xf32> to vector<16x144xf32>
    %c0_33 = arith.constant 0 : index
    %c0_34 = arith.constant 0 : index
    %58 = vector.load %arg8[%c0_33, %c0_34] : memref<144x1408xf32, #tpu.memory_space<vmem>>, vector<16x1408xf32>
    tpu.vector_store %arg8[%c0_33, %c0_34], %55 {strides = array<i32>} : memref<144x1408xf32, #tpu.memory_space<vmem>>, vector<16x1408xf32>,
    %c1407_i32_35 = arith.constant 1407 : i32
    %59 = tpu.dynamic_rotate %55 by %c1407_i32_35 dim 1 : vector<16x1408xf32>, i32 -> vector<16x1408xf32>
    %c16_36 = arith.constant 16 : index
    %c0_37 = arith.constant 0 : index
    %60 = vector.load %arg8[%c16_36, %c0_37] : memref<144x1408xf32, #tpu.memory_space<vmem>>, vector<16x1408xf32>
    tpu.vector_store %arg8[%c16_36, %c0_37], %59 {strides = array<i32>} : memref<144x1408xf32, #tpu.memory_space<vmem>>, vector<16x1408xf32>,
    %c1406_i32_38 = arith.constant 1406 : i32
    %61 = tpu.dynamic_rotate %55 by %c1406_i32_38 dim 1 : vector<16x1408xf32>, i32 -> vector<16x1408xf32>
    %c32_39 = arith.constant 32 : index
    %c0_40 = arith.constant 0 : index
    %62 = vector.load %arg8[%c32_39, %c0_40] : memref<144x1408xf32, #tpu.memory_space<vmem>>, vector<16x1408xf32>
    tpu.vector_store %arg8[%c32_39, %c0_40], %61 {strides = array<i32>} : memref<144x1408xf32, #tpu.memory_space<vmem>>, vector<16x1408xf32>,
    %c1382_i32_41 = arith.constant 1382 : i32
    %63 = tpu.dynamic_rotate %55 by %c1382_i32_41 dim 1 : vector<16x1408xf32>, i32 -> vector<16x1408xf32>
    %c48_42 = arith.constant 48 : index
    %c0_43 = arith.constant 0 : index
    %64 = vector.load %arg8[%c48_42, %c0_43] : memref<144x1408xf32, #tpu.memory_space<vmem>>, vector<16x1408xf32>
    tpu.vector_store %arg8[%c48_42, %c0_43], %63 {strides = array<i32>} : memref<144x1408xf32, #tpu.memory_space<vmem>>, vector<16x1408xf32>,
    %c1381_i32_44 = arith.constant 1381 : i32
    %65 = tpu.dynamic_rotate %55 by %c1381_i32_44 dim 1 : vector<16x1408xf32>, i32 -> vector<16x1408xf32>
    %c64_45 = arith.constant 64 : index
    %c0_46 = arith.constant 0 : index
    %66 = vector.load %arg8[%c64_45, %c0_46] : memref<144x1408xf32, #tpu.memory_space<vmem>>, vector<16x1408xf32>
    tpu.vector_store %arg8[%c64_45, %c0_46], %65 {strides = array<i32>} : memref<144x1408xf32, #tpu.memory_space<vmem>>, vector<16x1408xf32>,
    %c1380_i32_47 = arith.constant 1380 : i32
    %67 = tpu.dynamic_rotate %55 by %c1380_i32_47 dim 1 : vector<16x1408xf32>, i32 -> vector<16x1408xf32>
    %c80_48 = arith.constant 80 : index
    %c0_49 = arith.constant 0 : index
    %68 = vector.load %arg8[%c80_48, %c0_49] : memref<144x1408xf32, #tpu.memory_space<vmem>>, vector<16x1408xf32>
    tpu.vector_store %arg8[%c80_48, %c0_49], %67 {strides = array<i32>} : memref<144x1408xf32, #tpu.memory_space<vmem>>, vector<16x1408xf32>,
    %c1356_i32_50 = arith.constant 1356 : i32
    %69 = tpu.dynamic_rotate %55 by %c1356_i32_50 dim 1 : vector<16x1408xf32>, i32 -> vector<16x1408xf32>
    %c96_51 = arith.constant 96 : index
    %c0_52 = arith.constant 0 : index
    %70 = vector.load %arg8[%c96_51, %c0_52] : memref<144x1408xf32, #tpu.memory_space<vmem>>, vector<16x1408xf32>
    tpu.vector_store %arg8[%c96_51, %c0_52], %69 {strides = array<i32>} : memref<144x1408xf32, #tpu.memory_space<vmem>>, vector<16x1408xf32>,
    %c1355_i32_53 = arith.constant 1355 : i32
    %71 = tpu.dynamic_rotate %55 by %c1355_i32_53 dim 1 : vector<16x1408xf32>, i32 -> vector<16x1408xf32>
    %c112_54 = arith.constant 112 : index
    %c0_55 = arith.constant 0 : index
    %72 = vector.load %arg8[%c112_54, %c0_55] : memref<144x1408xf32, #tpu.memory_space<vmem>>, vector<16x1408xf32>
    tpu.vector_store %arg8[%c112_54, %c0_55], %71 {strides = array<i32>} : memref<144x1408xf32, #tpu.memory_space<vmem>>, vector<16x1408xf32>,
    %c1354_i32_56 = arith.constant 1354 : i32
    %73 = tpu.dynamic_rotate %55 by %c1354_i32_56 dim 1 : vector<16x1408xf32>, i32 -> vector<16x1408xf32>
    %c128_57 = arith.constant 128 : index
    %c0_58 = arith.constant 0 : index
    %74 = vector.load %arg8[%c128_57, %c0_58] : memref<144x1408xf32, #tpu.memory_space<vmem>>, vector<16x1408xf32>
    tpu.vector_store %arg8[%c128_57, %c0_58], %73 {strides = array<i32>} : memref<144x1408xf32, #tpu.memory_space<vmem>>, vector<16x1408xf32>,
    %c0_59 = arith.constant 0 : index
    %c0_60 = arith.constant 0 : index
    %75 = vector.load %arg8[%c0_59, %c0_60] : memref<144x1408xf32, #tpu.memory_space<vmem>>, vector<144x1408xf32>
    %cst_61 = arith.constant dense<0.000000e+00> : vector<16x1408xf32>
    %76 = tpu.matmul %57, %75, %cst_61 {dimension_numbers = #tpu.dot_dimension_numbers<[1], [0], [0], [1], [0, 0, 1, 1], [], []>} : vector<16x144xf32>, vector<144x1408xf32>, vector<16x1408xf32> -> vector<16x1408xf32>
    %c1_62 = arith.constant 1 : index
    %c0_63 = arith.constant 0 : index
    %77 = vector.load %arg6[%c1_62, %c0_63] : memref<4x1408xf32, #tpu.memory_space<vmem>>, vector<1x1408xf32>
    %78 = vector.broadcast %77 : vector<1x1408xf32> to vector<16x1408xf32>
    %79 = arith.mulf %76, %78 : vector<16x1408xf32>
    %cst_64 = arith.constant dense<0.000000e+00> : vector<16xf32>
    %80 = vector.multi_reduction <add>, %79, %cst_64 [1] : vector<16x1408xf32> to vector<16xf32>
    %81 = vector.shape_cast %80 : vector<16xf32> to vector<16x1xf32>
    %cst_65 = arith.constant 9.680000e+02 : f32
    %82 = vector.broadcast %cst_65 : f32 to vector<16x1xf32>
    %83 = arith.divf %81, %82 : vector<16x1xf32>
    %84 = vector.broadcast %83 : vector<16x1xf32> to vector<16x1408xf32>
    %85 = arith.subf %76, %84 : vector<16x1408xf32>
    %86 = arith.mulf %85, %85 : vector<16x1408xf32>
    %87 = vector.broadcast %77 : vector<1x1408xf32> to vector<16x1408xf32>
    %88 = arith.mulf %86, %87 : vector<16x1408xf32>
    %cst_66 = arith.constant dense<0.000000e+00> : vector<16xf32>
    %89 = vector.multi_reduction <add>, %88, %cst_66 [1] : vector<16x1408xf32> to vector<16xf32>
    %90 = vector.shape_cast %89 : vector<16xf32> to vector<16x1xf32>
    %cst_67 = arith.constant 9.680000e+02 : f32
    %91 = vector.broadcast %cst_67 : f32 to vector<16x1xf32>
    %92 = arith.divf %90, %91 : vector<16x1xf32>
    %cst_68 = arith.constant 9.99999974E-6 : f32
    %93 = vector.broadcast %cst_68 : f32 to vector<16x1xf32>
    %94 = arith.addf %92, %93 : vector<16x1xf32>
    %95 = math.rsqrt %94 : vector<16x1xf32>
    %96 = vector.broadcast %95 : vector<16x1xf32> to vector<16x1408xf32>
    %97 = arith.mulf %85, %96 : vector<16x1408xf32>
    %c1_69 = arith.constant 1 : index
    %c0_70 = arith.constant 0 : index
    %c0_71 = arith.constant 0 : index
    %98 = vector.load %arg4[%c1_69, %c0_70, %c0_71] : memref<4x16x1xf32, #tpu.memory_space<vmem>>, vector<1x16x1xf32>
    %99 = vector.shape_cast %98 : vector<1x16x1xf32> to vector<16x1xf32>
    %100 = vector.broadcast %99 : vector<16x1xf32> to vector<16x1408xf32>
    %101 = arith.mulf %97, %100 : vector<16x1408xf32>
    %c1_72 = arith.constant 1 : index
    %c0_73 = arith.constant 0 : index
    %c0_74 = arith.constant 0 : index
    %102 = vector.load %arg5[%c1_72, %c0_73, %c0_74] : memref<4x16x1xf32, #tpu.memory_space<vmem>>, vector<1x16x1xf32>
    %103 = vector.shape_cast %102 : vector<1x16x1xf32> to vector<16x1xf32>
    %104 = vector.broadcast %103 : vector<16x1xf32> to vector<16x1408xf32>
    %105 = arith.addf %101, %104 : vector<16x1408xf32>
    %cst_75 = arith.constant 0.000000e+00 : f32
    %106 = vector.broadcast %cst_75 : f32 to vector<16x1408xf32>
    %107 = arith.cmpf ogt, %105, %106 : vector<16x1408xf32>
    %cst_76 = arith.constant 2.000000e-01 : f32
    %108 = vector.broadcast %cst_76 : f32 to vector<16x1408xf32>
    %109 = arith.mulf %108, %105 : vector<16x1408xf32>
    %110 = arith.select %107, %105, %109 : vector<16x1408xi1>, vector<16x1408xf32>
    %c2 = arith.constant 2 : index
    %c0_77 = arith.constant 0 : index
    %c0_78 = arith.constant 0 : index
    %111 = vector.load %arg2[%c2, %c0_77, %c0_78] : memref<5x16x144xf32, #tpu.memory_space<vmem>>, vector<1x16x144xf32>
    %112 = vector.shape_cast %111 : vector<1x16x144xf32> to vector<16x144xf32>
    %c0_79 = arith.constant 0 : index
    %c0_80 = arith.constant 0 : index
    %113 = vector.load %arg8[%c0_79, %c0_80] : memref<144x1408xf32, #tpu.memory_space<vmem>>, vector<16x1408xf32>
    tpu.vector_store %arg8[%c0_79, %c0_80], %110 {strides = array<i32>} : memref<144x1408xf32, #tpu.memory_space<vmem>>, vector<16x1408xf32>,
    %c1407_i32_81 = arith.constant 1407 : i32
    %114 = tpu.dynamic_rotate %110 by %c1407_i32_81 dim 1 : vector<16x1408xf32>, i32 -> vector<16x1408xf32>
    %c16_82 = arith.constant 16 : index
    %c0_83 = arith.constant 0 : index
    %115 = vector.load %arg8[%c16_82, %c0_83] : memref<144x1408xf32, #tpu.memory_space<vmem>>, vector<16x1408xf32>
    tpu.vector_store %arg8[%c16_82, %c0_83], %114 {strides = array<i32>} : memref<144x1408xf32, #tpu.memory_space<vmem>>, vector<16x1408xf32>,
    %c1406_i32_84 = arith.constant 1406 : i32
    %116 = tpu.dynamic_rotate %110 by %c1406_i32_84 dim 1 : vector<16x1408xf32>, i32 -> vector<16x1408xf32>
    %c32_85 = arith.constant 32 : index
    %c0_86 = arith.constant 0 : index
    %117 = vector.load %arg8[%c32_85, %c0_86] : memref<144x1408xf32, #tpu.memory_space<vmem>>, vector<16x1408xf32>
    tpu.vector_store %arg8[%c32_85, %c0_86], %116 {strides = array<i32>} : memref<144x1408xf32, #tpu.memory_space<vmem>>, vector<16x1408xf32>,
    %c1382_i32_87 = arith.constant 1382 : i32
    %118 = tpu.dynamic_rotate %110 by %c1382_i32_87 dim 1 : vector<16x1408xf32>, i32 -> vector<16x1408xf32>
    %c48_88 = arith.constant 48 : index
    %c0_89 = arith.constant 0 : index
    %119 = vector.load %arg8[%c48_88, %c0_89] : memref<144x1408xf32, #tpu.memory_space<vmem>>, vector<16x1408xf32>
    tpu.vector_store %arg8[%c48_88, %c0_89], %118 {strides = array<i32>} : memref<144x1408xf32, #tpu.memory_space<vmem>>, vector<16x1408xf32>,
    %c1381_i32_90 = arith.constant 1381 : i32
    %120 = tpu.dynamic_rotate %110 by %c1381_i32_90 dim 1 : vector<16x1408xf32>, i32 -> vector<16x1408xf32>
    %c64_91 = arith.constant 64 : index
    %c0_92 = arith.constant 0 : index
    %121 = vector.load %arg8[%c64_91, %c0_92] : memref<144x1408xf32, #tpu.memory_space<vmem>>, vector<16x1408xf32>
    tpu.vector_store %arg8[%c64_91, %c0_92], %120 {strides = array<i32>} : memref<144x1408xf32, #tpu.memory_space<vmem>>, vector<16x1408xf32>,
    %c1380_i32_93 = arith.constant 1380 : i32
    %122 = tpu.dynamic_rotate %110 by %c1380_i32_93 dim 1 : vector<16x1408xf32>, i32 -> vector<16x1408xf32>
    %c80_94 = arith.constant 80 : index
    %c0_95 = arith.constant 0 : index
    %123 = vector.load %arg8[%c80_94, %c0_95] : memref<144x1408xf32, #tpu.memory_space<vmem>>, vector<16x1408xf32>
    tpu.vector_store %arg8[%c80_94, %c0_95], %122 {strides = array<i32>} : memref<144x1408xf32, #tpu.memory_space<vmem>>, vector<16x1408xf32>,
    %c1356_i32_96 = arith.constant 1356 : i32
    %124 = tpu.dynamic_rotate %110 by %c1356_i32_96 dim 1 : vector<16x1408xf32>, i32 -> vector<16x1408xf32>
    %c96_97 = arith.constant 96 : index
    %c0_98 = arith.constant 0 : index
    %125 = vector.load %arg8[%c96_97, %c0_98] : memref<144x1408xf32, #tpu.memory_space<vmem>>, vector<16x1408xf32>
    tpu.vector_store %arg8[%c96_97, %c0_98], %124 {strides = array<i32>} : memref<144x1408xf32, #tpu.memory_space<vmem>>, vector<16x1408xf32>,
    %c1355_i32_99 = arith.constant 1355 : i32
    %126 = tpu.dynamic_rotate %110 by %c1355_i32_99 dim 1 : vector<16x1408xf32>, i32 -> vector<16x1408xf32>
    %c112_100 = arith.constant 112 : index
    %c0_101 = arith.constant 0 : index
    %127 = vector.load %arg8[%c112_100, %c0_101] : memref<144x1408xf32, #tpu.memory_space<vmem>>, vector<16x1408xf32>
    tpu.vector_store %arg8[%c112_100, %c0_101], %126 {strides = array<i32>} : memref<144x1408xf32, #tpu.memory_space<vmem>>, vector<16x1408xf32>,
    %c1354_i32_102 = arith.constant 1354 : i32
    %128 = tpu.dynamic_rotate %110 by %c1354_i32_102 dim 1 : vector<16x1408xf32>, i32 -> vector<16x1408xf32>
    %c128_103 = arith.constant 128 : index
    %c0_104 = arith.constant 0 : index
    %129 = vector.load %arg8[%c128_103, %c0_104] : memref<144x1408xf32, #tpu.memory_space<vmem>>, vector<16x1408xf32>
    tpu.vector_store %arg8[%c128_103, %c0_104], %128 {strides = array<i32>} : memref<144x1408xf32, #tpu.memory_space<vmem>>, vector<16x1408xf32>,
    %c0_105 = arith.constant 0 : index
    %c0_106 = arith.constant 0 : index
    %130 = vector.load %arg8[%c0_105, %c0_106] : memref<144x1408xf32, #tpu.memory_space<vmem>>, vector<144x1408xf32>
    %cst_107 = arith.constant dense<0.000000e+00> : vector<16x1408xf32>
    %131 = tpu.matmul %112, %130, %cst_107 {dimension_numbers = #tpu.dot_dimension_numbers<[1], [0], [0], [1], [0, 0, 1, 1], [], []>} : vector<16x144xf32>, vector<144x1408xf32>, vector<16x1408xf32> -> vector<16x1408xf32>
    %c2_108 = arith.constant 2 : index
    %c0_109 = arith.constant 0 : index
    %132 = vector.load %arg6[%c2_108, %c0_109] : memref<4x1408xf32, #tpu.memory_space<vmem>>, vector<1x1408xf32>
    %133 = vector.broadcast %132 : vector<1x1408xf32> to vector<16x1408xf32>
    %134 = arith.mulf %131, %133 : vector<16x1408xf32>
    %cst_110 = arith.constant dense<0.000000e+00> : vector<16xf32>
    %135 = vector.multi_reduction <add>, %134, %cst_110 [1] : vector<16x1408xf32> to vector<16xf32>
    %136 = vector.shape_cast %135 : vector<16xf32> to vector<16x1xf32>
    %cst_111 = arith.constant 8.000000e+02 : f32
    %137 = vector.broadcast %cst_111 : f32 to vector<16x1xf32>
    %138 = arith.divf %136, %137 : vector<16x1xf32>
    %139 = vector.broadcast %138 : vector<16x1xf32> to vector<16x1408xf32>
    %140 = arith.subf %131, %139 : vector<16x1408xf32>
    %141 = arith.mulf %140, %140 : vector<16x1408xf32>
    %142 = vector.broadcast %132 : vector<1x1408xf32> to vector<16x1408xf32>
    %143 = arith.mulf %141, %142 : vector<16x1408xf32>
    %cst_112 = arith.constant dense<0.000000e+00> : vector<16xf32>
    %144 = vector.multi_reduction <add>, %143, %cst_112 [1] : vector<16x1408xf32> to vector<16xf32>
    %145 = vector.shape_cast %144 : vector<16xf32> to vector<16x1xf32>
    %cst_113 = arith.constant 8.000000e+02 : f32
    %146 = vector.broadcast %cst_113 : f32 to vector<16x1xf32>
    %147 = arith.divf %145, %146 : vector<16x1xf32>
    %cst_114 = arith.constant 9.99999974E-6 : f32
    %148 = vector.broadcast %cst_114 : f32 to vector<16x1xf32>
    %149 = arith.addf %147, %148 : vector<16x1xf32>
    %150 = math.rsqrt %149 : vector<16x1xf32>
    %151 = vector.broadcast %150 : vector<16x1xf32> to vector<16x1408xf32>
    %152 = arith.mulf %140, %151 : vector<16x1408xf32>
    %c2_115 = arith.constant 2 : index
    %c0_116 = arith.constant 0 : index
    %c0_117 = arith.constant 0 : index
    %153 = vector.load %arg4[%c2_115, %c0_116, %c0_117] : memref<4x16x1xf32, #tpu.memory_space<vmem>>, vector<1x16x1xf32>
    %154 = vector.shape_cast %153 : vector<1x16x1xf32> to vector<16x1xf32>
    %155 = vector.broadcast %154 : vector<16x1xf32> to vector<16x1408xf32>
    %156 = arith.mulf %152, %155 : vector<16x1408xf32>
    %c2_118 = arith.constant 2 : index
    %c0_119 = arith.constant 0 : index
    %c0_120 = arith.constant 0 : index
    %157 = vector.load %arg5[%c2_118, %c0_119, %c0_120] : memref<4x16x1xf32, #tpu.memory_space<vmem>>, vector<1x16x1xf32>
    %158 = vector.shape_cast %157 : vector<1x16x1xf32> to vector<16x1xf32>
    %159 = vector.broadcast %158 : vector<16x1xf32> to vector<16x1408xf32>
    %160 = arith.addf %156, %159 : vector<16x1408xf32>
    %cst_121 = arith.constant 0.000000e+00 : f32
    %161 = vector.broadcast %cst_121 : f32 to vector<16x1408xf32>
    %162 = arith.cmpf ogt, %160, %161 : vector<16x1408xf32>
    %cst_122 = arith.constant 2.000000e-01 : f32
    %163 = vector.broadcast %cst_122 : f32 to vector<16x1408xf32>
    %164 = arith.mulf %163, %160 : vector<16x1408xf32>
    %165 = arith.select %162, %160, %164 : vector<16x1408xi1>, vector<16x1408xf32>
    %c3 = arith.constant 3 : index
    %c0_123 = arith.constant 0 : index
    %c0_124 = arith.constant 0 : index
    %166 = vector.load %arg2[%c3, %c0_123, %c0_124] : memref<5x16x144xf32, #tpu.memory_space<vmem>>, vector<1x16x144xf32>
    %167 = vector.shape_cast %166 : vector<1x16x144xf32> to vector<16x144xf32>
    %c0_125 = arith.constant 0 : index
    %c0_126 = arith.constant 0 : index
    %168 = vector.load %arg8[%c0_125, %c0_126] : memref<144x1408xf32, #tpu.memory_space<vmem>>, vector<16x1408xf32>
    tpu.vector_store %arg8[%c0_125, %c0_126], %165 {strides = array<i32>} : memref<144x1408xf32, #tpu.memory_space<vmem>>, vector<16x1408xf32>,
    %c1407_i32_127 = arith.constant 1407 : i32
    %169 = tpu.dynamic_rotate %165 by %c1407_i32_127 dim 1 : vector<16x1408xf32>, i32 -> vector<16x1408xf32>
    %c16_128 = arith.constant 16 : index
    %c0_129 = arith.constant 0 : index
    %170 = vector.load %arg8[%c16_128, %c0_129] : memref<144x1408xf32, #tpu.memory_space<vmem>>, vector<16x1408xf32>
    tpu.vector_store %arg8[%c16_128, %c0_129], %169 {strides = array<i32>} : memref<144x1408xf32, #tpu.memory_space<vmem>>, vector<16x1408xf32>,
    %c1406_i32_130 = arith.constant 1406 : i32
    %171 = tpu.dynamic_rotate %165 by %c1406_i32_130 dim 1 : vector<16x1408xf32>, i32 -> vector<16x1408xf32>
    %c32_131 = arith.constant 32 : index
    %c0_132 = arith.constant 0 : index
    %172 = vector.load %arg8[%c32_131, %c0_132] : memref<144x1408xf32, #tpu.memory_space<vmem>>, vector<16x1408xf32>
    tpu.vector_store %arg8[%c32_131, %c0_132], %171 {strides = array<i32>} : memref<144x1408xf32, #tpu.memory_space<vmem>>, vector<16x1408xf32>,
    %c1382_i32_133 = arith.constant 1382 : i32
    %173 = tpu.dynamic_rotate %165 by %c1382_i32_133 dim 1 : vector<16x1408xf32>, i32 -> vector<16x1408xf32>
    %c48_134 = arith.constant 48 : index
    %c0_135 = arith.constant 0 : index
    %174 = vector.load %arg8[%c48_134, %c0_135] : memref<144x1408xf32, #tpu.memory_space<vmem>>, vector<16x1408xf32>
    tpu.vector_store %arg8[%c48_134, %c0_135], %173 {strides = array<i32>} : memref<144x1408xf32, #tpu.memory_space<vmem>>, vector<16x1408xf32>,
    %c1381_i32_136 = arith.constant 1381 : i32
    %175 = tpu.dynamic_rotate %165 by %c1381_i32_136 dim 1 : vector<16x1408xf32>, i32 -> vector<16x1408xf32>
    %c64_137 = arith.constant 64 : index
    %c0_138 = arith.constant 0 : index
    %176 = vector.load %arg8[%c64_137, %c0_138] : memref<144x1408xf32, #tpu.memory_space<vmem>>, vector<16x1408xf32>
    tpu.vector_store %arg8[%c64_137, %c0_138], %175 {strides = array<i32>} : memref<144x1408xf32, #tpu.memory_space<vmem>>, vector<16x1408xf32>,
    %c1380_i32_139 = arith.constant 1380 : i32
    %177 = tpu.dynamic_rotate %165 by %c1380_i32_139 dim 1 : vector<16x1408xf32>, i32 -> vector<16x1408xf32>
    %c80_140 = arith.constant 80 : index
    %c0_141 = arith.constant 0 : index
    %178 = vector.load %arg8[%c80_140, %c0_141] : memref<144x1408xf32, #tpu.memory_space<vmem>>, vector<16x1408xf32>
    tpu.vector_store %arg8[%c80_140, %c0_141], %177 {strides = array<i32>} : memref<144x1408xf32, #tpu.memory_space<vmem>>, vector<16x1408xf32>,
    %c1356_i32_142 = arith.constant 1356 : i32
    %179 = tpu.dynamic_rotate %165 by %c1356_i32_142 dim 1 : vector<16x1408xf32>, i32 -> vector<16x1408xf32>
    %c96_143 = arith.constant 96 : index
    %c0_144 = arith.constant 0 : index
    %180 = vector.load %arg8[%c96_143, %c0_144] : memref<144x1408xf32, #tpu.memory_space<vmem>>, vector<16x1408xf32>
    tpu.vector_store %arg8[%c96_143, %c0_144], %179 {strides = array<i32>} : memref<144x1408xf32, #tpu.memory_space<vmem>>, vector<16x1408xf32>,
    %c1355_i32_145 = arith.constant 1355 : i32
    %181 = tpu.dynamic_rotate %165 by %c1355_i32_145 dim 1 : vector<16x1408xf32>, i32 -> vector<16x1408xf32>
    %c112_146 = arith.constant 112 : index
    %c0_147 = arith.constant 0 : index
    %182 = vector.load %arg8[%c112_146, %c0_147] : memref<144x1408xf32, #tpu.memory_space<vmem>>, vector<16x1408xf32>
    tpu.vector_store %arg8[%c112_146, %c0_147], %181 {strides = array<i32>} : memref<144x1408xf32, #tpu.memory_space<vmem>>, vector<16x1408xf32>,
    %c1354_i32_148 = arith.constant 1354 : i32
    %183 = tpu.dynamic_rotate %165 by %c1354_i32_148 dim 1 : vector<16x1408xf32>, i32 -> vector<16x1408xf32>
    %c128_149 = arith.constant 128 : index
    %c0_150 = arith.constant 0 : index
    %184 = vector.load %arg8[%c128_149, %c0_150] : memref<144x1408xf32, #tpu.memory_space<vmem>>, vector<16x1408xf32>
    tpu.vector_store %arg8[%c128_149, %c0_150], %183 {strides = array<i32>} : memref<144x1408xf32, #tpu.memory_space<vmem>>, vector<16x1408xf32>,
    %c0_151 = arith.constant 0 : index
    %c0_152 = arith.constant 0 : index
    %185 = vector.load %arg8[%c0_151, %c0_152] : memref<144x1408xf32, #tpu.memory_space<vmem>>, vector<144x1408xf32>
    %cst_153 = arith.constant dense<0.000000e+00> : vector<16x1408xf32>
    %186 = tpu.matmul %167, %185, %cst_153 {dimension_numbers = #tpu.dot_dimension_numbers<[1], [0], [0], [1], [0, 0, 1, 1], [], []>} : vector<16x144xf32>, vector<144x1408xf32>, vector<16x1408xf32> -> vector<16x1408xf32>
    %c3_154 = arith.constant 3 : index
    %c0_155 = arith.constant 0 : index
    %187 = vector.load %arg6[%c3_154, %c0_155] : memref<4x1408xf32, #tpu.memory_space<vmem>>, vector<1x1408xf32>
    %188 = vector.broadcast %187 : vector<1x1408xf32> to vector<16x1408xf32>
    %189 = arith.mulf %186, %188 : vector<16x1408xf32>
    %cst_156 = arith.constant dense<0.000000e+00> : vector<16xf32>
    %190 = vector.multi_reduction <add>, %189, %cst_156 [1] : vector<16x1408xf32> to vector<16xf32>
    %191 = vector.shape_cast %190 : vector<16xf32> to vector<16x1xf32>
    %cst_157 = arith.constant 6.480000e+02 : f32
    %192 = vector.broadcast %cst_157 : f32 to vector<16x1xf32>
    %193 = arith.divf %191, %192 : vector<16x1xf32>
    %194 = vector.broadcast %193 : vector<16x1xf32> to vector<16x1408xf32>
    %195 = arith.subf %186, %194 : vector<16x1408xf32>
    %196 = arith.mulf %195, %195 : vector<16x1408xf32>
    %197 = vector.broadcast %187 : vector<1x1408xf32> to vector<16x1408xf32>
    %198 = arith.mulf %196, %197 : vector<16x1408xf32>
    %cst_158 = arith.constant dense<0.000000e+00> : vector<16xf32>
    %199 = vector.multi_reduction <add>, %198, %cst_158 [1] : vector<16x1408xf32> to vector<16xf32>
    %200 = vector.shape_cast %199 : vector<16xf32> to vector<16x1xf32>
    %cst_159 = arith.constant 6.480000e+02 : f32
    %201 = vector.broadcast %cst_159 : f32 to vector<16x1xf32>
    %202 = arith.divf %200, %201 : vector<16x1xf32>
    %cst_160 = arith.constant 9.99999974E-6 : f32
    %203 = vector.broadcast %cst_160 : f32 to vector<16x1xf32>
    %204 = arith.addf %202, %203 : vector<16x1xf32>
    %205 = math.rsqrt %204 : vector<16x1xf32>
    %206 = vector.broadcast %205 : vector<16x1xf32> to vector<16x1408xf32>
    %207 = arith.mulf %195, %206 : vector<16x1408xf32>
    %c3_161 = arith.constant 3 : index
    %c0_162 = arith.constant 0 : index
    %c0_163 = arith.constant 0 : index
    %208 = vector.load %arg4[%c3_161, %c0_162, %c0_163] : memref<4x16x1xf32, #tpu.memory_space<vmem>>, vector<1x16x1xf32>
    %209 = vector.shape_cast %208 : vector<1x16x1xf32> to vector<16x1xf32>
    %210 = vector.broadcast %209 : vector<16x1xf32> to vector<16x1408xf32>
    %211 = arith.mulf %207, %210 : vector<16x1408xf32>
    %c3_164 = arith.constant 3 : index
    %c0_165 = arith.constant 0 : index
    %c0_166 = arith.constant 0 : index
    %212 = vector.load %arg5[%c3_164, %c0_165, %c0_166] : memref<4x16x1xf32, #tpu.memory_space<vmem>>, vector<1x16x1xf32>
    %213 = vector.shape_cast %212 : vector<1x16x1xf32> to vector<16x1xf32>
    %214 = vector.broadcast %213 : vector<16x1xf32> to vector<16x1408xf32>
    %215 = arith.addf %211, %214 : vector<16x1408xf32>
    %cst_167 = arith.constant 0.000000e+00 : f32
    %216 = vector.broadcast %cst_167 : f32 to vector<16x1408xf32>
    %217 = arith.cmpf ogt, %215, %216 : vector<16x1408xf32>
    %cst_168 = arith.constant 2.000000e-01 : f32
    %218 = vector.broadcast %cst_168 : f32 to vector<16x1408xf32>
    %219 = arith.mulf %218, %215 : vector<16x1408xf32>
    %220 = arith.select %217, %215, %219 : vector<16x1408xi1>, vector<16x1408xf32>
    %c4 = arith.constant 4 : index
    %c0_169 = arith.constant 0 : index
    %c0_170 = arith.constant 0 : index
    %221 = vector.load %arg2[%c4, %c0_169, %c0_170] : memref<5x16x144xf32, #tpu.memory_space<vmem>>, vector<1x16x144xf32>
    %222 = vector.shape_cast %221 : vector<1x16x144xf32> to vector<16x144xf32>
    %c0_171 = arith.constant 0 : index
    %c0_172 = arith.constant 0 : index
    %223 = vector.load %arg8[%c0_171, %c0_172] : memref<144x1408xf32, #tpu.memory_space<vmem>>, vector<16x1408xf32>
    tpu.vector_store %arg8[%c0_171, %c0_172], %220 {strides = array<i32>} : memref<144x1408xf32, #tpu.memory_space<vmem>>, vector<16x1408xf32>,
    %c1407_i32_173 = arith.constant 1407 : i32
    %224 = tpu.dynamic_rotate %220 by %c1407_i32_173 dim 1 : vector<16x1408xf32>, i32 -> vector<16x1408xf32>
    %c16_174 = arith.constant 16 : index
    %c0_175 = arith.constant 0 : index
    %225 = vector.load %arg8[%c16_174, %c0_175] : memref<144x1408xf32, #tpu.memory_space<vmem>>, vector<16x1408xf32>
    tpu.vector_store %arg8[%c16_174, %c0_175], %224 {strides = array<i32>} : memref<144x1408xf32, #tpu.memory_space<vmem>>, vector<16x1408xf32>,
    %c1406_i32_176 = arith.constant 1406 : i32
    %226 = tpu.dynamic_rotate %220 by %c1406_i32_176 dim 1 : vector<16x1408xf32>, i32 -> vector<16x1408xf32>
    %c32_177 = arith.constant 32 : index
    %c0_178 = arith.constant 0 : index
    %227 = vector.load %arg8[%c32_177, %c0_178] : memref<144x1408xf32, #tpu.memory_space<vmem>>, vector<16x1408xf32>
    tpu.vector_store %arg8[%c32_177, %c0_178], %226 {strides = array<i32>} : memref<144x1408xf32, #tpu.memory_space<vmem>>, vector<16x1408xf32>,
    %c1382_i32_179 = arith.constant 1382 : i32
    %228 = tpu.dynamic_rotate %220 by %c1382_i32_179 dim 1 : vector<16x1408xf32>, i32 -> vector<16x1408xf32>
    %c48_180 = arith.constant 48 : index
    %c0_181 = arith.constant 0 : index
    %229 = vector.load %arg8[%c48_180, %c0_181] : memref<144x1408xf32, #tpu.memory_space<vmem>>, vector<16x1408xf32>
    tpu.vector_store %arg8[%c48_180, %c0_181], %228 {strides = array<i32>} : memref<144x1408xf32, #tpu.memory_space<vmem>>, vector<16x1408xf32>,
    %c1381_i32_182 = arith.constant 1381 : i32
    %230 = tpu.dynamic_rotate %220 by %c1381_i32_182 dim 1 : vector<16x1408xf32>, i32 -> vector<16x1408xf32>
    %c64_183 = arith.constant 64 : index
    %c0_184 = arith.constant 0 : index
    %231 = vector.load %arg8[%c64_183, %c0_184] : memref<144x1408xf32, #tpu.memory_space<vmem>>, vector<16x1408xf32>
    tpu.vector_store %arg8[%c64_183, %c0_184], %230 {strides = array<i32>} : memref<144x1408xf32, #tpu.memory_space<vmem>>, vector<16x1408xf32>,
    %c1380_i32_185 = arith.constant 1380 : i32
    %232 = tpu.dynamic_rotate %220 by %c1380_i32_185 dim 1 : vector<16x1408xf32>, i32 -> vector<16x1408xf32>
    %c80_186 = arith.constant 80 : index
    %c0_187 = arith.constant 0 : index
    %233 = vector.load %arg8[%c80_186, %c0_187] : memref<144x1408xf32, #tpu.memory_space<vmem>>, vector<16x1408xf32>
    tpu.vector_store %arg8[%c80_186, %c0_187], %232 {strides = array<i32>} : memref<144x1408xf32, #tpu.memory_space<vmem>>, vector<16x1408xf32>,
    %c1356_i32_188 = arith.constant 1356 : i32
    %234 = tpu.dynamic_rotate %220 by %c1356_i32_188 dim 1 : vector<16x1408xf32>, i32 -> vector<16x1408xf32>
    %c96_189 = arith.constant 96 : index
    %c0_190 = arith.constant 0 : index
    %235 = vector.load %arg8[%c96_189, %c0_190] : memref<144x1408xf32, #tpu.memory_space<vmem>>, vector<16x1408xf32>
    tpu.vector_store %arg8[%c96_189, %c0_190], %234 {strides = array<i32>} : memref<144x1408xf32, #tpu.memory_space<vmem>>, vector<16x1408xf32>,
    %c1355_i32_191 = arith.constant 1355 : i32
    %236 = tpu.dynamic_rotate %220 by %c1355_i32_191 dim 1 : vector<16x1408xf32>, i32 -> vector<16x1408xf32>
    %c112_192 = arith.constant 112 : index
    %c0_193 = arith.constant 0 : index
    %237 = vector.load %arg8[%c112_192, %c0_193] : memref<144x1408xf32, #tpu.memory_space<vmem>>, vector<16x1408xf32>
    tpu.vector_store %arg8[%c112_192, %c0_193], %236 {strides = array<i32>} : memref<144x1408xf32, #tpu.memory_space<vmem>>, vector<16x1408xf32>,
    %c1354_i32_194 = arith.constant 1354 : i32
    %238 = tpu.dynamic_rotate %220 by %c1354_i32_194 dim 1 : vector<16x1408xf32>, i32 -> vector<16x1408xf32>
    %c128_195 = arith.constant 128 : index
    %c0_196 = arith.constant 0 : index
    %239 = vector.load %arg8[%c128_195, %c0_196] : memref<144x1408xf32, #tpu.memory_space<vmem>>, vector<16x1408xf32>
    tpu.vector_store %arg8[%c128_195, %c0_196], %238 {strides = array<i32>} : memref<144x1408xf32, #tpu.memory_space<vmem>>, vector<16x1408xf32>,
    %c0_197 = arith.constant 0 : index
    %c0_198 = arith.constant 0 : index
    %240 = vector.load %arg8[%c0_197, %c0_198] : memref<144x1408xf32, #tpu.memory_space<vmem>>, vector<144x1408xf32>
    %cst_199 = arith.constant dense<0.000000e+00> : vector<16x1408xf32>
    %241 = tpu.matmul %222, %240, %cst_199 {dimension_numbers = #tpu.dot_dimension_numbers<[1], [0], [0], [1], [0, 0, 1, 1], [], []>} : vector<16x144xf32>, vector<144x1408xf32>, vector<16x1408xf32> -> vector<16x1408xf32>
    %c0_200 = arith.constant 0 : index
    %c0_201 = arith.constant 0 : index
    %242 = vector.load %arg3[%c0_200, %c0_201] : memref<16x1xf32, #tpu.memory_space<vmem>>, vector<16x1xf32>
    %243 = vector.broadcast %242 : vector<16x1xf32> to vector<16x1408xf32>
    %244 = arith.addf %241, %243 : vector<16x1408xf32>
    %245 = math.tanh %244 : vector<16x1408xf32>
    %c0_202 = arith.constant 0 : index
    %c0_203 = arith.constant 0 : index
    %246 = vector.load %arg1[%c0_202, %c0_203] : memref<16x1408xf32, #tpu.memory_space<vmem>>, vector<16x1408xf32>
    %247 = arith.addf %245, %246 : vector<16x1408xf32>
    %c0_204 = arith.constant 0 : index
    %c0_205 = arith.constant 0 : index
    %248 = vector.load %arg7[%c0_204, %c0_205] : memref<16x1408xf32, #tpu.memory_space<vmem>>, vector<16x1408xf32>
    tpu.vector_store %arg7[%c0_204, %c0_205], %247 {strides = array<i32>} : memref<16x1408xf32, #tpu.memory_space<vmem>>, vector<16x1408xf32>,
    return
  }
}

</mosaic_0001>

<bundles_post_ra>
// kernel: generator_forward.1
= control target key start
LH: loop header
LB: loop body
LE: loop exit
PB: predicated region body
PF: predicated region fallthrough
CT: control target
= control target key end

     0   :  { %s11231_s13 = smov 127   ;;  %s11232_s24 = smov 126   ;;  %vm986_vm8 = vcmask 130048   ;;  %s20402_s0 = inlined_call_operand.vmem [shape: f32[16,1408], index: 0, kind: input, shape index: {}]   ;;  %s20403_s2 = inlined_call_operand.vmem [shape: f32[5,16,144], index: 2, kind: input, shape index: {}]   ;;  %s20404_s4 = inlined_call_operand.vmem [shape: f32[4,16,1], index: 4, kind: input, shape index: {}]   ;;  %s20405_s5 = inlined_call_operand.vmem [shape: f32[4,16,1], index: 5, kind: input, shape index: {}]   ;;  %s20406_s6 = inlined_call_operand.vmem [shape: f32[4,1408], index: 6, kind: input, shape index: {}]   ;;  %s20407_s3 = inlined_call_operand.vmem [shape: f32[16,1], index: 3, kind: input, shape index: {}]   ;;  %s20408_s1 = inlined_call_operand.vmem [shape: f32[16,1408], index: 1, kind: input, shape index: {}]   ;;  %s20409_s7 = inlined_call_operand.vmem [shape: f32[16,1408], index: 7, kind: output, shape index: {}]  }
   0x1   :  { %v30_v0 = vld [vmem:[%s20402_s0 + $0x20] sm:$0xff]  ;;  %v41_v1 = vld [vmem:[%s20402_s0 + $0x78] sm:$0xff]  ;;  %v28_v2 = vld [vmem:[%s20402_s0 + $0x10] sm:$0xff]  ;;  %s11233_s25 = smov 102   ;;  %s11234_s26 = smov 101  }
   0x2   :  { %v11293_v3 = vpack.i.bf16 %v41_v1, %v30_v0  ;;  %v39_v4 = vld [vmem:[%s20402_s0 + $0x68] sm:$0xff]  ;;  %v11301_v5 = vld [vmem:[%s20402_s0] sm:$0xff]  ;;  %v11306_v6 = vld [vmem:[%s20402_s0 + $0x58] sm:$0xff]  ;;  %s11235_s27 = smov 100   ;;  %s11236_s28 = smov 76  }
   0x3   :  { %v11308_v7 = vpack.i.bf16 %v39_v4, %v28_v2  ;;  %v11312_v8 = vpack.i.bf16 %v11306_v6, %v11301_v5  ;;  %v31_v9 = vld [vmem:[%s20402_s0 + $0x28] sm:$0xff]  ;;  %v42_v10 = vld [vmem:[%s20402_s0 + $0x80] sm:$0xff]  ;;  %v29_v11 = vld [vmem:[%s20402_s0 + $0x18] sm:$0xff]  ;;  %s11237_s29 = smov 75   ;;  %s11238_s30 = smov 74  }
   0x4   :  { %8963 = vrot.lane.b32.xlu2 %v11293_v3, %s11231_s13  ;;  %v40_v12 = vld [vmem:[%s20402_s0 + $0x70] sm:$0xff]  ;;  %v11335_v13 = vld [vmem:[%s20402_s0 + $0x8] sm:$0xff]  ;;  %v11340_v14 = vld [vmem:[%s20402_s0 + $0x60] sm:$0xff]  ;;  %v11342_v15 = vpack.i.bf16 %v42_v10, %v31_v9 }
   0x5   :  { %8953 = vrot.lane.b32.xlu1 %v11308_v7, %s11231_s13  ;;  %8943 = vrot.lane.b32.xlu0 %v11312_v8, %s11231_s13  ;;  %v11344_v16 = vpack.i.bf16 %v40_v12, %v29_v11  ;;  %v11348_v17 = vpack.i.bf16 %v11340_v14, %v11335_v13  ;;  %v34_v18 = vld [vmem:[%s20402_s0 + $0x40] sm:$0xff]  ;;  %v45_v19 = vld [vmem:[%s20402_s0 + $0x98] sm:$0xff] }
   0x6   :  { %v33_v20 = vld [vmem:[%s20402_s0 + $0x38] sm:$0xff]  ;;  %v44_v21 = vld [vmem:[%s20402_s0 + $0x90] sm:$0xff]  ;;  %v43_v23 = vld [vmem:[%s20402_s0 + $0x88] sm:$0xff]  ;;  %v11374_v24 = vpack.i.bf16 %v45_v19, %v34_v18 }
   0x7   :  { %v32_v22 = vld [vmem:[%s20402_s0 + $0x30] sm:$0xff]  ;;  %v11376_v25 = vpack.i.bf16 %v44_v21, %v33_v20  ;;  %v47_v28 = vld [vmem:[%s20402_s0 + $0xa8] sm:$0xff]  ;;  %v46_v30 = vld [vmem:[%s20402_s0 + $0xa0] sm:$0xff] }
   0x8   :  { %v11378_v26 = vpack.i.bf16 %v43_v23, %v32_v22  ;;  %v36_v27 = vld [vmem:[%s20402_s0 + $0x50] sm:$0xff]  ;;  %v35_v29 = vld [vmem:[%s20402_s0 + $0x48] sm:$0xff] }
   0x9   :  { %v11398_v31 = vpack.i.bf16 %v47_v28, %v36_v27  ;;  %v11400_v32 = vpack.i.bf16 %v46_v30, %v35_v29 }
   0xc   :  { %8968 = vrot.lane.b32.xlu2 %v11342_v15, %s11231_s13 }
   0xd   :  { %8958 = vrot.lane.b32.xlu1 %v11344_v16, %s11231_s13  ;;  %8948 = vrot.lane.b32.xlu0 %v11348_v17, %s11231_s13 }
  0x14   :  { %8983 = vrot.lane.b32.xlu2 %v11374_v24, %s11231_s13 }
  0x15   :  { %8978 = vrot.lane.b32.xlu1 %v11376_v25, %s11231_s13  ;;  %8973 = vrot.lane.b32.xlu0 %v11378_v26, %s11231_s13 }
  0x1c   :  { %8998 = vrot.lane.b32.xlu2 %v11312_v8, %s11232_s24 }
  0x1d   :  { %8993 = vrot.lane.b32.xlu1 %v11398_v31, %s11231_s13  ;;  %8988 = vrot.lane.b32.xlu0 %v11400_v32, %s11231_s13 }
  0x24   :  { %9013 = vrot.lane.b32.xlu2 %v11344_v16, %s11232_s24 }
  0x25   :  { %9008 = vrot.lane.b32.xlu1 %v11308_v7, %s11232_s24  ;;  %9003 = vrot.lane.b32.xlu0 %v11348_v17, %s11232_s24 }
  0x2c   :  { %9028 = vrot.lane.b32.xlu2 %v11378_v26, %s11232_s24 }
  0x2d   :  { %9023 = vrot.lane.b32.xlu1 %v11342_v15, %s11232_s24  ;;  %9018 = vrot.lane.b32.xlu0 %v11293_v3, %s11232_s24 }
  0x34   :  { %9043 = vrot.lane.b32.xlu2 %v11400_v32, %s11232_s24 }
  0x35   :  { %9038 = vrot.lane.b32.xlu1 %v11374_v24, %s11232_s24  ;;  %9033 = vrot.lane.b32.xlu0 %v11376_v25, %s11232_s24 }
  0x3c   :  { %9058 = vrot.lane.b32.xlu2 %v11348_v17, %s11233_s25 }
  0x3d   :  { %9053 = vrot.lane.b32.xlu1 %v11312_v8, %s11233_s25  ;;  %9048 = vrot.lane.b32.xlu0 %v11398_v31, %s11232_s24 }
  0x44   :  { %9073 = vrot.lane.b32.xlu2 %v11293_v3, %s11233_s25 }
  0x45   :  { %9068 = vrot.lane.b32.xlu1 %v11344_v16, %s11233_s25  ;;  %9063 = vrot.lane.b32.xlu0 %v11308_v7, %s11233_s25 }
  0x4c   :  { %9088 = vrot.lane.b32.xlu2 %v11376_v25, %s11233_s25 }
  0x4d   :  { %9083 = vrot.lane.b32.xlu1 %v11378_v26, %s11233_s25  ;;  %9078 = vrot.lane.b32.xlu0 %v11342_v15, %s11233_s25 }
  0x54   :  { %9103 = vrot.lane.b32.xlu2 %v11398_v31, %s11233_s25 }
  0x55   :  { %9098 = vrot.lane.b32.xlu1 %v11400_v32, %s11233_s25  ;;  %9093 = vrot.lane.b32.xlu0 %v11374_v24, %s11233_s25 }
  0x5c   :  { %9118 = vrot.lane.b32.xlu2 %v11308_v7, %s11234_s26 }
  0x5d   :  { %9113 = vrot.lane.b32.xlu1 %v11348_v17, %s11234_s26  ;;  %9108 = vrot.lane.b32.xlu0 %v11312_v8, %s11234_s26 }
  0x5e   :  { %v11456_v33 = vpop.permute.xlu2 %8963 }
  0x64   :  { %9133 = vrot.lane.b32.xlu2 %v11342_v15, %s11234_s26 }
  0x65   :  { %9128 = vrot.lane.b32.xlu1 %v11293_v3, %s11234_s26  ;;  %9123 = vrot.lane.b32.xlu0 %v11344_v16, %s11234_s26 }
  0x66   :  { %v11464_v34 = vpop.permute.xlu2 %8968 }
  0x6c   :  { %9148 = vrot.lane.b32.xlu2 %v11374_v24, %s11234_s26 }
  0x6d   :  { %9143 = vrot.lane.b32.xlu1 %v11376_v25, %s11234_s26  ;;  %9138 = vrot.lane.b32.xlu0 %v11378_v26, %s11234_s26 }
  0x6e   :  { %v11472_v35 = vpop.permute.xlu2 %8983 }
  0x6f   :  { %20727 = vst [vmem:[#allocation3_spill] sm:$0xff] %v11472_v35 }
  0x74   :  { %9163 = vrot.lane.b32.xlu2 %v11312_v8, %s11235_s27 }
  0x75   :  { %9158 = vrot.lane.b32.xlu1 %v11398_v31, %s11234_s26  ;;  %9153 = vrot.lane.b32.xlu0 %v11400_v32, %s11234_s26 }
  0x76   :  { %v11480_v36 = vpop.permute.xlu2 %8998 }
  0x77   :  { %20728 = vst [vmem:[#allocation4_spill] sm:$0xff] %v11480_v36  ;;  %v11482_v37 = vpop.permute.xlu1 %8953  ;;  %v11484_v38 = vpop.permute.xlu0 %8943 }
  0x78   :  { %20729 = vst [vmem:[#allocation5_spill] sm:$0xff] %v11484_v38 }
  0x7c   :  { %9178 = vrot.lane.b32.xlu2 %v11344_v16, %s11235_s27 }
  0x7d   :  { %9173 = vrot.lane.b32.xlu1 %v11308_v7, %s11235_s27  ;;  %9168 = vrot.lane.b32.xlu0 %v11348_v17, %s11235_s27 }
  0x7e   :  { %v11492_v39 = vpop.permute.xlu2 %9013 }
  0x7f   :  { %v11494_v40 = vpop.permute.xlu1 %8958  ;;  %v11496_v41 = vpop.permute.xlu0 %8948 }
  0x84   :  { %9193 = vrot.lane.b32.xlu2 %v11378_v26, %s11235_s27 }
  0x85   :  { %9188 = vrot.lane.b32.xlu1 %v11342_v15, %s11235_s27  ;;  %9183 = vrot.lane.b32.xlu0 %v11293_v3, %s11235_s27 }
  0x86   :  { %v11504_v42 = vpop.permute.xlu2 %9028 }
  0x87   :  { %v11506_v43 = vpop.permute.xlu1 %8978  ;;  %v11508_v44 = vpop.permute.xlu0 %8973 }
  0x88   :  { %20730 = vst [vmem:[#allocation6_spill] sm:$0xff] %v11506_v43 }
  0x8c   :  { %9208 = vrot.lane.b32.xlu2 %v11400_v32, %s11235_s27 }
  0x8d   :  { %9203 = vrot.lane.b32.xlu1 %v11374_v24, %s11235_s27  ;;  %9198 = vrot.lane.b32.xlu0 %v11376_v25, %s11235_s27 }
  0x8e   :  { %v11516_v45 = vpop.permute.xlu2 %9043 }
  0x8f   :  { %20731 = vst [vmem:[#allocation7_spill] sm:$0xff] %v11516_v45  ;;  %v11518_v46 = vpop.permute.xlu1 %8993  ;;  %v11520_v47 = vpop.permute.xlu0 %8988 }
  0x90   :  { %20732 = vst [vmem:[#allocation8_spill] sm:$0xff] %v11518_v46 }
  0x91   :  { %20733 = vst [vmem:[#allocation9_spill] sm:$0xff] %v11520_v47 }
  0x94   :  { %9223 = vrot.lane.b32.xlu2 %v11348_v17, %s11236_s28 }
  0x95   :  { %9218 = vrot.lane.b32.xlu1 %v11312_v8, %s11236_s28  ;;  %9213 = vrot.lane.b32.xlu0 %v11398_v31, %s11235_s27 }
  0x96   :  { %v11528_v48 = vpop.permute.xlu2 %9058 }
  0x97   :  { %v11530_v49 = vpop.permute.xlu1 %9008  ;;  %v11532_v50 = vpop.permute.xlu0 %9003 }
  0x9c   :  { %9238 = vrot.lane.b32.xlu2 %v11293_v3, %s11236_s28 }
  0x9d   :  { %9233 = vrot.lane.b32.xlu1 %v11344_v16, %s11236_s28  ;;  %9228 = vrot.lane.b32.xlu0 %v11308_v7, %s11236_s28 }
  0x9e   :  { %v11540_v51 = vpop.permute.xlu2 %9073 }
  0x9f   :  { %v11542_v52 = vpop.permute.xlu1 %9023  ;;  %v11544_v53 = vpop.permute.xlu0 %9018 }
  0xa4   :  { %9253 = vrot.lane.b32.xlu2 %v11376_v25, %s11236_s28 }
  0xa5   :  { %9248 = vrot.lane.b32.xlu1 %v11378_v26, %s11236_s28  ;;  %9243 = vrot.lane.b32.xlu0 %v11342_v15, %s11236_s28 }
  0xa6   :  { %v11552_v54 = vpop.permute.xlu2 %9088 }
  0xa7   :  { %20734 = vst [vmem:[#allocation10_spill] sm:$0xff] %v11552_v54  ;;  %v11554_v55 = vpop.permute.xlu1 %9038  ;;  %v11556_v56 = vpop.permute.xlu0 %9033 }
  0xa8   :  { %20735 = vst [vmem:[#allocation11_spill] sm:$0xff] %v11554_v55 }
  0xa9   :  { %20736 = vst [vmem:[#allocation12_spill] sm:$0xff] %v11556_v56 }
  0xac   :  { %9268 = vrot.lane.b32.xlu2 %v11398_v31, %s11236_s28 }
  0xad   :  { %9263 = vrot.lane.b32.xlu1 %v11400_v32, %s11236_s28  ;;  %9258 = vrot.lane.b32.xlu0 %v11374_v24, %s11236_s28 }
  0xae   :  { %v11564_v57 = vpop.permute.xlu2 %9103 }
  0xaf   :  { %20737 = vst [vmem:[#allocation13_spill] sm:$0xff] %v11564_v57  ;;  %v11566_v58 = vpop.permute.xlu1 %9053  ;;  %v11568_v59 = vpop.permute.xlu0 %9048 }
  0xb0   :  { %20738 = vst [vmem:[#allocation14_spill] sm:$0xff] %v11566_v58 }
  0xb1   :  { %20739 = vst [vmem:[#allocation15_spill] sm:$0xff] %v11568_v59 }
  0xb4   :  { %9283 = vrot.lane.b32.xlu2 %v11308_v7, %s11237_s29 }
  0xb5   :  { %9278 = vrot.lane.b32.xlu1 %v11348_v17, %s11237_s29  ;;  %9273 = vrot.lane.b32.xlu0 %v11312_v8, %s11237_s29 }
  0xb6   :  { %v11576_v60 = vpop.permute.xlu2 %9118 }
  0xb7   :  { %v11578_v61 = vpop.permute.xlu1 %9068  ;;  %v11580_v62 = vpop.permute.xlu0 %9063 }
  0xbc   :  { %9298 = vrot.lane.b32.xlu2 %v11342_v15, %s11237_s29 }
  0xbd   :  { %9293 = vrot.lane.b32.xlu1 %v11293_v3, %s11237_s29  ;;  %9288 = vrot.lane.b32.xlu0 %v11344_v16, %s11237_s29 }
  0xbe   :  { %v11588_v63 = vpop.permute.xlu2 %9133 }
  0xbf   :  { %v11590_v0 = vpop.permute.xlu1 %9083  ;;  %v11592_v1 = vpop.permute.xlu0 %9078 }
  0xc4   :  { %9313 = vrot.lane.b32.xlu2 %v11374_v24, %s11237_s29 }
  0xc5   :  { %9308 = vrot.lane.b32.xlu1 %v11376_v25, %s11237_s29  ;;  %9303 = vrot.lane.b32.xlu0 %v11378_v26, %s11237_s29 }
  0xc6   :  { %v11600_v2 = vpop.permute.xlu2 %9148 }
  0xc7   :  { %20740 = vst [vmem:[#allocation16_spill] sm:$0xff] %v11600_v2  ;;  %v11602_v4 = vpop.permute.xlu1 %9098  ;;  %v11604_v9 = vpop.permute.xlu0 %9093 }
  0xc8   :  { %20741 = vst [vmem:[#allocation17_spill] sm:$0xff] %v11602_v4 }
  0xc9   :  { %20742 = vst [vmem:[#allocation18_spill] sm:$0xff] %v11604_v9 }
  0xcc   :  { %9328 = vrot.lane.b32.xlu2 %v11312_v8, %s11238_s30 }
  0xcd   :  { %9323 = vrot.lane.b32.xlu1 %v11398_v31, %s11237_s29  ;;  %9318 = vrot.lane.b32.xlu0 %v11400_v32, %s11237_s29 }
  0xce   :  { %v11616_v12 = vpop.permute.xlu2 %9163 }
  0xcf   :  { %v11612_v10 = vpop.permute.xlu1 %9113  ;;  %v11614_v11 = vpop.permute.xlu0 %9108 }
  0xd0   :  { %20743 = vst [vmem:[#allocation19_spill] sm:$0xff] %v11614_v11 }
  0xd4   :  { %9343 = vrot.lane.b32.xlu2 %v11344_v16, %s11238_s30 }
  0xd5   :  { %9338 = vrot.lane.b32.xlu1 %v11308_v7, %s11238_s30  ;;  %9333 = vrot.lane.b32.xlu0 %v11348_v17, %s11238_s30 }
  0xd6   :  { %v11628_v19 = vpop.permute.xlu2 %9178 }
  0xd7   :  { %v11624_v8 = vpop.permute.xlu1 %9128  ;;  %v11626_v18 = vpop.permute.xlu0 %9123 }
  0xdc   :  { %9358 = vrot.lane.b32.xlu2 %v11378_v26, %s11238_s30 }
  0xdd   :  { %9348 = vrot.lane.b32.xlu0 %v11293_v3, %s11238_s30  ;;  %9353 = vrot.lane.b32.xlu1 %v11342_v15, %s11238_s30 }
  0xde   :  { %v11638_v7 = vpop.permute.xlu2 %9193 }
  0xdf   :  { %v11634_v20 = vpop.permute.xlu1 %9143  ;;  %v11636_v16 = vpop.permute.xlu0 %9138 }
  0xe0   :  { %20744 = vst [vmem:[#allocation20_spill] sm:$0xff] %v11634_v20 }
  0xe4   :  { %9373 = vrot.lane.b32.xlu2 %v11400_v32, %s11238_s30 }
  0xe5   :  { %9363 = vrot.lane.b32.xlu0 %v11376_v25, %s11238_s30  ;;  %9368 = vrot.lane.b32.xlu1 %v11374_v24, %s11238_s30 }
  0xe6   :  { %v11652_v3 = vpop.permute.xlu2 %9208 }
  0xe7   :  { %v11644_v17 = vpop.permute.xlu1 %9158  ;;  %v11646_v21 = vpop.permute.xlu0 %9153  ;;  %20747 = vst [vmem:[#allocation23_spill] sm:$0xff] %v11652_v3 }
  0xe8   :  { %20745 = vst [vmem:[#allocation21_spill] sm:$0xff] %v11644_v17 }
  0xe9   :  { %20746 = vst [vmem:[#allocation22_spill] sm:$0xff] %v11646_v21 }
  0xed   :  { %9378 = vrot.lane.b32.xlu0 %v11398_v31, %s11238_s30 }
  0xee   :  { %v9224_v24 = vpop.permute.xlu2 %9223 }
  0xef   :  { %v11654_v15 = vpop.permute.xlu1 %9173  ;;  %v11656_v22 = vpop.permute.xlu0 %9168  ;;  %v9225_v3 = vunpack.i.l.bf16 %v9224_v24 }
  0xf6   :  { %v11666_v29 = vpop.permute.xlu2 %9238 }
  0xf7   :  { %v11658_v23 = vpop.permute.xlu1 %9188  ;;  %v11660_v25 = vpop.permute.xlu0 %9183 }
  0xfe   :  { %v11672_v31 = vpop.permute.xlu2 %9253 }
  0xff   :  { %v11662_v27 = vpop.permute.xlu1 %9203  ;;  %v11664_v28 = vpop.permute.xlu0 %9198  ;;  %20751 = vst [vmem:[#allocation27_spill] sm:$0xff] %v11672_v31 }
 0x100   :  { %20748 = vst [vmem:[#allocation24_spill] sm:$0xff] %v11662_v27 }
 0x101   :  { %20749 = vst [vmem:[#allocation25_spill] sm:$0xff] %v11664_v28  ;;  %v9226_v28 = vunpack.i.h.bf16 %v9224_v24  ;;  %v9171_v24 = vunpack.i.h.bf16 %v11656_v22 }
 0x106   :  { %v11680_v57 = vpop.permute.xlu2 %9268 }
 0x107   :  { %v11668_v26 = vpop.permute.xlu1 %9218  ;;  %v11670_v30 = vpop.permute.xlu0 %9213  ;;  %20752 = vst [vmem:[#allocation28_spill] sm:$0xff] %v11680_v57 }
 0x108   :  { %20750 = vst [vmem:[#allocation26_spill] sm:$0xff] %v11670_v30  ;;  %v118_v30 = vlaneseq }
 0x10a   :  { %v11692_v54 = vand.u32 127, %v118_v30  ;;  %v20434_v30 = vunpack.i.h.bf16 %v11616_v12 }
 0x10c   :  { %vm654_vm0 = vcmp.lt.s32.totalorder %v11692_v54, 75  ;;  %vm565_vm1 = vcmp.lt.s32.totalorder %v11692_v54, 76  ;;  %vm476_vm2 = vcmp.lt.s32.totalorder %v11692_v54, 100  ;;  %vm387_vm3 = vcmp.lt.s32.totalorder %v11692_v54, 101 }
 0x10d   :  { %vm298_vm4 = vcmp.lt.s32.totalorder %v11692_v54, 102  ;;  %vm209_vm5 = vcmp.lt.s32.totalorder %v11692_v54, 126  ;;  %vm120_vm6 = vcmp.lt.s32.totalorder %v11692_v54, 127  ;;  %vm743_vm7 = vcmp.lt.s32.totalorder %v11692_v54, 74 }
 0x10e   :  { %v11686_v17 = vpop.permute.xlu2 %9283 }
 0x10f   :  { %v11674_v46 = vpop.permute.xlu1 %9233  ;;  %v11676_v59 = vpop.permute.xlu0 %9228  ;;  %v20754_v27 = vunpack.i.h.bf16 %v11686_v17 }
 0x116   :  { %v11701_v21 = vpop.permute.xlu2 %9298 }
 0x117   :  { %v11682_v43 = vpop.permute.xlu1 %9248  ;;  %v11684_v35 = vpop.permute.xlu0 %9243 }
 0x11f   :  { %v11688_v47 = vpop.permute.xlu1 %9263  ;;  %v11690_v56 = vpop.permute.xlu0 %9258 }
 0x120   :  { %20753 = vst [vmem:[#allocation29_spill] sm:$0xff] %v11690_v56 }
 0x127   :  { %v9279_v45 = vpop.permute.xlu1 %9278  ;;  %v11696_v9 = vpop.permute.xlu0 %9273 }
 0x128   :  { %v9281_v57 = vunpack.i.h.bf16 %v9279_v45  ;;  %v9280_v4 = vunpack.i.l.bf16 %v9279_v45  ;;  %v20432_v20 = vunpack.i.h.bf16 %v11696_v9  ;;  %v20755_v55 = vunpack.i.l.bf16 %v11696_v9 }
 0x12a   :  { %v674_v32 = vsel %vm654_vm0, %v20432_v20, %v9281_v57  ;;  %v672_v45 = vsel %vm654_vm0, %v9281_v57, %v20754_v27  ;;  %v673_v31 = vsel %vm654_vm0, %v20755_v55, %v9280_v4  ;;  %v20756_v20 = vunpack.i.l.bf16 %v11686_v17 }
 0x12b   :  { %993 = vmatpush.msra.mxu0 %v674_v32  ;;  %1039 = vmatpush.msra.mxu2 %v672_v45  ;;  %v20757_v27 = vunpack.i.h.bf16 %v11668_v26  ;;  %v20758_v45 = vunpack.i.h.bf16 %v11676_v59 }
 0x12c   :  { %v671_v56 = vsel %vm654_vm0, %v9280_v4, %v20756_v20  ;;  %v9170_v20 = vunpack.i.l.bf16 %v11656_v22  ;;  %v20762_v22 = vunpack.i.l.bf16 %v11654_v15 }
 0x12d   :  { %994 = vmatpush.msra.mxu0 %v673_v31  ;;  %1040 = vmatpush.msra.mxu2 %v671_v56  ;;  %v585_v32 = vsel %vm565_vm1, %v20757_v27, %v9226_v28  ;;  %v583_v55 = vsel %vm565_vm1, %v9226_v28, %v20758_v45  ;;  %v20759_v31 = vunpack.i.l.bf16 %v11668_v26  ;;  %v20760_v28 = vunpack.i.l.bf16 %v11676_v59 }
 0x12e   :  { %v20761_v56 = vunpack.i.h.bf16 %v11654_v15 }
 0x12f   :  { %v11735_v2 = vpop.permute.xlu1 %9293  ;;  %v11737_v4 = vpop.permute.xlu0 %9288  ;;  %995 = vmatpush.msra.mxu0 %v585_v32  ;;  %1041 = vmatpush.msra.mxu2 %v583_v55  ;;  %v584_v27 = vsel %vm565_vm1, %v20759_v31, %v9225_v3  ;;  %v582_v45 = vsel %vm565_vm1, %v9225_v3, %v20760_v28  ;;  %v20435_v32 = vunpack.i.l.bf16 %v11616_v12  ;;  %v9116_v55 = vunpack.i.h.bf16 %v11612_v10 }
 0x130   :  { %v496_v31 = vsel %vm476_vm2, %v20434_v30, %v9171_v24  ;;  %v494_v3 = vsel %vm476_vm2, %v9171_v24, %v20761_v56  ;;  %v11762_v28 = vpop.permute.xlu2 %9313  ;;  %v493_v24 = vsel %vm476_vm2, %v9170_v20, %v20762_v22  ;;  %v9061_v56 = vunpack.i.h.bf16 %v11528_v48 }
 0x131   :  { %996 = vmatpush.msra.mxu0 %v584_v27  ;;  %1042 = vmatpush.msra.mxu2 %v582_v45  ;;  %v9115_v27 = vunpack.i.l.bf16 %v11612_v10  ;;  %v495_v30 = vsel %vm476_vm2, %v20435_v32, %v9170_v20  ;;  %v20764_v32 = vunpack.i.h.bf16 %v11576_v60  ;;  %v9060_v20 = vunpack.i.l.bf16 %v11528_v48 }
 0x133   :  { %997 = vmatpush.msra.mxu0 %v496_v31  ;;  %1043 = vmatpush.msra.mxu2 %v494_v3  ;;  %v20763_v3 = vunpack.i.h.bf16 %v11614_v11  ;;  %v405_v45 = vsel %vm387_vm3, %v9116_v55, %v20764_v32  ;;  %v20766_v32 = vunpack.i.l.bf16 %v11576_v60 }
 0x135   :  { %998 = vmatpush.msra.mxu0 %v495_v30  ;;  %1044 = vmatpush.msra.mxu2 %v493_v24  ;;  %v407_v57 = vsel %vm387_vm3, %v20763_v3, %v9116_v55  ;;  %v20765_v3 = vunpack.i.l.bf16 %v11614_v11  ;;  %v404_v48 = vsel %vm387_vm3, %v9115_v27, %v20766_v32  ;;  %v9006_v55 = vunpack.i.h.bf16 %v11532_v50 }
 0x136   :  { %v20768_v24 = vunpack.i.h.bf16 %v11580_v62  ;;  %v20438_v11 = vunpack.i.h.bf16 %v11480_v36  ;;  %v20769_v32 = vunpack.i.l.bf16 %v11566_v58 }
 0x137   :  { %v11788_v22 = vpop.permute.xlu1 %9308  ;;  %v11790_v30 = vpop.permute.xlu0 %9303  ;;  %999 = vmatpush.msra.mxu0 %v407_v57  ;;  %1045 = vmatpush.msra.mxu2 %v405_v45  ;;  %v406_v31 = vsel %vm387_vm3, %v20765_v3, %v9115_v27  ;;  %v20446_v57 = vunpack.i.h.bf16 %v11530_v49  ;;  %v20767_v45 = vunpack.i.h.bf16 %v11566_v58  ;;  %v8950_v27 = vunpack.i.l.bf16 %v11496_v41 }
 0x138   :  { %v316_v3 = vsel %vm298_vm4, %v9061_v56, %v20768_v24  ;;  %v11825_v24 = vpop.permute.xlu2 %9328  ;;  %v20771_v58 = vunpack.i.l.bf16 %v11530_v49 }
 0x139   :  { %1000 = vmatpush.msra.mxu0 %v406_v31  ;;  %1046 = vmatpush.msra.mxu2 %v404_v48  ;;  %v318_v10 = vsel %vm298_vm4, %v20767_v45, %v9061_v56  ;;  %v9005_v31 = vunpack.i.l.bf16 %v11532_v50  ;;  %v317_v48 = vsel %vm298_vm4, %v20769_v32, %v9060_v20  ;;  %v20770_v45 = vunpack.i.l.bf16 %v11580_v62 }
 0x13a   :  { %v229_v50 = vsel %vm209_vm5, %v20438_v11, %v9006_v55  ;;  %v227_v32 = vsel %vm209_vm5, %v9006_v55, %v20446_v57  ;;  %v9291_v57 = vunpack.i.h.bf16 %v11737_v4 }
 0x13b   :  { %1001 = vmatpush.msra.mxu0 %v318_v10  ;;  %1047 = vmatpush.msra.mxu2 %v316_v3  ;;  %v315_v56 = vsel %vm298_vm4, %v9060_v20, %v20770_v45  ;;  %v20441_v10 = vunpack.i.l.bf16 %v11480_v36  ;;  %v8951_v3 = vunpack.i.h.bf16 %v11496_v41  ;;  %v20444_v20 = vunpack.i.h.bf16 %v11482_v37 }
 0x13c   :  { %v226_v55 = vsel %vm209_vm5, %v9005_v31, %v20771_v58 }
 0x13d   :  { %1002 = vmatpush.msra.mxu0 %v317_v48  ;;  %1048 = vmatpush.msra.mxu2 %v315_v56  ;;  %v20442_v56 = vunpack.i.h.bf16 %v11484_v38  ;;  %v228_v11 = vsel %vm209_vm5, %v20441_v10, %v9005_v31  ;;  %v138_v10 = vsel %vm120_vm6, %v8951_v3, %v20444_v20  ;;  %v20450_v31 = vunpack.i.h.bf16 %v11735_v2 }
 0x13f   :  { %v11838_v45 = vpop.permute.xlu1 %9323  ;;  %v11840_v48 = vpop.permute.xlu0 %9318  ;;  %1003 = vmatpush.msra.mxu0 %v229_v50  ;;  %1049 = vmatpush.msra.mxu2 %v227_v32  ;;  %v20445_v50 = vunpack.i.l.bf16 %v11482_v37  ;;  %v20443_v32 = vunpack.i.l.bf16 %v11484_v38  ;;  %v140_v41 = vsel %vm120_vm6, %v20442_v56, %v8951_v3  ;;  %v9241_v3 = vunpack.i.h.bf16 %v11666_v29 }
 0x140   :  { %v11873_v56 = vpop.permute.xlu2 %9343  ;;  %v9290_v38 = vunpack.i.l.bf16 %v11737_v4 }
 0x141   :  { %1004 = vmatpush.msra.mxu0 %v228_v11  ;;  %1050 = vmatpush.msra.mxu2 %v226_v55  ;;  %v139_v58 = vsel %vm120_vm6, %v20443_v32, %v8950_v27  ;;  %v137_v11 = vsel %vm120_vm6, %v8950_v27, %v20445_v50  ;;  %v20449_v55 = vunpack.i.h.bf16 %v11701_v21 }
 0x143   :  { %1005 = vmatpush.msra.mxu0 %v140_v41  ;;  %1051 = vmatpush.msra.mxu2 %v138_v10  ;;  %v20451_v41 = vunpack.i.h.bf16 %v11825_v24  ;;  %v9346_v10 = vunpack.i.h.bf16 %v11873_v56 }
 0x145   :  { %1006 = vmatpush.msra.mxu0 %v139_v58  ;;  %1052 = vmatpush.msra.mxu2 %v137_v11 }
 0x147   :  { %v9339_v32 = vpop.permute.xlu1 %9338  ;;  %v9334_v20 = vpop.permute.xlu0 %9333  ;;  %1053 = vmatpush.msra.mxu2 %v11340_v14  ;;  %1007 = vmatpush.msra.mxu0 %v11306_v6  ;;  %v666_v14 = vsel %vm654_vm0, %v20450_v31, %v20449_v55  ;;  %v9240_v55 = vunpack.i.l.bf16 %v11666_v29  ;;  %v20776_v29 = vunpack.i.l.bf16 %v11686_v17  ;;  %v9135_v6 = vunpack.i.l.bf16 %v11588_v63 }
 0x148   :  { %v9341_v27 = vunpack.i.h.bf16 %v9339_v32  ;;  %v9340_v50 = vunpack.i.l.bf16 %v9339_v32  ;;  %v9336_v58 = vunpack.i.h.bf16 %v9334_v20  ;;  %v9335_v11 = vunpack.i.l.bf16 %v9334_v20 }
 0x149   :  { %1054 = vmatpush.msra.mxu2 %v11335_v13  ;;  %1008 = vmatpush.msra.mxu0 %v11301_v5  ;;  %v20452_v32 = vunpack.i.l.bf16 %v11825_v24  ;;  %v20772_v5 = vunpack.i.l.bf16 %v11701_v21 }
 0x14a   :  { %v763_v20 = vsel %vm743_vm7, %v20451_v41, %v9336_v58  ;;  %v761_v13 = vsel %vm743_vm7, %v9336_v58, %v9341_v27  ;;  %v11911_v41 = vld [vmem:[%s20403_s2] sm:$0xff]  ;;  %v9191_v58 = vunpack.i.h.bf16 %v11658_v23 }
 0x14b   :  { %1177 = vmatpush.msrb.mxu2 %v666_v14  ;;  %1030 = vmatpush.msra.mxu1 %v763_v20  ;;  %v20773_v14 = vunpack.i.l.bf16 %v11735_v2  ;;  %v762_v4 = vsel %vm743_vm7, %v20452_v32, %v9335_v11  ;;  %v760_v20 = vsel %vm743_vm7, %v9335_v11, %v9340_v50  ;;  %v759_v11 = vsel %vm743_vm7, %v9341_v27, %v9346_v10 }
 0x14c   :  { %1076 = vmatpush.msra.mxu3 %v761_v13  ;;  %v11923_v13 = vld [vmem:[%s20403_s2 + $0x8] sm:$0xff]  ;;  %1009 = vmatmul.f32.vlgmr.msra.gmra.mxu0 %v11911_v41  ;;  %v669_v27 = vsel %vm654_vm0, %v20776_v29, %v9290_v38 }
 0x14d   :  { %v665_v31 = vsel %vm654_vm0, %v20773_v14, %v20772_v5  ;;  %1031 = vmatpush.msra.mxu1 %v762_v4  ;;  %v20774_v14 = vunpack.i.h.bf16 %v11686_v17  ;;  %v20775_v5 = vunpack.i.h.bf16 %v11684_v35  ;;  %v20779_v17 = vunpack.i.h.bf16 %v11735_v2  ;;  %1055 = vmatmul.f32.vlgmr.msra.gmra.mxu2 %v11911_v41 }
 0x14e   :  { %1178 = vmatpush.msrb.mxu2 %v665_v31  ;;  %v9236_v31 = vunpack.i.h.bf16 %v11674_v46  ;;  %1077 = vmatpush.msra.mxu3 %v760_v20 }
 0x14f   :  { %v670_v32 = vsel %vm654_vm0, %v20774_v14, %v9291_v57  ;;  %v577_v4 = vsel %vm565_vm1, %v9241_v3, %v20775_v5  ;;  %v9235_v14 = vunpack.i.l.bf16 %v11674_v46  ;;  %v11943_v36 = vpop.permute.xlu0 %9348  ;;  %8786 = vmatmul.msk.f32.vlgmr.msra.gmra.mxu3 %vm986_vm8, %v11923_v13  ;;  %v668_v29 = vsel %vm654_vm0, %v9291_v57, %v20779_v17  ;;  %8784 = vmatmul.msk.f32.vlgmr.msra.gmra.mxu1 %vm986_vm8, %v11923_v13 }
 0x150   :  { %1085 = vmatpush.msrb.mxu1 %v670_v32  ;;  %1122 = vmatpush.msrb.mxu3 %v759_v11  ;;  %v20777_v32 = vunpack.i.l.bf16 %v11873_v56  ;;  %v9185_v11 = vunpack.i.l.bf16 %v11660_v25  ;;  %v20456_v46 = vunpack.i.h.bf16 %v11943_v36  ;;  %v20781_v57 = vunpack.i.h.bf16 %v11660_v25 }
 0x151   :  { %1179 = vmatpush.msrb.mxu2 %v577_v4  ;;  %v20778_v4 = vunpack.i.l.bf16 %v11684_v35 }
 0x152   :  { %v758_v5 = vsel %vm743_vm7, %v9340_v50, %v20777_v32  ;;  %1086 = vmatpush.msrb.mxu1 %v669_v27  ;;  %v9181_v50 = vunpack.i.h.bf16 %v11628_v19  ;;  %v20455_v32 = vunpack.i.l.bf16 %v11943_v36  ;;  %v20780_v27 = vunpack.i.h.bf16 %v11676_v59 }
 0x153   :  { %1123 = vmatpush.msrb.mxu3 %v758_v5  ;;  %v576_v20 = vsel %vm565_vm1, %v9240_v55, %v20778_v4  ;;  %v488_v17 = vsel %vm476_vm2, %v20781_v57, %v9191_v58  ;;  %v9180_v57 = vunpack.i.l.bf16 %v11628_v19  ;;  %v20785_v19 = vunpack.i.l.bf16 %v11873_v56 }
 0x154   :  { %1180 = vmatpush.msrb.mxu2 %v576_v20  ;;  %v581_v5 = vsel %vm565_vm1, %v20780_v27, %v9236_v31  ;;  %v20782_v20 = vunpack.i.l.bf16 %v11735_v2  ;;  %v757_v27 = vsel %vm743_vm7, %v9346_v10, %v20456_v46  ;;  %v579_v10 = vsel %vm565_vm1, %v9236_v31, %v9241_v3 }
 0x155   :  { %1131 = vmatpush.msra.mxu3 %v668_v29  ;;  %1087 = vmatpush.msrb.mxu1 %v581_v5  ;;  %v20783_v5 = vunpack.i.l.bf16 %v11676_v59  ;;  %v9130_v59 = vunpack.i.l.bf16 %v11624_v8  ;;  %v9126_v3 = vunpack.i.h.bf16 %v11626_v18  ;;  %v20787_v31 = vunpack.i.h.bf16 %v11588_v63 }
 0x156   :  { %v667_v29 = vsel %vm654_vm0, %v9290_v38, %v20782_v20  ;;  %1181 = vmatpush.msrb.mxu2 %v488_v17  ;;  %1168 = vmatpush.msrb.mxu0 %v757_v27  ;;  %v20784_v38 = vunpack.i.l.bf16 %v11658_v23  ;;  %v20457_v17 = vunpack.i.l.bf16 %v11790_v30  ;;  %v20786_v20 = vunpack.i.h.bf16 %v11654_v15 }
 0x157   :  { %1132 = vmatpush.msra.mxu3 %v667_v29  ;;  %v580_v4 = vsel %vm565_vm1, %v20783_v5, %v9235_v14  ;;  %v20788_v27 = vunpack.i.h.bf16 %v11624_v8  ;;  %v20789_v56 = vunpack.i.h.bf16 %v11790_v30 }
 0x158   :  { %1088 = vmatpush.msrb.mxu1 %v580_v4  ;;  %v487_v2 = vsel %vm476_vm2, %v9185_v11, %v20784_v38  ;;  %v756_v4 = vsel %vm743_vm7, %v20785_v19, %v20455_v32  ;;  %v492_v29 = vsel %vm476_vm2, %v20786_v20, %v9181_v50  ;;  %v20790_v38 = vunpack.i.h.bf16 %v11701_v21 }
 0x159   :  { %1182 = vmatpush.msrb.mxu2 %v487_v2  ;;  %1133 = vmatpush.msra.mxu3 %v579_v10  ;;  %v399_v5 = vsel %vm387_vm3, %v20788_v27, %v20787_v31  ;;  %v12030_v10 = vld [vmem:[%s20403_s2 + $0x18] sm:$0xff]  ;;  %v9081_v19 = vunpack.i.h.bf16 %v11592_v1  ;;  %v578_v20 = vsel %vm565_vm1, %v9235_v14, %v9240_v55  ;;  %v9075_v31 = vunpack.i.l.bf16 %v11540_v51 }
 0x15a   :  { %1169 = vmatpush.msrb.mxu0 %v756_v4  ;;  %1089 = vmatpush.msrb.mxu1 %v492_v29  ;;  %v664_v2 = vsel %vm654_vm0, %v20790_v38, %v20789_v56  ;;  %v9251_v4 = vunpack.i.h.bf16 %v11682_v43  ;;  %v9076_v29 = vunpack.i.h.bf16 %v11540_v51  ;;  %v9125_v27 = vunpack.i.l.bf16 %v11626_v18 }
 0x15b   :  { %1183 = vmatpush.msrb.mxu2 %v399_v5  ;;  %1134 = vmatpush.msra.mxu3 %v578_v20  ;;  %v20791_v56 = vunpack.i.l.bf16 %v11654_v15  ;;  %v9080_v5 = vunpack.i.l.bf16 %v11592_v1  ;;  %v398_v18 = vsel %vm387_vm3, %v9130_v59, %v9135_v6  ;;  %v20792_v15 = vunpack.i.l.bf16 %v11701_v21 }
 0x15c   :  { %1223 = vmatpush.msra.mxu0 %v664_v2  ;;  %v9250_v2 = vunpack.i.l.bf16 %v11682_v43  ;;  %8787 = vmatmul.msk.f32.gmra.mxu3 %vm986_vm8, %v12030_v10  ;;  %v9026_v14 = vunpack.i.h.bf16 %v11542_v52  ;;  %v9071_v20 = vunpack.i.h.bf16 %v11578_v61  ;;  %v20794_v32 = vunpack.i.h.bf16 %v11576_v60 }
 0x15d   :  { %v491_v38 = vsel %vm476_vm2, %v20791_v56, %v9180_v57  ;;  %v663_v55 = vsel %vm654_vm0, %v20792_v15, %v20457_v17  ;;  %1184 = vmatpush.msrb.mxu2 %v398_v18  ;;  %v20793_v56 = vunpack.i.h.bf16 %v11660_v25  ;;  %v9021_v21 = vunpack.i.h.bf16 %v11544_v53  ;;  %8785 = vmatmul.msk.f32.gmra.mxu1 %vm986_vm8, %v12030_v10 }
 0x15e   :  { %1090 = vmatpush.msrb.mxu1 %v491_v38  ;;  %1224 = vmatpush.msra.mxu0 %v663_v55  ;;  %v403_v46 = vsel %vm387_vm3, %v20794_v32, %v9126_v3  ;;  %v9196_v15 = vunpack.i.h.bf16 %v11638_v7  ;;  %v310_v18 = vsel %vm298_vm4, %v9076_v29, %v9081_v19  ;;  %v20796_v55 = vunpack.i.l.bf16 %v11576_v60 }
 0x15f   :  { %v490_v38 = vsel %vm476_vm2, %v9181_v50, %v20793_v56  ;;  %v20795_v50 = vunpack.i.h.bf16 %v11684_v35  ;;  %1185 = vmatpush.msrb.mxu2 %v310_v18  ;;  %v9070_v17 = vunpack.i.l.bf16 %v11578_v61  ;;  %v309_v25 = vsel %vm298_vm4, %v9075_v31, %v9080_v5 }
 0x160   :  { %1135 = vmatpush.msra.mxu3 %v490_v38  ;;  %1091 = vmatpush.msrb.mxu1 %v403_v46  ;;  %v489_v46 = vsel %vm476_vm2, %v9180_v57, %v9185_v11  ;;  %v402_v56 = vsel %vm387_vm3, %v20796_v55, %v9125_v27  ;;  %v9025_v38 = vunpack.i.l.bf16 %v11542_v52  ;;  %v20797_v60 = vunpack.i.l.bf16 %v11684_v35  ;;  %v12120_v35 = vld [vmem:[%s20403_s2 + $0x10] sm:$0xff] }
 0x161   :  { %v575_v32 = vsel %vm565_vm1, %v20795_v50, %v9251_v4  ;;  %v9020_v57 = vunpack.i.l.bf16 %v11544_v53  ;;  %v9195_v61 = vunpack.i.l.bf16 %v11638_v7  ;;  %1186 = vmatpush.msrb.mxu2 %v309_v25  ;;  %v20798_v18 = vunpack.i.h.bf16 %v11624_v8  ;;  %1012 = vmatmul.f32.gmra.mxu0 %v12120_v35 }
 0x162   :  { %1225 = vmatpush.msra.mxu0 %v575_v32  ;;  %1136 = vmatpush.msra.mxu3 %v489_v46  ;;  %v574_v11 = vsel %vm565_vm1, %v20797_v60, %v9250_v2  ;;  %v20799_v32 = vunpack.i.h.bf16 %v11580_v62  ;;  %v9016_v55 = vunpack.i.h.bf16 %v11492_v39  ;;  %v8966_v25 = vunpack.i.h.bf16 %v11456_v33 }
 0x163   :  { %1092 = vmatpush.msrb.mxu1 %v402_v56  ;;  %v401_v50 = vsel %vm387_vm3, %v9126_v3, %v20798_v18  ;;  %v221_v3 = vsel %vm209_vm5, %v9021_v21, %v9026_v14  ;;  %v486_v56 = vsel %vm476_vm2, %v9191_v58, %v9196_v15  ;;  %v8971_v60 = vunpack.i.h.bf16 %v11464_v34  ;;  %1058 = vmatmul.f32.gmra.mxu2 %v12120_v35 }
 0x164   :  { %1226 = vmatpush.msra.mxu0 %v574_v11  ;;  %v314_v46 = vsel %vm298_vm4, %v20799_v32, %v9071_v20  ;;  %1137 = vmatpush.msra.mxu3 %v401_v50  ;;  %v9141_v11 = vunpack.i.h.bf16 %v11636_v16  ;;  %v400_v18 = vsel %vm387_vm3, %v9125_v27, %v9130_v59  ;;  %v8965_v50 = vunpack.i.l.bf16 %v11456_v33 }
 0x165   :  { %1093 = vmatpush.msrb.mxu1 %v314_v46  ;;  %1187 = vmatpush.msrb.mxu2 %v221_v3  ;;  %v20800_v58 = vunpack.i.l.bf16 %v11580_v62  ;;  %v8970_v46 = vunpack.i.l.bf16 %v11464_v34  ;;  %v9015_v3 = vunpack.i.l.bf16 %v11492_v39  ;;  %v220_v8 = vsel %vm209_vm5, %v9020_v57, %v9025_v38 }
 0x166   :  { %1227 = vmatpush.msra.mxu0 %v486_v56  ;;  %1138 = vmatpush.msra.mxu3 %v400_v18  ;;  %v20801_v62 = vunpack.i.l.bf16 %v11658_v23  ;;  %v9140_v39 = vunpack.i.l.bf16 %v11636_v16  ;;  %v312_v27 = vsel %vm298_vm4, %v9071_v20, %v9076_v29  ;;  %v20802_v56 = vunpack.i.h.bf16 %v11530_v49 }
 0x167   :  { %v313_v32 = vsel %vm298_vm4, %v20800_v58, %v9070_v17  ;;  %8788 = vmatmul.msk.f32.vlgmr.msrb.gmra.mxu3 %vm986_vm8, %v11923_v13  ;;  %1188 = vmatpush.msrb.mxu2 %v220_v8  ;;  %v8961_v58 = vunpack.i.h.bf16 %v11494_v40  ;;  %v132_v23 = vsel %vm120_vm6, %v8966_v25, %v8971_v60  ;;  %v20803_v29 = vunpack.i.h.bf16 %v11588_v63 }
 0x168   :  { %1094 = vmatpush.msrb.mxu1 %v313_v32  ;;  %v485_v59 = vsel %vm476_vm2, %v20801_v62, %v9195_v61  ;;  %v225_v18 = vsel %vm209_vm5, %v20802_v56, %v9016_v55  ;;  %1139 = vmatpush.msra.mxu3 %v312_v27  ;;  %v12186_v32 = vpop.permute.xlu2 %9358  ;;  %v9086_v8 = vunpack.i.h.bf16 %v11590_v0  ;;  %v311_v62 = vsel %vm298_vm4, %v9070_v17, %v9075_v31  ;;  %v12194_v27 = vpop.permute.xlu0 %9363 }
 0x169   :  { %1228 = vmatpush.msra.mxu0 %v485_v59  ;;  %v397_v20 = vsel %vm387_vm3, %v20803_v29, %v9141_v11  ;;  %1189 = vmatpush.msrb.mxu2 %v132_v23  ;;  %v8960_v59 = vunpack.i.l.bf16 %v11494_v40  ;;  %v20804_v56 = vunpack.i.l.bf16 %v11530_v49  ;;  %v131_v51 = vsel %vm120_vm6, %v8965_v50, %v8970_v46 }
 0x16a   :  { %1095 = vmatpush.msrb.mxu1 %v225_v18  ;;  %1140 = vmatpush.msra.mxu3 %v311_v62  ;;  %v9366_v17 = vunpack.i.h.bf16 %v12194_v27  ;;  %v396_v40 = vsel %vm387_vm3, %v9135_v6, %v9140_v39  ;;  %v9361_v49 = vunpack.i.h.bf16 %v12186_v32  ;;  %v20462_v31 = vunpack.i.l.bf16 %v11590_v0 }
 0x16b   :  { %1229 = vmatpush.msra.mxu0 %v397_v20  ;;  %v224_v18 = vsel %vm209_vm5, %v20804_v56, %v9015_v3  ;;  %1190 = vmatpush.msrb.mxu2 %v131_v51  ;;  %v223_v23 = vsel %vm209_vm5, %v9016_v55, %v9021_v21  ;;  %v20805_v29 = vunpack.i.h.bf16 %v11482_v37  ;;  %v9365_v6 = vunpack.i.l.bf16 %v12194_v27  ;;  %v12234_v56 = vpop.permute.xlu1 %9353  ;;  %v11213_v55 = vld [vmem:[%s20402_s0 + $0x78] sm:$0xff] }
 0x16c   :  { %1096 = vmatpush.msrb.mxu1 %v224_v18  ;;  %v9360_v20 = vunpack.i.l.bf16 %v12186_v32  ;;  %1141 = vmatpush.msra.mxu3 %v223_v23  ;;  %v308_v62 = vsel %vm298_vm4, %v9081_v19, %v9086_v8  ;;  %v20460_v21 = vunpack.i.h.bf16 %v11504_v42  ;;  %v222_v18 = vsel %vm209_vm5, %v9015_v3, %v9020_v57  ;;  %v11214_v3 = vld [vmem:[%s20402_s0 + $0x20] sm:$0xff] }
 0x16d   :  { %1230 = vmatpush.msra.mxu0 %v396_v40  ;;  %v136_v63 = vsel %vm120_vm6, %v20805_v29, %v8961_v58  ;;  %1191 = vmatpush.msrb.mxu2 %v11213_v55  ;;  %v20806_v51 = vunpack.i.l.bf16 %v11482_v37  ;;  %v751_v40 = vsel %vm743_vm7, %v9361_v49, %v9366_v17  ;;  %v307_v37 = vsel %vm298_vm4, %v9080_v5, %v20462_v31 }
 0x16e   :  { %1097 = vmatpush.msrb.mxu1 %v136_v63  ;;  %1142 = vmatpush.msra.mxu3 %v222_v18  ;;  %v20459_v53 = vunpack.i.l.bf16 %v11504_v42  ;;  %v9321_v57 = vunpack.i.h.bf16 %v11840_v48  ;;  %v134_v23 = vsel %vm120_vm6, %v8961_v58, %v8966_v25  ;;  %v750_v1 = vsel %vm743_vm7, %v9360_v20, %v9365_v6 }
 0x16f   :  { %1231 = vmatpush.msra.mxu0 %v308_v62  ;;  %v135_v19 = vsel %vm120_vm6, %v20806_v51, %v8960_v59  ;;  %8789 = vmatmul.msk.f32.gmra.mxu3 %vm986_vm8, %v12030_v10  ;;  %v9356_v5 = vunpack.i.h.bf16 %v12234_v56  ;;  %v219_v29 = vsel %vm209_vm5, %v9026_v14, %v20460_v21  ;;  %v20458_v25 = vunpack.i.h.bf16 %v11508_v44  ;;  %v11215_v62 = vld [vmem:[%s20402_s0 + $0x68] sm:$0xff]  ;;  %v11216_v51 = vld [vmem:[%s20402_s0 + $0x10] sm:$0xff] }
 0x170   :  { %1098 = vmatpush.msrb.mxu1 %v135_v19  ;;  %8790 = vmatmul.msk.f32.vlgmr.msrb.gmra.mxu0 %vm986_vm8, %v11923_v13  ;;  %v9316_v58 = vunpack.i.h.bf16 %v11762_v28  ;;  %v9320_v63 = vunpack.i.l.bf16 %v11840_v48  ;;  %v133_v55 = vsel %vm120_vm6, %v8960_v59, %v8965_v50  ;;  %v9315_v14 = vunpack.i.l.bf16 %v11762_v28 }
 0x171   :  { %1192 = vmatpush.msrb.mxu2 %v11214_v3  ;;  %1232 = vmatpush.msra.mxu0 %v307_v37  ;;  %v9355_v18 = vunpack.i.l.bf16 %v12234_v56  ;;  %v218_v33 = vsel %vm209_vm5, %v9025_v38, %v20459_v53  ;;  %v20461_v59 = vunpack.i.l.bf16 %v11508_v44  ;;  %v9311_v19 = vunpack.i.h.bf16 %v11788_v22  ;;  %v20808_v37 = vld [vmem:[#allocation29_spill] sm:$0xff]  ;;  %v20813_v53 = vld [vmem:[#allocation24_spill] sm:$0xff] }
 0x172   :  { %1143 = vmatpush.msra.mxu3 %v134_v23  ;;  %1099 = vmatpush.msrb.mxu1 %v11215_v62  ;;  %v658_v50 = vsel %vm654_vm0, %v9316_v58, %v9321_v57  ;;  %v9266_v38 = vunpack.i.h.bf16 %v11688_v47  ;;  %v20463_v3 = vunpack.i.h.bf16 %v20808_v37  ;;  %v11217_v23 = vld [vmem:[%s20402_s0 + $0x70] sm:$0xff]  ;;  %v20466_v21 = vunpack.i.h.bf16 %v20813_v53 }
 0x173   :  { %1306 = vmatpush.msra.mxu2 %v751_v40  ;;  %1233 = vmatpush.msra.mxu0 %v219_v29  ;;  %v20807_v40 = vunpack.i.h.bf16 %v11943_v36  ;;  %v657_v29 = vsel %vm654_vm0, %v9315_v14, %v9320_v63  ;;  %v12338_v62 = vpop.permute.xlu1 %9368 }
 0x174   :  { %1144 = vmatpush.msra.mxu3 %v133_v55  ;;  %1100 = vmatpush.msrb.mxu1 %v11216_v51  ;;  %v9310_v55 = vunpack.i.l.bf16 %v11788_v22  ;;  %v9265_v51 = vunpack.i.l.bf16 %v11688_v47  ;;  %v569_v34 = vsel %vm565_vm1, %v20463_v3, %v9266_v38  ;;  %v20469_v3 = vunpack.i.l.bf16 %v20813_v53 }
 0x175   :  { %1307 = vmatpush.msra.mxu2 %v750_v1  ;;  %1234 = vmatpush.msra.mxu0 %v218_v33  ;;  %v755_v52 = vsel %vm743_vm7, %v20807_v40, %v9356_v5  ;;  %v130_v1 = vsel %vm120_vm6, %v8971_v60, %v20458_v25  ;;  %v20464_v33 = vunpack.i.l.bf16 %v20808_v37  ;;  %v11218_v60 = vld [vmem:[%s20402_s0 + $0x18] sm:$0xff] }
 0x176   :  { %1193 = vmatmul.f32.vlgmr.msrb.gmra.mxu2 %v11911_v41  ;;  %1101 = vmatmul.f32.vlgmr.msrb.gmra.mxu1 %v11911_v41 }
 0x177   :  { %1361 = vmatpush.msrb.mxu2 %v658_v50  ;;  %1145 = vmatpush.msra.mxu3 %v11217_v23  ;;  %v20809_v50 = vunpack.i.l.bf16 %v11943_v36  ;;  %v20810_v23 = vld [vmem:[#allocation27_spill] sm:$0xff]  ;;  %v20811_v36 = vunpack.i.h.bf16 %v11790_v30 }
 0x178   :  { %1235 = vmatpush.msra.mxu0 %v130_v1  ;;  %1214 = vmatpush.msra.mxu1 %v755_v52  ;;  %v9256_v1 = vunpack.i.h.bf16 %v20810_v23  ;;  %v129_v52 = vsel %vm120_vm6, %v8970_v46, %v20461_v59  ;;  %v753_v46 = vsel %vm743_vm7, %v9356_v5, %v9361_v49  ;;  %v20468_v59 = vunpack.i.l.bf16 %v12338_v62  ;;  %v11219_v49 = vld [vmem:[%s20402_s0 + $0x80] sm:$0xff]  ;;  %v20815_v5 = vld [vmem:[#allocation25_spill] sm:$0xff] }
 0x179   :  { %1362 = vmatpush.msrb.mxu2 %v657_v29  ;;  %1146 = vmatpush.msra.mxu3 %v11218_v60  ;;  %v754_v40 = vsel %vm743_vm7, %v20809_v50, %v9355_v18  ;;  %v662_v29 = vsel %vm654_vm0, %v20811_v36, %v9311_v19  ;;  %v20465_v60 = vunpack.i.h.bf16 %v12338_v62  ;;  %v20812_v50 = vld [vmem:[#allocation23_spill] sm:$0xff]  ;;  %v20467_v36 = vunpack.i.l.bf16 %v20810_v23 }
 0x17a   :  { %1147 = vmatmul.f32.vlgmr.msra.gmra.mxu3 %v11911_v41  ;;  %8791 = vmatmul.msk.f32.gmra.mxu0 %vm986_vm8, %v12030_v10  ;;  %v9211_v25 = vunpack.i.h.bf16 %v20812_v50  ;;  %v9210_v31 = vunpack.i.l.bf16 %v20812_v50  ;;  %v20835_v50 = vunpack.i.h.bf16 %v11504_v42 }
 0x17b   :  { %1236 = vmatpush.msra.mxu0 %v129_v52  ;;  %1269 = vmatpush.msrb.mxu3 %v662_v29  ;;  %v20814_v52 = vunpack.i.l.bf16 %v11790_v30  ;;  %v568_v30 = vsel %vm565_vm1, %v20464_v33, %v9265_v51  ;;  %v9200_v33 = vunpack.i.l.bf16 %v20815_v5 }
 0x17c   :  { %1363 = vmatpush.msrb.mxu2 %v569_v34  ;;  %1215 = vmatpush.msra.mxu1 %v754_v40  ;;  %v9201_v40 = vunpack.i.h.bf16 %v20815_v5  ;;  %v573_v34 = vsel %vm565_vm1, %v9251_v4, %v9256_v1  ;;  %v480_v4 = vsel %vm476_vm2, %v20466_v21, %v9211_v25  ;;  %v479_v43 = vsel %vm476_vm2, %v20469_v3, %v9210_v31  ;;  %v20818_v21 = vld [vmem:[#allocation20_spill] sm:$0xff] }
 0x17d   :  { %v661_v29 = vsel %vm654_vm0, %v20814_v52, %v9310_v55  ;;  %1237 = vmatpush.msra.mxu0 %v11219_v49  ;;  %v749_v52 = vsel %vm743_vm7, %v9366_v17, %v20465_v60  ;;  %v20470_v17 = vunpack.i.h.bf16 %v11838_v45  ;;  %v9146_v27 = vunpack.i.h.bf16 %v20818_v21 }
 0x17e   :  { %1270 = vmatpush.msrb.mxu3 %v661_v29  ;;  %1364 = vmatpush.msrb.mxu2 %v568_v30  ;;  %v20816_v29 = vld [vmem:[#allocation22_spill] sm:$0xff]  ;;  %v11220_v30 = vld [vmem:[%s20402_s0 + $0x28] sm:$0xff]  ;;  %v483_v32 = vsel %vm476_vm2, %v9195_v61, %v9200_v33 }
 0x17f   :  { %1260 = vmatpush.msrb.mxu1 %v753_v46  ;;  %v9156_v49 = vunpack.i.h.bf16 %v20816_v29  ;;  %1238 = vmatpush.msra.mxu0 %v11220_v30  ;;  %v572_v46 = vsel %vm565_vm1, %v9250_v2, %v20467_v36  ;;  %v20817_v30 = vld [vmem:[#allocation16_spill] sm:$0xff]  ;;  %v20473_v36 = vunpack.i.l.bf16 %v11838_v45 }
 0x180   :  { %1271 = vmatpush.msrb.mxu3 %v573_v34  ;;  %1365 = vmatpush.msrb.mxu2 %v480_v4  ;;  %v748_v34 = vsel %vm743_vm7, %v9365_v6, %v20468_v59  ;;  %v20472_v60 = vunpack.i.h.bf16 %v20817_v30  ;;  %v9155_v4 = vunpack.i.l.bf16 %v20816_v29  ;;  %v20471_v2 = vunpack.i.l.bf16 %v20817_v30  ;;  %v20820_v59 = vld [vmem:[#allocation18_spill] sm:$0xff] }
 0x181   :  { %1104 = vmatmul.f32.gmra.mxu1 %v12120_v35  ;;  %1352 = vmatpush.msrb.mxu0 %v749_v52  ;;  %v484_v6 = vsel %vm476_vm2, %v9196_v15, %v9201_v40  ;;  %v20819_v52 = vld [vmem:[#allocation17_spill] sm:$0xff]  ;;  %v9096_v3 = vunpack.i.h.bf16 %v20820_v59  ;;  %v752_v15 = vsel %vm743_vm7, %v9355_v18, %v9360_v20  ;;  %v9095_v20 = vunpack.i.l.bf16 %v20820_v59 }
 0x182   :  { %1272 = vmatpush.msrb.mxu3 %v572_v46  ;;  %1366 = vmatpush.msrb.mxu2 %v479_v43  ;;  %v9101_v46 = vunpack.i.h.bf16 %v20819_v52  ;;  %v391_v43 = vsel %vm387_vm3, %v20472_v60, %v9156_v49  ;;  %v9100_v56 = vunpack.i.l.bf16 %v20819_v52  ;;  %v9145_v18 = vunpack.i.l.bf16 %v20818_v21  ;;  %v20846_v21 = vld [vmem:[#allocation8_spill] sm:$0xff] }
 0x183   :  { %1150 = vmatmul.f32.gmra.mxu3 %v12120_v35  ;;  %1353 = vmatpush.msrb.mxu0 %v748_v34  ;;  %v656_v34 = vsel %vm654_vm0, %v9321_v57, %v20470_v17  ;;  %v390_v57 = vsel %vm387_vm3, %v20471_v2, %v9155_v4  ;;  %v655_v61 = vsel %vm654_vm0, %v9320_v63, %v20473_v36  ;;  %v20823_v17 = vld [vmem:[#allocation11_spill] sm:$0xff]  ;;  %v20845_v52 = vunpack.i.h.bf16 %v11825_v24 }
 0x184   :  { %1273 = vmatpush.msrb.mxu3 %v484_v6  ;;  %1239 = vmatmul.f32.vlgmr.msra.gmra.mxu0 %v11911_v41  ;;  %v20821_v6 = vld [vmem:[#allocation28_spill] sm:$0xff]  ;;  %v9041_v2 = vunpack.i.h.bf16 %v20823_v17  ;;  %v302_v48 = vsel %vm298_vm4, %v9096_v3, %v9101_v46 }
 0x185   :  { %1367 = vmatpush.msrb.mxu2 %v391_v43  ;;  %1407 = vmatpush.msra.mxu0 %v656_v34  ;;  %v20475_v7 = vunpack.i.h.bf16 %v20821_v6  ;;  %v395_v43 = vsel %vm387_vm3, %v9141_v11, %v9146_v27  ;;  %v20822_v34 = vld [vmem:[#allocation7_spill] sm:$0xff]  ;;  %v20474_v63 = vunpack.i.l.bf16 %v20821_v6 }
 0x186   :  { %1274 = vmatpush.msrb.mxu3 %v483_v32  ;;  %1261 = vmatpush.msrb.mxu1 %v752_v15  ;;  %v9046_v32 = vunpack.i.h.bf16 %v20822_v34  ;;  %v20825_v15 = vld [vmem:[#allocation26_spill] sm:$0xff] }
 0x187   :  { %1368 = vmatpush.msrb.mxu2 %v390_v57  ;;  %v20824_v57 = vld [vmem:[#allocation10_spill] sm:$0xff]  ;;  %1408 = vmatpush.msra.mxu0 %v655_v61  ;;  %v20476_v36 = vunpack.i.h.bf16 %v20825_v15  ;;  %v567_v11 = vsel %vm565_vm1, %v9266_v38, %v20475_v7  ;;  %v660_v61 = vsel %vm654_vm0, %v9311_v19, %v9316_v58  ;;  %v394_v38 = vsel %vm387_vm3, %v9140_v39, %v9145_v18  ;;  %v20826_v39 = vld [vmem:[#allocation12_spill] sm:$0xff]  ;;  %v20831_v7 = vld [vmem:[#allocation3_spill] sm:$0xff] }
 0x188   :  { %v9091_v60 = vunpack.i.h.bf16 %v20824_v57  ;;  %1275 = vmatpush.msrb.mxu3 %v395_v43  ;;  %v9090_v43 = vunpack.i.l.bf16 %v20824_v57  ;;  %v9045_v58 = vunpack.i.l.bf16 %v20822_v34  ;;  %v9040_v19 = vunpack.i.l.bf16 %v20823_v17  ;;  %1196 = vmatmul.f32.gmra.mxu2 %v12120_v35 }
 0x189   :  { %1369 = vmatpush.msrb.mxu2 %v302_v48  ;;  %8792 = vmatmul.msk.f32.vlgmr.msra.gmra.mxu1 %vm986_vm8, %v11923_v13  ;;  %v301_v48 = vsel %vm298_vm4, %v9095_v20, %v9100_v56  ;;  %v566_v16 = vsel %vm565_vm1, %v9265_v51, %v20474_v63  ;;  %v20827_v51 = vld [vmem:[#allocation9_spill] sm:$0xff]  ;;  %v213_v28 = vsel %vm209_vm5, %v9041_v2, %v9046_v32  ;;  %v20849_v57 = vunpack.i.l.bf16 %v12338_v62 }
 0x18a   :  { %1409 = vmatpush.msra.mxu0 %v567_v11  ;;  %1315 = vmatpush.msra.mxu1 %v660_v61  ;;  %v20477_v11 = vunpack.i.l.bf16 %v20825_v15  ;;  %v9036_v61 = vunpack.i.h.bf16 %v20826_v39  ;;  %v306_v47 = vsel %vm298_vm4, %v9086_v8, %v9091_v60  ;;  %v20828_v63 = vld [vmem:[#allocation21_spill] sm:$0xff]  ;;  %v478_v22 = vsel %vm476_vm2, %v9211_v25, %v20476_v36 }
 0x18b   :  { %1276 = vmatpush.msrb.mxu3 %v394_v38  ;;  %1370 = vmatpush.msrb.mxu2 %v301_v48  ;;  %v659_v38 = vsel %vm654_vm0, %v9310_v55, %v9315_v14  ;;  %v8991_v48 = vunpack.i.h.bf16 %v20827_v51  ;;  %v9035_v8 = vunpack.i.l.bf16 %v20826_v39  ;;  %v20829_v14 = vunpack.i.h.bf16 %v20808_v37 }
 0x18c   :  { %1410 = vmatpush.msra.mxu0 %v566_v16  ;;  %v9161_v16 = vunpack.i.h.bf16 %v20828_v63  ;;  %1316 = vmatpush.msra.mxu1 %v659_v38  ;;  %v20830_v38 = vunpack.i.l.bf16 %v11590_v0  ;;  %v8986_v25 = vunpack.i.h.bf16 %v20831_v7  ;;  %v8990_v36 = vunpack.i.l.bf16 %v20827_v51 }
 0x18d   :  { %1277 = vmatpush.msrb.mxu3 %v306_v47  ;;  %1371 = vmatpush.msrb.mxu2 %v213_v28  ;;  %v571_v55 = vsel %vm565_vm1, %v9256_v1, %v20829_v14  ;;  %v212_v1 = vsel %vm209_vm5, %v9040_v19, %v9045_v58  ;;  %v477_v0 = vsel %vm476_vm2, %v9210_v31, %v20477_v11  ;;  %v20832_v28 = vld [vmem:[#allocation6_spill] sm:$0xff]  ;;  %v9160_v14 = vunpack.i.l.bf16 %v20828_v63  ;;  %v20868_v63 = vld [vmem:[#allocation4_spill] sm:$0xff] }
 0x18e   :  { %1411 = vmatpush.msra.mxu0 %v478_v22  ;;  %v305_v47 = vsel %vm298_vm4, %v20830_v38, %v9090_v43  ;;  %1317 = vmatpush.msra.mxu1 %v571_v55  ;;  %v8981_v22 = vunpack.i.h.bf16 %v20832_v28  ;;  %v20833_v55 = vunpack.i.l.bf16 %v20808_v37  ;;  %v20834_v38 = vunpack.i.l.bf16 %v20810_v23 }
 0x18f   :  { %1278 = vmatpush.msrb.mxu3 %v305_v47  ;;  %1372 = vmatpush.msrb.mxu2 %v212_v1  ;;  %v217_v31 = vsel %vm209_vm5, %v20835_v50, %v9036_v61  ;;  %v8985_v11 = vunpack.i.l.bf16 %v20831_v7  ;;  %v124_v37 = vsel %vm120_vm6, %v8986_v25, %v8991_v48  ;;  %v389_v23 = vsel %vm387_vm3, %v9156_v49, %v9161_v16  ;;  %v20838_v50 = vld [vmem:[#allocation13_spill] sm:$0xff] }
 0x190   :  { %1412 = vmatpush.msra.mxu0 %v477_v0  ;;  %v570_v47 = vsel %vm565_vm1, %v20834_v38, %v20833_v55  ;;  %v8980_v1 = vunpack.i.l.bf16 %v20832_v28  ;;  %v12635_v0 = vpop.permute.xlu0 %9378  ;;  %v20836_v55 = vunpack.i.l.bf16 %v11504_v42  ;;  %8796 = vmatmul.msk.f32.vlgmr.msra.gmra.mxu2 %vm986_vm8, %v11923_v13  ;;  %v215_v59 = vsel %vm209_vm5, %v9036_v61, %v9041_v2  ;;  %v11227_v28 = vld [vmem:[%s20402_s0 + $0x90] sm:$0xff] }
 0x191   :  { %1318 = vmatpush.msra.mxu1 %v570_v47  ;;  %1279 = vmatpush.msrb.mxu3 %v217_v31  ;;  %v20837_v47 = vunpack.i.h.bf16 %v20813_v53  ;;  %v123_v42 = vsel %vm120_vm6, %v8985_v11, %v8990_v36  ;;  %v9106_v31 = vunpack.i.h.bf16 %v20838_v50  ;;  %v20852_v61 = vunpack.i.l.bf16 %v11696_v9 }
 0x192   :  { %1373 = vmatpush.msrb.mxu2 %v124_v37  ;;  %1413 = vmatpush.msra.mxu0 %v389_v23  ;;  %v216_v38 = vsel %vm209_vm5, %v20836_v55, %v9035_v8  ;;  %v388_v37 = vsel %vm387_vm3, %v9155_v4, %v9160_v14  ;;  %v9381_v55 = vunpack.i.h.bf16 %v12635_v0  ;;  %v9105_v4 = vunpack.i.l.bf16 %v20838_v50 }
 0x193   :  { %8793 = vmatmul.msk.f32.gmra.mxu1 %vm986_vm8, %v12030_v10  ;;  %v482_v49 = vsel %vm476_vm2, %v9201_v40, %v20837_v47  ;;  %1280 = vmatpush.msrb.mxu3 %v216_v38  ;;  %v20839_v40 = vunpack.i.h.bf16 %v11508_v44  ;;  %v20840_v38 = vunpack.i.l.bf16 %v20813_v53  ;;  %v12677_v47 = vpop.permute.xlu2 %9373  ;;  %v300_v53 = vsel %vm298_vm4, %v9101_v46, %v9106_v31  ;;  %v11222_v46 = vld [vmem:[%s20402_s0 + $0x40] sm:$0xff] }
 0x194   :  { %1319 = vmatpush.msra.mxu1 %v482_v49  ;;  %1374 = vmatpush.msrb.mxu2 %v123_v42  ;;  %v20841_v49 = vld [vmem:[#allocation15_spill] sm:$0xff]  ;;  %v126_v17 = vsel %vm120_vm6, %v8981_v22, %v8986_v25  ;;  %v125_v39 = vsel %vm120_vm6, %v8980_v1, %v8985_v11  ;;  %v20856_v25 = vunpack.i.l.bf16 %v11668_v26  ;;  %v11226_v11 = vld [vmem:[%s20402_s0 + $0x48] sm:$0xff]  ;;  %v20870_v50 = vunpack.i.l.bf16 %v20868_v63 }
 0x195   :  { %v128_v23 = vsel %vm120_vm6, %v20839_v40, %v8981_v22  ;;  %1414 = vmatpush.msra.mxu0 %v388_v37  ;;  %v481_v29 = vsel %vm476_vm2, %v9200_v33, %v20840_v38  ;;  %v9051_v42 = vunpack.i.h.bf16 %v20841_v49  ;;  %v11221_v40 = vld [vmem:[%s20402_s0 + $0x98] sm:$0xff]  ;;  %v20842_v33 = vunpack.i.l.bf16 %v11508_v44 }
 0x196   :  { %1281 = vmatpush.msrb.mxu3 %v128_v23  ;;  %1320 = vmatpush.msra.mxu1 %v481_v29  ;;  %v9380_v37 = vunpack.i.l.bf16 %v12635_v0  ;;  %v20843_v23 = vunpack.i.h.bf16 %v20817_v30  ;;  %v299_v44 = vsel %vm298_vm4, %v9100_v56, %v9105_v4  ;;  %v9376_v29 = vunpack.i.h.bf16 %v12677_v47 }
 0x197   :  { %1375 = vmatpush.msrb.mxu2 %v11221_v40  ;;  %v127_v5 = vsel %vm120_vm6, %v20842_v33, %v8980_v1  ;;  %1415 = vmatpush.msra.mxu0 %v300_v53  ;;  %v9050_v40 = vunpack.i.l.bf16 %v20841_v49  ;;  %v765_v56 = vsel %vm743_vm7, %v9381_v55, %v20845_v52  ;;  %v8996_v33 = vunpack.i.h.bf16 %v20846_v21  ;;  %v11229_v49 = vld [vmem:[%s20402_s0 + $0xa8] sm:$0xff] }
 0x198   :  { %v393_v38 = vsel %vm387_vm3, %v9146_v27, %v20843_v23  ;;  %1282 = vmatpush.msrb.mxu3 %v127_v5  ;;  %v20844_v27 = vunpack.i.l.bf16 %v20817_v30  ;;  %v211_v30 = vsel %vm209_vm5, %v9046_v32, %v9051_v42  ;;  %v20847_v5 = vunpack.i.l.bf16 %v11825_v24  ;;  %1242 = vmatmul.f32.gmra.mxu0 %v12120_v35 }
 0x199   :  { %1321 = vmatpush.msra.mxu1 %v393_v38  ;;  %1376 = vmatpush.msrb.mxu2 %v11222_v46  ;;  %v9375_v38 = vunpack.i.l.bf16 %v12677_v47  ;;  %v304_v32 = vsel %vm298_vm4, %v9091_v60, %v9096_v3  ;;  %v20848_v24 = vunpack.i.h.bf16 %v12338_v62  ;;  %v210_v3 = vsel %vm209_vm5, %v9045_v58, %v9050_v40 }
 0x19a   :  { %1416 = vmatpush.msra.mxu0 %v299_v44  ;;  %v392_v53 = vsel %vm387_vm3, %v9145_v18, %v20844_v27  ;;  %v11223_v18 = vld [vmem:[%s20402_s0 + $0x88] sm:$0xff]  ;;  %v764_v23 = vsel %vm743_vm7, %v9380_v37, %v20847_v5  ;;  %v8995_v44 = vunpack.i.l.bf16 %v20846_v21  ;;  %v11224_v27 = vld [vmem:[%s20402_s0 + $0x30] sm:$0xff]  ;;  %v303_v60 = vsel %vm298_vm4, %v9090_v43, %v9095_v20  ;;  %8797 = vmatmul.msk.f32.gmra.mxu2 %vm986_vm8, %v12030_v10 }
 0x19b   :  { %1322 = vmatpush.msra.mxu1 %v392_v53  ;;  %1490 = vmatpush.msra.mxu2 %v765_v56  ;;  %v747_v46 = vsel %vm743_vm7, %v20848_v24, %v9376_v29  ;;  %v122_v34 = vsel %vm120_vm6, %v8991_v48, %v8996_v33  ;;  %v746_v20 = vsel %vm743_vm7, %v20849_v57, %v9375_v38  ;;  %v20850_v58 = vunpack.i.h.bf16 %v11696_v9  ;;  %v11228_v53 = vld [vmem:[%s20402_s0 + $0x38] sm:$0xff] }
 0x19c   :  { %1283 = vmatpush.msrb.mxu3 %v11223_v18  ;;  %1417 = vmatpush.msra.mxu0 %v211_v30  ;;  %v121_v43 = vsel %vm120_vm6, %v8990_v36, %v8995_v44  ;;  %v20851_v48 = vunpack.i.h.bf16 %v11838_v45  ;;  %v214_v62 = vsel %vm209_vm5, %v9035_v8, %v9040_v19  ;;  %v20853_v36 = vunpack.i.l.bf16 %v11838_v45  ;;  %v11225_v8 = vld [vmem:[%s20402_s0 + $0xa0] sm:$0xff] }
 0x19d   :  { %8794 = vmatmul.msk.f32.vlgmr.msrb.gmra.mxu1 %vm986_vm8, %v11923_v13  ;;  %1491 = vmatpush.msra.mxu2 %v764_v23  ;;  %v20854_v9 = vunpack.i.h.bf16 %v11668_v26  ;;  %v20855_v45 = vunpack.i.h.bf16 %v20821_v6  ;;  %v20857_v22 = vunpack.i.l.bf16 %v20821_v6  ;;  %v20858_v1 = vunpack.i.h.bf16 %v11616_v12 }
 0x19e   :  { %1323 = vmatpush.msra.mxu1 %v304_v32  ;;  %1284 = vmatpush.msrb.mxu3 %v11224_v27  ;;  %v676_v2 = vsel %vm654_vm0, %v20851_v48, %v20850_v58  ;;  %v675_v51 = vsel %vm654_vm0, %v20853_v36, %v20852_v61  ;;  %v20859_v26 = vunpack.i.h.bf16 %v20825_v15  ;;  %v745_v52 = vsel %vm743_vm7, %v9376_v29, %v9381_v55  ;;  %v20862_v55 = vld [vmem:[#allocation19_spill] sm:$0xff]  ;;  %v20871_v32 = vld [vmem:[#allocation5_spill] sm:$0xff] }
 0x19f   :  { %1418 = vmatpush.msra.mxu0 %v210_v3  ;;  %1285 = vmatmul.f32.vlgmr.msrb.gmra.mxu3 %v11911_v41  ;;  %v587_v19 = vsel %vm565_vm1, %v20855_v45, %v20854_v9  ;;  %v586_v7 = vsel %vm565_vm1, %v20857_v22, %v20856_v25  ;;  %v20860_v56 = vunpack.i.l.bf16 %v11616_v12  ;;  %v20861_v30 = vunpack.i.l.bf16 %v20825_v15 }
 0x1a0   :  { %1324 = vmatpush.msra.mxu1 %v303_v60  ;;  %1398 = vmatpush.msra.mxu3 %v747_v46  ;;  %v498_v6 = vsel %vm476_vm2, %v20859_v26, %v20858_v1  ;;  %v744_v47 = vsel %vm743_vm7, %v9375_v38, %v9380_v37  ;;  %v20863_v29 = vunpack.i.h.bf16 %v20862_v55  ;;  %v20864_v15 = vunpack.i.l.bf16 %v20862_v55  ;;  %v20865_v37 = vld [vmem:[#allocation14_spill] sm:$0xff] }
 0x1a1   :  { %1419 = vmatpush.msra.mxu0 %v122_v34  ;;  %v497_v18 = vsel %vm476_vm2, %v20861_v30, %v20860_v56  ;;  %v20866_v5 = vunpack.i.h.bf16 %v20865_v37  ;;  %v20867_v23 = vunpack.i.l.bf16 %v20865_v37  ;;  %v20872_v24 = vunpack.i.h.bf16 %v20871_v32 }
 0x1a2   :  { %1325 = vmatpush.msra.mxu1 %v215_v59  ;;  %1399 = vmatpush.msra.mxu3 %v746_v20  ;;  %v409_v12 = vsel %vm387_vm3, %v9161_v16, %v20863_v29  ;;  %v408_v0 = vsel %vm387_vm3, %v9160_v14, %v20864_v15  ;;  %v20869_v14 = vunpack.i.h.bf16 %v20868_v63  ;;  %v20873_v46 = vunpack.i.l.bf16 %v20871_v32 }
 0x1a3   :  { %1420 = vmatpush.msra.mxu0 %v121_v43  ;;  %1377 = vmatmul.f32.vlgmr.msrb.gmra.mxu2 %v11911_v41  ;;  %v320_v16 = vsel %vm298_vm4, %v9106_v31, %v20866_v5  ;;  %v319_v38 = vsel %vm298_vm4, %v9105_v4, %v20867_v23  ;;  %v230_v4 = vsel %vm209_vm5, %v9050_v40, %v20870_v50  ;;  %v11230_v40 = vld [vmem:[%s20402_s0 + $0x50] sm:$0xff]  ;;  %v11239_v34 = vmov 0  }
 0x1a4   :  { %1453 = vmatpush.msrb.mxu3 %v676_v2  ;;  %1326 = vmatpush.msra.mxu1 %v214_v62  ;;  %v231_v31 = vsel %vm209_vm5, %v9051_v42, %v20869_v14  ;;  %v142_v42 = vsel %vm120_vm6, %v8996_v33, %v20872_v24  ;;  %v141_v27 = vsel %vm120_vm6, %v8995_v44, %v20873_v46  ;;  %v1718_v62 = vld [vmem:[%s20404_s4 + $0x8] sm:$0xff] }
 0x1a5   :  { %8795 = vmatmul.msk.f32.gmra.mxu1 %vm986_vm8, %v12030_v10  ;;  %1421 = vmatpush.msra.mxu0 %v11225_v8 }
 0x1a6   :  { %1454 = vmatpush.msrb.mxu3 %v675_v51  ;;  %1327 = vmatpush.msra.mxu1 %v126_v17 }
 0x1a7   :  { %1288 = vmatmul.f32.gmra.mxu3 %v12120_v35  ;;  %1422 = vmatpush.msra.mxu0 %v11226_v11 }
 0x1a8   :  { %1455 = vmatpush.msrb.mxu3 %v587_v19  ;;  %1328 = vmatpush.msra.mxu1 %v125_v39 }
 0x1a9   :  { %8798 = vmatmul.msk.f32.vlgmr.msrb.gmra.mxu0 %vm986_vm8, %v11923_v13  ;;  %9382 = vset.pattern.permute.xlu1 %v11239_v34 }
 0x1aa   :  { %1456 = vmatpush.msrb.mxu3 %v586_v7  ;;  %1329 = vmatpush.msra.mxu1 %v11227_v28 }
 0x1ab   :  { %1380 = vmatmul.f32.gmra.mxu2 %v12120_v35  ;;  %9383 = vset.pattern.permute.xlu2 %v11239_v34 }
 0x1ac   :  { %1457 = vmatpush.msrb.mxu3 %v498_v6  ;;  %1330 = vmatpush.msra.mxu1 %v11228_v53  ;;  %v1499_v6 = vld [vmem:[%s20406_s6] ss:$4 sm:$0xff] }
 0x1ad   :  { %1331 = vmatmul.f32.vlgmr.msra.gmra.mxu1 %v11911_v41  ;;  %9384 = vset.pattern.permute.xlu0 %v11239_v34  ;;  %v12978_v30 = vperm.slane %v1499_v6, 1  ;;  %v12982_v29 = vperm.slane %v1499_v6, 2  ;;  %v12996_v63 = vperm.slane %v1499_v6, 4  ;;  %v13006_v24 = vperm.slane %v1499_v6, 5 }
 0x1ae   :  { %1444 = vmatpush.msrb.mxu1 %v745_v52  ;;  %1458 = vmatpush.msrb.mxu3 %v497_v18  ;;  %v12974_v52 = vperm.slane %v1499_v6, 0 }
 0x1af   :  { %8800 = vmatmul.msk.f32.vlgmr.msra.gmra.mxu3 %vm986_vm8, %v11923_v13  ;;  %1726 = vperm.xlu2 %9383, %v1718_v62  }
 0x1b0   :  { %1445 = vmatpush.msrb.mxu1 %v744_v47  ;;  %1459 = vmatpush.msrb.mxu3 %v409_v12 }
 0x1b1   :  { %8799 = vmatmul.msk.f32.gmra.mxu0 %vm986_vm8, %v12030_v10 }
 0x1b2   :  { %1460 = vmatpush.msrb.mxu3 %v408_v0 }
 0x1b3   :  { %8804 = vmatmul.msk.f32.vlgmr.msra.gmra.mxu2 %vm986_vm8, %v11923_v13 }
 0x1b4   :  { %1461 = vmatpush.msrb.mxu3 %v320_v16  ;;  %v12990_v16 = vperm.slane %v1499_v6, 3 }
 0x1b5   :  { %1334 = vmatmul.f32.gmra.mxu1 %v12120_v35 }
 0x1b6   :  { %1462 = vmatpush.msrb.mxu3 %v319_v38 }
 0x1b7   :  { %8801 = vmatmul.msk.f32.gmra.mxu3 %vm986_vm8, %v12030_v10 }
 0x1b8   :  { %1463 = vmatpush.msrb.mxu3 %v231_v31 }
 0x1b9   :  { %1423 = vmatmul.f32.vlgmr.msra.gmra.mxu0 %v11911_v41 }
 0x1ba   :  { %1464 = vmatpush.msrb.mxu3 %v230_v4 }
 0x1bb   :  { %8805 = vmatmul.msk.f32.gmra.mxu2 %vm986_vm8, %v12030_v10 }
 0x1bc   :  { %1465 = vmatpush.msrb.mxu3 %v142_v42 }
 0x1bd   :  { %8802 = vmatmul.msk.f32.vlgmr.msrb.gmra.mxu1 %vm986_vm8, %v11923_v13 }
 0x1be   :  { %1466 = vmatpush.msrb.mxu3 %v141_v27 }
 0x1c0   :  { %1467 = vmatpush.msrb.mxu3 %v11229_v49 }
 0x1c1   :  { %1426 = vmatmul.f32.gmra.mxu0 %v12120_v35 }
 0x1c2   :  { %1468 = vmatpush.msrb.mxu3 %v11230_v40 }
 0x1c3   :  { %1469 = vmatmul.f32.vlgmr.msrb.gmra.mxu3 %v11911_v41  ;;  %v1717_v41 = vld [vmem:[%s20404_s4] sm:$0xff] }
 0x1c4   :  { %1721 = vperm.xlu1 %9382, %v1717_v41  }
 0x1c5   :  { %8803 = vmatmul.msk.f32.gmra.mxu1 %vm986_vm8, %v12030_v10 }
 0x1c9   :  { %v1010_v3 = vpop.f32.mrf.mxu0 }
 0x1cb   :  { %1472 = vmatmul.f32.gmra.mxu3 %v12120_v35  ;;  %v1752_v35 = vld [vmem:[%s20405_s5 + $0x8] sm:$0xff] }
 0x1cc   :  { %v1033_v13 = vpop.f32.mrf.mxu1  ;;  %1760 = vperm.xlu1 %9382, %v1752_v35  }
 0x1cd   :  { %v12972_v53 = vadd.f32 %v1033_v13, %v1010_v3  ;;  %v13014_v13 = vperm.slane %v1499_v6, 6 }
 0x1cf   :  { %v1526_v0 = vmul.f32 %v12974_v52, %v12972_v53 }
 0x1d0   :  { %v1056_v10 = vpop.f32.mrf.mxu2 }
 0x1d2   :  { %v1079_v21 = vpop.f32.mrf.mxu3 }
 0x1d3   :  { %v12976_v56 = vadd.f32 %v1079_v21, %v1056_v10  ;;  %v13029_v10 = vperm.slane %v1499_v6, 7 }
 0x1d5   :  { %v1527_v37 = vmul.f32 %v12978_v30, %v12976_v56 }
 0x1d7   :  { %v1548_v50 = vadd.f32 %v1527_v37, %v1526_v0 }
 0x1da   :  { %v1036_v33 = vpop.f32.mrf.mxu1 }
 0x1de   :  { %v1013_v59 = vpop.f32.mrf.mxu0 }
 0x1df   :  { %v1082_v44 = vpop.f32.mrf.mxu3  ;;  %v12998_v14 = vadd.f32 %v1036_v33, %v1013_v59 }
 0x1e1   :  { %v1537_v33 = vmul.f32 %v12974_v52, %v12998_v14 }
 0x1e6   :  { %v1059_v43 = vpop.f32.mrf.mxu2 }
 0x1e7   :  { %v13000_v31 = vadd.f32 %v1082_v44, %v1059_v43 }
 0x1e9   :  { %v1538_v44 = vmul.f32 %v12978_v30, %v13000_v31 }
 0x1ea   :  { %v1125_v57 = vpop.f32.mrf.mxu3 }
 0x1ed   :  { %v1171_v58 = vpop.f32.mrf.mxu0 }
 0x1f2   :  { %v1128_v48 = vpop.f32.mrf.mxu3 }
 0x1f3   :  { %v1102_v60 = vpop.f32.mrf.mxu1 }
 0x1f4   :  { %v12980_v55 = vadd.f32 %v1125_v57, %v1102_v60  ;;  %v8806_v60 = vld [vmem:[%s20406_s6 + $0x20] ss:$4 sm:$0x7] }
 0x1f5   :  { %v13039_v62 = vperm.slane %v8806_v60, 0 }
 0x1f6   :  { %v1528_v23 = vmul.f32 %v12982_v29, %v12980_v55 }
 0x1f7   :  { %v1174_v36 = vpop.f32.mrf.mxu0 }
 0x1f8   :  { %v1549_v27 = vadd.f32 %v1548_v50, %v1528_v23  ;;  %v13064_v23 = vperm.slane %v8806_v60, 2 }
 0x1f9   :  { %v1194_v61 = vpop.f32.mrf.mxu2 }
 0x1fd   :  { %v1148_v51 = vpop.f32.mrf.mxu3 }
 0x1fe   :  { %v1105_v20 = vpop.f32.mrf.mxu1  ;;  %v12988_v5 = vadd.f32 %v1171_v58, %v1148_v51 }
 0x1ff   :  { %v13008_v42 = vadd.f32 %v1128_v48, %v1105_v20 }
 0x200   :  { %v1529_v4 = vmul.f32 %v12990_v16, %v12988_v5 }
 0x201   :  { %v1240_v45 = vpop.f32.mrf.mxu0  ;;  %v1539_v20 = vmul.f32 %v12982_v29, %v13008_v42 }
 0x202   :  { %v1550_v34 = vadd.f32 %v1549_v27, %v1529_v4 }
 0x206   :  { %v1217_v2 = vpop.f32.mrf.mxu1  ;;  %v1151_v19 = vpop.f32.mrf.mxu3 }
 0x207   :  { %v12994_v38 = vadd.f32 %v1217_v2, %v1194_v61  ;;  %v13020_v3 = vadd.f32 %v1174_v36, %v1151_v19  ;;  %v1560_v61 = vadd.f32 %v1538_v44, %v1537_v33  ;;  %v13049_v19 = vperm.slane %v8806_v60, 1 }
 0x209   :  { %v1530_v49 = vmul.f32 %v12996_v63, %v12994_v38  ;;  %v1540_v36 = vmul.f32 %v12990_v16, %v13020_v3 }
 0x20b   :  { %v1197_v9 = vpop.f32.mrf.mxu2  ;;  %v1551_v58 = vadd.f32 %v1550_v34, %v1530_v49 }
 0x210   :  { %v1220_v17 = vpop.f32.mrf.mxu1 }
 0x211   :  { %v13033_v35 = vadd.f32 %v1220_v17, %v1197_v9 }
 0x213   :  { %v1309_v8 = vpop.f32.mrf.mxu2 }
 0x215   :  { %v1243_v25 = vpop.f32.mrf.mxu0 }
 0x21a   :  { %v1263_v39 = vpop.f32.mrf.mxu1 }
 0x21b   :  { %v13004_v32 = vadd.f32 %v1263_v39, %v1240_v45  ;;  %v1561_v39 = vadd.f32 %v1560_v61, %v1539_v20 }
 0x21d   :  { %v12967_v11 = vpop.f32.mrf.mxu2  ;;  %v1531_v59 = vmul.f32 %v13006_v24, %v13004_v32 }
 0x21f   :  { %v1552_v45 = vadd.f32 %v1551_v58, %v1531_v59 }
 0x222   :  { %v1266_v22 = vpop.f32.mrf.mxu1  ;;  %v1286_v7 = vpop.f32.mrf.mxu3 }
 0x223   :  { %v13012_v40 = vadd.f32 %v1309_v8, %v1286_v7  ;;  %v13043_v51 = vadd.f32 %v1266_v22, %v1243_v25  ;;  %v1541_v8 = vmul.f32 %v12996_v63, %v13033_v35  ;;  %v1562_v22 = vadd.f32 %v1561_v39, %v1540_v36  ;;  %v1751_v39 = vld [vmem:[%s20405_s5] sm:$0xff] }
 0x224   :  { %1755 = vperm.xlu0 %9384, %v1751_v39  }
 0x225   :  { %v1532_v48 = vmul.f32 %v13014_v13, %v13012_v40  ;;  %v1542_v6 = vmul.f32 %v13006_v24, %v13043_v51  ;;  %v1563_v50 = vadd.f32 %v1562_v22, %v1541_v8  ;;  %v11240_v8 = vmov 1152.0  }
 0x226   :  { %v1355_v28 = vpop.f32.mrf.mxu0  ;;  %v1378_v47 = vpop.f32.mrf.mxu2  ;;  %11145 = vrcp.f32 %v11240_v8 }
 0x227   :  { %v1564_v33 = vadd.f32 %v1563_v50, %v1542_v6  ;;  %v13095_v50 = vpop.permute.xlu2 %1726 }
 0x22a   :  { %v1289_v1 = vpop.f32.mrf.mxu3  ;;  %v1332_v26 = vpop.f32.mrf.mxu1 }
 0x22b   :  { %v13027_v57 = vadd.f32 %v1355_v28, %v1332_v26  ;;  %v1553_v28 = vadd.f32 %v1552_v45, %v1532_v48  ;;  %v13054_v26 = vadd.f32 %v12967_v11, %v1289_v1 }
 0x22d   :  { %v1533_v17 = vmul.f32 %v13029_v10, %v13027_v57  ;;  %v1543_v1 = vmul.f32 %v13014_v13, %v13054_v26 }
 0x22e   :  { %v1358_v18 = vpop.f32.mrf.mxu0  ;;  %v1381_v46 = vpop.f32.mrf.mxu2 }
 0x232   :  { %v1335_v12 = vpop.f32.mrf.mxu1  ;;  %v1401_v15 = vpop.f32.mrf.mxu3 }
 0x233   :  { %v13037_v2 = vadd.f32 %v1401_v15, %v1378_v47  ;;  %v1554_v47 = vadd.f32 %v1553_v28, %v1533_v17  ;;  %v13060_v15 = vadd.f32 %v1358_v18, %v1335_v12 }
 0x235   :  { %v1534_v25 = vmul.f32 %v13039_v62, %v13037_v2  ;;  %v1544_v18 = vmul.f32 %v13029_v10, %v13060_v15 }
 0x236   :  { %v1424_v21 = vpop.f32.mrf.mxu0  ;;  %v1493_v7 = vpop.f32.mrf.mxu2 }
 0x237   :  { %v13089_v28 = vpop.permute.xlu1 %1721 }
 0x23a   :  { %v1447_v41 = vpop.f32.mrf.mxu1  ;;  %v1404_v43 = vpop.f32.mrf.mxu3 }
 0x23b   :  { %v13047_v9 = vadd.f32 %v1447_v41, %v1424_v21  ;;  %v13068_v27 = vadd.f32 %v1404_v43, %v1381_v46  ;;  %v1555_v21 = vadd.f32 %v1554_v47, %v1534_v25  ;;  %v1565_v41 = vadd.f32 %v1564_v33, %v1543_v1 }
 0x23d   :  { %v1535_v0 = vmul.f32 %v13049_v19, %v13047_v9  ;;  %v1545_v34 = vmul.f32 %v13039_v62, %v13068_v27  ;;  %v1566_v20 = vadd.f32 %v1565_v41, %v1544_v18 }
 0x23e   :  { %v1427_v37 = vpop.f32.mrf.mxu0  ;;  %v1496_v46 = vpop.f32.mrf.mxu2 }
 0x23f   :  { %v1556_v60 = vadd.f32 %v1555_v21, %v1535_v0  ;;  %v1567_v61 = vadd.f32 %v1566_v20, %v1545_v34  ;;  %v13091_v47 = vpop.permute.xlu1 %1760 }
 0x242   :  { %v1450_v4 = vpop.f32.mrf.mxu1 }
 0x243   :  { %v13074_v12 = vadd.f32 %v1450_v4, %v1427_v37 }
 0x245   :  { %v1546_v43 = vmul.f32 %v13049_v19, %v13074_v12 }
 0x246   :  { %v1470_v11 = vpop.f32.mrf.mxu3 }
 0x247   :  { %v13070_v49 = vadd.f32 %v1493_v7, %v1470_v11  ;;  %v1568_v45 = vadd.f32 %v1567_v61, %v1546_v43  ;;  %v11146_v7 = vpop.eup %11145 }
 0x248   :  { %v1573_v25 = vmul.f32 1152.0, %v11146_v7  ;;  %vm1577_vm9 = vweird.f32 %v11146_v7 }
 0x249   :  { %v1536_v44 = vmul.f32 %v13064_v23, %v13070_v49 }
 0x24a   :  { %v1574_v22 = vsub.f32 1.0, %v1573_v25 }
 0x24b   :  { %v1557_v59 = vadd.f32 %v1556_v60, %v1536_v44 }
 0x24c   :  { %v1575_v6 = vmul.f32 %v11146_v7, %v1574_v22 }
 0x24d   :  { %1558 = vadd.xlane.f32.xlu1 %v1557_v59 }
 0x24e   :  { %v1473_v58 = vpop.f32.mrf.mxu3  ;;  %v1576_v0 = vadd.f32 %v11146_v7, %v1575_v6 }
 0x24f   :  { %v13082_v48 = vadd.f32 %v1496_v46, %v1473_v58 }
 0x250   :  { %v13093_v37 = vsel %vm1577_vm9, %v11146_v7, %v1576_v0 }
 0x251   :  { %v1547_v36 = vmul.f32 %v13064_v23, %v13082_v48 }
 0x253   :  { %v1569_v17 = vadd.f32 %v1568_v45, %v1547_v36 }
 0x255   :  { %1570 = vadd.xlane.f32.xlu2 %v1569_v17 }
 0x2c0   :  { %v1559_v4 = vpop.xlane.xlu1 %1558 }
 0x2c1   :  { %v1579_v11 = vmul.f32 %v13093_v37, %v1559_v4 }
 0x2c3   :  { %v13099_v1 = vsub.f32 %v12972_v53, %v1579_v11  ;;  %v13102_v21 = vsub.f32 %v12976_v56, %v1579_v11  ;;  %v13105_v33 = vsub.f32 %v12980_v55, %v1579_v11  ;;  %v13108_v18 = vsub.f32 %v12988_v5, %v1579_v11 }
 0x2c4   :  { %v13115_v41 = vsub.f32 %v12994_v38, %v1579_v11  ;;  %v13123_v59 = vsub.f32 %v13004_v32, %v1579_v11  ;;  %v13128_v20 = vsub.f32 %v13012_v40, %v1579_v11  ;;  %v13137_v36 = vsub.f32 %v13027_v57, %v1579_v11 }
 0x2c5   :  { %v1603_v44 = vmul.f32 %v13099_v1, %v13099_v1  ;;  %v1604_v60 = vmul.f32 %v13102_v21, %v13102_v21  ;;  %v1605_v53 = vmul.f32 %v13105_v33, %v13105_v33  ;;  %v1606_v46 = vmul.f32 %v13108_v18, %v13108_v18 }
 0x2c6   :  { %v1607_v38 = vmul.f32 %v13115_v41, %v13115_v41  ;;  %v1608_v45 = vmul.f32 %v13123_v59, %v13123_v59  ;;  %v13149_v8 = vsub.f32 %v13037_v2, %v1579_v11  ;;  %v1610_v2 = vmul.f32 %v13137_v36, %v13137_v36 }
 0x2c7   :  { %v1625_v34 = vmul.f32 %v1603_v44, %v12974_v52  ;;  %v1626_v55 = vmul.f32 %v1604_v60, %v12978_v30  ;;  %v1627_v43 = vmul.f32 %v1605_v53, %v12982_v29  ;;  %v1628_v40 = vmul.f32 %v1606_v46, %v12990_v16 }
 0x2c8   :  { %v1571_v56 = vpop.xlane.xlu2 %1570  ;;  %v1630_v6 = vmul.f32 %v1608_v45, %v13006_v24  ;;  %v1611_v60 = vmul.f32 %v13149_v8, %v13149_v8 }
 0x2c9   :  { %v1580_v5 = vmul.f32 %v13093_v37, %v1571_v56  ;;  %v1647_v58 = vadd.f32 %v1626_v55, %v1625_v34 }
 0x2cb   :  { %v13134_v61 = vsub.f32 %v12998_v14, %v1580_v5  ;;  %v13140_v32 = vsub.f32 %v13000_v31, %v1580_v5  ;;  %v1648_v17 = vadd.f32 %v1647_v58, %v1627_v43  ;;  %v13146_v39 = vsub.f32 %v13008_v42, %v1580_v5 }
 0x2cc   :  { %v1609_v14 = vmul.f32 %v13128_v20, %v13128_v20  ;;  %v1629_v31 = vmul.f32 %v1607_v38, %v12996_v63  ;;  %v13157_v25 = vsub.f32 %v13020_v3, %v1580_v5  ;;  %v13162_v42 = vsub.f32 %v13047_v9, %v1579_v11 }
 0x2cd   :  { %v1614_v57 = vmul.f32 %v13134_v61, %v13134_v61  ;;  %v1649_v7 = vadd.f32 %v1648_v17, %v1628_v40  ;;  %v1615_v22 = vmul.f32 %v13140_v32, %v13140_v32  ;;  %v13168_v4 = vsub.f32 %v13033_v35, %v1580_v5 }
 0x2ce   :  { %v1616_v44 = vmul.f32 %v13146_v39, %v13146_v39  ;;  %v13173_v3 = vsub.f32 %v13070_v49, %v1579_v11  ;;  %v1631_v56 = vmul.f32 %v1609_v14, %v13014_v13  ;;  %v13181_v55 = vsub.f32 %v13043_v51, %v1580_v5 }
 0x2cf   :  { %v1650_v0 = vadd.f32 %v1649_v7, %v1629_v31  ;;  %v1636_v9 = vmul.f32 %v1614_v57, %v12974_v52  ;;  %v1637_v53 = vmul.f32 %v1615_v22, %v12978_v30  ;;  %v1617_v35 = vmul.f32 %v13157_v25, %v13157_v25 }
 0x2d0   :  { %v1612_v49 = vmul.f32 %v13162_v42, %v13162_v42  ;;  %v1632_v11 = vmul.f32 %v1610_v2, %v13029_v10  ;;  %v13189_v46 = vsub.f32 %v13054_v26, %v1580_v5  ;;  %v1618_v30 = vmul.f32 %v13168_v4, %v13168_v4 }
 0x2d1   :  { %v1651_v34 = vadd.f32 %v1650_v0, %v1630_v6  ;;  %v1638_v38 = vmul.f32 %v1616_v44, %v12982_v29  ;;  %v1659_v43 = vadd.f32 %v1637_v53, %v1636_v9  ;;  %v1613_v51 = vmul.f32 %v13173_v3, %v13173_v3 }
 0x2d2   :  { %v1633_v58 = vmul.f32 %v1611_v60, %v13039_v62  ;;  %v13198_v45 = vsub.f32 %v13060_v15, %v1580_v5  ;;  %v1619_v26 = vmul.f32 %v13181_v55, %v13181_v55  ;;  %v1639_v17 = vmul.f32 %v1617_v35, %v12990_v16 }
 0x2d3   :  { %v1652_v52 = vadd.f32 %v1651_v34, %v1631_v56  ;;  %v1660_v14 = vadd.f32 %v1659_v43, %v1638_v38  ;;  %v1634_v57 = vmul.f32 %v1612_v49, %v13049_v19  ;;  %v13205_v29 = vsub.f32 %v13068_v27, %v1580_v5  ;;  %v13231_v38 = vpop.permute.xlu0 %1755 }
 0x2d4   :  { %v1620_v7 = vmul.f32 %v13189_v46, %v13189_v46  ;;  %v1640_v22 = vmul.f32 %v1618_v30, %v12996_v63  ;;  %v1635_v2 = vmul.f32 %v1613_v51, %v13064_v23  ;;  %v13212_v6 = vsub.f32 %v13074_v12, %v1580_v5 }
 0x2d5   :  { %v1653_v40 = vadd.f32 %v1652_v52, %v1632_v11  ;;  %v1661_v15 = vadd.f32 %v1660_v14, %v1639_v17  ;;  %v1621_v16 = vmul.f32 %v13198_v45, %v13198_v45  ;;  %v1641_v44 = vmul.f32 %v1619_v26, %v13006_v24 }
 0x2d6   :  { %v13218_v60 = vsub.f32 %v13082_v48, %v1580_v5  ;;  %v1622_v63 = vmul.f32 %v13205_v29, %v13205_v29  ;;  %v1642_v53 = vmul.f32 %v1620_v7, %v13014_v13  ;;  %v1623_v12 = vmul.f32 %v13212_v6, %v13212_v6 }
 0x2d7   :  { %v1654_v31 = vadd.f32 %v1653_v40, %v1633_v58  ;;  %v1662_v27 = vadd.f32 %v1661_v15, %v1640_v22  ;;  %v1643_v34 = vmul.f32 %v1621_v16, %v13029_v10 }
 0x2d8   :  { %v1624_v24 = vmul.f32 %v13218_v60, %v13218_v60  ;;  %v1644_v48 = vmul.f32 %v1622_v63, %v13039_v62  ;;  %v1645_v49 = vmul.f32 %v1623_v12, %v13049_v19 }
 0x2d9   :  { %v1655_v0 = vadd.f32 %v1654_v31, %v1634_v57  ;;  %v1663_v56 = vadd.f32 %v1662_v27, %v1641_v44 }
 0x2da   :  { %v1646_v52 = vmul.f32 %v1624_v24, %v13064_v23 }
 0x2db   :  { %v1656_v9 = vadd.f32 %v1655_v0, %v1635_v2  ;;  %v1664_v35 = vadd.f32 %v1663_v56, %v1642_v53 }
 0x2dd   :  { %1657 = vadd.xlane.f32.xlu0 %v1656_v9  ;;  %v1665_v5 = vadd.f32 %v1664_v35, %v1643_v34 }
 0x2df   :  { %v1666_v11 = vadd.f32 %v1665_v5, %v1644_v48 }
 0x2e1   :  { %v1667_v13 = vadd.f32 %v1666_v11, %v1645_v49 }
 0x2e3   :  { %v1668_v30 = vadd.f32 %v1667_v13, %v1646_v52 }
 0x2e5   :  { %1669 = vadd.xlane.f32.xlu2 %v1668_v30 }
 0x350   :  { %v1658_v43 = vpop.xlane.xlu0 %1657 }
 0x351   :  { %v1671_v10 = vmul.f32 %v1658_v43, %v13093_v37 }
 0x353   :  { %v1673_v51 = vadd.f32 1e-05, %v1671_v10 }
 0x355   :  { %11147 = vrsqrt.f32 %v1673_v51  ;;  %vm1681_vm11 = vweird.f32 %v1673_v51 }
 0x358   :  { %v1670_v58 = vpop.xlane.xlu2 %1669 }
 0x359   :  { %v1672_v62 = vmul.f32 %v1670_v58, %v13093_v37 }
 0x35b   :  { %v11148_v40 = vpop.eup %11147  ;;  %v1674_v17 = vadd.f32 1e-05, %v1672_v62 }
 0x35c   :  { %v1676_v26 = vmul.f32 %v11148_v40, %v1673_v51  ;;  %vm1682_vm10 = vweird.f32 %v11148_v40 }
 0x35d   :  { %11149 = vrsqrt.f32 %v1674_v17  ;;  %vm1683_vm12 = vmor %vm1681_vm11, %vm1682_vm10  ;;  %vm1691_vm14 = vweird.f32 %v1674_v17 }
 0x35e   :  { %v1677_v19 = vmul.f32 %v11148_v40, %v1676_v26 }
 0x360   :  { %v1678_v14 = vmul.f32 0.5, %v1677_v19 }
 0x362   :  { %v1679_v23 = vsub.f32 1.5, %v1678_v14 }
 0x363   :  { %v11150_v31 = vpop.eup %11149 }
 0x364   :  { %v1680_v57 = vmul.f32 %v11148_v40, %v1679_v23  ;;  %v1686_v22 = vmul.f32 %v11150_v31, %v1674_v17  ;;  %vm1692_vm13 = vweird.f32 %v11150_v31 }
 0x365   :  { %vm1693_vm15 = vmor %vm1691_vm14, %vm1692_vm13 }
 0x366   :  { %v13235_v7 = vsel %vm1683_vm12, %v11148_v40, %v1680_v57  ;;  %v1687_v16 = vmul.f32 %v11150_v31, %v1686_v22 }
 0x367   :  { %v1700_v15 = vmul.f32 %v13235_v7, %v13123_v59  ;;  %v1696_v37 = vmul.f32 %v13235_v7, %v13102_v21  ;;  %v1695_v2 = vmul.f32 %v13235_v7, %v13099_v1  ;;  %v1703_v0 = vmul.f32 %v13235_v7, %v13149_v8 }
 0x368   :  { %v1698_v44 = vmul.f32 %v13235_v7, %v13108_v18  ;;  %v1697_v27 = vmul.f32 %v13235_v7, %v13105_v33  ;;  %v1688_v63 = vmul.f32 0.5, %v1687_v16  ;;  %v1701_v8 = vmul.f32 %v13235_v7, %v13128_v20 }
 0x369   :  { %v1734_v9 = vmul.f32 %v13089_v28, %v1700_v15  ;;  %v1730_v59 = vmul.f32 %v13089_v28, %v1696_v37  ;;  %v1729_v21 = vmul.f32 %v13089_v28, %v1695_v2  ;;  %v1737_v53 = vmul.f32 %v13089_v28, %v1703_v0 }
 0x36a   :  { %v1732_v1 = vmul.f32 %v13089_v28, %v1698_v44  ;;  %v1689_v56 = vsub.f32 1.5, %v1688_v63  ;;  %v1731_v33 = vmul.f32 %v13089_v28, %v1697_v27  ;;  %v1735_v20 = vmul.f32 %v13089_v28, %v1701_v8 }
 0x36b   :  { %v1768_v18 = vadd.f32 %v13231_v38, %v1734_v9  ;;  %v1764_v34 = vadd.f32 %v13231_v38, %v1730_v59  ;;  %v1763_v35 = vadd.f32 %v13231_v38, %v1729_v21  ;;  %v13261_v24 = vadd.f32 %v13231_v38, %v1737_v53 }
 0x36c   :  { %v1690_v12 = vmul.f32 %v11150_v31, %v1689_v56  ;;  %v13264_v48 = vadd.f32 %v13231_v38, %v1732_v1  ;;  %v13270_v11 = vadd.f32 %v13231_v38, %v1731_v33  ;;  %v1699_v33 = vmul.f32 %v13235_v7, %v13115_v41 }
 0x36d   :  { %vm1790_vm9 = vcmp.gt.f32.partialorder %v1768_v18, 0.0  ;;  %v1812_v49 = vmul.f32 0.2, %v1768_v18  ;;  %vm1786_vm10 = vcmp.gt.f32.partialorder %v1764_v34, 0.0  ;;  %v1808_v10 = vmul.f32 0.2, %v1764_v34 }
 0x36e   :  { %v13267_v5 = vsel %vm1693_vm15, %v11150_v31, %v1690_v12  ;;  %vm1785_vm11 = vcmp.gt.f32.partialorder %v1763_v35, 0.0  ;;  %vm1793_vm12 = vcmp.gt.f32.partialorder %v13261_v24, 0.0  ;;  %v1810_v8 = vmul.f32 0.2, %v13264_v48 }
 0x36f   :  { %v1711_v52 = vmul.f32 %v13267_v5, %v13181_v55  ;;  %v1707_v13 = vmul.f32 %v13267_v5, %v13140_v32  ;;  %v1706_v30 = vmul.f32 %v13267_v5, %v13134_v61  ;;  %v1714_v43 = vmul.f32 %v13267_v5, %v13205_v29 }
 0x370   :  { %v1709_v51 = vmul.f32 %v13267_v5, %v13157_v25  ;;  %v1708_v58 = vmul.f32 %v13267_v5, %v13146_v39  ;;  %v1807_v61 = vmul.f32 0.2, %v1763_v35  ;;  %v13295_v19 = vsel %vm1790_vm9, %v1768_v18, %v1812_v49 }
 0x371   :  { %v1745_v40 = vmul.f32 %v13095_v50, %v1711_v52  ;;  %v1741_v55 = vmul.f32 %v13095_v50, %v1707_v13  ;;  %v1740_v32 = vmul.f32 %v13095_v50, %v1706_v30  ;;  %v1748_v62 = vmul.f32 %v13095_v50, %v1714_v43  ;;  %20874 = vst [vmem:[#allocation29_spill] sm:$0xff] %v13295_v19 }
 0x372   :  { %v1743_v29 = vmul.f32 %v13095_v50, %v1709_v51  ;;  %v1742_v26 = vmul.f32 %v13095_v50, %v1708_v58  ;;  %v1712_v57 = vmul.f32 %v13267_v5, %v13189_v46  ;;  %v13302_v15 = vsel %vm1786_vm10, %v1764_v34, %v1808_v10 }
 0x373   :  { %v1779_v17 = vadd.f32 %v13091_v47, %v1745_v40  ;;  %v1775_v25 = vadd.f32 %v13091_v47, %v1741_v55  ;;  %v1774_v39 = vadd.f32 %v13091_v47, %v1740_v32  ;;  %v1782_v14 = vadd.f32 %v13091_v47, %v1748_v62 }
 0x374   :  { %v1777_v23 = vadd.f32 %v13091_v47, %v1743_v29  ;;  %v1776_v2 = vadd.f32 %v13091_v47, %v1742_v26  ;;  %v13310_v44 = vsel %vm1785_vm11, %v1763_v35, %v1807_v61  ;;  %v1815_v46 = vmul.f32 0.2, %v13261_v24 }
 0x375   :  { %vm1801_vm13 = vcmp.gt.f32.partialorder %v1779_v17, 0.0  ;;  %v1823_v31 = vmul.f32 0.2, %v1779_v17  ;;  %vm1797_vm14 = vcmp.gt.f32.partialorder %v1775_v25, 0.0  ;;  %v1819_v22 = vmul.f32 0.2, %v1775_v25 }
 0x376   :  { %vm1796_vm15 = vcmp.gt.f32.partialorder %v1774_v39, 0.0  ;;  %v1818_v37 = vmul.f32 0.2, %v1774_v39  ;;  %v1826_v59 = vmul.f32 0.2, %v1782_v14  ;;  %vm1804_vm9 = vcmp.gt.f32.partialorder %v1782_v14, 0.0 }
 0x377   :  { %v13305_v0 = vsel %vm1801_vm13, %v1779_v17, %v1823_v31  ;;  %v13307_v16 = vsel %vm1797_vm14, %v1775_v25, %v1819_v22  ;;  %v1821_v53 = vmul.f32 0.2, %v1777_v23  ;;  %v1746_v1 = vmul.f32 %v13095_v50, %v1712_v57 }
 0x378   :  { %20875 = vst [vmem:[#allocation27_spill] sm:$0xff] %v13305_v0  ;;  %v13315_v27 = vpack.i.bf16 %v13305_v0, %v13295_v19  ;;  %v13319_v9 = vpack.i.bf16 %v13307_v16, %v13302_v15  ;;  %v13321_v63 = vsel %vm1796_vm15, %v1774_v39, %v1818_v37  ;;  %vm1788_vm10 = vcmp.gt.f32.partialorder %v13264_v48, 0.0 }
 0x379   :  { %v13325_v21 = vpack.i.bf16 %v13321_v63, %v13310_v44  ;;  %vm1799_vm11 = vcmp.gt.f32.partialorder %v1777_v23, 0.0  ;;  %v1820_v56 = vmul.f32 0.2, %v1776_v2  ;;  %vm1798_vm13 = vcmp.gt.f32.partialorder %v1776_v2, 0.0 }
 0x37a   :  { %9411 = vrot.lane.b32.xlu0 %v13315_v27, %s11231_s13  ;;  %9391 = vrot.lane.b32.xlu1 %v13319_v9, %s11231_s13  ;;  %v1809_v18 = vmul.f32 0.2, %v13270_v11  ;;  %v1710_v12 = vmul.f32 %v13267_v5, %v13168_v4  ;;  %v13341_v34 = vsel %vm1804_vm9, %v1782_v14, %v1826_v59  ;;  %vm1787_vm14 = vcmp.gt.f32.partialorder %v13270_v11, 0.0 }
 0x37b   :  { %9386 = vrot.lane.b32.xlu2 %v13325_v21, %s11231_s13  ;;  %20876 = vst [vmem:[#allocation23_spill] sm:$0xff] %v13341_v34  ;;  %v1769_v35 = vadd.f32 %v13231_v38, %v1735_v20  ;;  %v13345_v49 = vsel %vm1799_vm11, %v1777_v23, %v1821_v53  ;;  %v1780_v52 = vadd.f32 %v13091_v47, %v1746_v1 }
 0x37c   :  { %20877 = vst [vmem:[#allocation24_spill] sm:$0xff] %v13345_v49  ;;  %v1733_v13 = vmul.f32 %v13089_v28, %v1699_v33  ;;  %v1744_v30 = vmul.f32 %v13095_v50, %v1710_v12  ;;  %v13353_v41 = vsel %vm1793_vm12, %v13261_v24, %v1815_v46  ;;  %v13358_v4 = vsel %vm1788_vm10, %v13264_v48, %v1810_v8 }
 0x37d   :  { %20878 = vst [vmem:[#allocation25_spill] sm:$0xff] %v13353_v41  ;;  %v13360_v43 = vsel %vm1798_vm13, %v1776_v2, %v1820_v56  ;;  %v1715_v20 = vmul.f32 %v13267_v5, %v13212_v6  ;;  %v13366_v10 = vpack.i.bf16 %v13341_v34, %v13353_v41  ;;  %v13369_v51 = vsel %vm1787_vm14, %v13270_v11, %v1809_v18 }
 0x37e   :  { %20879 = vst [vmem:[#allocation22_spill] sm:$0xff] %v13358_v4  ;;  %v1778_v24 = vadd.f32 %v13091_v47, %v1744_v30  ;;  %v1704_v58 = vmul.f32 %v13235_v7, %v13162_v42  ;;  %v13376_v48 = vpack.i.bf16 %v13345_v49, %v13358_v4  ;;  %v1767_v40 = vadd.f32 %v13231_v38, %v1733_v13 }
 0x37f   :  { %20880 = vst [vmem:[#allocation16_spill] sm:$0xff] %v13360_v43  ;;  %v1702_v6 = vmul.f32 %v13235_v7, %v13137_v36  ;;  %v1713_v55 = vmul.f32 %v13267_v5, %v13198_v45  ;;  %v13385_v11 = vpack.i.bf16 %v13360_v43, %v13369_v51  ;;  %v1824_v32 = vmul.f32 0.2, %v1780_v52 }
 0x380   :  { %20881 = vst [vmem:[#allocation20_spill] sm:$0xff] %v13369_v51  ;;  %v1749_v62 = vmul.f32 %v13095_v50, %v1715_v20  ;;  %vm1802_vm12 = vcmp.gt.f32.partialorder %v1780_v52, 0.0  ;;  %v1822_v42 = vmul.f32 0.2, %v1778_v24  ;;  %v1813_v36 = vmul.f32 0.2, %v1769_v35 }
 0x381   :  { %vm1800_vm15 = vcmp.gt.f32.partialorder %v1778_v24, 0.0  ;;  %v1738_v45 = vmul.f32 %v13089_v28, %v1704_v58  ;;  %v1747_v61 = vmul.f32 %v13095_v50, %v1713_v55  ;;  %vm1791_vm9 = vcmp.gt.f32.partialorder %v1769_v35, 0.0 }
 0x382   :  { %9426 = vrot.lane.b32.xlu0 %v13366_v10, %s11231_s13  ;;  %9401 = vrot.lane.b32.xlu1 %v13376_v48, %s11231_s13  ;;  %v1811_v29 = vmul.f32 0.2, %v1767_v40  ;;  %v1736_v26 = vmul.f32 %v13089_v28, %v1702_v6  ;;  %v13397_v17 = vsel %vm1802_vm12, %v1780_v52, %v1824_v32  ;;  %vm1789_vm10 = vcmp.gt.f32.partialorder %v1767_v40, 0.0 }
 0x383   :  { %9396 = vrot.lane.b32.xlu2 %v13385_v11, %s11231_s13  ;;  %20882 = vst [vmem:[#allocation17_spill] sm:$0xff] %v13397_v17  ;;  %v1783_v25 = vadd.f32 %v13091_v47, %v1749_v62  ;;  %v13400_v39 = vsel %vm1800_vm15, %v1778_v24, %v1822_v42  ;;  %v1781_v14 = vadd.f32 %v13091_v47, %v1747_v61 }
 0x384   :  { %v1716_v23 = vmul.f32 %v13267_v5, %v13218_v60  ;;  %v13405_v57 = vsel %vm1791_vm9, %v1769_v35, %v1813_v36  ;;  %v1772_v31 = vadd.f32 %v13231_v38, %v1738_v45  ;;  %v13412_v37 = vsel %vm1789_vm10, %v1767_v40, %v1811_v29 }
 0x385   :  { %20883 = vst [vmem:[#allocation18_spill] sm:$0xff] %v13405_v57  ;;  %v13410_v22 = vpack.i.bf16 %v13397_v17, %v13405_v57  ;;  %v1770_v2 = vadd.f32 %v13231_v38, %v1736_v26  ;;  %v1705_v46 = vmul.f32 %v13235_v7, %v13173_v3  ;;  %v13419_v59 = vpack.i.bf16 %v13400_v39, %v13412_v37 }
 0x386   :  { %20884 = vst [vmem:[#allocation28_spill] sm:$0xff] %v13412_v37  ;;  %v1827_v60 = vmul.f32 0.2, %v1783_v25  ;;  %vm1805_vm11 = vcmp.gt.f32.partialorder %v1783_v25, 0.0  ;;  %v1825_v5 = vmul.f32 0.2, %v1781_v14  ;;  %v1750_v53 = vmul.f32 %v13095_v50, %v1716_v23 }
 0x387   :  { %v1816_v1 = vmul.f32 0.2, %v1772_v31  ;;  %vm1803_vm13 = vcmp.gt.f32.partialorder %v1781_v14, 0.0  ;;  %vm1794_vm14 = vcmp.gt.f32.partialorder %v1772_v31, 0.0  ;;  %v1814_v3 = vmul.f32 0.2, %v1770_v2 }
 0x388   :  { %v1739_v7 = vmul.f32 %v13089_v28, %v1705_v46  ;;  %v13429_v8 = vsel %vm1805_vm11, %v1783_v25, %v1827_v60  ;;  %vm1792_vm12 = vcmp.gt.f32.partialorder %v1770_v2, 0.0  ;;  %v13431_v56 = vsel %vm1803_vm13, %v1781_v14, %v1825_v5 }
 0x389   :  { %20885 = vst [vmem:[#allocation7_spill] sm:$0xff] %v13429_v8  ;;  %v1784_v18 = vadd.f32 %v13091_v47, %v1750_v53  ;;  %v13434_v33 = vsel %vm1794_vm14, %v1772_v31, %v1816_v1  ;;  %v13440_v12 = vsel %vm1792_vm12, %v1770_v2, %v1814_v3 }
 0x38a   :  { %9416 = vrot.lane.b32.xlu1 %v13410_v22, %s11231_s13  ;;  %9441 = vrot.lane.b32.xlu0 %v13325_v21, %s11232_s24  ;;  %20886 = vst [vmem:[#allocation11_spill] sm:$0xff] %v13431_v56  ;;  %v13438_v50 = vpack.i.bf16 %v13429_v8, %v13434_v33  ;;  %v1773_v35 = vadd.f32 %v13231_v38, %v1739_v7 }
 0x38b   :  { %9406 = vrot.lane.b32.xlu2 %v13419_v59, %s11231_s13  ;;  %20887 = vst [vmem:[#allocation10_spill] sm:$0xff] %v13434_v33  ;;  %v13445_v28 = vpack.i.bf16 %v13431_v56, %v13440_v12  ;;  %v1828_v47 = vmul.f32 0.2, %v1784_v18  ;;  %vm1806_vm15 = vcmp.gt.f32.partialorder %v1784_v18, 0.0 }
 0x38c   :  { %20888 = vst [vmem:[#allocation26_spill] sm:$0xff] %v13440_v12  ;;  %v1817_v52 = vmul.f32 0.2, %v1773_v35  ;;  %vm1795_vm9 = vcmp.gt.f32.partialorder %v1773_v35, 0.0 }
 0x38d   :  { %v13453_v13 = vsel %vm1806_vm15, %v1784_v18, %v1828_v47 }
 0x38e   :  { %20889 = vst [vmem:[#allocation12_spill] sm:$0xff] %v13453_v13  ;;  %v13455_v38 = vsel %vm1795_vm9, %v1773_v35, %v1817_v52 }
 0x38f   :  { %20890 = vst [vmem:[#allocation9_spill] sm:$0xff] %v13455_v38  ;;  %v13459_v30 = vpack.i.bf16 %v13453_v13, %v13455_v38 }
 0x392   :  { %9431 = vrot.lane.b32.xlu1 %v13438_v50, %s11231_s13  ;;  %9456 = vrot.lane.b32.xlu0 %v13376_v48, %s11232_s24 }
 0x393   :  { %9421 = vrot.lane.b32.xlu2 %v13445_v28, %s11231_s13 }
 0x39a   :  { %9446 = vrot.lane.b32.xlu1 %v13319_v9, %s11232_s24  ;;  %9471 = vrot.lane.b32.xlu0 %v13410_v22, %s11232_s24 }
 0x39b   :  { %9436 = vrot.lane.b32.xlu2 %v13459_v30, %s11231_s13 }
 0x3a2   :  { %9461 = vrot.lane.b32.xlu1 %v13419_v59, %s11232_s24  ;;  %9486 = vrot.lane.b32.xlu0 %v13438_v50, %s11232_s24 }
 0x3a3   :  { %9451 = vrot.lane.b32.xlu2 %v13385_v11, %s11232_s24 }
 0x3aa   :  { %9476 = vrot.lane.b32.xlu1 %v13445_v28, %s11232_s24  ;;  %9501 = vrot.lane.b32.xlu0 %v13319_v9, %s11233_s25 }
 0x3ab   :  { %9466 = vrot.lane.b32.xlu2 %v13315_v27, %s11232_s24 }
 0x3b2   :  { %9491 = vrot.lane.b32.xlu1 %v13459_v30, %s11232_s24  ;;  %9516 = vrot.lane.b32.xlu0 %v13419_v59, %s11233_s25 }
 0x3b3   :  { %9481 = vrot.lane.b32.xlu2 %v13366_v10, %s11232_s24 }
 0x3ba   :  { %9506 = vrot.lane.b32.xlu1 %v13385_v11, %s11233_s25  ;;  %9531 = vrot.lane.b32.xlu0 %v13445_v28, %s11233_s25 }
 0x3bb   :  { %9496 = vrot.lane.b32.xlu2 %v13325_v21, %s11233_s25 }
 0x3c2   :  { %9521 = vrot.lane.b32.xlu1 %v13315_v27, %s11233_s25  ;;  %9546 = vrot.lane.b32.xlu0 %v13459_v30, %s11233_s25 }
 0x3c3   :  { %9511 = vrot.lane.b32.xlu2 %v13376_v48, %s11233_s25 }
 0x3ca   :  { %9536 = vrot.lane.b32.xlu1 %v13366_v10, %s11233_s25  ;;  %9561 = vrot.lane.b32.xlu0 %v13385_v11, %s11234_s26 }
 0x3cb   :  { %9526 = vrot.lane.b32.xlu2 %v13410_v22, %s11233_s25 }
 0x3d2   :  { %9551 = vrot.lane.b32.xlu1 %v13325_v21, %s11234_s26  ;;  %9576 = vrot.lane.b32.xlu0 %v13315_v27, %s11234_s26 }
 0x3d3   :  { %9541 = vrot.lane.b32.xlu2 %v13438_v50, %s11233_s25 }
 0x3d5   :  { %v13509_v20 = vpop.permute.xlu2 %9386 }
 0x3da   :  { %9566 = vrot.lane.b32.xlu1 %v13376_v48, %s11234_s26  ;;  %9591 = vrot.lane.b32.xlu0 %v13366_v10, %s11234_s26 }
 0x3db   :  { %9556 = vrot.lane.b32.xlu2 %v13319_v9, %s11234_s26 }
 0x3dd   :  { %v13517_v24 = vpop.permute.xlu2 %9396 }
 0x3e2   :  { %9581 = vrot.lane.b32.xlu1 %v13410_v22, %s11234_s26  ;;  %9606 = vrot.lane.b32.xlu0 %v13325_v21, %s11235_s27 }
 0x3e3   :  { %9571 = vrot.lane.b32.xlu2 %v13419_v59, %s11234_s26 }
 0x3e5   :  { %v13525_v58 = vpop.permute.xlu2 %9406 }
 0x3ea   :  { %9596 = vrot.lane.b32.xlu1 %v13438_v50, %s11234_s26  ;;  %9621 = vrot.lane.b32.xlu0 %v13376_v48, %s11235_s27 }
 0x3eb   :  { %9586 = vrot.lane.b32.xlu2 %v13445_v28, %s11234_s26 }
 0x3ec   :  { %v13533_v40 = vpop.permute.xlu0 %9411  ;;  %v13535_v6 = vpop.permute.xlu1 %9391 }
 0x3ed   :  { %v13537_v55 = vpop.permute.xlu2 %9421 }
 0x3ee   :  { %20891 = vst [vmem:[#allocation21_spill] sm:$0xff] %v13537_v55  ;;  %v8838_v55 = vld [vmem:[%s20405_s5 + $0x18] sm:$0xff] }
 0x3f2   :  { %9611 = vrot.lane.b32.xlu1 %v13319_v9, %s11235_s27  ;;  %9636 = vrot.lane.b32.xlu0 %v13410_v22, %s11235_s27 }
 0x3f3   :  { %9601 = vrot.lane.b32.xlu2 %v13459_v30, %s11234_s26 }
 0x3f4   :  { %v13545_v32 = vpop.permute.xlu0 %9426  ;;  %v13547_v62 = vpop.permute.xlu1 %9401 }
 0x3f5   :  { %20892 = vst [vmem:[#allocation3_spill] sm:$0xff] %v13545_v32  ;;  %v13549_v42 = vpop.permute.xlu2 %9436  ;;  %v8837_v32 = vld [vmem:[%s20405_s5 + $0x10] sm:$0xff] }
 0x3f6   :  { %20893 = vst [vmem:[#allocation6_spill] sm:$0xff] %v13549_v42 }
 0x3fa   :  { %9626 = vrot.lane.b32.xlu1 %v13419_v59, %s11235_s27  ;;  %9651 = vrot.lane.b32.xlu0 %v13438_v50, %s11235_s27 }
 0x3fb   :  { %9616 = vrot.lane.b32.xlu2 %v13385_v11, %s11235_s27 }
 0x3fc   :  { %v13557_v36 = vpop.permute.xlu1 %9416  ;;  %v13559_v45 = vpop.permute.xlu0 %9441 }
 0x3fd   :  { %20894 = vst [vmem:[#allocation13_spill] sm:$0xff] %v13557_v36  ;;  %v13561_v61 = vpop.permute.xlu2 %9451 }
 0x402   :  { %9641 = vrot.lane.b32.xlu1 %v13445_v28, %s11235_s27  ;;  %9666 = vrot.lane.b32.xlu0 %v13319_v9, %s11236_s28 }
 0x403   :  { %9631 = vrot.lane.b32.xlu2 %v13315_v27, %s11235_s27 }
 0x404   :  { %v13569_v29 = vpop.permute.xlu1 %9431  ;;  %v13571_v26 = vpop.permute.xlu0 %9456 }
 0x405   :  { %20895 = vst [vmem:[#allocation15_spill] sm:$0xff] %v13569_v29  ;;  %v13573_v25 = vpop.permute.xlu2 %9466 }
 0x40a   :  { %9656 = vrot.lane.b32.xlu1 %v13459_v30, %s11235_s27  ;;  %9681 = vrot.lane.b32.xlu0 %v13419_v59, %s11236_s28 }
 0x40b   :  { %9646 = vrot.lane.b32.xlu2 %v13366_v10, %s11235_s27 }
 0x40c   :  { %v13581_v14 = vpop.permute.xlu1 %9446  ;;  %v13583_v23 = vpop.permute.xlu0 %9471 }
 0x40d   :  { %v13585_v31 = vpop.permute.xlu2 %9481 }
 0x40e   :  { %20896 = vst [vmem:[#allocation8_spill] sm:$0xff] %v13585_v31 }
 0x412   :  { %9671 = vrot.lane.b32.xlu1 %v13385_v11, %s11236_s28  ;;  %9696 = vrot.lane.b32.xlu0 %v13445_v28, %s11236_s28 }
 0x413   :  { %9661 = vrot.lane.b32.xlu2 %v13325_v21, %s11236_s28 }
 0x414   :  { %v13593_v2 = vpop.permute.xlu1 %9461  ;;  %v13595_v46 = vpop.permute.xlu0 %9486 }
 0x415   :  { %20897 = vst [vmem:[#allocation19_spill] sm:$0xff] %v13595_v46  ;;  %v13597_v60 = vpop.permute.xlu2 %9496 }
 0x41a   :  { %9686 = vrot.lane.b32.xlu1 %v13315_v27, %s11236_s28  ;;  %9711 = vrot.lane.b32.xlu0 %v13459_v30, %s11236_s28 }
 0x41b   :  { %9676 = vrot.lane.b32.xlu2 %v13376_v48, %s11236_s28 }
 0x41c   :  { %v13605_v5 = vpop.permute.xlu1 %9476  ;;  %v13607_v53 = vpop.permute.xlu0 %9501 }
 0x41d   :  { %20898 = vst [vmem:[#allocation14_spill] sm:$0xff] %v13605_v5  ;;  %v13609_v1 = vpop.permute.xlu2 %9511 }
 0x422   :  { %9701 = vrot.lane.b32.xlu1 %v13366_v10, %s11236_s28  ;;  %9726 = vrot.lane.b32.xlu0 %v13385_v11, %s11237_s29 }
 0x423   :  { %9691 = vrot.lane.b32.xlu2 %v13410_v22, %s11236_s28 }
 0x424   :  { %v13617_v3 = vpop.permute.xlu1 %9491  ;;  %v13619_v7 = vpop.permute.xlu0 %9516 }
 0x425   :  { %20899 = vst [vmem:[#allocation4_spill] sm:$0xff] %v13617_v3  ;;  %v13621_v18 = vpop.permute.xlu2 %9526  ;;  %v8835_v3 = vld [vmem:[%s20404_s4 + $0x10] sm:$0xff] }
 0x42a   :  { %9716 = vrot.lane.b32.xlu1 %v13325_v21, %s11237_s29  ;;  %9741 = vrot.lane.b32.xlu0 %v13315_v27, %s11237_s29 }
 0x42b   :  { %9706 = vrot.lane.b32.xlu2 %v13438_v50, %s11236_s28 }
 0x42c   :  { %v13629_v35 = vpop.permute.xlu1 %9506  ;;  %v13631_v47 = vpop.permute.xlu0 %9531 }
 0x42d   :  { %20900 = vst [vmem:[#allocation5_spill] sm:$0xff] %v13631_v47  ;;  %v13633_v52 = vpop.permute.xlu2 %9541 }
 0x42e   :  { %20901 = vst [vmem:[#allocation30_spill] sm:$0xff] %v13633_v52 }
 0x432   :  { %9731 = vrot.lane.b32.xlu1 %v13376_v48, %s11237_s29  ;;  %9756 = vrot.lane.b32.xlu0 %v13366_v10, %s11237_s29 }
 0x433   :  { %9721 = vrot.lane.b32.xlu2 %v13319_v9, %s11237_s29 }
 0x434   :  { %v13641_v38 = vpop.permute.xlu1 %9521  ;;  %v13643_v13 = vpop.permute.xlu0 %9546 }
 0x435   :  { %20902 = vst [vmem:[#allocation31_spill] sm:$0xff] %v13643_v13  ;;  %v13645_v33 = vpop.permute.xlu2 %9556  ;;  %v8836_v13 = vld [vmem:[%s20404_s4 + $0x18] sm:$0xff] }
 0x436   :  { %v9559_v43 = vunpack.i.h.bf16 %v13645_v33 }
 0x43a   :  { %9746 = vrot.lane.b32.xlu1 %v13410_v22, %s11237_s29  ;;  %9771 = vrot.lane.b32.xlu0 %v13325_v21, %s11238_s30 }
 0x43b   :  { %9736 = vrot.lane.b32.xlu2 %v13419_v59, %s11237_s29 }
 0x43c   :  { %v13653_v8 = vpop.permute.xlu1 %9536  ;;  %v13655_v42 = vpop.permute.xlu0 %9561 }
 0x43d   :  { %20903 = vst [vmem:[#allocation32_spill] sm:$0xff] %v13653_v8  ;;  %v13657_v12 = vpop.permute.xlu2 %9571 }
 0x442   :  { %9761 = vrot.lane.b32.xlu1 %v13438_v50, %s11237_s29  ;;  %9786 = vrot.lane.b32.xlu0 %v13376_v48, %s11238_s30 }
 0x443   :  { %9751 = vrot.lane.b32.xlu2 %v13445_v28, %s11237_s29 }
 0x444   :  { %v13665_v57 = vpop.permute.xlu1 %9551  ;;  %v13667_v21 = vpop.permute.xlu0 %9576 }
 0x445   :  { %v13669_v41 = vpop.permute.xlu2 %9586 }
 0x446   :  { %20904 = vst [vmem:[#allocation33_spill] sm:$0xff] %v13669_v41 }
 0x44a   :  { %9776 = vrot.lane.b32.xlu1 %v13319_v9, %s11238_s30  ;;  %9801 = vrot.lane.b32.xlu0 %v13410_v22, %s11238_s30 }
 0x44b   :  { %9766 = vrot.lane.b32.xlu2 %v13459_v30, %s11237_s29 }
 0x44c   :  { %v13677_v56 = vpop.permute.xlu1 %9566  ;;  %v13679_v48 = vpop.permute.xlu0 %9591 }
 0x44d   :  { %20905 = vst [vmem:[#allocation34_spill] sm:$0xff] %v13679_v48  ;;  %v13681_v17 = vpop.permute.xlu2 %9601 }
 0x44e   :  { %20906 = vst [vmem:[#allocation35_spill] sm:$0xff] %v13681_v17 }
 0x452   :  { %9791 = vrot.lane.b32.xlu1 %v13419_v59, %s11238_s30  ;;  %9816 = vrot.lane.b32.xlu0 %v13438_v50, %s11238_s30 }
 0x453   :  { %9781 = vrot.lane.b32.xlu2 %v13385_v11, %s11238_s30 }
 0x454   :  { %v13689_v9 = vpop.permute.xlu1 %9581  ;;  %v13691_v22 = vpop.permute.xlu0 %9606 }
 0x455   :  { %v13693_v34 = vpop.permute.xlu2 %9616 }
 0x45a   :  { %9806 = vrot.lane.b32.xlu1 %v13445_v28, %s11238_s30  ;;  %3516 = vperm.xlu0 %9384, %v8835_v3  }
 0x45b   :  { %9796 = vrot.lane.b32.xlu2 %v13315_v27, %s11238_s30 }
 0x45c   :  { %v13702_v59 = vpop.permute.xlu1 %9596  ;;  %v13704_v11 = vpop.permute.xlu0 %9621 }
 0x45d   :  { %20907 = vst [vmem:[#allocation36_spill] sm:$0xff] %v13702_v59  ;;  %v13706_v50 = vpop.permute.xlu2 %9631 }
 0x462   :  { %9821 = vrot.lane.b32.xlu1 %v13459_v30, %s11238_s30  ;;  %3556 = vperm.xlu0 %9384, %v8838_v55  }
 0x463   :  { %9811 = vrot.lane.b32.xlu2 %v13366_v10, %s11238_s30 }
 0x464   :  { %v13715_v28 = vpop.permute.xlu1 %9611  ;;  %v13717_v27 = vpop.permute.xlu0 %9636 }
 0x465   :  { %v13719_v3 = vpop.permute.xlu2 %9646  ;;  %v9614_v4 = vunpack.i.h.bf16 %v13715_v28 }
 0x466   :  { %20908 = vst [vmem:[#allocation37_spill] sm:$0xff] %v13719_v3 }
 0x46a   :  { %3521 = vperm.xlu1 %9382, %v8836_v13  }
 0x46b   :  { %3551 = vperm.xlu2 %9383, %v8837_v32  }
 0x46c   :  { %v13727_v30 = vpop.permute.xlu1 %9626  ;;  %v13729_v55 = vpop.permute.xlu0 %9651 }
 0x46d   :  { %20909 = vst [vmem:[#allocation38_spill] sm:$0xff] %v13729_v55  ;;  %v13731_v10 = vpop.permute.xlu2 %9661 }
 0x46e   :  { %20910 = vst [vmem:[#allocation39_spill] sm:$0xff] %v13731_v10 }
 0x474   :  { %v13733_v29 = vpop.permute.xlu1 %9641  ;;  %v13735_v17 = vpop.permute.xlu0 %9666 }
 0x475   :  { %20911 = vst [vmem:[#allocation40_spill] sm:$0xff] %v13733_v29  ;;  %v13737_v31 = vpop.permute.xlu2 %9676 }
 0x47c   :  { %v13739_v5 = vpop.permute.xlu1 %9656  ;;  %v13741_v46 = vpop.permute.xlu0 %9681 }
 0x47d   :  { %20912 = vst [vmem:[#allocation41_spill] sm:$0xff] %v13739_v5  ;;  %v13743_v52 = vpop.permute.xlu2 %9691 }
 0x484   :  { %v13745_v13 = vpop.permute.xlu1 %9671  ;;  %v13747_v32 = vpop.permute.xlu0 %9696 }
 0x485   :  { %20913 = vst [vmem:[#allocation42_spill] sm:$0xff] %v13747_v32  ;;  %v13749_v8 = vpop.permute.xlu2 %9706  ;;  %v20917_v51 = vunpack.i.h.bf16 %v13745_v13  ;;  %v20919_v36 = vunpack.i.l.bf16 %v13745_v13 }
 0x486   :  { %20914 = vst [vmem:[#allocation43_spill] sm:$0xff] %v13749_v8 }
 0x48c   :  { %v13751_v47 = vpop.permute.xlu1 %9686  ;;  %v13753_v41 = vpop.permute.xlu0 %9711 }
 0x48d   :  { %20915 = vst [vmem:[#allocation44_spill] sm:$0xff] %v13753_v41  ;;  %v9722_v59 = vpop.permute.xlu2 %9721  ;;  %v9669_v41 = vunpack.i.h.bf16 %v13735_v17 }
 0x48e   :  { %v9724_v5 = vunpack.i.h.bf16 %v9722_v59  ;;  %v9723_v0 = vunpack.i.l.bf16 %v9722_v59  ;;  %v9668_v59 = vunpack.i.l.bf16 %v13735_v17 }
 0x490   :  { %v2378_v49 = vsel %vm565_vm1, %v9668_v59, %v20919_v36  ;;  %v20525_v36 = vunpack.i.h.bf16 %v13731_v10 }
 0x494   :  { %v13755_v48 = vpop.permute.xlu1 %9701  ;;  %v13757_v3 = vpop.permute.xlu0 %9726 }
 0x495   :  { %20916 = vst [vmem:[#allocation45_spill] sm:$0xff] %v13755_v48  ;;  %v20516_v19 = vunpack.i.h.bf16 %v13757_v3  ;;  %v20518_v29 = vunpack.i.l.bf16 %v13757_v3  ;;  %v13774_v55 = vpop.permute.xlu2 %9736 }
 0x497   :  { %v2467_v8 = vsel %vm654_vm0, %v9724_v5, %v20516_v19  ;;  %v2466_v32 = vsel %vm654_vm0, %v9723_v0, %v20518_v29 }
 0x498   :  { %2832 = vmatpush.msrb.mxu2 %v2467_v8  ;;  %v2379_v8 = vsel %vm565_vm1, %v9669_v41, %v20917_v51 }
 0x49a   :  { %2833 = vmatpush.msrb.mxu2 %v2466_v32  ;;  %v9613_v32 = vunpack.i.l.bf16 %v13715_v28  ;;  %v20920_v28 = vunpack.i.h.bf16 %v13693_v34 }
 0x49c   :  { %v13781_v48 = vpop.permute.xlu1 %9716  ;;  %v13783_v37 = vpop.permute.xlu0 %9741  ;;  %2834 = vmatpush.msrb.mxu2 %v2379_v8  ;;  %v2291_v17 = vsel %vm476_vm2, %v9614_v4, %v20920_v28 }
 0x49d   :  { %20918 = vst [vmem:[#allocation46_spill] sm:$0xff] %v13781_v48  ;;  %v20522_v29 = vunpack.i.h.bf16 %v13781_v48  ;;  %v20921_v51 = vunpack.i.l.bf16 %v13781_v48  ;;  %v13831_v28 = vpop.permute.xlu2 %9751 }
 0x49e   :  { %2835 = vmatpush.msrb.mxu2 %v2378_v49  ;;  %v2381_v49 = vsel %vm565_vm1, %v20525_v36, %v9669_v41 }
 0x49f   :  { %v2469_v8 = vsel %vm654_vm0, %v20522_v29, %v9724_v5  ;;  %v2468_v19 = vsel %vm654_vm0, %v20921_v51, %v9723_v0  ;;  %v20922_v5 = vunpack.i.l.bf16 %v13693_v34  ;;  %v20923_v0 = vunpack.i.h.bf16 %v13655_v42 }
 0x4a0   :  { %2786 = vmatpush.msra.mxu1 %v2469_v8  ;;  %2836 = vmatpush.msrb.mxu2 %v2291_v17  ;;  %v9558_v17 = vunpack.i.l.bf16 %v13645_v33  ;;  %v20527_v8 = vunpack.i.l.bf16 %v13731_v10  ;;  %v20531_v33 = vunpack.i.l.bf16 %v13691_v22  ;;  %v20533_v10 = vunpack.i.h.bf16 %v13561_v61 }
 0x4a1   :  { %v2290_v29 = vsel %vm476_vm2, %v9613_v32, %v20922_v5  ;;  %v2203_v51 = vsel %vm387_vm3, %v9559_v43, %v20923_v0  ;;  %v9504_v5 = vunpack.i.h.bf16 %v13607_v53  ;;  %v20925_v0 = vunpack.i.l.bf16 %v13655_v42 }
 0x4a2   :  { %2787 = vmatpush.msra.mxu1 %v2468_v19  ;;  %2837 = vmatpush.msrb.mxu2 %v2290_v29  ;;  %v20530_v29 = vunpack.i.h.bf16 %v13691_v22  ;;  %v2380_v41 = vsel %vm565_vm1, %v20527_v8, %v9668_v59  ;;  %v20926_v8 = vunpack.i.h.bf16 %v13629_v35 }
 0x4a3   :  { %v2202_v36 = vsel %vm387_vm3, %v9558_v17, %v20925_v0 }
 0x4a4   :  { %v13825_v48 = vpop.permute.xlu1 %9731  ;;  %v13827_v19 = vpop.permute.xlu0 %9756  ;;  %2788 = vmatpush.msra.mxu1 %v2381_v49  ;;  %2838 = vmatpush.msrb.mxu2 %v2203_v51  ;;  %v9503_v49 = vunpack.i.l.bf16 %v13607_v53  ;;  %v20532_v51 = vunpack.i.h.bf16 %v13665_v57  ;;  %v2293_v59 = vsel %vm476_vm2, %v20530_v29, %v9614_v4  ;;  %v2115_v0 = vsel %vm298_vm4, %v9504_v5, %v20926_v8 }
 0x4a5   :  { %20924 = vst [vmem:[#allocation47_spill] sm:$0xff] %v13827_v19  ;;  %v9449_v19 = vunpack.i.h.bf16 %v13581_v14  ;;  %v9448_v53 = vunpack.i.l.bf16 %v13581_v14  ;;  %v20927_v4 = vunpack.i.l.bf16 %v13629_v35  ;;  %v9394_v8 = vunpack.i.h.bf16 %v13535_v6 }
 0x4a6   :  { %2789 = vmatpush.msra.mxu1 %v2380_v41  ;;  %2839 = vmatpush.msrb.mxu2 %v2202_v36  ;;  %v20534_v36 = vunpack.i.l.bf16 %v13665_v57  ;;  %v2292_v41 = vsel %vm476_vm2, %v20531_v33, %v9613_v32  ;;  %v2205_v14 = vsel %vm387_vm3, %v20532_v51, %v9559_v43 }
 0x4a7   :  { %v2114_v29 = vsel %vm298_vm4, %v9503_v49, %v20927_v4  ;;  %v2027_v32 = vsel %vm209_vm5, %v9449_v19, %v20533_v10 }
 0x4a8   :  { %2790 = vmatpush.msra.mxu1 %v2293_v59  ;;  %2840 = vmatpush.msrb.mxu2 %v2115_v0  ;;  %v20545_v59 = vunpack.i.l.bf16 %v13561_v61  ;;  %v20542_v0 = vunpack.i.h.bf16 %v13517_v24  ;;  %v2204_v43 = vsel %vm387_vm3, %v20534_v36, %v9558_v17 }
 0x4aa   :  { %2791 = vmatpush.msra.mxu1 %v2292_v41  ;;  %2841 = vmatpush.msrb.mxu2 %v2114_v29  ;;  %v9393_v29 = vunpack.i.l.bf16 %v13535_v6  ;;  %v20539_v41 = vunpack.i.h.bf16 %v13597_v60  ;;  %v2026_v51 = vsel %vm209_vm5, %v9448_v53, %v20545_v59  ;;  %v20537_v6 = vunpack.i.l.bf16 %v13597_v60 }
 0x4ab   :  { %v1939_v17 = vsel %vm120_vm6, %v9394_v8, %v20542_v0  ;;  %v9688_v59 = vunpack.i.l.bf16 %v13751_v47 }
 0x4ac   :  { %v13875_v33 = vpop.permute.xlu1 %9746  ;;  %2792 = vmatpush.msra.mxu1 %v2205_v14  ;;  %2842 = vmatpush.msrb.mxu2 %v2027_v32  ;;  %v13879_v4 = vpop.permute.xlu0 %9771  ;;  %v20540_v14 = vunpack.i.l.bf16 %v13517_v24  ;;  %v2117_v10 = vsel %vm298_vm4, %v20539_v41, %v9504_v5  ;;  %v20535_v5 = vunpack.i.l.bf16 %v13559_v45 }
 0x4ad   :  { %v13891_v32 = vpop.permute.xlu2 %9766 }
 0x4ae   :  { %2793 = vmatpush.msra.mxu1 %v2204_v43  ;;  %2843 = vmatpush.msrb.mxu2 %v2026_v51  ;;  %v20536_v51 = vunpack.i.h.bf16 %v13559_v45  ;;  %v2116_v43 = vsel %vm298_vm4, %v20537_v6, %v9503_v49  ;;  %v1938_v36 = vsel %vm120_vm6, %v9393_v29, %v20540_v14  ;;  %v20538_v49 = vunpack.i.h.bf16 %v13509_v20 }
 0x4b0   :  { %2794 = vmatpush.msra.mxu1 %v2117_v10  ;;  %2844 = vmatpush.msrb.mxu2 %v1939_v17  ;;  %v2029_v10 = vsel %vm209_vm5, %v20536_v51, %v9449_v19  ;;  %v20541_v19 = vunpack.i.l.bf16 %v13509_v20 }
 0x4b2   :  { %2795 = vmatpush.msra.mxu1 %v2116_v43  ;;  %2845 = vmatpush.msrb.mxu2 %v1938_v36  ;;  %v2028_v43 = vsel %vm209_vm5, %v20535_v5, %v9448_v53  ;;  %v13927_v36 = vld [vmem:[%s20403_s2 + $0x20] sm:$0xff] }
 0x4b4   :  { %v13915_v17 = vpop.permute.xlu1 %9761  ;;  %2796 = vmatpush.msra.mxu1 %v2029_v10  ;;  %2846 = vmatpush.msrb.mxu2 %v13307_v16  ;;  %v13930_v10 = vpop.permute.xlu0 %9786  ;;  %v1941_v16 = vsel %vm120_vm6, %v20538_v49, %v9394_v8  ;;  %v20543_v8 = vunpack.i.h.bf16 %v13879_v4 }
 0x4b5   :  { %v9782_v53 = vpop.permute.xlu2 %9781  ;;  %v9788_v51 = vunpack.i.l.bf16 %v13930_v10 }
 0x4b6   :  { %2797 = vmatpush.msra.mxu1 %v2028_v43  ;;  %2847 = vmatpush.msrb.mxu2 %v13302_v15  ;;  %v1940_v15 = vsel %vm120_vm6, %v20541_v19, %v9393_v29  ;;  %v9789_v43 = vunpack.i.h.bf16 %v13930_v10  ;;  %v9784_v5 = vunpack.i.h.bf16 %v9782_v53  ;;  %v9783_v14 = vunpack.i.l.bf16 %v9782_v53 }
 0x4b7   :  { %2848 = vmatmul.f32.vlgmr.msrb.gmra.mxu2 %v13927_v36  ;;  %v20544_v19 = vunpack.i.l.bf16 %v13879_v4  ;;  %v20547_v53 = vunpack.i.l.bf16 %v13783_v37 }
 0x4b8   :  { %2798 = vmatpush.msra.mxu1 %v1941_v16  ;;  %v20546_v16 = vunpack.i.h.bf16 %v13783_v37  ;;  %v2553_v29 = vsel %vm743_vm7, %v9784_v5, %v9789_v43  ;;  %v2552_v0 = vsel %vm743_vm7, %v9783_v14, %v9788_v51 }
 0x4ba   :  { %2799 = vmatpush.msra.mxu1 %v1940_v15  ;;  %v9734_v15 = vunpack.i.h.bf16 %v13825_v48 }
 0x4bc   :  { %v9777_v6 = vpop.permute.xlu1 %9776  ;;  %2800 = vmatpush.msra.mxu1 %v13321_v63 }
 0x4bd   :  { %v9779_v49 = vunpack.i.h.bf16 %v9777_v6  ;;  %v9778_v41 = vunpack.i.l.bf16 %v9777_v6 }
 0x4be   :  { %2801 = vmatpush.msra.mxu1 %v13310_v44  ;;  %v9739_v44 = vunpack.i.h.bf16 %v13774_v55 }
 0x4bf   :  { %v2557_v63 = vsel %vm743_vm7, %v20543_v8, %v9779_v49  ;;  %v2555_v6 = vsel %vm743_vm7, %v9779_v49, %v9784_v5  ;;  %v9733_v8 = vunpack.i.l.bf16 %v13825_v48  ;;  %v2556_v5 = vsel %vm743_vm7, %v20544_v19, %v9778_v41  ;;  %2802 = vmatmul.f32.vlgmr.msra.gmra.mxu1 %v13927_v36 }
 0x4c0   :  { %2915 = vmatpush.msrb.mxu1 %v2553_v29  ;;  %2823 = vmatpush.msrb.mxu0 %v2557_v63  ;;  %v13968_v29 = vld [vmem:[%s20403_s2 + $0x30] sm:$0xff]  ;;  %v9689_v49 = vunpack.i.h.bf16 %v13751_v47  ;;  %v9738_v63 = vunpack.i.l.bf16 %v13774_v55  ;;  %v2461_v48 = vsel %vm654_vm0, %v9739_v44, %v20546_v16  ;;  %v9684_v19 = vunpack.i.h.bf16 %v13741_v46 }
 0x4c1   :  { %2869 = vmatpush.msra.mxu3 %v2555_v6  ;;  %2851 = vmatmul.f32.gmra.mxu2 %v13968_v29  ;;  %v2554_v6 = vsel %vm743_vm7, %v9778_v41, %v9783_v14  ;;  %v20928_v55 = vunpack.i.h.bf16 %v13757_v3  ;;  %v2463_v41 = vsel %vm654_vm0, %v9734_v15, %v9739_v44  ;;  %v9679_v14 = vunpack.i.h.bf16 %v13737_v31 }
 0x4c2   :  { %2916 = vmatpush.msrb.mxu1 %v2552_v0  ;;  %2824 = vmatpush.msrb.mxu0 %v2556_v5  ;;  %v13988_v0 = vld [vmem:[%s20403_s2 + $0x28] sm:$0xff]  ;;  %v9459_v47 = vunpack.i.h.bf16 %v13571_v26 }
 0x4c3   :  { %2870 = vmatpush.msra.mxu3 %v2554_v6  ;;  %v2465_v5 = vsel %vm654_vm0, %v20928_v55, %v9734_v15  ;;  %v2460_v6 = vsel %vm654_vm0, %v9738_v63, %v20547_v53  ;;  %v20929_v15 = vunpack.i.l.bf16 %v13757_v3  ;;  %v9629_v53 = vunpack.i.h.bf16 %v13727_v30  ;;  %8811 = vmatmul.msk.f32.vlgmr.msrb.gmra.mxu0 %vm986_vm8, %v13988_v0 }
 0x4c4   :  { %2970 = vmatpush.msra.mxu1 %v2461_v48  ;;  %2878 = vmatpush.msra.mxu0 %v2465_v5  ;;  %v13999_v16 = vpop.permute.xlu1 %9791  ;;  %v9683_v48 = vunpack.i.l.bf16 %v13741_v46  ;;  %v2462_v5 = vsel %vm654_vm0, %v9733_v8, %v9738_v63  ;;  %v2373_v3 = vsel %vm565_vm1, %v9684_v19, %v9689_v49 }
 0x4c5   :  { %2924 = vmatpush.msrb.mxu3 %v2463_v41  ;;  %v20548_v55 = vunpack.i.h.bf16 %v13999_v16  ;;  %v2464_v44 = vsel %vm654_vm0, %v20929_v15, %v9733_v8  ;;  %v9624_v41 = vunpack.i.h.bf16 %v13704_v11  ;;  %v9793_v46 = vunpack.i.l.bf16 %v13999_v16 }
 0x4c6   :  { %2971 = vmatpush.msra.mxu1 %v2460_v6  ;;  %8813 = vmatmul.msk.f32.vlgmr.msra.gmra.mxu3 %vm986_vm8, %v13988_v0  ;;  %v9678_v6 = vunpack.i.l.bf16 %v13737_v31  ;;  %v20930_v8 = vunpack.i.h.bf16 %v13745_v13  ;;  %v2375_v15 = vsel %vm565_vm1, %v9679_v14, %v9684_v19  ;;  %v9634_v31 = vunpack.i.h.bf16 %v13706_v50 }
 0x4c7   :  { %2879 = vmatpush.msra.mxu0 %v2464_v44  ;;  %2925 = vmatpush.msrb.mxu3 %v2462_v5  ;;  %v2551_v44 = vsel %vm743_vm7, %v9789_v43, %v20548_v55  ;;  %v9749_v5 = vunpack.i.h.bf16 %v13875_v33  ;;  %v2372_v19 = vsel %vm565_vm1, %v9683_v48, %v9688_v59  ;;  %v20931_v43 = vunpack.i.l.bf16 %v13745_v13 }
 0x4c8   :  { %2972 = vmatpush.msra.mxu1 %v2373_v3  ;;  %v2377_v63 = vsel %vm565_vm1, %v20930_v8, %v9679_v14  ;;  %v9623_v14 = vunpack.i.l.bf16 %v13704_v11  ;;  %v9628_v3 = vunpack.i.l.bf16 %v13727_v30  ;;  %2961 = vmatpush.msra.mxu2 %v2551_v44  ;;  %v9748_v55 = vunpack.i.l.bf16 %v13875_v33 }
 0x4c9   :  { %2880 = vmatpush.msra.mxu0 %v2377_v63  ;;  %2926 = vmatpush.msrb.mxu3 %v2375_v15  ;;  %v2376_v8 = vsel %vm565_vm1, %v20931_v43, %v9678_v6  ;;  %v2374_v63 = vsel %vm565_vm1, %v9678_v6, %v9683_v48  ;;  %v9579_v15 = vunpack.i.h.bf16 %v13667_v21  ;;  %v2550_v11 = vsel %vm743_vm7, %v9788_v51, %v9793_v46 }
 0x4ca   :  { %2973 = vmatpush.msra.mxu1 %v2372_v19  ;;  %v2285_v30 = vsel %vm476_vm2, %v9629_v53, %v9634_v31  ;;  %v9569_v13 = vunpack.i.h.bf16 %v13677_v56  ;;  %v9633_v48 = vunpack.i.l.bf16 %v13706_v50  ;;  %2962 = vmatpush.msra.mxu2 %v2550_v11  ;;  %v20932_v6 = vunpack.i.h.bf16 %v13693_v34 }
 0x4cb   :  { %2881 = vmatpush.msra.mxu0 %v2376_v8  ;;  %2927 = vmatpush.msrb.mxu3 %v2374_v63  ;;  %v2287_v10 = vsel %vm476_vm2, %v9624_v41, %v9629_v53  ;;  %v9574_v51 = vunpack.i.h.bf16 %v13657_v12  ;;  %v20933_v19 = vunpack.i.h.bf16 %v13783_v37  ;;  %v9578_v8 = vunpack.i.l.bf16 %v13667_v21 }
 0x4cc   :  { %2974 = vmatpush.msra.mxu1 %v2285_v30  ;;  %v2289_v44 = vsel %vm476_vm2, %v20932_v6, %v9624_v41  ;;  %v9568_v63 = vunpack.i.l.bf16 %v13677_v56  ;;  %v2284_v53 = vsel %vm476_vm2, %v9628_v3, %v9633_v48  ;;  %v20934_v41 = vunpack.i.l.bf16 %v13693_v34  ;;  %8817 = vmatmul.msk.f32.vlgmr.msra.gmra.mxu2 %vm986_vm8, %v13988_v0 }
 0x4cd   :  { %2882 = vmatpush.msra.mxu0 %v2289_v44  ;;  %2928 = vmatpush.msrb.mxu3 %v2287_v10  ;;  %v2459_v43 = vsel %vm654_vm0, %v20933_v19, %v9749_v5  ;;  %v9519_v30 = vunpack.i.h.bf16 %v13619_v7  ;;  %v9694_v6 = vunpack.i.h.bf16 %v13743_v52  ;;  %v2286_v56 = vsel %vm476_vm2, %v9623_v14, %v9628_v3 }
 0x4ce   :  { %3016 = vmatpush.msrb.mxu2 %v2459_v43  ;;  %2805 = vmatmul.f32.gmra.mxu1 %v13968_v29  ;;  %v2288_v11 = vsel %vm476_vm2, %v20934_v41, %v9623_v14  ;;  %v20935_v44 = vunpack.i.l.bf16 %v13783_v37  ;;  %v9524_v34 = vunpack.i.h.bf16 %v13641_v38  ;;  %v9573_v19 = vunpack.i.l.bf16 %v13657_v12 }
 0x4cf   :  { %2975 = vmatpush.msra.mxu1 %v2284_v53  ;;  %2883 = vmatpush.msra.mxu0 %v2288_v11  ;;  %v2197_v43 = vsel %vm387_vm3, %v9574_v51, %v9579_v15  ;;  %v20936_v14 = vunpack.i.h.bf16 %v13655_v42  ;;  %v9639_v37 = vunpack.i.h.bf16 %v13717_v27  ;;  %v9693_v53 = vunpack.i.l.bf16 %v13743_v52 }
 0x4d0   :  { %v2458_v10 = vsel %vm654_vm0, %v20935_v44, %v9748_v55  ;;  %2929 = vmatpush.msrb.mxu3 %v2286_v56  ;;  %v2199_v12 = vsel %vm387_vm3, %v9569_v13, %v9574_v51  ;;  %v2371_v41 = vsel %vm565_vm1, %v9689_v49, %v9694_v6  ;;  %v9514_v11 = vunpack.i.h.bf16 %v13609_v1 }
 0x4d1   :  { %3017 = vmatpush.msrb.mxu2 %v2458_v10  ;;  %v2201_v3 = vsel %vm387_vm3, %v20936_v14, %v9569_v13  ;;  %2976 = vmatpush.msra.mxu1 %v2197_v43  ;;  %v2196_v56 = vsel %vm387_vm3, %v9573_v19, %v9578_v8  ;;  %v20937_v44 = vunpack.i.l.bf16 %v13655_v42  ;;  %v9518_v51 = vunpack.i.l.bf16 %v13619_v7 }
 0x4d2   :  { %2884 = vmatpush.msra.mxu0 %v2201_v3  ;;  %2930 = vmatpush.msrb.mxu3 %v2199_v12  ;;  %v9523_v10 = vunpack.i.l.bf16 %v13641_v38  ;;  %v2198_v49 = vsel %vm387_vm3, %v9568_v63, %v9573_v19  ;;  %v2370_v43 = vsel %vm565_vm1, %v9688_v59, %v9693_v53  ;;  %v9513_v42 = vunpack.i.l.bf16 %v13609_v1  ;;  %v20946_v38 = vld [vmem:[#allocation13_spill] sm:$0xff] }
 0x4d3   :  { %3018 = vmatpush.msrb.mxu2 %v2371_v41  ;;  %v2200_v13 = vsel %vm387_vm3, %v20937_v44, %v9568_v63  ;;  %2977 = vmatpush.msra.mxu1 %v2196_v56  ;;  %v9638_v14 = vunpack.i.l.bf16 %v13717_v27  ;;  %v2109_v7 = vsel %vm298_vm4, %v9519_v30, %v9524_v34  ;;  %v20938_v63 = vunpack.i.h.bf16 %v13629_v35 }
 0x4d4   :  { %2885 = vmatpush.msra.mxu0 %v2200_v13  ;;  %2931 = vmatpush.msrb.mxu3 %v2198_v49  ;;  %v9464_v59 = vunpack.i.h.bf16 %v13593_v2  ;;  %v2111_v1 = vsel %vm298_vm4, %v9514_v11, %v9519_v30  ;;  %v2283_v3 = vsel %vm476_vm2, %v9634_v31, %v9639_v37  ;;  %v9458_v12 = vunpack.i.l.bf16 %v13571_v26  ;;  %v14167_v30 = vld [vmem:[%s20403_s2 + $0x38] sm:$0xff] }
 0x4d5   :  { %3019 = vmatpush.msrb.mxu2 %v2370_v43  ;;  %v2113_v19 = vsel %vm298_vm4, %v20938_v63, %v9514_v11  ;;  %2978 = vmatpush.msra.mxu1 %v2109_v7  ;;  %v9584_v41 = vunpack.i.h.bf16 %v13689_v9  ;;  %v20939_v56 = vunpack.i.l.bf16 %v13629_v35  ;;  %v9469_v11 = vunpack.i.h.bf16 %v13573_v25 }
 0x4d6   :  { %2886 = vmatpush.msra.mxu0 %v2113_v19  ;;  %2932 = vmatpush.msrb.mxu3 %v2111_v1  ;;  %v9463_v31 = vunpack.i.l.bf16 %v13593_v2  ;;  %v2108_v26 = vsel %vm298_vm4, %v9518_v51, %v9523_v10  ;;  %v2110_v35 = vsel %vm298_vm4, %v9513_v42, %v9518_v51  ;;  %v9583_v13 = vunpack.i.l.bf16 %v13689_v9  ;;  %v20969_v9 = vld [vmem:[#allocation14_spill] sm:$0xff] }
 0x4d7   :  { %3020 = vmatpush.msrb.mxu2 %v2283_v3  ;;  %v2112_v44 = vsel %vm298_vm4, %v20939_v56, %v9513_v42  ;;  %8815 = vmatmul.msk.f32.vlgmr.msrb.gmra.mxu1 %vm986_vm8, %v13988_v0  ;;  %v2282_v2 = vsel %vm476_vm2, %v9633_v48, %v9638_v14  ;;  %v9414_v49 = vunpack.i.h.bf16 %v13533_v40  ;;  %v9468_v43 = vunpack.i.l.bf16 %v13573_v25 }
 0x4d8   :  { %2887 = vmatpush.msra.mxu0 %v2112_v44  ;;  %2979 = vmatpush.msra.mxu1 %v2108_v26  ;;  %v2021_v51 = vsel %vm209_vm5, %v9464_v59, %v9469_v11  ;;  %v20940_v42 = vunpack.i.h.bf16 %v13561_v61  ;;  %v9404_v48 = vunpack.i.h.bf16 %v13547_v62  ;;  %v2023_v7 = vsel %vm209_vm5, %v9459_v47, %v9464_v59 }
 0x4d9   :  { %2933 = vmatpush.msrb.mxu3 %v2110_v35  ;;  %3021 = vmatpush.msrb.mxu2 %v2282_v2  ;;  %v2195_v63 = vsel %vm387_vm3, %v9579_v15, %v9584_v41  ;;  %v9409_v19 = vunpack.i.h.bf16 %v13525_v58  ;;  %v2020_v1 = vsel %vm209_vm5, %v9463_v31, %v9468_v43  ;;  %v20941_v3 = vunpack.i.l.bf16 %v13561_v61 }
 0x4da   :  { %8814 = vmatmul.msk.f32.gmra.mxu3 %vm986_vm8, %v14167_v30  ;;  %v2025_v50 = vsel %vm209_vm5, %v20940_v42, %v9459_v47  ;;  %2980 = vmatpush.msra.mxu1 %v2021_v51  ;;  %v9413_v59 = vunpack.i.l.bf16 %v13533_v40  ;;  %v9403_v56 = vunpack.i.l.bf16 %v13547_v62  ;;  %v2022_v15 = vsel %vm209_vm5, %v9458_v12, %v9463_v31  ;;  %v14240_v31 = vpop.permute.xlu1 %9806 }
 0x4db   :  { %2888 = vmatpush.msra.mxu0 %v2025_v50  ;;  %2934 = vmatpush.msrb.mxu3 %v2023_v7  ;;  %v2024_v47 = vsel %vm209_vm5, %v20941_v3, %v9458_v12  ;;  %v2194_v44 = vsel %vm387_vm3, %v9578_v8, %v9583_v13  ;;  %v9529_v61 = vunpack.i.h.bf16 %v13621_v18  ;;  %v1933_v62 = vsel %vm120_vm6, %v9409_v19, %v9414_v49  ;;  %v20944_v3 = vld [vmem:[#allocation16_spill] sm:$0xff] }
 0x4dc   :  { %3022 = vmatpush.msrb.mxu2 %v2195_v63  ;;  %2981 = vmatpush.msra.mxu1 %v2020_v1  ;;  %v9408_v26 = vunpack.i.l.bf16 %v13525_v58  ;;  %v20942_v21 = vunpack.i.h.bf16 %v13517_v24  ;;  %v1935_v12 = vsel %vm120_vm6, %v9404_v48, %v9409_v19  ;;  %v9474_v35 = vunpack.i.h.bf16 %v13583_v23  ;;  %v9797_v19 = vpop.permute.xlu2 %9796 }
 0x4dd   :  { %2889 = vmatpush.msra.mxu0 %v2024_v47  ;;  %2935 = vmatpush.msrb.mxu3 %v2022_v15  ;;  %v2107_v58 = vsel %vm298_vm4, %v9524_v34, %v9529_v61  ;;  %v9528_v2 = vunpack.i.l.bf16 %v13621_v18  ;;  %v20943_v42 = vunpack.i.l.bf16 %v13517_v24  ;;  %v9473_v7 = vunpack.i.l.bf16 %v13583_v23  ;;  %v20945_v47 = vld [vmem:[#allocation24_spill] sm:$0xff] }
 0x4de   :  { %3023 = vmatpush.msrb.mxu2 %v2194_v44  ;;  %8812 = vmatmul.msk.f32.gmra.mxu0 %vm986_vm8, %v14167_v30  ;;  %v1937_v8 = vsel %vm120_vm6, %v20942_v21, %v9404_v48  ;;  %v1932_v51 = vsel %vm120_vm6, %v9408_v26, %v9413_v59  ;;  %v9802_v48 = vpop.permute.xlu0 %9801  ;;  %v1934_v34 = vsel %vm120_vm6, %v9403_v56, %v9408_v26  ;;  %v9809_v63 = vunpack.i.h.bf16 %v14240_v31  ;;  %v20947_v44 = vld [vmem:[#allocation28_spill] sm:$0xff]  ;;  %v20949_v26 = vld [vmem:[#allocation22_spill] sm:$0xff] }
 0x4df   :  { %2982 = vmatpush.msra.mxu1 %v1933_v62  ;;  %2890 = vmatpush.msra.mxu0 %v1937_v8  ;;  %v1936_v50 = vsel %vm120_vm6, %v20943_v42, %v9403_v56  ;;  %v2106_v24 = vsel %vm298_vm4, %v9523_v10, %v9528_v2  ;;  %v9804_v1 = vunpack.i.h.bf16 %v9802_v48  ;;  %v2019_v56 = vsel %vm209_vm5, %v9469_v11, %v9474_v35  ;;  %v20948_v62 = vld [vmem:[#allocation20_spill] sm:$0xff] }
 0x4e0   :  { %2936 = vmatpush.msrb.mxu3 %v1935_v12  ;;  %3024 = vmatpush.msrb.mxu2 %v2107_v58  ;;  %v9419_v15 = vunpack.i.h.bf16 %v20946_v38  ;;  %v9808_v10 = vunpack.i.l.bf16 %v14240_v31  ;;  %v2018_v21 = vsel %vm209_vm5, %v9468_v43, %v9473_v7  ;;  %v9764_v8 = vunpack.i.h.bf16 %v13915_v17 }
 0x4e1   :  { %8816 = vmatmul.msk.f32.gmra.mxu1 %vm986_vm8, %v14167_v30  ;;  %2891 = vmatpush.msra.mxu0 %v1936_v50  ;;  %v2545_v11 = vsel %vm743_vm7, %v9804_v1, %v9809_v63  ;;  %v9803_v12 = vunpack.i.l.bf16 %v9802_v48  ;;  %v9798_v58 = vunpack.i.l.bf16 %v9797_v19  ;;  %v20950_v25 = vunpack.i.h.bf16 %v13999_v16  ;;  %v20951_v50 = vld [vmem:[#allocation47_spill] sm:$0xff] }
 0x4e2   :  { %2983 = vmatpush.msra.mxu1 %v1932_v51  ;;  %2937 = vmatpush.msrb.mxu3 %v1934_v34  ;;  %v9418_v42 = vunpack.i.l.bf16 %v20946_v38  ;;  %v9759_v34 = vunpack.i.h.bf16 %v20951_v50  ;;  %v1931_v48 = vsel %vm120_vm6, %v9414_v49, %v9419_v15  ;;  %v9478_v18 = vunpack.i.l.bf16 %v20969_v9  ;;  %v20977_v38 = vld [vmem:[#allocation23_spill] sm:$0xff] }
 0x4e3   :  { %3025 = vmatpush.msrb.mxu2 %v2106_v24  ;;  %2892 = vmatpush.msra.mxu0 %v20944_v3  ;;  %v2544_v24 = vsel %vm743_vm7, %v9803_v12, %v9808_v10  ;;  %v2548_v3 = vsel %vm743_vm7, %v9793_v46, %v9798_v58  ;;  %v2546_v49 = vsel %vm743_vm7, %v9798_v58, %v9803_v12 }
 0x4e4   :  { %2984 = vmatpush.msra.mxu1 %v13400_v39  ;;  %2938 = vmatpush.msrb.mxu3 %v20945_v47  ;;  %v9799_v39 = vunpack.i.h.bf16 %v9797_v19  ;;  %v9754_v19 = vunpack.i.h.bf16 %v13831_v28  ;;  %v9758_v47 = vunpack.i.l.bf16 %v20951_v50  ;;  %v14349_v58 = vpop.permute.xlu2 %9811  ;;  %v20956_v50 = vld [vmem:[#allocation38_spill] sm:$0xff] }
 0x4e5   :  { %3026 = vmatpush.msrb.mxu2 %v2019_v56  ;;  %2893 = vmatpush.msra.mxu0 %v20948_v62  ;;  %v2453_v56 = vsel %vm654_vm0, %v9759_v34, %v9764_v8  ;;  %v20953_v62 = vld [vmem:[#allocation45_spill] sm:$0xff] }
 0x4e6   :  { %2985 = vmatpush.msra.mxu1 %v20947_v44  ;;  %2939 = vmatpush.msrb.mxu3 %v20949_v26  ;;  %v2549_v43 = vsel %vm743_vm7, %v20950_v25, %v9799_v39  ;;  %v2547_v51 = vsel %vm743_vm7, %v9799_v39, %v9804_v1  ;;  %v9763_v1 = vunpack.i.l.bf16 %v13915_v17  ;;  %v20952_v44 = vld [vmem:[#allocation42_spill] sm:$0xff]  ;;  %v9704_v16 = vunpack.i.h.bf16 %v20953_v62  ;;  %v20965_v17 = vld [vmem:[#allocation32_spill] sm:$0xff] }
 0x4e7   :  { %3027 = vmatpush.msrb.mxu2 %v2018_v21  ;;  %2894 = vmatmul.f32.vlgmr.msra.gmra.mxu0 %v13927_v36  ;;  %v9699_v39 = vunpack.i.h.bf16 %v20952_v44  ;;  %v9753_v26 = vunpack.i.l.bf16 %v13831_v28  ;;  %v2457_v46 = vsel %vm654_vm0, %v9749_v5, %v9754_v19  ;;  %v1930_v21 = vsel %vm120_vm6, %v9413_v59, %v9418_v42 }
 0x4e8   :  { %3099 = vmatpush.msrb.mxu1 %v2545_v11  ;;  %2940 = vmatmul.f32.vlgmr.msrb.gmra.mxu3 %v13927_v36  ;;  %v2455_v28 = vsel %vm654_vm0, %v9754_v19, %v9759_v34  ;;  %v20954_v11 = vld [vmem:[#allocation43_spill] sm:$0xff]  ;;  %v2452_v5 = vsel %vm654_vm0, %v9758_v47, %v9763_v1  ;;  %v9703_v59 = vunpack.i.l.bf16 %v20953_v62  ;;  %v9654_v34 = vunpack.i.h.bf16 %v20956_v50 }
 0x4e9   :  { %3007 = vmatpush.msrb.mxu0 %v2549_v43  ;;  %3053 = vmatpush.msra.mxu3 %v2547_v51  ;;  %v9709_v12 = vunpack.i.h.bf16 %v20954_v11  ;;  %v2456_v40 = vsel %vm654_vm0, %v9748_v55, %v9753_v26  ;;  %v2454_v25 = vsel %vm654_vm0, %v9753_v26, %v9758_v47  ;;  %v9698_v43 = vunpack.i.l.bf16 %v20952_v44  ;;  %v20955_v51 = vld [vmem:[#allocation27_spill] sm:$0xff] }
 0x4ea   :  { %3028 = vmatpush.msrb.mxu2 %v1931_v48  ;;  %3100 = vmatpush.msrb.mxu1 %v2544_v24  ;;  %v2369_v55 = vsel %vm565_vm1, %v9694_v6, %v9699_v39  ;;  %v9708_v48 = vunpack.i.l.bf16 %v20954_v11  ;;  %v9814_v24 = vunpack.i.h.bf16 %v14349_v58  ;;  %v2367_v19 = vsel %vm565_vm1, %v9699_v39, %v9704_v16 }
 0x4eb   :  { %2986 = vmatmul.f32.vlgmr.msra.gmra.mxu1 %v13927_v36  ;;  %3008 = vmatpush.msrb.mxu0 %v2548_v3  ;;  %v2365_v33 = vsel %vm565_vm1, %v9704_v16, %v9709_v12  ;;  %v20957_v3 = vld [vmem:[#allocation40_spill] sm:$0xff]  ;;  %v9813_v6 = vunpack.i.l.bf16 %v14349_v58  ;;  %v9653_v16 = vunpack.i.l.bf16 %v20956_v50 }
 0x4ec   :  { %3054 = vmatpush.msra.mxu3 %v2546_v49  ;;  %3154 = vmatpush.msra.mxu1 %v2453_v56  ;;  %v9644_v47 = vunpack.i.h.bf16 %v20957_v3  ;;  %v20958_v49 = vld [vmem:[#allocation29_spill] sm:$0xff]  ;;  %v2543_v39 = vsel %vm743_vm7, %v9809_v63, %v9814_v24  ;;  %v2364_v62 = vsel %vm565_vm1, %v9703_v59, %v9708_v48  ;;  %v9643_v26 = vunpack.i.l.bf16 %v20957_v3 }
 0x4ed   :  { %8818 = vmatmul.msk.f32.gmra.mxu2 %vm986_vm8, %v14167_v30  ;;  %3062 = vmatpush.msra.mxu0 %v2457_v46  ;;  %v20959_v56 = vld [vmem:[#allocation37_spill] sm:$0xff]  ;;  %v2368_v46 = vsel %vm565_vm1, %v9693_v53, %v9698_v43  ;;  %v9769_v63 = vunpack.i.h.bf16 %v13891_v32  ;;  %v20960_v53 = vld [vmem:[#allocation34_spill] sm:$0xff] }
 0x4ee   :  { %3029 = vmatpush.msrb.mxu2 %v1930_v21  ;;  %3108 = vmatpush.msrb.mxu3 %v2455_v28  ;;  %v9649_v44 = vunpack.i.h.bf16 %v20959_v56  ;;  %v2366_v21 = vsel %vm565_vm1, %v9698_v43, %v9703_v59  ;;  %v2542_v28 = vsel %vm743_vm7, %v9808_v10, %v9813_v6  ;;  %v2281_v31 = vsel %vm476_vm2, %v9639_v37, %v9644_v47  ;;  %v20962_v43 = vld [vmem:[#allocation44_spill] sm:$0xff] }
 0x4ef   :  { %3155 = vmatpush.msra.mxu1 %v2452_v5  ;;  %3063 = vmatpush.msra.mxu0 %v2456_v40  ;;  %v9594_v5 = vunpack.i.h.bf16 %v20960_v53  ;;  %v20961_v40 = vld [vmem:[#allocation36_spill] sm:$0xff]  ;;  %v9714_v10 = vunpack.i.h.bf16 %v20962_v43  ;;  %v9593_v27 = vunpack.i.l.bf16 %v20960_v53  ;;  %v20966_v53 = vld [vmem:[#allocation41_spill] sm:$0xff] }
 0x4f0   :  { %3030 = vmatpush.msrb.mxu2 %v20955_v51  ;;  %3109 = vmatpush.msrb.mxu3 %v2454_v25  ;;  %v2277_v52 = vsel %vm476_vm2, %v9649_v44, %v9654_v34  ;;  %v9599_v59 = vunpack.i.h.bf16 %v20961_v40  ;;  %v9648_v25 = vunpack.i.l.bf16 %v20959_v56  ;;  %v9768_v51 = vunpack.i.l.bf16 %v13891_v32 }
 0x4f1   :  { %3156 = vmatpush.msra.mxu1 %v2365_v33  ;;  %3064 = vmatpush.msra.mxu0 %v2369_v55  ;;  %v2279_v33 = vsel %vm476_vm2, %v9644_v47, %v9649_v44  ;;  %v2451_v55 = vsel %vm654_vm0, %v9764_v8, %v9769_v63  ;;  %v2280_v47 = vsel %vm476_vm2, %v9638_v14, %v9643_v26  ;;  %v9598_v44 = vunpack.i.l.bf16 %v20961_v40  ;;  %v9822_v40 = vpop.permute.xlu1 %9821 }
 0x4f2   :  { %3031 = vmatpush.msrb.mxu2 %v20958_v49  ;;  %3110 = vmatpush.msrb.mxu3 %v2367_v19  ;;  %v20963_v19 = vld [vmem:[#allocation33_spill] sm:$0xff]  ;;  %v2276_v37 = vsel %vm476_vm2, %v9648_v25, %v9653_v16  ;;  %v2278_v8 = vsel %vm476_vm2, %v9643_v26, %v9648_v25  ;;  %v9713_v14 = vunpack.i.l.bf16 %v20962_v43  ;;  %v20967_v25 = vld [vmem:[#allocation30_spill] sm:$0xff]  ;;  %v20996_v43 = vunpack.i.h.bf16 %v13665_v57 }
 0x4f3   :  { %2897 = vmatmul.f32.gmra.mxu0 %v13968_v29  ;;  %2943 = vmatmul.f32.gmra.mxu3 %v13968_v29  ;;  %v9589_v3 = vunpack.i.h.bf16 %v20963_v19  ;;  %v20964_v49 = vld [vmem:[#allocation5_spill] sm:$0xff] }
 0x4f4   :  { %3145 = vmatpush.msra.mxu2 %v2543_v39  ;;  %3157 = vmatpush.msra.mxu1 %v2364_v62  ;;  %v9534_v56 = vunpack.i.h.bf16 %v20964_v49  ;;  %v2450_v39 = vsel %vm654_vm0, %v9763_v1, %v9768_v51  ;;  %v2189_v62 = vsel %vm387_vm3, %v9594_v5, %v9599_v59  ;;  %v9588_v1 = vunpack.i.l.bf16 %v20963_v19 }
 0x4f5   :  { %3065 = vmatpush.msra.mxu0 %v2368_v46  ;;  %3111 = vmatpush.msrb.mxu3 %v2366_v21  ;;  %v2193_v26 = vsel %vm387_vm3, %v9584_v41, %v9589_v3  ;;  %v9539_v46 = vunpack.i.h.bf16 %v20965_v17  ;;  %v2191_v21 = vsel %vm387_vm3, %v9589_v3, %v9594_v5  ;;  %v9659_v41 = vunpack.i.h.bf16 %v20966_v53 }
 0x4f6   :  { %3146 = vmatpush.msra.mxu2 %v2542_v28  ;;  %3158 = vmatpush.msra.mxu1 %v2277_v52  ;;  %v2363_v28 = vsel %vm565_vm1, %v9709_v12, %v9714_v10  ;;  %v9533_v52 = vunpack.i.l.bf16 %v20964_v49  ;;  %v2188_v12 = vsel %vm387_vm3, %v9593_v27, %v9598_v44  ;;  %v2192_v5 = vsel %vm387_vm3, %v9583_v13, %v9588_v1 }
 0x4f7   :  { %3032 = vmatmul.f32.vlgmr.msrb.gmra.mxu2 %v13927_v36  ;;  %3066 = vmatpush.msra.mxu0 %v2281_v31  ;;  %v9544_v31 = vunpack.i.h.bf16 %v20967_v25  ;;  %v9658_v3 = vunpack.i.l.bf16 %v20966_v53  ;;  %v9479_v49 = vunpack.i.h.bf16 %v20969_v9  ;;  %v9543_v13 = vunpack.i.l.bf16 %v20967_v25  ;;  %v20975_v9 = vld [vmem:[#allocation21_spill] sm:$0xff] }
 0x4f8   :  { %3112 = vmatpush.msrb.mxu3 %v2279_v33  ;;  %3200 = vmatpush.msrb.mxu2 %v2451_v55  ;;  %v9538_v33 = vunpack.i.l.bf16 %v20965_v17  ;;  %v20968_v55 = vld [vmem:[#allocation19_spill] sm:$0xff]  ;;  %v2103_v11 = vsel %vm298_vm4, %v9534_v56, %v9539_v46  ;;  %v9423_v23 = vunpack.i.l.bf16 %v20975_v9 }
 0x4f9   :  { %3159 = vmatpush.msra.mxu1 %v2276_v37  ;;  %3067 = vmatpush.msra.mxu0 %v2280_v47  ;;  %v9489_v19 = vunpack.i.h.bf16 %v20968_v55  ;;  %v2190_v37 = vsel %vm387_vm3, %v9588_v1, %v9593_v27  ;;  %v2362_v47 = vsel %vm565_vm1, %v9708_v48, %v9713_v14  ;;  %v2275_v48 = vsel %vm476_vm2, %v9654_v34, %v9659_v41  ;;  %v20970_v27 = vld [vmem:[#allocation8_spill] sm:$0xff] }
 0x4fa   :  { %3113 = vmatpush.msrb.mxu3 %v2278_v8  ;;  %3201 = vmatpush.msrb.mxu2 %v2450_v39  ;;  %v2101_v8 = vsel %vm298_vm4, %v9539_v46, %v9544_v31  ;;  %v2105_v39 = vsel %vm298_vm4, %v9529_v61, %v9534_v56  ;;  %v2100_v61 = vsel %vm298_vm4, %v9538_v33, %v9543_v13  ;;  %v9488_v1 = vunpack.i.l.bf16 %v20968_v55 }
 0x4fb   :  { %3160 = vmatpush.msra.mxu1 %v2189_v62  ;;  %3068 = vmatpush.msra.mxu0 %v2193_v26  ;;  %v9484_v62 = vunpack.i.h.bf16 %v20970_v27  ;;  %v2104_v56 = vsel %vm298_vm4, %v9528_v2, %v9533_v52  ;;  %v20971_v26 = vld [vmem:[#allocation35_spill] sm:$0xff]  ;;  %v2102_v34 = vsel %vm298_vm4, %v9533_v52, %v9538_v33  ;;  %v2274_v46 = vsel %vm476_vm2, %v9653_v16, %v9658_v3 }
 0x4fc   :  { %3114 = vmatpush.msrb.mxu3 %v2191_v21  ;;  %3202 = vmatpush.msrb.mxu2 %v2363_v28  ;;  %v9604_v17 = vunpack.i.h.bf16 %v20971_v26  ;;  %v2017_v21 = vsel %vm209_vm5, %v9474_v35, %v9479_v49  ;;  %v20972_v28 = vld [vmem:[#allocation15_spill] sm:$0xff]  ;;  %v9483_v33 = vunpack.i.l.bf16 %v20970_v27 }
 0x4fd   :  { %8819 = vmatmul.msk.f32.vlgmr.msrb.gmra.mxu0 %vm986_vm8, %v13988_v0  ;;  %8821 = vmatmul.msk.f32.vlgmr.msra.gmra.mxu3 %vm986_vm8, %v13988_v0  ;;  %v2013_v2 = vsel %vm209_vm5, %v9484_v62, %v9489_v19  ;;  %v2015_v50 = vsel %vm209_vm5, %v9479_v49, %v9484_v62  ;;  %v9434_v52 = vunpack.i.h.bf16 %v20972_v28  ;;  %v9424_v49 = vunpack.i.h.bf16 %v20975_v9 }
 0x4fe   :  { %3161 = vmatpush.msra.mxu1 %v2188_v12  ;;  %3069 = vmatpush.msra.mxu0 %v2192_v5  ;;  %v2187_v16 = vsel %vm387_vm3, %v9599_v59, %v9604_v17  ;;  %v20973_v12 = vld [vmem:[#allocation3_spill] sm:$0xff]  ;;  %v9433_v59 = vunpack.i.l.bf16 %v20972_v28  ;;  %v2014_v27 = vsel %vm209_vm5, %v9478_v18, %v9483_v33 }
 0x4ff   :  { %3115 = vmatpush.msrb.mxu3 %v2190_v37  ;;  %3203 = vmatpush.msrb.mxu2 %v2362_v47  ;;  %v9429_v35 = vunpack.i.h.bf16 %v20973_v12  ;;  %v20974_v5 = vld [vmem:[#allocation31_spill] sm:$0xff]  ;;  %v9603_v47 = vunpack.i.l.bf16 %v20971_v26  ;;  %v21000_v26 = vunpack.i.h.bf16 %v13559_v45 }
 0x500   :  { %3162 = vmatpush.msra.mxu1 %v2101_v8  ;;  %3070 = vmatpush.msra.mxu0 %v2105_v39  ;;  %v9549_v37 = vunpack.i.h.bf16 %v20974_v5  ;;  %v2012_v8 = vsel %vm209_vm5, %v9483_v33, %v9488_v1  ;;  %v2016_v39 = vsel %vm209_vm5, %v9473_v7, %v9478_v18  ;;  %v1928_v18 = vsel %vm120_vm6, %v9418_v42, %v9423_v23  ;;  %v20978_v42 = vld [vmem:[#allocation17_spill] sm:$0xff] }
 0x501   :  { %3116 = vmatpush.msrb.mxu3 %v2103_v11  ;;  %3204 = vmatpush.msrb.mxu2 %v2275_v48  ;;  %v9428_v11 = vunpack.i.l.bf16 %v20973_v12  ;;  %v9548_v48 = vunpack.i.l.bf16 %v20974_v5  ;;  %v2186_v62 = vsel %vm387_vm3, %v9598_v44, %v9603_v47  ;;  %v1925_v7 = vsel %vm120_vm6, %v9429_v35, %v9434_v52  ;;  %v20979_v12 = vld [vmem:[#allocation11_spill] sm:$0xff] }
 0x502   :  { %3163 = vmatpush.msra.mxu1 %v2100_v61  ;;  %3071 = vmatpush.msra.mxu0 %v2104_v56  ;;  %v1929_v61 = vsel %vm120_vm6, %v9419_v15, %v9424_v49  ;;  %v20976_v56 = vld [vmem:[#allocation4_spill] sm:$0xff]  ;;  %v1927_v44 = vsel %vm120_vm6, %v9424_v49, %v9429_v35  ;;  %v20981_v35 = vld [vmem:[#allocation18_spill] sm:$0xff]  ;;  %v9823_v49 = vunpack.i.l.bf16 %v9822_v40 }
 0x503   :  { %3117 = vmatpush.msrb.mxu3 %v2102_v34  ;;  %3205 = vmatpush.msrb.mxu2 %v2274_v46  ;;  %v9494_v34 = vunpack.i.h.bf16 %v20976_v56  ;;  %v2099_v46 = vsel %vm298_vm4, %v9544_v31, %v9549_v37  ;;  %v1924_v15 = vsel %vm120_vm6, %v9428_v11, %v9433_v59  ;;  %v2098_v31 = vsel %vm298_vm4, %v9543_v13, %v9548_v48  ;;  %v20980_v13 = vld [vmem:[#allocation25_spill] sm:$0xff] }
 0x504   :  { %3164 = vmatpush.msra.mxu1 %v2013_v2  ;;  %3072 = vmatpush.msra.mxu0 %v2017_v21  ;;  %v9817_v2 = vpop.permute.xlu0 %9816  ;;  %v1926_v21 = vsel %vm120_vm6, %v9423_v23, %v9428_v11 }
 0x505   :  { %3118 = vmatpush.msrb.mxu3 %v2015_v50  ;;  %3206 = vmatpush.msrb.mxu2 %v2187_v16  ;;  %v9493_v50 = vunpack.i.l.bf16 %v20976_v56  ;;  %v9824_v16 = vunpack.i.h.bf16 %v9822_v40  ;;  %v2011_v33 = vsel %vm209_vm5, %v9489_v19, %v9494_v34  ;;  %v9819_v25 = vunpack.i.h.bf16 %v9817_v2  ;;  %v21005_v56 = vld [vmem:[#allocation9_spill] sm:$0xff] }
 0x506   :  { %2989 = vmatmul.f32.gmra.mxu1 %v13968_v29  ;;  %8820 = vmatmul.msk.f32.gmra.mxu0 %vm986_vm8, %v14167_v30  ;;  %v9818_v9 = vunpack.i.l.bf16 %v9817_v2 }
 0x507   :  { %3035 = vmatmul.f32.gmra.mxu2 %v13968_v29  ;;  %8822 = vmatmul.msk.f32.gmra.mxu3 %vm986_vm8, %v14167_v30  ;;  %v2010_v19 = vsel %vm209_vm5, %v9488_v1, %v9493_v50  ;;  %v2541_v55 = vsel %vm743_vm7, %v9814_v24, %v9819_v25  ;;  %v2539_v23 = vsel %vm743_vm7, %v9819_v25, %v9824_v16 }
 0x508   :  { %3165 = vmatpush.msra.mxu1 %v2012_v8  ;;  %3073 = vmatpush.msra.mxu0 %v2016_v39  ;;  %v20982_v8 = vld [vmem:[#allocation26_spill] sm:$0xff]  ;;  %v20983_v39 = vunpack.i.h.bf16 %v13879_v4  ;;  %v2540_v40 = vsel %vm743_vm7, %v9813_v6, %v9818_v9  ;;  %v20988_v6 = vld [vmem:[#allocation7_spill] sm:$0xff] }
 0x509   :  { %3119 = vmatpush.msrb.mxu3 %v2014_v27  ;;  %3207 = vmatpush.msrb.mxu2 %v2186_v62  ;;  %v20984_v27 = vld [vmem:[#allocation6_spill] sm:$0xff] }
 0x50a   :  { %3166 = vmatpush.msra.mxu1 %v1925_v7  ;;  %3074 = vmatpush.msra.mxu0 %v1929_v61  ;;  %v2559_v11 = vsel %vm743_vm7, %v9824_v16, %v20983_v39  ;;  %v9439_v62 = vunpack.i.h.bf16 %v20984_v27  ;;  %v9438_v1 = vunpack.i.l.bf16 %v20984_v27  ;;  %v20985_v61 = vunpack.i.l.bf16 %v13879_v4  ;;  %v20986_v4 = vld [vmem:[#allocation46_spill] sm:$0xff] }
 0x50b   :  { %3120 = vmatpush.msrb.mxu3 %v1927_v44  ;;  %3208 = vmatpush.msrb.mxu2 %v2099_v46  ;;  %v2538_v44 = vsel %vm743_vm7, %v9818_v9, %v9823_v49  ;;  %v20987_v46 = vunpack.i.h.bf16 %v20986_v4 }
 0x50c   :  { %3167 = vmatpush.msra.mxu1 %v1924_v15  ;;  %3075 = vmatpush.msra.mxu0 %v1928_v18  ;;  %v1923_v7 = vsel %vm120_vm6, %v9434_v52, %v9439_v62  ;;  %v2558_v24 = vsel %vm743_vm7, %v9823_v49, %v20985_v61  ;;  %v1922_v52 = vsel %vm120_vm6, %v9433_v59, %v9438_v1  ;;  %v20989_v15 = vunpack.i.l.bf16 %v20986_v4  ;;  %v20990_v59 = vld [vmem:[#allocation10_spill] sm:$0xff]  ;;  %v20991_v18 = vld [vmem:[#allocation39_spill] sm:$0xff] }
 0x50d   :  { %3121 = vmatpush.msrb.mxu3 %v1926_v21  ;;  %3209 = vmatpush.msrb.mxu2 %v2098_v31  ;;  %v2471_v58 = vsel %vm654_vm0, %v9769_v63, %v20987_v46  ;;  %v20992_v2 = vunpack.i.h.bf16 %v20991_v18  ;;  %v20993_v32 = vunpack.i.l.bf16 %v20991_v18  ;;  %v20994_v21 = vunpack.i.h.bf16 %v13691_v22  ;;  %v8833_v46 = vld [vmem:[%s20406_s6 + $0x1] ss:$4 sm:$0xff] }
 0x50e   :  { %3168 = vmatpush.msra.mxu1 %v20977_v38  ;;  %3076 = vmatpush.msra.mxu0 %v20978_v42  ;;  %v2470_v28 = vsel %vm654_vm0, %v9768_v51, %v20989_v15  ;;  %v20995_v31 = vunpack.i.l.bf16 %v13691_v22  ;;  %v20997_v22 = vunpack.i.l.bf16 %v13665_v57  ;;  %v14782_v15 = vperm.slane %v8833_v46, 0 }
 0x50f   :  { %3122 = vmatpush.msrb.mxu3 %v20979_v12  ;;  %3210 = vmatpush.msrb.mxu2 %v2011_v33  ;;  %v2383_v63 = vsel %vm565_vm1, %v9714_v10, %v20992_v2  ;;  %v2382_v51 = vsel %vm565_vm1, %v9713_v14, %v20993_v32  ;;  %v2295_v10 = vsel %vm476_vm2, %v9659_v41, %v20994_v21  ;;  %v20998_v41 = vunpack.i.h.bf16 %v13597_v60 }
 0x510   :  { %3169 = vmatpush.msra.mxu1 %v20980_v13  ;;  %3077 = vmatpush.msra.mxu0 %v20981_v35  ;;  %v2294_v16 = vsel %vm476_vm2, %v9658_v3, %v20995_v31  ;;  %v2207_v14 = vsel %vm387_vm3, %v9604_v17, %v20996_v43  ;;  %v2206_v53 = vsel %vm387_vm3, %v9603_v47, %v20997_v22  ;;  %v20999_v17 = vunpack.i.l.bf16 %v13597_v60 }
 0x511   :  { %8823 = vmatmul.msk.f32.vlgmr.msrb.gmra.mxu1 %vm986_vm8, %v13988_v0  ;;  %3123 = vmatpush.msrb.mxu3 %v20982_v8  ;;  %v2119_v3 = vsel %vm298_vm4, %v9549_v37, %v20998_v41  ;;  %v2031_v47 = vsel %vm209_vm5, %v9494_v34, %v21000_v26  ;;  %v21001_v60 = vunpack.i.l.bf16 %v13559_v45  ;;  %v21002_v37 = vunpack.i.h.bf16 %v13509_v20  ;;  %v21004_v45 = vld [vmem:[#allocation12_spill] sm:$0xff] }
 0x512   :  { %3211 = vmatpush.msrb.mxu2 %v2010_v19  ;;  %3283 = vmatpush.msrb.mxu1 %v2559_v11  ;;  %v2118_v57 = vsel %vm298_vm4, %v9548_v48, %v20999_v17  ;;  %v21003_v34 = vunpack.i.l.bf16 %v13509_v20  ;;  %v14790_v32 = vperm.slane %v8833_v46, 2  ;;  %v14804_v22 = vperm.slane %v8833_v46, 4 }
 0x513   :  { %3078 = vmatmul.f32.vlgmr.msra.gmra.mxu0 %v13927_v36  ;;  %3124 = vmatmul.f32.vlgmr.msrb.gmra.mxu3 %v13927_v36  ;;  %v2030_v5 = vsel %vm209_vm5, %v9493_v50, %v21001_v60  ;;  %v1943_v48 = vsel %vm120_vm6, %v9439_v62, %v21002_v37  ;;  %v14814_v26 = vperm.slane %v8833_v46, 5 }
 0x514   :  { %8825 = vmatmul.msk.f32.vlgmr.msra.gmra.mxu2 %vm986_vm8, %v13988_v0  ;;  %3191 = vmatpush.msrb.mxu0 %v2541_v55  ;;  %v1942_v38 = vsel %vm120_vm6, %v9438_v1, %v21003_v34  ;;  %v14822_v34 = vperm.slane %v8833_v46, 6 }
 0x515   :  { %3237 = vmatpush.msra.mxu3 %v2539_v23  ;;  %3212 = vmatpush.msrb.mxu2 %v1923_v7 }
 0x516   :  { %3284 = vmatpush.msrb.mxu1 %v2558_v24  ;;  %3192 = vmatpush.msrb.mxu0 %v2540_v40 }
 0x517   :  { %3238 = vmatpush.msra.mxu3 %v2538_v44  ;;  %3213 = vmatpush.msrb.mxu2 %v1922_v52 }
 0x518   :  { %3246 = vmatpush.msra.mxu0 %v2471_v58 }
 0x519   :  { %3214 = vmatpush.msrb.mxu2 %v20988_v6  ;;  %8824 = vmatmul.msk.f32.gmra.mxu1 %vm986_vm8, %v14167_v30 }
 0x51a   :  { %3247 = vmatpush.msra.mxu0 %v2470_v28 }
 0x51b   :  { %3215 = vmatpush.msrb.mxu2 %v20990_v59  ;;  %3081 = vmatmul.f32.gmra.mxu0 %v13968_v29  ;;  %v14786_v59 = vperm.slane %v8833_v46, 1 }
 0x51c   :  { %3248 = vmatpush.msra.mxu0 %v2383_v63  ;;  %3127 = vmatmul.f32.gmra.mxu3 %v13968_v29 }
 0x51d   :  { %8826 = vmatmul.msk.f32.gmra.mxu2 %vm986_vm8, %v14167_v30 }
 0x51e   :  { %3249 = vmatpush.msra.mxu0 %v2382_v51 }
 0x520   :  { %3250 = vmatpush.msra.mxu0 %v2295_v10 }
 0x521   :  { %3170 = vmatmul.f32.vlgmr.msra.gmra.mxu1 %v13927_v36 }
 0x522   :  { %3251 = vmatpush.msra.mxu0 %v2294_v16  ;;  %v14798_v16 = vperm.slane %v8833_v46, 3 }
 0x523   :  { %8827 = vmatmul.msk.f32.vlgmr.msrb.gmra.mxu0 %vm986_vm8, %v13988_v0 }
 0x524   :  { %3252 = vmatpush.msra.mxu0 %v2207_v14  ;;  %8829 = vmatmul.msk.f32.vlgmr.msra.gmra.mxu3 %vm986_vm8, %v13988_v0 }
 0x525   :  { %3216 = vmatmul.f32.vlgmr.msrb.gmra.mxu2 %v13927_v36 }
 0x526   :  { %3253 = vmatpush.msra.mxu0 %v2206_v53 }
 0x528   :  { %3254 = vmatpush.msra.mxu0 %v2119_v3 }
 0x529   :  { %3173 = vmatmul.f32.gmra.mxu1 %v13968_v29 }
 0x52a   :  { %3255 = vmatpush.msra.mxu0 %v2118_v57 }
 0x52b   :  { %8828 = vmatmul.msk.f32.gmra.mxu0 %vm986_vm8, %v14167_v30 }
 0x52c   :  { %3256 = vmatpush.msra.mxu0 %v2031_v47  ;;  %8830 = vmatmul.msk.f32.gmra.mxu3 %vm986_vm8, %v14167_v30 }
 0x52d   :  { %3219 = vmatmul.f32.gmra.mxu2 %v13968_v29 }
 0x52e   :  { %3257 = vmatpush.msra.mxu0 %v2030_v5 }
 0x530   :  { %3258 = vmatpush.msra.mxu0 %v1943_v48 }
 0x531   :  { %8831 = vmatmul.msk.f32.vlgmr.msrb.gmra.mxu1 %vm986_vm8, %v13988_v0 }
 0x532   :  { %3259 = vmatpush.msra.mxu0 %v1942_v38 }
 0x534   :  { %3260 = vmatpush.msra.mxu0 %v21004_v45 }
 0x536   :  { %3261 = vmatpush.msra.mxu0 %v21005_v56 }
 0x537   :  { %3262 = vmatmul.f32.vlgmr.msra.gmra.mxu0 %v13927_v36 }
 0x539   :  { %8832 = vmatmul.msk.f32.gmra.mxu1 %vm986_vm8, %v14167_v30 }
 0x53a   :  { %v2849_v25 = vpop.f32.mrf.mxu2 }
 0x53c   :  { %v2803_v50 = vpop.f32.mrf.mxu1 }
 0x53f   :  { %3265 = vmatmul.f32.gmra.mxu0 %v13968_v29 }
 0x540   :  { %v2826_v20 = vpop.f32.mrf.mxu0 }
 0x541   :  { %v14780_v6 = vadd.f32 %v2826_v20, %v2803_v50  ;;  %v8834_v20 = vld [vmem:[%s20406_s6 + $0x21] ss:$4 sm:$0x7] }
 0x543   :  { %v3320_v21 = vmul.f32 %v14782_v15, %v14780_v6 }
 0x544   :  { %v2852_v35 = vpop.f32.mrf.mxu2 }
 0x549   :  { %v2872_v42 = vpop.f32.mrf.mxu3 }
 0x54a   :  { %v14784_v28 = vadd.f32 %v2872_v42, %v2849_v25 }
 0x54b   :  { %v2806_v33 = vpop.f32.mrf.mxu1 }
 0x54c   :  { %v3321_v10 = vmul.f32 %v14786_v59, %v14784_v28 }
 0x54e   :  { %v3342_v3 = vadd.f32 %v3321_v10, %v3320_v21 }
 0x54f   :  { %v2964_v8 = vpop.f32.mrf.mxu2 }
 0x554   :  { %v2918_v0 = vpop.f32.mrf.mxu1 }
 0x55b   :  { %v2829_v12 = vpop.f32.mrf.mxu0 }
 0x55c   :  { %v14806_v53 = vadd.f32 %v2829_v12, %v2806_v33 }
 0x55d   :  { %v2875_v13 = vpop.f32.mrf.mxu3 }
 0x55e   :  { %v2921_v19 = vpop.f32.mrf.mxu1  ;;  %v14808_v41 = vadd.f32 %v2875_v13, %v2852_v35  ;;  %v3331_v45 = vmul.f32 %v14782_v15, %v14806_v53  ;;  %v14837_v13 = vperm.slane %v8833_v46, 7 }
 0x560   :  { %v3332_v56 = vmul.f32 %v14786_v59, %v14808_v41 }
 0x564   :  { %v2895_v9 = vpop.f32.mrf.mxu0 }
 0x565   :  { %v14788_v63 = vadd.f32 %v2918_v0, %v2895_v9 }
 0x567   :  { %v3322_v43 = vmul.f32 %v14790_v32, %v14788_v63 }
 0x568   :  { %v2987_v27 = vpop.f32.mrf.mxu1 }
 0x569   :  { %v3343_v5 = vadd.f32 %v3342_v3, %v3322_v43  ;;  %v14871_v43 = vperm.slane %v8834_v20, 2 }
 0x56b   :  { %v2941_v49 = vpop.f32.mrf.mxu3 }
 0x56c   :  { %v14796_v31 = vadd.f32 %v2964_v8, %v2941_v49 }
 0x56e   :  { %v3323_v17 = vmul.f32 %v14798_v16, %v14796_v31 }
 0x570   :  { %v2898_v39 = vpop.f32.mrf.mxu0  ;;  %v2967_v11 = vpop.f32.mrf.mxu2  ;;  %v3344_v33 = vadd.f32 %v3343_v5, %v3323_v17 }
 0x571   :  { %v14816_v47 = vadd.f32 %v2921_v19, %v2898_v39  ;;  %v14847_v39 = vperm.slane %v8834_v20, 0 }
 0x573   :  { %v3333_v0 = vmul.f32 %v14790_v32, %v14816_v47 }
 0x576   :  { %v2944_v36 = vpop.f32.mrf.mxu3 }
 0x577   :  { %v14828_v50 = vadd.f32 %v2967_v11, %v2944_v36  ;;  %v3354_v36 = vadd.f32 %v3332_v56, %v3331_v45 }
 0x579   :  { %v3334_v11 = vmul.f32 %v14798_v16, %v14828_v50 }
 0x57a   :  { %v3010_v30 = vpop.f32.mrf.mxu0  ;;  %v3033_v29 = vpop.f32.mrf.mxu2 }
 0x57b   :  { %v14802_v14 = vadd.f32 %v3010_v30, %v2987_v27 }
 0x57d   :  { %v3324_v37 = vmul.f32 %v14804_v22, %v14802_v14 }
 0x57f   :  { %v3345_v49 = vadd.f32 %v3344_v33, %v3324_v37 }
 0x580   :  { %v3056_v62 = vpop.f32.mrf.mxu3 }
 0x581   :  { %v14812_v57 = vadd.f32 %v3056_v62, %v3033_v29 }
 0x583   :  { %v2990_v55 = vpop.f32.mrf.mxu1  ;;  %v3013_v1 = vpop.f32.mrf.mxu0  ;;  %v3325_v25 = vmul.f32 %v14814_v26, %v14812_v57 }
 0x584   :  { %v14841_v35 = vadd.f32 %v3013_v1, %v2990_v55  ;;  %v14857_v55 = vperm.slane %v8834_v20, 1  ;;  %v3355_v1 = vadd.f32 %v3354_v36, %v3333_v0 }
 0x585   :  { %v3346_v30 = vadd.f32 %v3345_v49, %v3325_v25 }
 0x58a   :  { %v3059_v23 = vpop.f32.mrf.mxu3  ;;  %v3036_v61 = vpop.f32.mrf.mxu2 }
 0x58b   :  { %v14851_v27 = vadd.f32 %v3059_v23, %v3036_v61  ;;  %v3356_v61 = vadd.f32 %v3355_v1, %v3334_v11  ;;  %v11241_v1 = vmov 968.0  }
 0x58c   :  { %11151 = vrcp.f32 %v11241_v1 }
 0x58d   :  { %v3336_v46 = vmul.f32 %v14814_v26, %v14851_v27 }
 0x58e   :  { %v3102_v7 = vpop.f32.mrf.mxu1 }
 0x590   :  { %v3079_v24 = vpop.f32.mrf.mxu0 }
 0x591   :  { %v14820_v48 = vadd.f32 %v3102_v7, %v3079_v24  ;;  %v3335_v7 = vmul.f32 %v14804_v22, %v14841_v35 }
 0x593   :  { %v3326_v8 = vmul.f32 %v14822_v34, %v14820_v48  ;;  %v3357_v3 = vadd.f32 %v3356_v61, %v3335_v7  ;;  %v11152_v7 = vpop.eup %11151 }
 0x594   :  { %vm3371_vm10 = vweird.f32 %v11152_v7 }
 0x595   :  { %v3358_v45 = vadd.f32 %v3357_v3, %v3336_v46  ;;  %v14895_v46 = vpop.permute.xlu2 %3551 }
 0x596   :  { %v3125_v40 = vpop.f32.mrf.mxu3  ;;  %v3105_v44 = vpop.f32.mrf.mxu1 }
 0x597   :  { %v3148_v52 = vpop.f32.mrf.mxu2 }
 0x598   :  { %v3082_v4 = vpop.f32.mrf.mxu0  ;;  %v14835_v12 = vadd.f32 %v3148_v52, %v3125_v40  ;;  %v3347_v40 = vadd.f32 %v3346_v30, %v3326_v8 }
 0x599   :  { %v14861_v52 = vadd.f32 %v3105_v44, %v3082_v4 }
 0x59a   :  { %v3327_v62 = vmul.f32 %v14837_v13, %v14835_v12 }
 0x59b   :  { %v3337_v4 = vmul.f32 %v14822_v34, %v14861_v52 }
 0x59e   :  { %v3171_v58 = vpop.f32.mrf.mxu1 }
 0x59f   :  { %v3128_v18 = vpop.f32.mrf.mxu3 }
 0x5a0   :  { %v3151_v2 = vpop.f32.mrf.mxu2  ;;  %v3194_v51 = vpop.f32.mrf.mxu0 }
 0x5a1   :  { %v14845_v19 = vadd.f32 %v3194_v51, %v3171_v58  ;;  %v3348_v58 = vadd.f32 %v3347_v40, %v3327_v62  ;;  %v14867_v51 = vadd.f32 %v3151_v2, %v3128_v18 }
 0x5a3   :  { %v3328_v23 = vmul.f32 %v14847_v39, %v14845_v19  ;;  %v3338_v18 = vmul.f32 %v14837_v13, %v14867_v51 }
 0x5a5   :  { %v3349_v5 = vadd.f32 %v3348_v58, %v3328_v23  ;;  %v14893_v23 = vpop.permute.xlu0 %3516 }
 0x5a6   :  { %v3174_v60 = vpop.f32.mrf.mxu1 }
 0x5a7   :  { %v3240_v38 = vpop.f32.mrf.mxu3 }
 0x5a8   :  { %v3217_v42 = vpop.f32.mrf.mxu2  ;;  %v3197_v9 = vpop.f32.mrf.mxu0 }
 0x5a9   :  { %v14855_v29 = vadd.f32 %v3240_v38, %v3217_v42  ;;  %v14875_v37 = vadd.f32 %v3197_v9, %v3174_v60  ;;  %v3359_v42 = vadd.f32 %v3358_v45, %v3337_v4 }
 0x5ab   :  { %v3329_v21 = vmul.f32 %v14857_v55, %v14855_v29  ;;  %v3339_v33 = vmul.f32 %v14847_v39, %v14875_v37  ;;  %v3360_v60 = vadd.f32 %v3359_v42, %v3338_v18 }
 0x5ad   :  { %v3350_v2 = vadd.f32 %v3349_v5, %v3329_v21  ;;  %v3361_v8 = vadd.f32 %v3360_v60, %v3339_v33 }
 0x5ae   :  { %v3286_v24 = vpop.f32.mrf.mxu1 }
 0x5af   :  { %v3243_v10 = vpop.f32.mrf.mxu3 }
 0x5b0   :  { %v3220_v17 = vpop.f32.mrf.mxu2 }
 0x5b1   :  { %v14881_v56 = vadd.f32 %v3243_v10, %v3220_v17  ;;  %v14899_v10 = vpop.permute.xlu0 %3556 }
 0x5b3   :  { %v3340_v9 = vmul.f32 %v14857_v55, %v14881_v56 }
 0x5b4   :  { %v3263_v44 = vpop.f32.mrf.mxu0 }
 0x5b5   :  { %v14877_v38 = vadd.f32 %v3286_v24, %v3263_v44  ;;  %v3362_v11 = vadd.f32 %v3361_v8, %v3340_v9  ;;  %v3367_v24 = vmul.f32 968.0, %v11152_v7 }
 0x5b6   :  { %v3289_v0 = vpop.f32.mrf.mxu1 }
 0x5b7   :  { %v3330_v20 = vmul.f32 %v14871_v43, %v14877_v38  ;;  %v3368_v40 = vsub.f32 1.0, %v3367_v24 }
 0x5b9   :  { %v3351_v25 = vadd.f32 %v3350_v2, %v3330_v20  ;;  %v3369_v61 = vmul.f32 %v11152_v7, %v3368_v40 }
 0x5bb   :  { %3352 = vadd.xlane.f32.xlu2 %v3351_v25  ;;  %v3370_v58 = vadd.f32 %v11152_v7, %v3369_v61 }
 0x5bc   :  { %v3266_v49 = vpop.f32.mrf.mxu0 }
 0x5bd   :  { %v14889_v36 = vadd.f32 %v3289_v0, %v3266_v49  ;;  %v14897_v21 = vsel %vm3371_vm10, %v11152_v7, %v3370_v58 }
 0x5bf   :  { %v3341_v30 = vmul.f32 %v14871_v43, %v14889_v36 }
 0x5c1   :  { %v3363_v62 = vadd.f32 %v3362_v11, %v3341_v30 }
 0x5c3   :  { %3364 = vadd.xlane.f32.xlu0 %v3363_v62 }
 0x62e   :  { %v3353_v3 = vpop.xlane.xlu2 %3352 }
 0x62f   :  { %v3373_v17 = vmul.f32 %v14897_v21, %v3353_v3 }
 0x631   :  { %v14903_v44 = vsub.f32 %v14780_v6, %v3373_v17  ;;  %v14906_v4 = vsub.f32 %v14784_v28, %v3373_v17  ;;  %v14909_v5 = vsub.f32 %v14788_v63, %v3373_v17  ;;  %v14912_v45 = vsub.f32 %v14796_v31, %v3373_v17 }
 0x632   :  { %v14919_v20 = vsub.f32 %v14802_v14, %v3373_v17  ;;  %v14927_v33 = vsub.f32 %v14812_v57, %v3373_v17  ;;  %v14932_v0 = vsub.f32 %v14820_v48, %v3373_v17  ;;  %v14941_v8 = vsub.f32 %v14835_v12, %v3373_v17 }
 0x633   :  { %v3397_v18 = vmul.f32 %v14903_v44, %v14903_v44  ;;  %v3398_v2 = vmul.f32 %v14906_v4, %v14906_v4  ;;  %v3399_v6 = vmul.f32 %v14909_v5, %v14909_v5  ;;  %v3400_v25 = vmul.f32 %v14912_v45, %v14912_v45 }
 0x634   :  { %v3401_v14 = vmul.f32 %v14919_v20, %v14919_v20  ;;  %v3402_v11 = vmul.f32 %v14927_v33, %v14927_v33  ;;  %v14953_v1 = vsub.f32 %v14845_v19, %v3373_v17  ;;  %v3404_v19 = vmul.f32 %v14941_v8, %v14941_v8 }
 0x635   :  { %v3419_v42 = vmul.f32 %v3397_v18, %v14782_v15  ;;  %v3420_v63 = vmul.f32 %v3398_v2, %v14786_v59  ;;  %v3421_v60 = vmul.f32 %v3399_v6, %v14790_v32  ;;  %v3422_v48 = vmul.f32 %v3400_v25, %v14798_v16 }
 0x636   :  { %v3365_v28 = vpop.xlane.xlu0 %3364  ;;  %v3424_v61 = vmul.f32 %v3402_v11, %v14814_v26  ;;  %v3405_v2 = vmul.f32 %v14953_v1, %v14953_v1 }
 0x637   :  { %v3374_v31 = vmul.f32 %v14897_v21, %v3365_v28  ;;  %v3441_v9 = vadd.f32 %v3420_v63, %v3419_v42 }
 0x639   :  { %v14938_v49 = vsub.f32 %v14806_v53, %v3374_v31  ;;  %v14944_v57 = vsub.f32 %v14808_v41, %v3374_v31  ;;  %v3442_v30 = vadd.f32 %v3441_v9, %v3421_v60  ;;  %v14950_v62 = vsub.f32 %v14816_v47, %v3374_v31 }
 0x63a   :  { %v3403_v53 = vmul.f32 %v14932_v0, %v14932_v0  ;;  %v3423_v41 = vmul.f32 %v3401_v14, %v14804_v22  ;;  %v14961_v24 = vsub.f32 %v14828_v50, %v3374_v31  ;;  %v14966_v47 = vsub.f32 %v14855_v29, %v3373_v17 }
 0x63b   :  { %v3408_v12 = vmul.f32 %v14938_v49, %v14938_v49  ;;  %v3443_v7 = vadd.f32 %v3442_v30, %v3422_v48  ;;  %v3409_v40 = vmul.f32 %v14944_v57, %v14944_v57  ;;  %v14972_v3 = vsub.f32 %v14841_v35, %v3374_v31 }
 0x63c   :  { %v3410_v18 = vmul.f32 %v14950_v62, %v14950_v62  ;;  %v14977_v50 = vsub.f32 %v14877_v38, %v3373_v17  ;;  %v3425_v28 = vmul.f32 %v3403_v53, %v14822_v34  ;;  %v14985_v63 = vsub.f32 %v14851_v27, %v3374_v31 }
 0x63d   :  { %v3444_v58 = vadd.f32 %v3443_v7, %v3423_v41  ;;  %v3430_v29 = vmul.f32 %v3408_v12, %v14782_v15  ;;  %v3431_v6 = vmul.f32 %v3409_v40, %v14786_v59  ;;  %v3411_v35 = vmul.f32 %v14961_v24, %v14961_v24 }
 0x63e   :  { %v3406_v38 = vmul.f32 %v14966_v47, %v14966_v47  ;;  %v3426_v17 = vmul.f32 %v3404_v19, %v14837_v13  ;;  %v14993_v25 = vsub.f32 %v14861_v52, %v3374_v31  ;;  %v3412_v59 = vmul.f32 %v14972_v3, %v14972_v3 }
 0x63f   :  { %v3445_v42 = vadd.f32 %v3444_v58, %v3424_v61  ;;  %v3432_v14 = vmul.f32 %v3410_v18, %v14790_v32  ;;  %v3453_v60 = vadd.f32 %v3431_v6, %v3430_v29  ;;  %v3407_v27 = vmul.f32 %v14977_v50, %v14977_v50 }
 0x640   :  { %v3427_v9 = vmul.f32 %v3405_v2, %v14847_v39  ;;  %v15002_v11 = vsub.f32 %v14867_v51, %v3374_v31  ;;  %v3413_v52 = vmul.f32 %v14985_v63, %v14985_v63  ;;  %v3433_v30 = vmul.f32 %v3411_v35, %v14798_v16 }
 0x641   :  { %v3446_v15 = vadd.f32 %v3445_v42, %v3425_v28  ;;  %v3454_v53 = vadd.f32 %v3453_v60, %v3432_v14  ;;  %v3428_v12 = vmul.f32 %v3406_v38, %v14857_v55  ;;  %v15009_v32 = vsub.f32 %v14875_v37, %v3374_v31  ;;  %v15035_v14 = vpop.permute.xlu1 %3521 }
 0x642   :  { %v3414_v7 = vmul.f32 %v14993_v25, %v14993_v25  ;;  %v3434_v40 = vmul.f32 %v3412_v59, %v14804_v22  ;;  %v3429_v19 = vmul.f32 %v3407_v27, %v14871_v43  ;;  %v15016_v61 = vsub.f32 %v14881_v56, %v3374_v31 }
 0x643   :  { %v3447_v48 = vadd.f32 %v3446_v15, %v3426_v17  ;;  %v3455_v51 = vadd.f32 %v3454_v53, %v3433_v30  ;;  %v3415_v16 = vmul.f32 %v15002_v11, %v15002_v11  ;;  %v3435_v18 = vmul.f32 %v3413_v52, %v14814_v26 }
 0x644   :  { %v15022_v2 = vsub.f32 %v14889_v36, %v3374_v31  ;;  %v3416_v22 = vmul.f32 %v15009_v32, %v15009_v32  ;;  %v3436_v6 = vmul.f32 %v3414_v7, %v14822_v34  ;;  %v3417_v56 = vmul.f32 %v15016_v61, %v15016_v61 }
 0x645   :  { %v3448_v41 = vadd.f32 %v3447_v48, %v3427_v9  ;;  %v3456_v37 = vadd.f32 %v3455_v51, %v3434_v40  ;;  %v3437_v42 = vmul.f32 %v3415_v16, %v14837_v13 }
 0x646   :  { %v3418_v26 = vmul.f32 %v15022_v2, %v15022_v2  ;;  %v3438_v36 = vmul.f32 %v3416_v22, %v14847_v39  ;;  %v3439_v38 = vmul.f32 %v3417_v56, %v14857_v55 }
 0x647   :  { %v3449_v58 = vadd.f32 %v3448_v41, %v3428_v12  ;;  %v3457_v28 = vadd.f32 %v3456_v37, %v3435_v18 }
 0x648   :  { %v3440_v15 = vmul.f32 %v3418_v26, %v14871_v43 }
 0x649   :  { %v3450_v29 = vadd.f32 %v3449_v58, %v3429_v19  ;;  %v3458_v35 = vadd.f32 %v3457_v28, %v3436_v6 }
 0x64b   :  { %3451 = vadd.xlane.f32.xlu1 %v3450_v29  ;;  %v3459_v31 = vadd.f32 %v3458_v35, %v3437_v42 }
 0x64d   :  { %v3460_v17 = vadd.f32 %v3459_v31, %v3438_v36 }
 0x64f   :  { %v3461_v34 = vadd.f32 %v3460_v17, %v3439_v38 }
 0x651   :  { %v3462_v59 = vadd.f32 %v3461_v34, %v3440_v15 }
 0x653   :  { %3463 = vadd.xlane.f32.xlu2 %v3462_v59 }
 0x6be   :  { %v3452_v60 = vpop.xlane.xlu1 %3451 }
 0x6bf   :  { %v3465_v13 = vmul.f32 %v3452_v60, %v14897_v21 }
 0x6c1   :  { %v3467_v27 = vadd.f32 1e-05, %v3465_v13 }
 0x6c3   :  { %11153 = vrsqrt.f32 %v3467_v27  ;;  %vm3475_vm13 = vweird.f32 %v3467_v27 }
 0x6c6   :  { %v3464_v9 = vpop.xlane.xlu2 %3463 }
 0x6c7   :  { %v3466_v39 = vmul.f32 %v3464_v9, %v14897_v21 }
 0x6c9   :  { %v11154_v48 = vpop.eup %11153  ;;  %v3468_v30 = vadd.f32 1e-05, %v3466_v39 }
 0x6ca   :  { %v3470_v52 = vmul.f32 %v11154_v48, %v3467_v27  ;;  %vm3476_vm11 = vweird.f32 %v11154_v48 }
 0x6cb   :  { %11155 = vrsqrt.f32 %v3468_v30  ;;  %vm3477_vm14 = vmor %vm3475_vm13, %vm3476_vm11  ;;  %vm3485_vm15 = vweird.f32 %v3468_v30 }
 0x6cc   :  { %v3471_v55 = vmul.f32 %v11154_v48, %v3470_v52 }
 0x6ce   :  { %v3472_v53 = vmul.f32 0.5, %v3471_v55 }
 0x6d0   :  { %v3473_v43 = vsub.f32 1.5, %v3472_v53 }
 0x6d1   :  { %v11156_v41 = vpop.eup %11155 }
 0x6d2   :  { %v3474_v12 = vmul.f32 %v11154_v48, %v3473_v43  ;;  %v3480_v40 = vmul.f32 %v11156_v41, %v3468_v30  ;;  %vm3486_vm12 = vweird.f32 %v11156_v41 }
 0x6d3   :  { %vm3487_vm9 = vmor %vm3485_vm15, %vm3486_vm12 }
 0x6d4   :  { %v15039_v7 = vsel %vm3477_vm14, %v11154_v48, %v3474_v12  ;;  %v3481_v16 = vmul.f32 %v11156_v41, %v3480_v40 }
 0x6d5   :  { %v3491_v51 = vmul.f32 %v15039_v7, %v14909_v5  ;;  %v3490_v21 = vmul.f32 %v15039_v7, %v14906_v4  ;;  %v3489_v19 = vmul.f32 %v15039_v7, %v14903_v44  ;;  %v3494_v58 = vmul.f32 %v15039_v7, %v14927_v33 }
 0x6d6   :  { %v3493_v18 = vmul.f32 %v15039_v7, %v14919_v20  ;;  %v3492_v37 = vmul.f32 %v15039_v7, %v14912_v45  ;;  %v3497_v29 = vmul.f32 %v15039_v7, %v14953_v1  ;;  %v3482_v22 = vmul.f32 0.5, %v3481_v16 }
 0x6d7   :  { %v3526_v5 = vmul.f32 %v14893_v23, %v3491_v51  ;;  %v3525_v4 = vmul.f32 %v14893_v23, %v3490_v21  ;;  %v3524_v44 = vmul.f32 %v14893_v23, %v3489_v19  ;;  %v3529_v6 = vmul.f32 %v14893_v23, %v3494_v58 }
 0x6d8   :  { %v3528_v28 = vmul.f32 %v14893_v23, %v3493_v18  ;;  %v3527_v20 = vmul.f32 %v14893_v23, %v3492_v37  ;;  %v3532_v45 = vmul.f32 %v14893_v23, %v3497_v29  ;;  %v3483_v56 = vsub.f32 1.5, %v3482_v22 }
 0x6d9   :  { %v3561_v33 = vadd.f32 %v14895_v46, %v3526_v5  ;;  %v3560_v1 = vadd.f32 %v14895_v46, %v3525_v4  ;;  %v3559_v35 = vadd.f32 %v14895_v46, %v3524_v44  ;;  %v15066_v26 = vadd.f32 %v14895_v46, %v3529_v6 }
 0x6da   :  { %v3484_v42 = vmul.f32 %v11156_v41, %v3483_v56  ;;  %v15069_v36 = vadd.f32 %v14895_v46, %v3528_v28  ;;  %v15072_v31 = vadd.f32 %v14895_v46, %v3527_v20  ;;  %v15075_v38 = vadd.f32 %v14895_v46, %v3532_v45 }
 0x6db   :  { %vm3583_vm10 = vcmp.gt.f32.partialorder %v3561_v33, 0.0  ;;  %v3605_v15 = vmul.f32 0.2, %v3561_v33  ;;  %vm3582_vm11 = vcmp.gt.f32.partialorder %v3560_v1, 0.0  ;;  %v3604_v34 = vmul.f32 0.2, %v3560_v1 }
 0x6dc   :  { %v15077_v17 = vsel %vm3487_vm9, %v11156_v41, %v3484_v42  ;;  %vm3581_vm13 = vcmp.gt.f32.partialorder %v3559_v35, 0.0  ;;  %v3603_v9 = vmul.f32 0.2, %v3559_v35  ;;  %vm3586_vm14 = vcmp.gt.f32.partialorder %v15066_v26, 0.0 }
 0x6dd   :  { %v3502_v59 = vmul.f32 %v15077_v17, %v14950_v62  ;;  %v3501_v60 = vmul.f32 %v15077_v17, %v14944_v57  ;;  %v3500_v13 = vmul.f32 %v15077_v17, %v14938_v49  ;;  %v3505_v27 = vmul.f32 %v15077_v17, %v14985_v63 }
 0x6de   :  { %v3504_v48 = vmul.f32 %v15077_v17, %v14972_v3  ;;  %v3503_v39 = vmul.f32 %v15077_v17, %v14961_v24  ;;  %v15097_v49 = vsel %vm3583_vm10, %v3561_v33, %v3605_v15  ;;  %v15100_v63 = vsel %vm3582_vm11, %v3560_v1, %v3604_v34 }
 0x6df   :  { %v3537_v52 = vmul.f32 %v15035_v14, %v3502_v59  ;;  %v3536_v62 = vmul.f32 %v15035_v14, %v3501_v60  ;;  %v3535_v57 = vmul.f32 %v15035_v14, %v3500_v13  ;;  %v3540_v30 = vmul.f32 %v15035_v14, %v3505_v27  ;;  %21006 = vst [vmem:[#allocation16_spill] sm:$0xff] %v15097_v49 }
 0x6e0   :  { %v3539_v3 = vmul.f32 %v15035_v14, %v3504_v48  ;;  %v3538_v24 = vmul.f32 %v15035_v14, %v3503_v39  ;;  %v15109_v41 = vsel %vm3581_vm13, %v3559_v35, %v3603_v9  ;;  %v3608_v40 = vmul.f32 0.2, %v15066_v26 }
 0x6e1   :  { %v3572_v55 = vadd.f32 %v14899_v10, %v3537_v52  ;;  %v3571_v53 = vadd.f32 %v14899_v10, %v3536_v62  ;;  %v3570_v43 = vadd.f32 %v14899_v10, %v3535_v57  ;;  %v3575_v12 = vadd.f32 %v14899_v10, %v3540_v30 }
 0x6e2   :  { %v3574_v51 = vadd.f32 %v14899_v10, %v3539_v3  ;;  %v3508_v21 = vmul.f32 %v15077_v17, %v15009_v32  ;;  %v3573_v37 = vadd.f32 %v14899_v10, %v3538_v24  ;;  %v3607_v4 = vmul.f32 0.2, %v15069_v36 }
 0x6e3   :  { %vm3594_vm12 = vcmp.gt.f32.partialorder %v3572_v55, 0.0  ;;  %v3616_v19 = vmul.f32 0.2, %v3572_v55  ;;  %vm3593_vm15 = vcmp.gt.f32.partialorder %v3571_v53, 0.0  ;;  %v3615_v58 = vmul.f32 0.2, %v3571_v53 }
 0x6e4   :  { %vm3592_vm9 = vcmp.gt.f32.partialorder %v3570_v43, 0.0  ;;  %v3614_v16 = vmul.f32 0.2, %v3570_v43  ;;  %v3619_v18 = vmul.f32 0.2, %v3575_v12  ;;  %vm3597_vm10 = vcmp.gt.f32.partialorder %v3575_v12, 0.0 }
 0x6e5   :  { %v15116_v29 = vsel %vm3594_vm12, %v3572_v55, %v3616_v19  ;;  %v15118_v5 = vsel %vm3593_vm15, %v3571_v53, %v3615_v58  ;;  %v3543_v6 = vmul.f32 %v15035_v14, %v3508_v21  ;;  %vm3585_vm11 = vcmp.gt.f32.partialorder %v15069_v36, 0.0 }
 0x6e6   :  { %v15123_v22 = vpack.i.bf16 %v15116_v29, %v15097_v49  ;;  %v15127_v32 = vpack.i.bf16 %v15118_v5, %v15100_v63  ;;  %v15129_v44 = vsel %vm3592_vm9, %v3570_v43, %v3614_v16  ;;  %v3618_v28 = vmul.f32 0.2, %v3574_v51 }
 0x6e7   :  { %v15134_v33 = vpack.i.bf16 %v15129_v44, %v15109_v41  ;;  %v3606_v20 = vmul.f32 0.2, %v15072_v31  ;;  %v15142_v45 = vsel %vm3597_vm10, %v3575_v12, %v3619_v18  ;;  %vm3596_vm13 = vcmp.gt.f32.partialorder %v3574_v51, 0.0 }
 0x6e8   :  { %9836 = vrot.lane.b32.xlu2 %v15123_v22, %s11231_s13  ;;  %9831 = vrot.lane.b32.xlu0 %v15127_v32, %s11231_s13  ;;  %21007 = vst [vmem:[#allocation24_spill] sm:$0xff] %v15142_v45  ;;  %vm3584_vm12 = vcmp.gt.f32.partialorder %v15072_v31, 0.0  ;;  %v3617_v56 = vmul.f32 0.2, %v3573_v37  ;;  %vm3595_vm15 = vcmp.gt.f32.partialorder %v3573_v37, 0.0  ;;  %v3496_v1 = vmul.f32 %v15039_v7, %v14941_v8 }
 0x6e9   :  { %9826 = vrot.lane.b32.xlu1 %v15134_v33, %s11231_s13  ;;  %v3507_v42 = vmul.f32 %v15077_v17, %v15002_v11  ;;  %v3495_v35 = vmul.f32 %v15039_v7, %v14932_v0  ;;  %v15156_v15 = vsel %vm3586_vm14, %v15066_v26, %v3608_v40  ;;  %v15159_v34 = vsel %vm3585_vm11, %v15069_v36, %v3607_v4 }
 0x6ea   :  { %21008 = vst [vmem:[#allocation13_spill] sm:$0xff] %v15156_v15  ;;  %v3578_v59 = vadd.f32 %v14899_v10, %v3543_v6  ;;  %v3506_v60 = vmul.f32 %v15077_v17, %v14993_v25  ;;  %v15164_v8 = vsel %vm3596_vm13, %v3574_v51, %v3618_v28  ;;  %v15167_v11 = vsel %vm3584_vm12, %v15072_v31, %v3606_v20 }
 0x6eb   :  { %21009 = vst [vmem:[#allocation28_spill] sm:$0xff] %v15159_v34  ;;  %v3531_v0 = vmul.f32 %v14893_v23, %v3496_v1  ;;  %v3542_v13 = vmul.f32 %v15035_v14, %v3507_v42  ;;  %v15173_v26 = vpack.i.bf16 %v15142_v45, %v15156_v15  ;;  %v15175_v36 = vsel %vm3595_vm15, %v3573_v37, %v3617_v56 }
 0x6ec   :  { %21010 = vst [vmem:[#allocation20_spill] sm:$0xff] %v15164_v8  ;;  %v3530_v27 = vmul.f32 %v14893_v23, %v3495_v35  ;;  %v3541_v9 = vmul.f32 %v15035_v14, %v3506_v60  ;;  %v3499_v31 = vmul.f32 %v15039_v7, %v14977_v50  ;;  %v3510_v39 = vmul.f32 %v15077_v17, %v15022_v2 }
 0x6ed   :  { %21011 = vst [vmem:[#allocation22_spill] sm:$0xff] %v15167_v11  ;;  %v3566_v25 = vadd.f32 %v14895_v46, %v3531_v0  ;;  %v3577_v48 = vadd.f32 %v14899_v10, %v3542_v13  ;;  %v15187_v52 = vpack.i.bf16 %v15164_v8, %v15159_v34  ;;  %v3622_v62 = vmul.f32 0.2, %v3578_v59 }
 0x6ee   :  { %v3565_v57 = vadd.f32 %v14895_v46, %v3530_v27  ;;  %v3576_v30 = vadd.f32 %v14899_v10, %v3541_v9  ;;  %v15193_v3 = vpack.i.bf16 %v15175_v36, %v15167_v11  ;;  %vm3600_vm14 = vcmp.gt.f32.partialorder %v3578_v59, 0.0 }
 0x6ef   :  { %v3621_v24 = vmul.f32 0.2, %v3577_v48  ;;  %vm3589_vm9 = vcmp.gt.f32.partialorder %v15075_v38, 0.0  ;;  %v3611_v50 = vmul.f32 0.2, %v15075_v38  ;;  %vm3599_vm10 = vcmp.gt.f32.partialorder %v3577_v48, 0.0 }
 0x6f0   :  { %9851 = vrot.lane.b32.xlu2 %v15173_v26, %s11231_s13  ;;  %9846 = vrot.lane.b32.xlu0 %v15187_v52, %s11231_s13  ;;  %v3620_v2 = vmul.f32 0.2, %v3576_v30  ;;  %v3610_v55 = vmul.f32 0.2, %v3566_v25  ;;  %vm3598_vm11 = vcmp.gt.f32.partialorder %v3576_v30, 0.0  ;;  %v3534_v53 = vmul.f32 %v14893_v23, %v3499_v31 }
 0x6f1   :  { %9841 = vrot.lane.b32.xlu1 %v15193_v3, %s11231_s13  ;;  %v3545_v43 = vmul.f32 %v15035_v14, %v3510_v39  ;;  %v15205_v12 = vsel %vm3600_vm14, %v3578_v59, %v3622_v62  ;;  %vm3588_vm13 = vcmp.gt.f32.partialorder %v3566_v25, 0.0  ;;  %v3609_v40 = vmul.f32 0.2, %v3565_v57 }
 0x6f2   :  { %21012 = vst [vmem:[#allocation47_spill] sm:$0xff] %v15205_v12  ;;  %v3498_v51 = vmul.f32 %v15039_v7, %v14966_v47  ;;  %v15209_v21 = vsel %vm3599_vm10, %v3577_v48, %v3621_v24  ;;  %vm3587_vm12 = vcmp.gt.f32.partialorder %v3565_v57, 0.0  ;;  %v15215_v58 = vsel %vm3589_vm9, %v15075_v38, %v3611_v50 }
 0x6f3   :  { %21013 = vst [vmem:[#allocation42_spill] sm:$0xff] %v15209_v21  ;;  %v3580_v19 = vadd.f32 %v14899_v10, %v3545_v43  ;;  %v15217_v16 = vsel %vm3598_vm11, %v3576_v30, %v3620_v2  ;;  %v3509_v18 = vmul.f32 %v15077_v17, %v15016_v61  ;;  %v15224_v47 = vpack.i.bf16 %v15205_v12, %v15215_v58 }
 0x6f4   :  { %21014 = vst [vmem:[#allocation45_spill] sm:$0xff] %v15215_v58  ;;  %v3533_v37 = vmul.f32 %v14893_v23, %v3498_v51  ;;  %v15226_v7 = vsel %vm3588_vm13, %v3566_v25, %v3610_v55  ;;  %v3569_v4 = vadd.f32 %v14895_v46, %v3534_v53  ;;  %v15233_v38 = vsel %vm3587_vm12, %v3565_v57, %v3609_v40 }
 0x6f5   :  { %21015 = vst [vmem:[#allocation43_spill] sm:$0xff] %v15217_v16  ;;  %v15231_v6 = vpack.i.bf16 %v15209_v21, %v15226_v7  ;;  %v3544_v28 = vmul.f32 %v15035_v14, %v3509_v18  ;;  %v15239_v23 = vpack.i.bf16 %v15217_v16, %v15233_v38  ;;  %v3624_v17 = vmul.f32 0.2, %v3580_v19 }
 0x6f6   :  { %21016 = vst [vmem:[#allocation27_spill] sm:$0xff] %v15226_v7  ;;  %v3568_v61 = vadd.f32 %v14895_v46, %v3533_v37  ;;  %vm3602_vm15 = vcmp.gt.f32.partialorder %v3580_v19, 0.0  ;;  %v3613_v14 = vmul.f32 0.2, %v3569_v4  ;;  %vm3591_vm14 = vcmp.gt.f32.partialorder %v3569_v4, 0.0 }
 0x6f7   :  { %21017 = vst [vmem:[#allocation38_spill] sm:$0xff] %v15233_v38  ;;  %v3579_v20 = vadd.f32 %v14899_v10, %v3544_v28  ;;  %v15248_v1 = vsel %vm3602_vm15, %v3580_v19, %v3624_v17 }
 0x6f8   :  { %9866 = vrot.lane.b32.xlu2 %v15224_v47, %s11231_s13  ;;  %9861 = vrot.lane.b32.xlu0 %v15231_v6, %s11231_s13  ;;  %v3612_v46 = vmul.f32 0.2, %v3568_v61  ;;  %21018 = vst [vmem:[#allocation40_spill] sm:$0xff] %v15248_v1  ;;  %vm3590_vm10 = vcmp.gt.f32.partialorder %v3568_v61, 0.0  ;;  %v15252_v35 = vsel %vm3591_vm14, %v3569_v4, %v3613_v14 }
 0x6f9   :  { %9856 = vrot.lane.b32.xlu1 %v15239_v23, %s11231_s13  ;;  %vm3601_vm9 = vcmp.gt.f32.partialorder %v3579_v20, 0.0  ;;  %v3623_v56 = vmul.f32 0.2, %v3579_v20  ;;  %21020 = vst [vmem:[#allocation37_spill] sm:$0xff] %v15252_v35  ;;  %v15256_v59 = vpack.i.bf16 %v15248_v1, %v15252_v35 }
 0x6fa   :  { %v15258_v10 = vsel %vm3590_vm10, %v3568_v61, %v3612_v46 }
 0x6fb   :  { %v15250_v42 = vsel %vm3601_vm9, %v3579_v20, %v3623_v56  ;;  %21021 = vst [vmem:[#allocation34_spill] sm:$0xff] %v15258_v10 }
 0x6fc   :  { %21019 = vst [vmem:[#allocation29_spill] sm:$0xff] %v15250_v42  ;;  %v15262_v60 = vpack.i.bf16 %v15250_v42, %v15258_v10 }
 0x700   :  { %9876 = vrot.lane.b32.xlu0 %v15256_v59, %s11231_s13  ;;  %9881 = vrot.lane.b32.xlu2 %v15134_v33, %s11232_s24 }
 0x701   :  { %9871 = vrot.lane.b32.xlu1 %v15262_v60, %s11231_s13 }
 0x708   :  { %9891 = vrot.lane.b32.xlu0 %v15123_v22, %s11232_s24  ;;  %9896 = vrot.lane.b32.xlu2 %v15193_v3, %s11232_s24 }
 0x709   :  { %9886 = vrot.lane.b32.xlu1 %v15127_v32, %s11232_s24 }
 0x710   :  { %9906 = vrot.lane.b32.xlu0 %v15173_v26, %s11232_s24  ;;  %9911 = vrot.lane.b32.xlu2 %v15239_v23, %s11232_s24 }
 0x711   :  { %9901 = vrot.lane.b32.xlu1 %v15187_v52, %s11232_s24 }
 0x718   :  { %9921 = vrot.lane.b32.xlu0 %v15224_v47, %s11232_s24  ;;  %9926 = vrot.lane.b32.xlu2 %v15262_v60, %s11232_s24 }
 0x719   :  { %9916 = vrot.lane.b32.xlu1 %v15231_v6, %s11232_s24 }
 0x720   :  { %9936 = vrot.lane.b32.xlu0 %v15134_v33, %s11233_s25  ;;  %9941 = vrot.lane.b32.xlu2 %v15127_v32, %s11233_s25 }
 0x721   :  { %9931 = vrot.lane.b32.xlu1 %v15256_v59, %s11232_s24 }
 0x728   :  { %9951 = vrot.lane.b32.xlu0 %v15193_v3, %s11233_s25  ;;  %9956 = vrot.lane.b32.xlu2 %v15187_v52, %s11233_s25 }
 0x729   :  { %9946 = vrot.lane.b32.xlu1 %v15123_v22, %s11233_s25 }
 0x730   :  { %9966 = vrot.lane.b32.xlu0 %v15239_v23, %s11233_s25  ;;  %9971 = vrot.lane.b32.xlu2 %v15231_v6, %s11233_s25 }
 0x731   :  { %9961 = vrot.lane.b32.xlu1 %v15173_v26, %s11233_s25 }
 0x738   :  { %9981 = vrot.lane.b32.xlu0 %v15262_v60, %s11233_s25  ;;  %9986 = vrot.lane.b32.xlu2 %v15256_v59, %s11233_s25 }
 0x739   :  { %9976 = vrot.lane.b32.xlu1 %v15224_v47, %s11233_s25 }
 0x740   :  { %9996 = vrot.lane.b32.xlu0 %v15127_v32, %s11234_s26  ;;  %10001 = vrot.lane.b32.xlu2 %v15123_v22, %s11234_s26 }
 0x741   :  { %9991 = vrot.lane.b32.xlu1 %v15134_v33, %s11234_s26 }
 0x742   :  { %v15318_v0 = vpop.permute.xlu2 %9836 }
 0x748   :  { %10011 = vrot.lane.b32.xlu0 %v15187_v52, %s11234_s26  ;;  %10016 = vrot.lane.b32.xlu2 %v15173_v26, %s11234_s26 }
 0x749   :  { %10006 = vrot.lane.b32.xlu1 %v15193_v3, %s11234_s26 }
 0x74a   :  { %v15326_v13 = vpop.permute.xlu2 %9851 }
 0x750   :  { %10026 = vrot.lane.b32.xlu0 %v15231_v6, %s11234_s26  ;;  %10031 = vrot.lane.b32.xlu2 %v15224_v47, %s11234_s26 }
 0x751   :  { %10021 = vrot.lane.b32.xlu1 %v15239_v23, %s11234_s26 }
 0x752   :  { %v15334_v27 = vpop.permute.xlu2 %9866 }
 0x753   :  { %21022 = vst [vmem:[#allocation36_spill] sm:$0xff] %v15334_v27  ;;  %v8868_v27 = vld [vmem:[%s20404_s4 + $0x28] sm:$0xff] }
 0x758   :  { %10041 = vrot.lane.b32.xlu0 %v15256_v59, %s11234_s26  ;;  %10046 = vrot.lane.b32.xlu2 %v15134_v33, %s11235_s27 }
 0x759   :  { %10036 = vrot.lane.b32.xlu1 %v15262_v60, %s11234_s26 }
 0x75a   :  { %v15342_v9 = vpop.permute.xlu0 %9831  ;;  %v15344_v25 = vpop.permute.xlu2 %9881 }
 0x75b   :  { %v15346_v48 = vpop.permute.xlu1 %9826 }
 0x75c   :  { %21023 = vst [vmem:[#allocation44_spill] sm:$0xff] %v15346_v48 }
 0x760   :  { %10056 = vrot.lane.b32.xlu0 %v15123_v22, %s11235_s27  ;;  %10061 = vrot.lane.b32.xlu2 %v15193_v3, %s11235_s27 }
 0x761   :  { %10051 = vrot.lane.b32.xlu1 %v15127_v32, %s11235_s27 }
 0x762   :  { %v15354_v31 = vpop.permute.xlu0 %9846  ;;  %v15356_v39 = vpop.permute.xlu2 %9896 }
 0x763   :  { %v15358_v62 = vpop.permute.xlu1 %9841 }
 0x768   :  { %10071 = vrot.lane.b32.xlu0 %v15173_v26, %s11235_s27  ;;  %10076 = vrot.lane.b32.xlu2 %v15239_v23, %s11235_s27 }
 0x769   :  { %10066 = vrot.lane.b32.xlu1 %v15187_v52, %s11235_s27 }
 0x76a   :  { %v15366_v57 = vpop.permute.xlu0 %9861  ;;  %v15368_v30 = vpop.permute.xlu2 %9911 }
 0x76b   :  { %21024 = vst [vmem:[#allocation33_spill] sm:$0xff] %v15366_v57  ;;  %v15370_v24 = vpop.permute.xlu1 %9856 }
 0x76c   :  { %21025 = vst [vmem:[#allocation5_spill] sm:$0xff] %v15370_v24 }
 0x770   :  { %10086 = vrot.lane.b32.xlu0 %v15224_v47, %s11235_s27  ;;  %10091 = vrot.lane.b32.xlu2 %v15262_v60, %s11235_s27 }
 0x771   :  { %10081 = vrot.lane.b32.xlu1 %v15231_v6, %s11235_s27 }
 0x772   :  { %v15378_v50 = vpop.permute.xlu0 %9876  ;;  %v15380_v2 = vpop.permute.xlu2 %9926 }
 0x773   :  { %21026 = vst [vmem:[#allocation32_spill] sm:$0xff] %v15378_v50  ;;  %v15382_v55 = vpop.permute.xlu1 %9871 }
 0x774   :  { %21027 = vst [vmem:[#allocation41_spill] sm:$0xff] %v15380_v2 }
 0x775   :  { %21028 = vst [vmem:[#allocation30_spill] sm:$0xff] %v15382_v55 }
 0x778   :  { %10101 = vrot.lane.b32.xlu0 %v15134_v33, %s11236_s28  ;;  %10106 = vrot.lane.b32.xlu2 %v15127_v32, %s11236_s28 }
 0x779   :  { %10096 = vrot.lane.b32.xlu1 %v15256_v59, %s11235_s27 }
 0x77a   :  { %v15390_v53 = vpop.permute.xlu0 %9891  ;;  %v15392_v43 = vpop.permute.xlu2 %9941 }
 0x77b   :  { %v15394_v40 = vpop.permute.xlu1 %9886 }
 0x780   :  { %10116 = vrot.lane.b32.xlu0 %v15193_v3, %s11236_s28  ;;  %10121 = vrot.lane.b32.xlu2 %v15187_v52, %s11236_s28 }
 0x781   :  { %10111 = vrot.lane.b32.xlu1 %v15123_v22, %s11236_s28 }
 0x782   :  { %v15402_v51 = vpop.permute.xlu0 %9906  ;;  %v15404_v19 = vpop.permute.xlu2 %9956 }
 0x783   :  { %v15406_v18 = vpop.permute.xlu1 %9901 }
 0x788   :  { %10131 = vrot.lane.b32.xlu0 %v15239_v23, %s11236_s28  ;;  %10136 = vrot.lane.b32.xlu2 %v15231_v6, %s11236_s28 }
 0x789   :  { %10126 = vrot.lane.b32.xlu1 %v15173_v26, %s11236_s28 }
 0x78a   :  { %v15414_v37 = vpop.permute.xlu0 %9921  ;;  %v15416_v4 = vpop.permute.xlu2 %9971 }
 0x78b   :  { %21029 = vst [vmem:[#allocation19_spill] sm:$0xff] %v15414_v37  ;;  %v15418_v28 = vpop.permute.xlu1 %9916 }
 0x78c   :  { %21030 = vst [vmem:[#allocation14_spill] sm:$0xff] %v15416_v4 }
 0x78d   :  { %21031 = vst [vmem:[#allocation8_spill] sm:$0xff] %v15418_v28 }
 0x790   :  { %10146 = vrot.lane.b32.xlu0 %v15262_v60, %s11236_s28  ;;  %10151 = vrot.lane.b32.xlu2 %v15256_v59, %s11236_s28 }
 0x791   :  { %10141 = vrot.lane.b32.xlu1 %v15224_v47, %s11236_s28 }
 0x792   :  { %v15426_v61 = vpop.permute.xlu0 %9936  ;;  %v15428_v17 = vpop.permute.xlu2 %9986 }
 0x793   :  { %21032 = vst [vmem:[#allocation35_spill] sm:$0xff] %v15428_v17  ;;  %v15430_v20 = vpop.permute.xlu1 %9931 }
 0x794   :  { %21033 = vst [vmem:[#allocation15_spill] sm:$0xff] %v15430_v20  ;;  %v8867_v20 = vld [vmem:[%s20404_s4 + $0x20] sm:$0xff] }
 0x798   :  { %10161 = vrot.lane.b32.xlu0 %v15127_v32, %s11237_s29  ;;  %10166 = vrot.lane.b32.xlu2 %v15123_v22, %s11237_s29 }
 0x799   :  { %10156 = vrot.lane.b32.xlu1 %v15134_v33, %s11237_s29 }
 0x79a   :  { %v15438_v14 = vpop.permute.xlu0 %9951  ;;  %v15440_v46 = vpop.permute.xlu2 %10001 }
 0x79b   :  { %v15442_v56 = vpop.permute.xlu1 %9946 }
 0x7a0   :  { %10176 = vrot.lane.b32.xlu0 %v15187_v52, %s11237_s29  ;;  %10181 = vrot.lane.b32.xlu2 %v15173_v26, %s11237_s29 }
 0x7a1   :  { %10171 = vrot.lane.b32.xlu1 %v15193_v3, %s11237_s29 }
 0x7a2   :  { %v15450_v35 = vpop.permute.xlu0 %9966  ;;  %v15452_v1 = vpop.permute.xlu2 %10016 }
 0x7a3   :  { %v15454_v10 = vpop.permute.xlu1 %9961 }
 0x7a8   :  { %10191 = vrot.lane.b32.xlu0 %v15231_v6, %s11237_s29  ;;  %10196 = vrot.lane.b32.xlu2 %v15224_v47, %s11237_s29 }
 0x7a9   :  { %10186 = vrot.lane.b32.xlu1 %v15239_v23, %s11237_s29 }
 0x7aa   :  { %v15462_v42 = vpop.permute.xlu0 %9981  ;;  %v15464_v58 = vpop.permute.xlu2 %10031 }
 0x7ab   :  { %21034 = vst [vmem:[#allocation3_spill] sm:$0xff] %v15462_v42  ;;  %v15466_v7 = vpop.permute.xlu1 %9976 }
 0x7ac   :  { %21035 = vst [vmem:[#allocation31_spill] sm:$0xff] %v15464_v58 }
 0x7ad   :  { %21036 = vst [vmem:[#allocation21_spill] sm:$0xff] %v15466_v7 }
 0x7b0   :  { %10206 = vrot.lane.b32.xlu0 %v15256_v59, %s11237_s29  ;;  %10211 = vrot.lane.b32.xlu2 %v15134_v33, %s11238_s30 }
 0x7b1   :  { %10201 = vrot.lane.b32.xlu1 %v15262_v60, %s11237_s29 }
 0x7b2   :  { %v15474_v38 = vpop.permute.xlu0 %9996  ;;  %v15476_v50 = vpop.permute.xlu2 %10046 }
 0x7b3   :  { %v15478_v12 = vpop.permute.xlu1 %9991 }
 0x7b4   :  { %21037 = vst [vmem:[#allocation4_spill] sm:$0xff] %v15478_v12 }
 0x7b8   :  { %10221 = vrot.lane.b32.xlu0 %v15123_v22, %s11238_s30  ;;  %10226 = vrot.lane.b32.xlu2 %v15193_v3, %s11238_s30 }
 0x7b9   :  { %10216 = vrot.lane.b32.xlu1 %v15127_v32, %s11238_s30 }
 0x7ba   :  { %v15486_v21 = vpop.permute.xlu0 %10011  ;;  %v15488_v33 = vpop.permute.xlu2 %10061 }
 0x7bb   :  { %v15490_v16 = vpop.permute.xlu1 %10006 }
 0x7c0   :  { %10236 = vrot.lane.b32.xlu0 %v15173_v26, %s11238_s30  ;;  %10241 = vrot.lane.b32.xlu2 %v15239_v23, %s11238_s30 }
 0x7c1   :  { %10231 = vrot.lane.b32.xlu1 %v15187_v52, %s11238_s30  ;;  %v8869_v52 = vld [vmem:[%s20405_s5 + $0x20] sm:$0xff] }
 0x7c2   :  { %v15498_v22 = vpop.permute.xlu0 %10026  ;;  %v15502_v32 = vpop.permute.xlu2 %10076 }
 0x7c3   :  { %21038 = vst [vmem:[#allocation23_spill] sm:$0xff] %v15498_v22  ;;  %v15500_v3 = vpop.permute.xlu1 %10021 }
 0x7c8   :  { %10251 = vrot.lane.b32.xlu0 %v15224_v47, %s11238_s30  ;;  %10256 = vrot.lane.b32.xlu2 %v15262_v60, %s11238_s30  ;;  %v8870_v60 = vld [vmem:[%s20405_s5 + $0x28] sm:$0xff] }
 0x7c9   :  { %10246 = vrot.lane.b32.xlu1 %v15231_v6, %s11238_s30 }
 0x7ca   :  { %v15510_v26 = vpop.permute.xlu0 %10041  ;;  %v15520_v17 = vpop.permute.xlu2 %10091 }
 0x7cb   :  { %21039 = vst [vmem:[#allocation17_spill] sm:$0xff] %v15510_v26  ;;  %v15512_v23 = vpop.permute.xlu1 %10036 }
 0x7cc   :  { %21040 = vst [vmem:[#allocation11_spill] sm:$0xff] %v15512_v23 }
 0x7cd   :  { %21041 = vst [vmem:[#allocation25_spill] sm:$0xff] %v15520_v17 }
 0x7d0   :  { %5347 = vperm.xlu0 %9384, %v8869_v52   ;;  %5312 = vperm.xlu2 %9383, %v8867_v20  }
 0x7d1   :  { %10261 = vrot.lane.b32.xlu1 %v15256_v59, %s11238_s30 }
 0x7d2   :  { %v15524_v47 = vpop.permute.xlu0 %10056  ;;  %v10107_v55 = vpop.permute.xlu2 %10106 }
 0x7d3   :  { %v15526_v6 = vpop.permute.xlu1 %10051  ;;  %v10109_v49 = vunpack.i.h.bf16 %v10107_v55 }
 0x7d8   :  { %5352 = vperm.xlu2 %9383, %v8870_v60  }
 0x7d9   :  { %5317 = vperm.xlu1 %9382, %v8868_v27  }
 0x7da   :  { %v15534_v52 = vpop.permute.xlu0 %10071  ;;  %v15538_v59 = vpop.permute.xlu2 %10121 }
 0x7db   :  { %v15536_v20 = vpop.permute.xlu1 %10066 }
 0x7e2   :  { %v15540_v57 = vpop.permute.xlu0 %10086  ;;  %v15548_v4 = vpop.permute.xlu2 %10136 }
 0x7e3   :  { %21042 = vst [vmem:[#allocation18_spill] sm:$0xff] %v15540_v57  ;;  %v15542_v2 = vpop.permute.xlu1 %10081 }
 0x7e4   :  { %21043 = vst [vmem:[#allocation26_spill] sm:$0xff] %v15542_v2 }
 0x7e5   :  { %21045 = vst [vmem:[#allocation46_spill] sm:$0xff] %v15548_v4 }
 0x7ea   :  { %v15544_v26 = vpop.permute.xlu0 %10101  ;;  %v15554_v27 = vpop.permute.xlu2 %10151 }
 0x7eb   :  { %v15546_v28 = vpop.permute.xlu1 %10096  ;;  %21046 = vst [vmem:[#allocation7_spill] sm:$0xff] %v15554_v27  ;;  %v21052_v8 = vunpack.i.h.bf16 %v15544_v26  ;;  %v21054_v24 = vunpack.i.l.bf16 %v15544_v26 }
 0x7ec   :  { %21044 = vst [vmem:[#allocation6_spill] sm:$0xff] %v15546_v28 }
 0x7f2   :  { %v15550_v42 = vpop.permute.xlu0 %10116  ;;  %v15560_v58 = vpop.permute.xlu2 %10166 }
 0x7f3   :  { %v15552_v60 = vpop.permute.xlu1 %10111  ;;  %v20589_v57 = vunpack.i.h.bf16 %v15560_v58  ;;  %v20591_v34 = vunpack.i.l.bf16 %v15560_v58 }
 0x7fa   :  { %v15556_v37 = vpop.permute.xlu0 %10131  ;;  %v15566_v17 = vpop.permute.xlu2 %10181 }
 0x7fb   :  { %v15558_v7 = vpop.permute.xlu1 %10126 }
 0x802   :  { %v15562_v23 = vpop.permute.xlu0 %10146 }
 0x803   :  { %21047 = vst [vmem:[#allocation10_spill] sm:$0xff] %v15562_v23  ;;  %v15564_v22 = vpop.permute.xlu1 %10141 }
 0x804   :  { %21048 = vst [vmem:[#allocation39_spill] sm:$0xff] %v15564_v22 }
 0x80a   :  { %v10162_v28 = vpop.permute.xlu0 %10161 }
 0x80b   :  { %v10164_v15 = vunpack.i.h.bf16 %v10162_v28  ;;  %v10163_v2 = vunpack.i.l.bf16 %v10162_v28  ;;  %v15569_v45 = vpop.permute.xlu1 %10156 }
 0x80c   :  { %21049 = vst [vmem:[#allocation12_spill] sm:$0xff] %v15569_v45  ;;  %v20590_v27 = vunpack.i.h.bf16 %v15569_v45 }
 0x80d   :  { %v4263_v23 = vsel %vm654_vm0, %v10164_v15, %v20589_v57  ;;  %v4262_v11 = vsel %vm654_vm0, %v10163_v2, %v20591_v34  ;;  %v21050_v57 = vunpack.i.l.bf16 %v15569_v45  ;;  %v4177_v45 = vsel %vm565_vm1, %v21052_v8, %v10109_v49 }
 0x80e   :  { %v4265_v28 = vsel %vm654_vm0, %v20590_v27, %v10164_v15  ;;  %4628 = vmatpush.msra.mxu1 %v4263_v23  ;;  %v10108_v23 = vunpack.i.l.bf16 %v10107_v55  ;;  %v10054_v27 = vunpack.i.h.bf16 %v15526_v6  ;;  %v21053_v55 = vunpack.i.l.bf16 %v15552_v60  ;;  %v15615_v15 = vpop.permute.xlu2 %10196 }
 0x80f   :  { %4582 = vmatpush.msrb.mxu3 %v4265_v28  ;;  %v4264_v22 = vsel %vm654_vm0, %v21050_v57, %v10163_v2  ;;  %v21051_v28 = vunpack.i.h.bf16 %v15552_v60  ;;  %v10053_v57 = vunpack.i.l.bf16 %v15526_v6  ;;  %v9999_v8 = vunpack.i.h.bf16 %v15474_v38 }
 0x810   :  { %4629 = vmatpush.msra.mxu1 %v4262_v11  ;;  %v20596_v6 = vunpack.i.l.bf16 %v15476_v50 }
 0x811   :  { %4583 = vmatpush.msrb.mxu3 %v4264_v22  ;;  %v4175_v4 = vsel %vm565_vm1, %v10109_v49, %v21051_v28  ;;  %v4174_v22 = vsel %vm565_vm1, %v10108_v23, %v21053_v55  ;;  %v20595_v28 = vunpack.i.h.bf16 %v15476_v50  ;;  %v4176_v49 = vsel %vm565_vm1, %v21054_v24, %v10108_v23 }
 0x812   :  { %v15600_v34 = vpop.permute.xlu0 %10176  ;;  %4630 = vmatpush.msra.mxu1 %v4175_v4  ;;  %v20597_v24 = vunpack.i.h.bf16 %v15440_v46  ;;  %v9998_v23 = vunpack.i.l.bf16 %v15474_v38  ;;  %v4088_v55 = vsel %vm476_vm2, %v20596_v6, %v10053_v57  ;;  %v9889_v6 = vunpack.i.h.bf16 %v15394_v40 }
 0x813   :  { %v15608_v2 = vpop.permute.xlu1 %10171  ;;  %4584 = vmatpush.msrb.mxu3 %v4177_v45  ;;  %v21055_v45 = vunpack.i.h.bf16 %v15524_v47  ;;  %v4089_v11 = vsel %vm476_vm2, %v20595_v28, %v10054_v27  ;;  %v21057_v28 = vunpack.i.h.bf16 %v15478_v12 }
 0x814   :  { %4631 = vmatpush.msra.mxu1 %v4174_v22  ;;  %v21056_v22 = vunpack.i.l.bf16 %v15524_v47  ;;  %v3999_v38 = vsel %vm387_vm3, %v9999_v8, %v20597_v24 }
 0x815   :  { %4585 = vmatpush.msrb.mxu3 %v4176_v49  ;;  %v4087_v4 = vsel %vm476_vm2, %v10054_v27, %v21055_v45  ;;  %v20599_v45 = vunpack.i.l.bf16 %v15478_v12  ;;  %v20598_v27 = vunpack.i.l.bf16 %v15440_v46 }
 0x816   :  { %4632 = vmatpush.msra.mxu1 %v4087_v4  ;;  %v4086_v49 = vsel %vm476_vm2, %v10053_v57, %v21056_v22  ;;  %v20600_v4 = vunpack.i.h.bf16 %v15442_v56  ;;  %v4001_v57 = vsel %vm387_vm3, %v21057_v28, %v9999_v8  ;;  %v21060_v8 = vunpack.i.l.bf16 %v15426_v61 }
 0x817   :  { %4586 = vmatpush.msrb.mxu3 %v4089_v11  ;;  %v3998_v24 = vsel %vm387_vm3, %v9998_v23, %v20598_v27  ;;  %v4000_v28 = vsel %vm387_vm3, %v20599_v45, %v9998_v23  ;;  %v15676_v27 = vpop.permute.xlu2 %10211  ;;  %v21058_v11 = vunpack.i.h.bf16 %v15426_v61 }
 0x818   :  { %4633 = vmatpush.msra.mxu1 %v4086_v49  ;;  %v9944_v49 = vunpack.i.h.bf16 %v15392_v43 }
 0x819   :  { %4587 = vmatpush.msrb.mxu3 %v4088_v55 }
 0x81a   :  { %v15650_v22 = vpop.permute.xlu0 %10191  ;;  %4634 = vmatpush.msra.mxu1 %v3999_v38  ;;  %v9943_v38 = vunpack.i.l.bf16 %v15392_v43  ;;  %v3913_v23 = vsel %vm298_vm4, %v21058_v11, %v9944_v49  ;;  %v9888_v43 = vunpack.i.l.bf16 %v15394_v40  ;;  %v9834_v11 = vunpack.i.h.bf16 %v15342_v9 }
 0x81b   :  { %v15658_v55 = vpop.permute.xlu1 %10186  ;;  %4588 = vmatpush.msrb.mxu3 %v4001_v57  ;;  %v3911_v57 = vsel %vm298_vm4, %v9944_v49, %v20600_v4  ;;  %v20603_v4 = vunpack.i.h.bf16 %v15344_v25  ;;  %v21061_v49 = vunpack.i.h.bf16 %v15390_v53 }
 0x81c   :  { %4635 = vmatpush.msra.mxu1 %v3998_v24  ;;  %v20607_v24 = vunpack.i.l.bf16 %v15390_v53  ;;  %v3912_v12 = vsel %vm298_vm4, %v21060_v8, %v9943_v38 }
 0x81d   :  { %4589 = vmatpush.msrb.mxu3 %v4000_v28  ;;  %v21059_v28 = vunpack.i.l.bf16 %v15442_v56  ;;  %v3823_v40 = vsel %vm209_vm5, %v9889_v6, %v21061_v49  ;;  %v3825_v8 = vsel %vm209_vm5, %v20603_v4, %v9889_v6 }
 0x81e   :  { %4636 = vmatpush.msra.mxu1 %v3911_v57  ;;  %v20604_v57 = vunpack.i.l.bf16 %v15344_v25  ;;  %v3822_v49 = vsel %vm209_vm5, %v9888_v43, %v20607_v24 }
 0x81f   :  { %4590 = vmatpush.msrb.mxu3 %v3913_v23  ;;  %v3910_v45 = vsel %vm298_vm4, %v9943_v38, %v21059_v28  ;;  %v20608_v23 = vunpack.i.l.bf16 %v15346_v48 }
 0x820   :  { %4637 = vmatpush.msra.mxu1 %v3910_v45  ;;  %v20606_v45 = vunpack.i.h.bf16 %v15318_v0  ;;  %v3824_v6 = vsel %vm209_vm5, %v20604_v57, %v9888_v43 }
 0x821   :  { %4591 = vmatpush.msrb.mxu3 %v3912_v12  ;;  %v9833_v12 = vunpack.i.l.bf16 %v15342_v9 }
 0x822   :  { %v15700_v28 = vpop.permute.xlu0 %10206  ;;  %4638 = vmatpush.msra.mxu1 %v3823_v40  ;;  %v20605_v40 = vunpack.i.l.bf16 %v15318_v0  ;;  %v3735_v9 = vsel %vm120_vm6, %v9834_v11, %v20606_v45 }
 0x823   :  { %v15708_v38 = vpop.permute.xlu1 %10201  ;;  %4592 = vmatpush.msrb.mxu3 %v3825_v8  ;;  %v21062_v8 = vunpack.i.h.bf16 %v15346_v48  ;;  %v21063_v48 = vunpack.i.l.bf16 %v15676_v27 }
 0x824   :  { %4639 = vmatpush.msra.mxu1 %v3822_v49  ;;  %v3734_v43 = vsel %vm120_vm6, %v9833_v12, %v20605_v40  ;;  %v15732_v49 = vpop.permute.xlu2 %10226  ;;  %v20612_v40 = vunpack.i.h.bf16 %v15676_v27 }
 0x825   :  { %4593 = vmatpush.msrb.mxu3 %v3824_v6  ;;  %v3737_v4 = vsel %vm120_vm6, %v21062_v8, %v9834_v11  ;;  %v3736_v6 = vsel %vm120_vm6, %v20608_v23, %v9833_v12  ;;  %v20609_v11 = vunpack.i.h.bf16 %v15732_v49  ;;  %v15746_v12 = vld [vmem:[%s20403_s2 + $0x40] sm:$0xff] }
 0x826   :  { %4640 = vmatpush.msra.mxu1 %v3735_v9 }
 0x827   :  { %4594 = vmatpush.msrb.mxu3 %v3737_v4 }
 0x828   :  { %4641 = vmatpush.msra.mxu1 %v3734_v43  ;;  %v10174_v43 = vunpack.i.h.bf16 %v15608_v2 }
 0x829   :  { %4595 = vmatpush.msrb.mxu3 %v3736_v6 }
 0x82a   :  { %v10222_v57 = vpop.permute.xlu0 %10221  ;;  %4642 = vmatpush.msra.mxu1 %v15118_v5  ;;  %v10228_v5 = vunpack.i.l.bf16 %v15732_v49 }
 0x82b   :  { %v10224_v4 = vunpack.i.h.bf16 %v10222_v57  ;;  %v10223_v9 = vunpack.i.l.bf16 %v10222_v57  ;;  %v10217_v8 = vpop.permute.xlu1 %10216  ;;  %4596 = vmatpush.msrb.mxu3 %v15129_v44  ;;  %v10179_v57 = vunpack.i.h.bf16 %v15600_v34 }
 0x82c   :  { %v10219_v45 = vunpack.i.h.bf16 %v10217_v8  ;;  %v10218_v24 = vunpack.i.l.bf16 %v10217_v8  ;;  %4643 = vmatpush.msra.mxu1 %v15100_v63  ;;  %v10178_v63 = vunpack.i.l.bf16 %v15600_v34  ;;  %v20613_v34 = vunpack.i.l.bf16 %v15566_v17 }
 0x82d   :  { %4597 = vmatpush.msrb.mxu3 %v15109_v41  ;;  %v4349_v44 = vsel %vm743_vm7, %v10224_v4, %v20609_v11  ;;  %4644 = vmatmul.f32.vlgmr.msra.gmra.mxu1 %v15746_v12  ;;  %v10173_v41 = vunpack.i.l.bf16 %v15608_v2  ;;  %v4348_v23 = vsel %vm743_vm7, %v10223_v9, %v10228_v5  ;;  %v20615_v11 = vunpack.i.h.bf16 %v15566_v17 }
 0x82e   :  { %v4353_v6 = vsel %vm743_vm7, %v20612_v40, %v10219_v45  ;;  %v4351_v8 = vsel %vm743_vm7, %v10219_v45, %v10224_v4  ;;  %v4352_v40 = vsel %vm743_vm7, %v21063_v48, %v10218_v24  ;;  %v4350_v45 = vsel %vm743_vm7, %v10218_v24, %v10223_v9  ;;  %4598 = vmatmul.f32.vlgmr.msrb.gmra.mxu3 %v15746_v12 }
 0x82f   :  { %4711 = vmatpush.msra.mxu3 %v4349_v44  ;;  %4619 = vmatpush.msra.mxu2 %v4353_v6  ;;  %v10119_v2 = vunpack.i.h.bf16 %v15550_v42  ;;  %v21064_v4 = vunpack.i.h.bf16 %v15560_v58  ;;  %v20614_v6 = vunpack.i.h.bf16 %v15558_v7  ;;  %v4259_v48 = vsel %vm654_vm0, %v10174_v43, %v10179_v57 }
 0x830   :  { %4665 = vmatpush.msrb.mxu0 %v4351_v8  ;;  %v4257_v24 = vsel %vm654_vm0, %v10179_v57, %v20615_v11  ;;  %v21065_v8 = vunpack.i.l.bf16 %v15560_v58  ;;  %v10128_v57 = vunpack.i.l.bf16 %v15558_v7  ;;  %v4256_v58 = vsel %vm654_vm0, %v10178_v63, %v20613_v34 }
 0x831   :  { %4712 = vmatpush.msra.mxu3 %v4348_v23  ;;  %4620 = vmatpush.msra.mxu2 %v4352_v40  ;;  %v4261_v44 = vsel %vm654_vm0, %v21064_v4, %v10174_v43  ;;  %v10124_v23 = vunpack.i.h.bf16 %v15538_v59  ;;  %v10118_v40 = vunpack.i.l.bf16 %v15550_v42  ;;  %v15802_v43 = vld [vmem:[%s20403_s2 + $0x48] sm:$0xff]  ;;  %v4258_v42 = vsel %vm654_vm0, %v10173_v41, %v10178_v63  ;;  %v15824_v63 = vld [vmem:[%s20403_s2 + $0x50] sm:$0xff] }
 0x832   :  { %4666 = vmatpush.msrb.mxu0 %v4350_v45  ;;  %v4260_v45 = vsel %vm654_vm0, %v21065_v8, %v10173_v41  ;;  %v21066_v8 = vunpack.i.h.bf16 %v15552_v60  ;;  %v10064_v34 = vunpack.i.h.bf16 %v15488_v33  ;;  %v10068_v11 = vunpack.i.l.bf16 %v15536_v20  ;;  %8843 = vmatmul.msk.f32.vlgmr.msra.gmra.mxu2 %vm986_vm8, %v15802_v43 }
 0x833   :  { %4674 = vmatpush.msrb.mxu2 %v4261_v44  ;;  %4766 = vmatpush.msrb.mxu3 %v4257_v24  ;;  %v15793_v9 = vpop.permute.xlu1 %10231  ;;  %v10074_v44 = vunpack.i.h.bf16 %v15534_v52 }
 0x834   :  { %4720 = vmatpush.msra.mxu0 %v4259_v48  ;;  %v10234_v4 = vunpack.i.h.bf16 %v15793_v9  ;;  %v10123_v48 = vunpack.i.l.bf16 %v15538_v59  ;;  %v10233_v24 = vunpack.i.l.bf16 %v15793_v9  ;;  %v4173_v41 = vsel %vm565_vm1, %v21066_v8, %v10119_v2 }
 0x835   :  { %4675 = vmatpush.msrb.mxu2 %v4260_v45  ;;  %8845 = vmatmul.msk.f32.vlgmr.msrb.gmra.mxu0 %vm986_vm8, %v15802_v43  ;;  %v10069_v45 = vunpack.i.h.bf16 %v15536_v20  ;;  %v4171_v59 = vsel %vm565_vm1, %v10119_v2, %v10124_v23  ;;  %v21068_v2 = vunpack.i.l.bf16 %v15552_v60  ;;  %v10188_v60 = vunpack.i.l.bf16 %v15658_v55 }
 0x836   :  { %4721 = vmatpush.msra.mxu0 %v4258_v42  ;;  %4767 = vmatpush.msrb.mxu3 %v4256_v58  ;;  %v4169_v42 = vsel %vm565_vm1, %v10124_v23, %v20614_v6  ;;  %v21067_v58 = vunpack.i.h.bf16 %v15732_v49  ;;  %v10014_v6 = vunpack.i.h.bf16 %v15486_v21  ;;  %v4346_v20 = vsel %vm743_vm7, %v10228_v5, %v10233_v24 }
 0x837   :  { %4676 = vmatpush.msrb.mxu2 %v4173_v41  ;;  %4647 = vmatmul.f32.gmra.mxu1 %v15824_v63  ;;  %v10189_v41 = vunpack.i.h.bf16 %v15658_v55  ;;  %v4172_v23 = vsel %vm565_vm1, %v21068_v2, %v10118_v40  ;;  %v10009_v2 = vunpack.i.h.bf16 %v15490_v16  ;;  %v4081_v49 = vsel %vm476_vm2, %v10069_v45, %v10074_v44  ;;  %v21091_v55 = vld [vmem:[#allocation26_spill] sm:$0xff] }
 0x838   :  { %v4347_v8 = vsel %vm743_vm7, %v21067_v58, %v10234_v4  ;;  %4722 = vmatpush.msra.mxu0 %v4171_v59  ;;  %4768 = vmatpush.msrb.mxu3 %v4169_v42  ;;  %v4170_v58 = vsel %vm565_vm1, %v10118_v40, %v10123_v48  ;;  %v4168_v59 = vsel %vm565_vm1, %v10123_v48, %v10128_v57  ;;  %v10073_v42 = vunpack.i.l.bf16 %v15534_v52 }
 0x839   :  { %4757 = vmatpush.msrb.mxu1 %v4347_v8  ;;  %4677 = vmatpush.msrb.mxu2 %v4172_v23  ;;  %v21069_v40 = vunpack.i.h.bf16 %v15524_v47  ;;  %v10063_v48 = vunpack.i.l.bf16 %v15488_v33  ;;  %v4083_v23 = vsel %vm476_vm2, %v10064_v34, %v10069_v45  ;;  %v10134_v5 = vunpack.i.h.bf16 %v15556_v37 }
 0x83a   :  { %4723 = vmatpush.msra.mxu0 %v4170_v58  ;;  %4769 = vmatpush.msrb.mxu3 %v4168_v59  ;;  %v21070_v33 = vunpack.i.h.bf16 %v15566_v17  ;;  %v10013_v59 = vunpack.i.l.bf16 %v15486_v21  ;;  %v21071_v45 = vunpack.i.l.bf16 %v15524_v47  ;;  %v4080_v21 = vsel %vm476_vm2, %v10068_v11, %v10073_v42 }
 0x83b   :  { %v4085_v8 = vsel %vm476_vm2, %v21069_v40, %v10064_v34  ;;  %4758 = vmatpush.msrb.mxu1 %v4346_v20  ;;  %v10008_v34 = vunpack.i.l.bf16 %v15490_v16  ;;  %4601 = vmatmul.f32.gmra.mxu3 %v15824_v63  ;;  %v4082_v40 = vsel %vm476_vm2, %v10063_v48, %v10068_v11  ;;  %v21072_v16 = vunpack.i.l.bf16 %v15566_v17 }
 0x83c   :  { %4678 = vmatpush.msrb.mxu2 %v4085_v8  ;;  %4724 = vmatpush.msra.mxu0 %v4083_v23  ;;  %v4255_v58 = vsel %vm654_vm0, %v21070_v33, %v10189_v41  ;;  %v4084_v20 = vsel %vm476_vm2, %v21071_v45, %v10063_v48  ;;  %v10019_v8 = vunpack.i.h.bf16 %v15452_v1  ;;  %v10133_v23 = vunpack.i.l.bf16 %v15556_v37 }
 0x83d   :  { %4770 = vmatpush.msrb.mxu3 %v4081_v49  ;;  %4812 = vmatpush.msra.mxu1 %v4255_v58  ;;  %v4254_v47 = vsel %vm654_vm0, %v21072_v16, %v10188_v60  ;;  %v9954_v48 = vunpack.i.h.bf16 %v15438_v14  ;;  %v21073_v49 = vunpack.i.h.bf16 %v15440_v46  ;;  %v3995_v58 = vsel %vm387_vm3, %v10009_v2, %v10014_v6 }
 0x83e   :  { %4679 = vmatpush.msrb.mxu2 %v4084_v20  ;;  %4725 = vmatpush.msra.mxu0 %v4082_v40  ;;  %v10018_v11 = vunpack.i.l.bf16 %v15452_v1  ;;  %v9964_v45 = vunpack.i.h.bf16 %v15454_v10  ;;  %v3993_v17 = vsel %vm387_vm3, %v10014_v6, %v10019_v8  ;;  %v21074_v20 = vunpack.i.h.bf16 %v15558_v7 }
 0x83f   :  { %4771 = vmatpush.msrb.mxu3 %v4080_v21  ;;  %4813 = vmatpush.msra.mxu1 %v4254_v47  ;;  %v3997_v33 = vsel %vm387_vm3, %v21073_v49, %v10009_v2  ;;  %v9959_v2 = vunpack.i.h.bf16 %v15404_v19  ;;  %v21075_v21 = vunpack.i.l.bf16 %v15440_v46  ;;  %v3994_v47 = vsel %vm387_vm3, %v10008_v34, %v10013_v59 }
 0x840   :  { %4680 = vmatpush.msrb.mxu2 %v3997_v33  ;;  %4726 = vmatpush.msra.mxu0 %v3995_v58  ;;  %v4167_v40 = vsel %vm565_vm1, %v21074_v20, %v10134_v5  ;;  %v9953_v6 = vunpack.i.l.bf16 %v15438_v14  ;;  %v3992_v49 = vsel %vm387_vm3, %v10013_v59, %v10018_v11  ;;  %v4166_v46 = vsel %vm565_vm1, %v10128_v57, %v10133_v23 }
 0x841   :  { %4772 = vmatpush.msrb.mxu3 %v3993_v17  ;;  %4814 = vmatpush.msra.mxu1 %v4167_v40  ;;  %v3996_v16 = vsel %vm387_vm3, %v21075_v21, %v10008_v34  ;;  %v9849_v33 = vunpack.i.h.bf16 %v15354_v31  ;;  %v9963_v34 = vunpack.i.l.bf16 %v15454_v10  ;;  %v10079_v14 = vunpack.i.h.bf16 %v15502_v32 }
 0x842   :  { %4681 = vmatpush.msrb.mxu2 %v3996_v16  ;;  %4727 = vmatpush.msra.mxu0 %v3994_v47  ;;  %v3907_v58 = vsel %vm298_vm4, %v9954_v48, %v9959_v2  ;;  %v9958_v59 = vunpack.i.l.bf16 %v15404_v19  ;;  %v9904_v17 = vunpack.i.h.bf16 %v15406_v18  ;;  %v21076_v7 = vunpack.i.h.bf16 %v15442_v56 }
 0x843   :  { %4773 = vmatpush.msrb.mxu3 %v3992_v49  ;;  %4815 = vmatpush.msra.mxu1 %v4166_v46  ;;  %v3905_v20 = vsel %vm298_vm4, %v9959_v2, %v9964_v45  ;;  %v9909_v40 = vunpack.i.h.bf16 %v15402_v51  ;;  %v10078_v19 = vunpack.i.l.bf16 %v15502_v32  ;;  %v10024_v21 = vunpack.i.h.bf16 %v15500_v3 }
 0x844   :  { %v3909_v57 = vsel %vm298_vm4, %v21076_v7, %v9954_v48  ;;  %4728 = vmatpush.msra.mxu0 %v3907_v58  ;;  %v4079_v48 = vsel %vm476_vm2, %v10074_v44, %v10079_v14  ;;  %v9899_v16 = vunpack.i.h.bf16 %v15356_v39  ;;  %v9903_v47 = vunpack.i.l.bf16 %v15406_v18  ;;  %8847 = vmatmul.msk.f32.vlgmr.msra.gmra.mxu3 %vm986_vm8, %v15802_v43 }
 0x845   :  { %4682 = vmatpush.msrb.mxu2 %v3909_v57  ;;  %4774 = vmatpush.msrb.mxu3 %v3905_v20  ;;  %v21077_v2 = vunpack.i.l.bf16 %v15442_v56  ;;  %v3906_v46 = vsel %vm298_vm4, %v9953_v6, %v9958_v59  ;;  %v9908_v58 = vunpack.i.l.bf16 %v15402_v51  ;;  %v10023_v44 = vunpack.i.l.bf16 %v15500_v3 }
 0x846   :  { %4816 = vmatpush.msra.mxu1 %v4079_v48  ;;  %4729 = vmatpush.msra.mxu0 %v3906_v46  ;;  %v3904_v18 = vsel %vm298_vm4, %v9958_v59, %v9963_v34  ;;  %v4078_v56 = vsel %vm476_vm2, %v10073_v42, %v10078_v19  ;;  %v9844_v7 = vunpack.i.h.bf16 %v15358_v62  ;;  %v21078_v57 = vunpack.i.h.bf16 %v15390_v53 }
 0x847   :  { %v3908_v49 = vsel %vm298_vm4, %v21077_v2, %v9953_v6  ;;  %v9898_v6 = vunpack.i.l.bf16 %v15356_v39  ;;  %4775 = vmatpush.msrb.mxu3 %v3904_v18  ;;  %v3819_v59 = vsel %vm209_vm5, %v9899_v16, %v9904_v17  ;;  %v3817_v52 = vsel %vm209_vm5, %v9904_v17, %v9909_v40  ;;  %v16015_v17 = vld [vmem:[%s20403_s2 + $0x58] sm:$0xff]  ;;  %8849 = vmatmul.msk.f32.vlgmr.msrb.gmra.mxu1 %vm986_vm8, %v15802_v43 }
 0x848   :  { %4683 = vmatpush.msrb.mxu2 %v3908_v49  ;;  %4817 = vmatpush.msra.mxu1 %v4078_v56  ;;  %v3821_v20 = vsel %vm209_vm5, %v21078_v57, %v9899_v16  ;;  %v3991_v39 = vsel %vm387_vm3, %v10019_v8, %v10024_v21  ;;  %v9969_v42 = vunpack.i.h.bf16 %v15450_v35  ;;  %v21079_v48 = vunpack.i.l.bf16 %v15390_v53  ;;  %v10237_v57 = vpop.permute.xlu0 %10236 }
 0x849   :  { %4730 = vmatpush.msra.mxu0 %v3819_v59  ;;  %4776 = vmatpush.msrb.mxu3 %v3817_v52  ;;  %v3818_v2 = vsel %vm209_vm5, %v9898_v6, %v9903_v47  ;;  %v9854_v49 = vunpack.i.h.bf16 %v15326_v13  ;;  %v9843_v8 = vunpack.i.l.bf16 %v15358_v62  ;;  %v3816_v53 = vsel %vm209_vm5, %v9903_v47, %v9908_v58  ;;  %v10242_v52 = vpop.permute.xlu2 %10241 }
 0x84a   :  { %4684 = vmatpush.msrb.mxu2 %v3821_v20  ;;  %4818 = vmatpush.msra.mxu1 %v3991_v39  ;;  %v3820_v16 = vsel %vm209_vm5, %v21079_v48, %v9898_v6  ;;  %v3990_v46 = vsel %vm387_vm3, %v10018_v11, %v10023_v44  ;;  %v9848_v18 = vunpack.i.l.bf16 %v15354_v31  ;;  %v3731_v62 = vsel %vm120_vm6, %v9844_v7, %v9849_v33  ;;  %v16056_v20 = vpop.permute.xlu1 %10246 }
 0x84b   :  { %4731 = vmatpush.msra.mxu0 %v3818_v2  ;;  %4777 = vmatpush.msrb.mxu3 %v3816_v53  ;;  %v9968_v56 = vunpack.i.l.bf16 %v15450_v35  ;;  %v21080_v47 = vunpack.i.h.bf16 %v15318_v0  ;;  %v3729_v31 = vsel %vm120_vm6, %v9849_v33, %v9854_v49  ;;  %v3903_v11 = vsel %vm298_vm4, %v9964_v45, %v9969_v42 }
 0x84c   :  { %4685 = vmatpush.msrb.mxu2 %v3820_v16  ;;  %4819 = vmatpush.msra.mxu1 %v3990_v46  ;;  %v9853_v6 = vunpack.i.l.bf16 %v15326_v13  ;;  %v3730_v45 = vsel %vm120_vm6, %v9843_v8, %v9848_v18  ;;  %v9914_v59 = vunpack.i.h.bf16 %v15368_v30  ;;  %v10239_v48 = vunpack.i.h.bf16 %v10237_v57 }
 0x84d   :  { %8844 = vmatmul.msk.f32.gmra.mxu2 %vm986_vm8, %v16015_v17  ;;  %v3733_v1 = vsel %vm120_vm6, %v21080_v47, %v9844_v7  ;;  %4732 = vmatpush.msra.mxu0 %v3731_v62  ;;  %v21081_v7 = vunpack.i.l.bf16 %v15318_v0  ;;  %v3902_v39 = vsel %vm298_vm4, %v9963_v34, %v9968_v56  ;;  %v9913_v16 = vunpack.i.l.bf16 %v15368_v30  ;;  %v21084_v47 = vld [vmem:[#allocation16_spill] sm:$0xff] }
 0x84e   :  { %4686 = vmatpush.msrb.mxu2 %v3733_v1  ;;  %4778 = vmatpush.msrb.mxu3 %v3729_v31  ;;  %v3728_v0 = vsel %vm120_vm6, %v9848_v18, %v9853_v6  ;;  %v10249_v2 = vunpack.i.h.bf16 %v16056_v20  ;;  %v3815_v10 = vsel %vm209_vm5, %v9909_v40, %v9914_v59  ;;  %v10244_v53 = vunpack.i.h.bf16 %v10242_v52  ;;  %v21083_v18 = vld [vmem:[#allocation20_spill] sm:$0xff] }
 0x84f   :  { %4820 = vmatpush.msra.mxu1 %v3903_v11  ;;  %8846 = vmatmul.msk.f32.gmra.mxu0 %vm986_vm8, %v16015_v17  ;;  %v3732_v33 = vsel %vm120_vm6, %v21081_v7, %v9843_v8  ;;  %v21082_v8 = vld [vmem:[#allocation5_spill] sm:$0xff]  ;;  %v10238_v46 = vunpack.i.l.bf16 %v10237_v57  ;;  %v10248_v62 = vunpack.i.l.bf16 %v16056_v20  ;;  %v10243_v40 = vunpack.i.l.bf16 %v10242_v52  ;;  %v21086_v1 = vld [vmem:[#allocation28_spill] sm:$0xff] }
 0x850   :  { %4687 = vmatpush.msrb.mxu2 %v3732_v33  ;;  %8848 = vmatmul.msk.f32.gmra.mxu3 %vm986_vm8, %v16015_v17  ;;  %v9859_v34 = vunpack.i.h.bf16 %v21082_v8  ;;  %v4343_v31 = vsel %vm743_vm7, %v10239_v48, %v10244_v53  ;;  %v9858_v11 = vunpack.i.l.bf16 %v21082_v8  ;;  %v4345_v57 = vsel %vm743_vm7, %v10234_v4, %v10239_v48  ;;  %v21087_v48 = vld [vmem:[#allocation39_spill] sm:$0xff] }
 0x851   :  { %4733 = vmatpush.msra.mxu0 %v3730_v45  ;;  %4779 = vmatpush.msrb.mxu3 %v3728_v0  ;;  %v4341_v51 = vsel %vm743_vm7, %v10244_v53, %v10249_v2  ;;  %v4342_v4 = vsel %vm743_vm7, %v10238_v46, %v10243_v40  ;;  %v10204_v33 = vunpack.i.h.bf16 %v15708_v38  ;;  %v4344_v45 = vsel %vm743_vm7, %v10233_v24, %v10238_v46  ;;  %v21088_v46 = vld [vmem:[#allocation10_spill] sm:$0xff] }
 0x852   :  { %4821 = vmatpush.msra.mxu1 %v3902_v39  ;;  %4688 = vmatpush.msrb.mxu2 %v15116_v29  ;;  %v21085_v29 = vld [vmem:[#allocation22_spill] sm:$0xff]  ;;  %v3727_v7 = vsel %vm120_vm6, %v9854_v49, %v9859_v34  ;;  %v4340_v13 = vsel %vm743_vm7, %v10243_v40, %v10248_v62  ;;  %v10199_v52 = vunpack.i.h.bf16 %v15615_v15  ;;  %v10193_v49 = vunpack.i.l.bf16 %v15650_v22  ;;  %v16128_v39 = vpop.permute.xlu0 %10251 }
 0x853   :  { %4734 = vmatpush.msra.mxu0 %v15175_v36  ;;  %4780 = vmatpush.msrb.mxu3 %v21083_v18  ;;  %v3814_v36 = vsel %vm209_vm5, %v9908_v58, %v9913_v16  ;;  %v10194_v58 = vunpack.i.h.bf16 %v15650_v22  ;;  %v10203_v0 = vunpack.i.l.bf16 %v15708_v38  ;;  %v3726_v9 = vsel %vm120_vm6, %v9853_v6, %v9858_v11  ;;  %v21089_v6 = vld [vmem:[#allocation46_spill] sm:$0xff] }
 0x854   :  { %4822 = vmatpush.msra.mxu1 %v3815_v10  ;;  %4689 = vmatpush.msrb.mxu2 %v21084_v47  ;;  %v10198_v24 = vunpack.i.l.bf16 %v15615_v15  ;;  %v10144_v22 = vunpack.i.h.bf16 %v21087_v48  ;;  %v10149_v18 = vunpack.i.h.bf16 %v21088_v46  ;;  %v4249_v15 = vsel %vm654_vm0, %v10199_v52, %v10204_v33 }
 0x855   :  { %4735 = vmatpush.msra.mxu0 %v21085_v29  ;;  %4781 = vmatpush.msrb.mxu3 %v21086_v1  ;;  %v4253_v10 = vsel %vm654_vm0, %v10189_v41, %v10194_v58  ;;  %v4251_v53 = vsel %vm654_vm0, %v10194_v58, %v10199_v52  ;;  %v10139_v47 = vunpack.i.h.bf16 %v21089_v6  ;;  %v10254_v29 = vunpack.i.h.bf16 %v16128_v39 }
 0x856   :  { %4823 = vmatpush.msra.mxu1 %v3814_v36  ;;  %4690 = vmatmul.f32.vlgmr.msrb.gmra.mxu2 %v15746_v12  ;;  %v21090_v36 = vld [vmem:[#allocation24_spill] sm:$0xff]  ;;  %v4252_v41 = vsel %vm654_vm0, %v10188_v60, %v10193_v49  ;;  %v4250_v40 = vsel %vm654_vm0, %v10193_v49, %v10198_v24  ;;  %v10138_v1 = vunpack.i.l.bf16 %v21089_v6  ;;  %v10084_v58 = vunpack.i.h.bf16 %v21091_v55 }
 0x857   :  { %4849 = vmatpush.msrb.mxu0 %v4343_v31  ;;  %4803 = vmatpush.msra.mxu2 %v4345_v57  ;;  %v10148_v31 = vunpack.i.l.bf16 %v21088_v46  ;;  %v10143_v57 = vunpack.i.l.bf16 %v21087_v48  ;;  %v10253_v60 = vunpack.i.l.bf16 %v16128_v39  ;;  %v4161_v49 = vsel %vm565_vm1, %v10144_v22, %v10149_v18 }
 0x858   :  { %4895 = vmatpush.msra.mxu3 %v4341_v51  ;;  %4824 = vmatpush.msra.mxu1 %v3727_v7  ;;  %v4248_v51 = vsel %vm654_vm0, %v10198_v24, %v10203_v0  ;;  %v21092_v7 = vld [vmem:[#allocation13_spill] sm:$0xff]  ;;  %v4164_v24 = vsel %vm565_vm1, %v10133_v23, %v10138_v1  ;;  %v10208_v37 = vunpack.i.l.bf16 %v15700_v28  ;;  %v4077_v6 = vsel %vm476_vm2, %v10079_v14, %v10084_v58 }
 0x859   :  { %4850 = vmatpush.msrb.mxu0 %v4342_v4  ;;  %4804 = vmatpush.msra.mxu2 %v4344_v45  ;;  %v4165_v4 = vsel %vm565_vm1, %v10134_v5, %v10139_v47  ;;  %v4163_v45 = vsel %vm565_vm1, %v10139_v47, %v10144_v22  ;;  %v4339_v5 = vsel %vm743_vm7, %v10249_v2, %v10254_v29  ;;  %v10083_v22 = vunpack.i.l.bf16 %v21091_v55  ;;  %v21094_v2 = vld [vmem:[#allocation25_spill] sm:$0xff]  ;;  %v21095_v47 = vld [vmem:[#allocation23_spill] sm:$0xff] }
 0x85a   :  { %4896 = vmatpush.msra.mxu3 %v4340_v13  ;;  %4736 = vmatmul.f32.vlgmr.msra.gmra.mxu0 %v15746_v12  ;;  %v21093_v13 = vld [vmem:[#allocation18_spill] sm:$0xff]  ;;  %v4338_v23 = vsel %vm743_vm7, %v10248_v62, %v10253_v60  ;;  %v21097_v62 = vld [vmem:[#allocation31_spill] sm:$0xff]  ;;  %v4246_v32 = vsel %vm654_vm0, %v10203_v0, %v10208_v37 }
 0x85b   :  { %8850 = vmatmul.msk.f32.gmra.mxu1 %vm986_vm8, %v16015_v17  ;;  %4782 = vmatmul.f32.vlgmr.msrb.gmra.mxu3 %v15746_v12  ;;  %v10089_v52 = vunpack.i.h.bf16 %v21093_v13  ;;  %v10088_v48 = vunpack.i.l.bf16 %v21093_v13  ;;  %v4076_v55 = vsel %vm476_vm2, %v10078_v19, %v10083_v22  ;;  %v21100_v0 = vld [vmem:[#allocation19_spill] sm:$0xff] }
 0x85c   :  { %4825 = vmatpush.msra.mxu1 %v3726_v9  ;;  %4858 = vmatpush.msrb.mxu2 %v4253_v10  ;;  %v10209_v9 = vunpack.i.h.bf16 %v15700_v28  ;;  %v4162_v10 = vsel %vm565_vm1, %v10138_v1, %v10143_v57  ;;  %v21096_v1 = vld [vmem:[#allocation11_spill] sm:$0xff]  ;;  %v21126_v28 = vld [vmem:[#allocation34_spill] sm:$0xff] }
 0x85d   :  { %4904 = vmatpush.msra.mxu0 %v4251_v53  ;;  %4950 = vmatpush.msrb.mxu3 %v4249_v15  ;;  %v4160_v53 = vsel %vm565_vm1, %v10143_v57, %v10148_v31  ;;  %v10094_v15 = vunpack.i.h.bf16 %v21094_v2  ;;  %v10039_v57 = vunpack.i.h.bf16 %v21096_v1  ;;  %v10038_v19 = vunpack.i.l.bf16 %v21096_v1 }
 0x85e   :  { %4826 = vmatpush.msra.mxu1 %v21090_v36  ;;  %4859 = vmatpush.msrb.mxu2 %v4252_v41  ;;  %v10029_v36 = vunpack.i.h.bf16 %v21095_v47  ;;  %v4075_v41 = vsel %vm476_vm2, %v10084_v58, %v10089_v52  ;;  %v4247_v14 = vsel %vm654_vm0, %v10204_v33, %v10209_v9  ;;  %v4074_v58 = vsel %vm476_vm2, %v10083_v22, %v10088_v48  ;;  %v21101_v22 = vld [vmem:[#allocation3_spill] sm:$0xff] }
 0x85f   :  { %4905 = vmatpush.msra.mxu0 %v4250_v40  ;;  %4951 = vmatpush.msrb.mxu3 %v4248_v51  ;;  %v10093_v40 = vunpack.i.l.bf16 %v21094_v2  ;;  %v4073_v20 = vsel %vm476_vm2, %v10089_v52, %v10094_v15  ;;  %v10034_v51 = vunpack.i.h.bf16 %v21097_v62 }
 0x860   :  { %4827 = vmatpush.msra.mxu1 %v21092_v7  ;;  %4860 = vmatpush.msrb.mxu2 %v4165_v4  ;;  %v10028_v7 = vunpack.i.l.bf16 %v21095_v47  ;;  %v21098_v4 = vld [vmem:[#allocation7_spill] sm:$0xff]  ;;  %v3989_v13 = vsel %vm387_vm3, %v10024_v21, %v10029_v36  ;;  %v21103_v47 = vld [vmem:[#allocation14_spill] sm:$0xff] }
 0x861   :  { %4906 = vmatpush.msra.mxu0 %v4163_v45  ;;  %4952 = vmatpush.msrb.mxu3 %v4161_v49  ;;  %v10154_v45 = vunpack.i.h.bf16 %v21098_v4  ;;  %v4072_v33 = vsel %vm476_vm2, %v10088_v48, %v10093_v40  ;;  %v3987_v52 = vsel %vm387_vm3, %v10029_v36, %v10034_v51  ;;  %v10033_v49 = vunpack.i.l.bf16 %v21097_v62 }
 0x862   :  { %4693 = vmatmul.f32.gmra.mxu2 %v15824_v63  ;;  %4941 = vmatpush.msrb.mxu1 %v4339_v5  ;;  %v21099_v5 = vld [vmem:[#allocation21_spill] sm:$0xff]  ;;  %v3985_v38 = vsel %vm387_vm3, %v10034_v51, %v10039_v57  ;;  %v9924_v48 = vunpack.i.h.bf16 %v21100_v0  ;;  %v9974_v36 = vunpack.i.h.bf16 %v21103_v47 }
 0x863   :  { %4861 = vmatpush.msrb.mxu2 %v4164_v24  ;;  %4907 = vmatpush.msra.mxu0 %v4162_v10  ;;  %v9979_v24 = vunpack.i.h.bf16 %v21099_v5  ;;  %v4159_v21 = vsel %vm565_vm1, %v10149_v18, %v10154_v45  ;;  %v9984_v10 = vunpack.i.h.bf16 %v21101_v22  ;;  %v3988_v18 = vsel %vm387_vm3, %v10023_v44, %v10028_v7 }
 0x864   :  { %4953 = vmatpush.msrb.mxu3 %v4160_v53  ;;  %4942 = vmatpush.msrb.mxu1 %v4338_v23  ;;  %v10153_v53 = vunpack.i.l.bf16 %v21098_v4  ;;  %v21102_v23 = vld [vmem:[#allocation6_spill] sm:$0xff]  ;;  %v3984_v51 = vsel %vm387_vm3, %v10033_v49, %v10038_v19  ;;  %v9973_v44 = vunpack.i.l.bf16 %v21103_v47  ;;  %v21107_v47 = vld [vmem:[#allocation33_spill] sm:$0xff]  ;;  %v21130_v4 = vld [vmem:[#allocation4_spill] sm:$0xff] }
 0x865   :  { %4862 = vmatpush.msrb.mxu2 %v4077_v6  ;;  %4828 = vmatmul.f32.vlgmr.msra.gmra.mxu1 %v15746_v12  ;;  %v10099_v6 = vunpack.i.h.bf16 %v21102_v23  ;;  %v10098_v62 = vunpack.i.l.bf16 %v21102_v23  ;;  %v3897_v46 = vsel %vm298_vm4, %v9979_v24, %v9984_v10 }
 0x866   :  { %4908 = vmatpush.msra.mxu0 %v4075_v41  ;;  %4954 = vmatpush.msrb.mxu3 %v4073_v20  ;;  %v9978_v41 = vunpack.i.l.bf16 %v21099_v5  ;;  %v3986_v20 = vsel %vm387_vm3, %v10028_v7, %v10033_v49  ;;  %v4158_v3 = vsel %vm565_vm1, %v10148_v31, %v10153_v53  ;;  %v3901_v7 = vsel %vm298_vm4, %v9969_v42, %v9974_v36  ;;  %v21106_v49 = vld [vmem:[#allocation41_spill] sm:$0xff] }
 0x867   :  { %4996 = vmatpush.msra.mxu1 %v4247_v14  ;;  %4863 = vmatpush.msrb.mxu2 %v4076_v55  ;;  %v9983_v14 = vunpack.i.l.bf16 %v21101_v22  ;;  %v21104_v55 = vld [vmem:[#allocation8_spill] sm:$0xff]  ;;  %v4071_v31 = vsel %vm476_vm2, %v10094_v15, %v10099_v6  ;;  %v3900_v42 = vsel %vm298_vm4, %v9968_v56, %v9973_v44  ;;  %v9929_v5 = vunpack.i.h.bf16 %v21106_v49 }
 0x868   :  { %4909 = vmatpush.msra.mxu0 %v4074_v58  ;;  %4955 = vmatpush.msrb.mxu3 %v4072_v33  ;;  %v9919_v58 = vunpack.i.h.bf16 %v21104_v55  ;;  %v3899_v33 = vsel %vm298_vm4, %v9974_v36, %v9979_v24  ;;  %v9918_v24 = vunpack.i.l.bf16 %v21104_v55  ;;  %v4070_v35 = vsel %vm476_vm2, %v10093_v40, %v10098_v62  ;;  %v21115_v22 = vld [vmem:[#allocation32_spill] sm:$0xff] }
 0x869   :  { %4997 = vmatpush.msra.mxu1 %v4246_v32  ;;  %4864 = vmatpush.msrb.mxu2 %v3989_v13  ;;  %v21105_v32 = vld [vmem:[#allocation17_spill] sm:$0xff]  ;;  %v3896_v15 = vsel %vm298_vm4, %v9978_v41, %v9983_v14  ;;  %v9923_v56 = vunpack.i.l.bf16 %v21100_v0  ;;  %v9864_v36 = vunpack.i.h.bf16 %v21107_v47  ;;  %v3809_v2 = vsel %vm209_vm5, %v9924_v48, %v9929_v5  ;;  %v21108_v0 = vld [vmem:[#allocation30_spill] sm:$0xff] }
 0x86a   :  { %4910 = vmatpush.msra.mxu0 %v3987_v52  ;;  %4956 = vmatpush.msrb.mxu3 %v3985_v38  ;;  %v10044_v13 = vunpack.i.h.bf16 %v21105_v32  ;;  %v3898_v52 = vsel %vm298_vm4, %v9973_v44, %v9978_v41  ;;  %v3813_v38 = vsel %vm209_vm5, %v9914_v59, %v9919_v58  ;;  %v10043_v41 = vunpack.i.l.bf16 %v21105_v32 }
 0x86b   :  { %4998 = vmatpush.msra.mxu1 %v4159_v21  ;;  %4739 = vmatmul.f32.gmra.mxu0 %v15824_v63  ;;  %v3811_v21 = vsel %vm209_vm5, %v9919_v58, %v9924_v48  ;;  %v9928_v59 = vunpack.i.l.bf16 %v21106_v49  ;;  %v3812_v48 = vsel %vm209_vm5, %v9913_v16, %v9918_v24  ;;  %v3810_v44 = vsel %vm209_vm5, %v9918_v24, %v9923_v56  ;;  %v21110_v58 = vld [vmem:[#allocation35_spill] sm:$0xff] }
 0x86c   :  { %8851 = vmatmul.msk.f32.vlgmr.msra.gmra.mxu2 %vm986_vm8, %v15802_v43  ;;  %4911 = vmatpush.msra.mxu0 %v3986_v20  ;;  %v3983_v40 = vsel %vm387_vm3, %v10039_v57, %v10044_v13  ;;  %v9863_v20 = vunpack.i.l.bf16 %v21107_v47  ;;  %v3982_v30 = vsel %vm387_vm3, %v10038_v19, %v10043_v41  ;;  %v3725_v16 = vsel %vm120_vm6, %v9859_v34, %v9864_v36  ;;  %v21111_v19 = vld [vmem:[#allocation15_spill] sm:$0xff] }
 0x86d   :  { %4865 = vmatpush.msrb.mxu2 %v3988_v18  ;;  %4957 = vmatpush.msrb.mxu3 %v3984_v51  ;;  %v9874_v18 = vunpack.i.h.bf16 %v21108_v0  ;;  %v21109_v51 = vld [vmem:[#allocation36_spill] sm:$0xff]  ;;  %v3808_v55 = vsel %vm209_vm5, %v9923_v56, %v9928_v59  ;;  %v21113_v56 = vld [vmem:[#allocation42_spill] sm:$0xff]  ;;  %v21135_v32 = vunpack.i.h.bf16 %v15344_v25 }
 0x86e   :  { %4999 = vmatpush.msra.mxu1 %v4158_v3  ;;  %4912 = vmatpush.msra.mxu0 %v3899_v33  ;;  %v9869_v57 = vunpack.i.h.bf16 %v21109_v51  ;;  %v9873_v3 = vunpack.i.l.bf16 %v21108_v0  ;;  %v9868_v33 = vunpack.i.l.bf16 %v21109_v51  ;;  %v9878_v51 = vunpack.i.l.bf16 %v21115_v22  ;;  %v21124_v0 = vld [vmem:[#allocation29_spill] sm:$0xff] }
 0x86f   :  { %4866 = vmatpush.msrb.mxu2 %v3901_v7  ;;  %4958 = vmatpush.msrb.mxu3 %v3897_v46  ;;  %v9989_v7 = vunpack.i.h.bf16 %v21110_v58 }
 0x870   :  { %5000 = vmatpush.msra.mxu1 %v4071_v31  ;;  %4913 = vmatpush.msra.mxu0 %v3898_v52  ;;  %v3723_v46 = vsel %vm120_vm6, %v9864_v36, %v9869_v57  ;;  %v3721_v1 = vsel %vm120_vm6, %v9869_v57, %v9874_v18  ;;  %v9988_v31 = vunpack.i.l.bf16 %v21110_v58  ;;  %v3724_v52 = vsel %vm120_vm6, %v9858_v11, %v9863_v20 }
 0x871   :  { %4867 = vmatpush.msrb.mxu2 %v3900_v42  ;;  %4959 = vmatpush.msrb.mxu3 %v3896_v15  ;;  %v9934_v42 = vunpack.i.h.bf16 %v21111_v19  ;;  %v3895_v34 = vsel %vm298_vm4, %v9984_v10, %v9989_v7  ;;  %v3722_v49 = vsel %vm120_vm6, %v9863_v20, %v9868_v33  ;;  %v3720_v24 = vsel %vm120_vm6, %v9868_v33, %v9873_v3  ;;  %v10262_v15 = vpop.permute.xlu1 %10261  ;;  %v10257_v10 = vpop.permute.xlu2 %10256  ;;  %v21117_v20 = vld [vmem:[#allocation27_spill] sm:$0xff] }
 0x872   :  { %5001 = vmatpush.msra.mxu1 %v4070_v35  ;;  %4914 = vmatpush.msra.mxu0 %v3811_v21  ;;  %v3894_v8 = vsel %vm298_vm4, %v9983_v14, %v9988_v31  ;;  %v9933_v11 = vunpack.i.l.bf16 %v21111_v19  ;;  %v21112_v35 = vld [vmem:[#allocation43_spill] sm:$0xff]  ;;  %v10264_v47 = vunpack.i.h.bf16 %v10262_v15  ;;  %v9879_v14 = vunpack.i.h.bf16 %v21115_v22  ;;  %v21141_v19 = vld [vmem:[#allocation37_spill] sm:$0xff] }
 0x873   :  { %4868 = vmatpush.msrb.mxu2 %v3813_v38  ;;  %4960 = vmatpush.msrb.mxu3 %v3809_v2  ;;  %v21114_v38 = vld [vmem:[#allocation47_spill] sm:$0xff]  ;;  %v3807_v21 = vsel %vm209_vm5, %v9929_v5, %v9934_v42  ;;  %v10259_v36 = vunpack.i.h.bf16 %v10257_v10  ;;  %v21116_v2 = vld [vmem:[#allocation38_spill] sm:$0xff]  ;;  %v10258_v57 = vunpack.i.l.bf16 %v10257_v10  ;;  %v3718_v39 = vsel %vm120_vm6, %v9873_v3, %v9878_v51 }
 0x874   :  { %5002 = vmatpush.msra.mxu1 %v3983_v40  ;;  %4785 = vmatmul.f32.gmra.mxu3 %v15824_v63  ;;  %v10263_v40 = vunpack.i.l.bf16 %v10262_v15  ;;  %v3806_v5 = vsel %vm209_vm5, %v9928_v59, %v9933_v11  ;;  %v21119_v59 = vunpack.i.h.bf16 %v15676_v27  ;;  %v21125_v3 = vunpack.i.h.bf16 %v15544_v26 }
 0x875   :  { %8852 = vmatmul.msk.f32.gmra.mxu2 %vm986_vm8, %v16015_v17  ;;  %8853 = vmatmul.msk.f32.vlgmr.msrb.gmra.mxu0 %vm986_vm8, %v15802_v43  ;;  %v21129_v15 = vunpack.i.l.bf16 %v15476_v50 }
 0x876   :  { %4869 = vmatpush.msrb.mxu2 %v3812_v48  ;;  %4915 = vmatpush.msra.mxu0 %v3810_v44  ;;  %v21118_v48 = vld [vmem:[#allocation45_spill] sm:$0xff]  ;;  %v4337_v44 = vsel %vm743_vm7, %v10254_v29, %v10259_v36  ;;  %v3719_v29 = vsel %vm120_vm6, %v9874_v18, %v9879_v14  ;;  %v4334_v33 = vsel %vm743_vm7, %v10258_v57, %v10263_v40  ;;  %v21121_v18 = vld [vmem:[#allocation12_spill] sm:$0xff] }
 0x877   :  { %4961 = vmatpush.msrb.mxu3 %v3808_v55  ;;  %5003 = vmatpush.msra.mxu1 %v3982_v30  ;;  %v4335_v55 = vsel %vm743_vm7, %v10259_v36, %v10264_v47  ;;  %v4355_v30 = vsel %vm743_vm7, %v10264_v47, %v21119_v59 }
 0x878   :  { %4870 = vmatpush.msrb.mxu2 %v3725_v16  ;;  %4916 = vmatpush.msra.mxu0 %v3723_v46  ;;  %v4336_v16 = vsel %vm743_vm7, %v10253_v60, %v10258_v57  ;;  %v21120_v46 = vunpack.i.l.bf16 %v15676_v27  ;;  %v21123_v27 = vunpack.i.l.bf16 %v21121_v18 }
 0x879   :  { %4962 = vmatpush.msrb.mxu3 %v3721_v1  ;;  %5004 = vmatpush.msra.mxu1 %v3895_v34  ;;  %v21122_v34 = vunpack.i.h.bf16 %v21121_v18 }
 0x87a   :  { %4871 = vmatpush.msrb.mxu2 %v3724_v52  ;;  %4917 = vmatpush.msra.mxu0 %v3722_v49  ;;  %v4354_v1 = vsel %vm743_vm7, %v10263_v40, %v21120_v46  ;;  %v4266_v52 = vsel %vm654_vm0, %v10208_v37, %v21123_v27  ;;  %v21127_v37 = vunpack.i.l.bf16 %v15544_v26  ;;  %v4090_v26 = vsel %vm476_vm2, %v10098_v62, %v21129_v15 }
 0x87b   :  { %4963 = vmatpush.msrb.mxu3 %v3720_v24  ;;  %5005 = vmatpush.msra.mxu1 %v3894_v8  ;;  %v4267_v60 = vsel %vm654_vm0, %v10209_v9, %v21122_v34  ;;  %v4179_v9 = vsel %vm565_vm1, %v10154_v45, %v21125_v3  ;;  %v21128_v24 = vunpack.i.h.bf16 %v15476_v50  ;;  %v21132_v50 = vunpack.i.l.bf16 %v21130_v4 }
 0x87c   :  { %4872 = vmatpush.msrb.mxu2 %v21112_v35  ;;  %4918 = vmatpush.msra.mxu0 %v21113_v56  ;;  %v4178_v49 = vsel %vm565_vm1, %v10153_v53, %v21127_v37  ;;  %v21131_v53 = vunpack.i.h.bf16 %v21130_v4  ;;  %v21133_v62 = vunpack.i.h.bf16 %v15426_v61  ;;  %v21134_v8 = vunpack.i.l.bf16 %v15426_v61 }
 0x87d   :  { %4964 = vmatpush.msrb.mxu3 %v21114_v38  ;;  %5006 = vmatpush.msra.mxu1 %v3807_v21  ;;  %v4091_v45 = vsel %vm476_vm2, %v10099_v6, %v21128_v24  ;;  %v4002_v23 = vsel %vm387_vm3, %v10043_v41, %v21132_v50  ;;  %v3827_v41 = vsel %vm209_vm5, %v9934_v42, %v21135_v32  ;;  %v21136_v61 = vunpack.i.l.bf16 %v15344_v25  ;;  %v21140_v25 = vld [vmem:[#allocation40_spill] sm:$0xff] }
 0x87e   :  { %8854 = vmatmul.msk.f32.gmra.mxu0 %vm986_vm8, %v16015_v17  ;;  %4831 = vmatmul.f32.gmra.mxu1 %v15824_v63  ;;  %v4003_v6 = vsel %vm387_vm3, %v10044_v13, %v21131_v53  ;;  %v3915_v13 = vsel %vm298_vm4, %v9989_v7, %v21133_v62  ;;  %v3914_v10 = vsel %vm298_vm4, %v9988_v31, %v21134_v8  ;;  %v21137_v7 = vld [vmem:[#allocation44_spill] sm:$0xff] }
 0x87f   :  { %4873 = vmatpush.msrb.mxu2 %v21116_v2  ;;  %4919 = vmatpush.msra.mxu0 %v21117_v20  ;;  %v3826_v58 = vsel %vm209_vm5, %v9933_v11, %v21136_v61  ;;  %v21138_v31 = vunpack.i.h.bf16 %v21137_v7  ;;  %v21139_v35 = vunpack.i.l.bf16 %v21137_v7 }
 0x880   :  { %4965 = vmatpush.msrb.mxu3 %v21118_v48  ;;  %5007 = vmatpush.msra.mxu1 %v3806_v5 }
 0x881   :  { %4874 = vmatmul.f32.vlgmr.msrb.gmra.mxu2 %v15746_v12  ;;  %8855 = vmatmul.msk.f32.vlgmr.msra.gmra.mxu3 %vm986_vm8, %v15802_v43  ;;  %v3739_v42 = vsel %vm120_vm6, %v9879_v14, %v21138_v31  ;;  %v3738_v56 = vsel %vm120_vm6, %v9878_v51, %v21139_v35 }
 0x882   :  { %4987 = vmatpush.msra.mxu2 %v4337_v44  ;;  %5033 = vmatpush.msrb.mxu0 %v4335_v55 }
 0x883   :  { %5079 = vmatpush.msra.mxu3 %v4355_v30  ;;  %5008 = vmatpush.msra.mxu1 %v3719_v29 }
 0x884   :  { %4988 = vmatpush.msra.mxu2 %v4336_v16  ;;  %5034 = vmatpush.msrb.mxu0 %v4334_v33 }
 0x885   :  { %5080 = vmatpush.msra.mxu3 %v4354_v1  ;;  %5009 = vmatpush.msra.mxu1 %v3718_v39  ;;  %v8865_v1 = vld [vmem:[%s20406_s6 + $0x2] ss:$4 sm:$0xff] }
 0x886   :  { %5042 = vmatpush.msrb.mxu2 %v4267_v60  ;;  %4920 = vmatmul.f32.vlgmr.msra.gmra.mxu0 %v15746_v12  ;;  %v16579_v60 = vperm.slane %v8865_v1, 0  ;;  %v16597_v15 = vperm.slane %v8865_v1, 3  ;;  %v16605_v50 = vperm.slane %v8865_v1, 4 }
 0x887   :  { %8857 = vmatmul.msk.f32.vlgmr.msrb.gmra.mxu1 %vm986_vm8, %v15802_v43 }
 0x888   :  { %5010 = vmatpush.msra.mxu1 %v21124_v0  ;;  %5043 = vmatpush.msrb.mxu2 %v4266_v52  ;;  %v16583_v52 = vperm.slane %v8865_v1, 1 }
 0x889   :  { %4877 = vmatmul.f32.gmra.mxu2 %v15824_v63  ;;  %8856 = vmatmul.msk.f32.gmra.mxu3 %vm986_vm8, %v16015_v17 }
 0x88a   :  { %5011 = vmatpush.msra.mxu1 %v21126_v28  ;;  %5044 = vmatpush.msrb.mxu2 %v4179_v9  ;;  %v16587_v9 = vperm.slane %v8865_v1, 2 }
 0x88c   :  { %5045 = vmatpush.msrb.mxu2 %v4178_v49 }
 0x88e   :  { %5046 = vmatpush.msrb.mxu2 %v4091_v45  ;;  %4923 = vmatmul.f32.gmra.mxu0 %v15824_v63 }
 0x88f   :  { %8858 = vmatmul.msk.f32.gmra.mxu1 %vm986_vm8, %v16015_v17 }
 0x890   :  { %5047 = vmatpush.msrb.mxu2 %v4090_v26 }
 0x891   :  { %8859 = vmatmul.msk.f32.vlgmr.msra.gmra.mxu2 %vm986_vm8, %v15802_v43  ;;  %4966 = vmatmul.f32.vlgmr.msrb.gmra.mxu3 %v15746_v12 }
 0x892   :  { %5048 = vmatpush.msrb.mxu2 %v4003_v6 }
 0x894   :  { %5049 = vmatpush.msrb.mxu2 %v4002_v23 }
 0x896   :  { %5050 = vmatpush.msrb.mxu2 %v3915_v13  ;;  %8861 = vmatmul.msk.f32.vlgmr.msrb.gmra.mxu0 %vm986_vm8, %v15802_v43 }
 0x897   :  { %5012 = vmatmul.f32.vlgmr.msra.gmra.mxu1 %v15746_v12 }
 0x898   :  { %5051 = vmatpush.msrb.mxu2 %v3914_v10 }
 0x899   :  { %8860 = vmatmul.msk.f32.gmra.mxu2 %vm986_vm8, %v16015_v17  ;;  %4969 = vmatmul.f32.gmra.mxu3 %v15824_v63 }
 0x89a   :  { %5052 = vmatpush.msrb.mxu2 %v3827_v41 }
 0x89c   :  { %5053 = vmatpush.msrb.mxu2 %v3826_v58 }
 0x89e   :  { %5054 = vmatpush.msrb.mxu2 %v3739_v42  ;;  %8862 = vmatmul.msk.f32.gmra.mxu0 %vm986_vm8, %v16015_v17  ;;  %v16619_v42 = vperm.slane %v8865_v1, 5 }
 0x89f   :  { %5015 = vmatmul.f32.gmra.mxu1 %v15824_v63 }
 0x8a0   :  { %5055 = vmatpush.msrb.mxu2 %v3738_v56 }
 0x8a1   :  { %8863 = vmatmul.msk.f32.vlgmr.msra.gmra.mxu3 %vm986_vm8, %v15802_v43 }
 0x8a2   :  { %5056 = vmatpush.msrb.mxu2 %v21140_v25 }
 0x8a4   :  { %5057 = vmatpush.msrb.mxu2 %v21141_v19 }
 0x8a5   :  { %5058 = vmatmul.f32.vlgmr.msrb.gmra.mxu2 %v15746_v12 }
 0x8a9   :  { %8864 = vmatmul.msk.f32.gmra.mxu3 %vm986_vm8, %v16015_v17 }
 0x8aa   :  { %v4645_v47 = vpop.f32.mrf.mxu1 }
 0x8ad   :  { %5061 = vmatmul.f32.gmra.mxu2 %v15824_v63 }
 0x8b1   :  { %v4599_v38 = vpop.f32.mrf.mxu3 }
 0x8b2   :  { %v4668_v21 = vpop.f32.mrf.mxu0 }
 0x8b3   :  { %v16581_v27 = vadd.f32 %v4668_v21, %v4645_v47 }
 0x8b4   :  { %v4648_v2 = vpop.f32.mrf.mxu1 }
 0x8b5   :  { %v4622_v11 = vpop.f32.mrf.mxu2  ;;  %v5117_v49 = vmul.f32 %v16583_v52, %v16581_v27 }
 0x8b6   :  { %v16577_v34 = vadd.f32 %v4622_v11, %v4599_v38  ;;  %v16627_v11 = vperm.slane %v8865_v1, 6 }
 0x8b8   :  { %v5116_v37 = vmul.f32 %v16579_v60, %v16577_v34 }
 0x8ba   :  { %v5138_v53 = vadd.f32 %v5117_v49, %v5116_v37 }
 0x8be   :  { %v4602_v14 = vpop.f32.mrf.mxu3 }
 0x8c4   :  { %v4760_v48 = vpop.f32.mrf.mxu1 }
 0x8c7   :  { %v4714_v20 = vpop.f32.mrf.mxu3 }
 0x8cc   :  { %v4671_v36 = vpop.f32.mrf.mxu0 }
 0x8cd   :  { %v16601_v4 = vadd.f32 %v4671_v36, %v4648_v2  ;;  %v8866_v2 = vld [vmem:[%s20406_s6 + $0x22] ss:$4 sm:$0x7] }
 0x8cf   :  { %v5128_v41 = vmul.f32 %v16583_v52, %v16601_v4 }
 0x8d0   :  { %v4625_v22 = vpop.f32.mrf.mxu2 }
 0x8d1   :  { %v16599_v26 = vadd.f32 %v4625_v22, %v4602_v14 }
 0x8d3   :  { %v4717_v51 = vpop.f32.mrf.mxu3  ;;  %v5127_v32 = vmul.f32 %v16579_v60, %v16599_v26 }
 0x8d5   :  { %v5150_v38 = vadd.f32 %v5128_v41, %v5127_v32  ;;  %v16672_v41 = vperm.slane %v8866_v2, 2 }
 0x8d7   :  { %v4737_v43 = vpop.f32.mrf.mxu0 }
 0x8d8   :  { %v4763_v57 = vpop.f32.mrf.mxu1  ;;  %v16595_v45 = vadd.f32 %v4760_v48, %v4737_v43  ;;  %v16642_v43 = vperm.slane %v8865_v1, 7 }
 0x8d9   :  { %v4691_v40 = vpop.f32.mrf.mxu2 }
 0x8da   :  { %v16585_v3 = vadd.f32 %v4714_v20, %v4691_v40  ;;  %v5119_v10 = vmul.f32 %v16597_v15, %v16595_v45 }
 0x8dc   :  { %v5118_v24 = vmul.f32 %v16587_v9, %v16585_v3 }
 0x8de   :  { %v4783_v17 = vpop.f32.mrf.mxu3  ;;  %v5139_v8 = vadd.f32 %v5138_v53, %v5118_v24 }
 0x8e0   :  { %v5140_v25 = vadd.f32 %v5139_v8, %v5119_v10 }
 0x8e2   :  { %v4829_v63 = vpop.f32.mrf.mxu1 }
 0x8e5   :  { %v4694_v5 = vpop.f32.mrf.mxu2 }
 0x8e6   :  { %v16607_v62 = vadd.f32 %v4717_v51, %v4694_v5 }
 0x8e8   :  { %v4740_v12 = vpop.f32.mrf.mxu0  ;;  %v5129_v35 = vmul.f32 %v16587_v9, %v16607_v62 }
 0x8e9   :  { %v16623_v56 = vadd.f32 %v4763_v57, %v4740_v12 }
 0x8ea   :  { %v5151_v14 = vadd.f32 %v5150_v38, %v5129_v35 }
 0x8eb   :  { %v5130_v36 = vmul.f32 %v16597_v15, %v16623_v56 }
 0x8ef   :  { %v4806_v44 = vpop.f32.mrf.mxu2 }
 0x8f0   :  { %v16603_v6 = vadd.f32 %v4806_v44, %v4783_v17 }
 0x8f2   :  { %v4852_v55 = vpop.f32.mrf.mxu0  ;;  %v5120_v7 = vmul.f32 %v16605_v50, %v16603_v6 }
 0x8f3   :  { %v16617_v31 = vadd.f32 %v4852_v55, %v4829_v63  ;;  %v16650_v55 = vperm.slane %v8866_v2, 0  ;;  %v5152_v63 = vadd.f32 %v5151_v14, %v5130_v36 }
 0x8f4   :  { %v5141_v47 = vadd.f32 %v5140_v25, %v5120_v7 }
 0x8f5   :  { %v5121_v22 = vmul.f32 %v16619_v42, %v16617_v31 }
 0x8f7   :  { %v4786_v30 = vpop.f32.mrf.mxu3  ;;  %v5142_v44 = vadd.f32 %v5141_v47, %v5121_v22 }
 0x8f8   :  { %v4809_v59 = vpop.f32.mrf.mxu2 }
 0x8f9   :  { %v16629_v21 = vadd.f32 %v4809_v59, %v4786_v30 }
 0x8fb   :  { %v4855_v29 = vpop.f32.mrf.mxu0  ;;  %v4832_v16 = vpop.f32.mrf.mxu1  ;;  %v5131_v5 = vmul.f32 %v16605_v50, %v16629_v21 }
 0x8fc   :  { %v16646_v51 = vadd.f32 %v4855_v29, %v4832_v16 }
 0x8fd   :  { %v5153_v1 = vadd.f32 %v5152_v63, %v5131_v5  ;;  %v11242_v63 = vmov 800.0  }
 0x8fe   :  { %v5132_v29 = vmul.f32 %v16619_v42, %v16646_v51  ;;  %11157 = vrcp.f32 %v11242_v63 }
 0x900   :  { %v5154_v53 = vadd.f32 %v5153_v1, %v5132_v29  ;;  %v16690_v1 = vpop.permute.xlu2 %5312 }
 0x903   :  { %v4921_v39 = vpop.f32.mrf.mxu0 }
 0x904   :  { %v4875_v33 = vpop.f32.mrf.mxu2  ;;  %v4898_v46 = vpop.f32.mrf.mxu3 }
 0x905   :  { %v4944_v18 = vpop.f32.mrf.mxu1  ;;  %v16625_v19 = vadd.f32 %v4898_v46, %v4875_v33 }
 0x906   :  { %v16640_v20 = vadd.f32 %v4944_v18, %v4921_v39  ;;  %v16662_v18 = vperm.slane %v8866_v2, 1 }
 0x907   :  { %v5122_v40 = vmul.f32 %v16627_v11, %v16625_v19 }
 0x908   :  { %v5123_v33 = vmul.f32 %v16642_v43, %v16640_v20 }
 0x909   :  { %v5143_v30 = vadd.f32 %v5142_v44, %v5122_v40 }
 0x90b   :  { %v4924_v23 = vpop.f32.mrf.mxu0  ;;  %v5144_v37 = vadd.f32 %v5143_v30, %v5123_v33 }
 0x90c   :  { %v4878_v0 = vpop.f32.mrf.mxu2  ;;  %v4901_v28 = vpop.f32.mrf.mxu3 }
 0x90d   :  { %v4947_v13 = vpop.f32.mrf.mxu1  ;;  %v16654_v46 = vadd.f32 %v4901_v28, %v4878_v0 }
 0x90e   :  { %v16666_v24 = vadd.f32 %v4947_v13, %v4924_v23 }
 0x90f   :  { %v5133_v49 = vmul.f32 %v16627_v11, %v16654_v46 }
 0x910   :  { %v5134_v35 = vmul.f32 %v16642_v43, %v16666_v24 }
 0x911   :  { %v5155_v7 = vadd.f32 %v5154_v53, %v5133_v49  ;;  %v16696_v53 = vpop.permute.xlu2 %5352 }
 0x913   :  { %v5036_v48 = vpop.f32.mrf.mxu0  ;;  %v5156_v22 = vadd.f32 %v5155_v7, %v5134_v35 }
 0x914   :  { %v4967_v61 = vpop.f32.mrf.mxu3  ;;  %v4990_v58 = vpop.f32.mrf.mxu2 }
 0x915   :  { %v5013_v12 = vpop.f32.mrf.mxu1  ;;  %v16648_v17 = vadd.f32 %v4990_v58, %v4967_v61 }
 0x916   :  { %v16660_v39 = vadd.f32 %v5036_v48, %v5013_v12 }
 0x917   :  { %v5124_v16 = vmul.f32 %v16650_v55, %v16648_v17 }
 0x918   :  { %v5125_v8 = vmul.f32 %v16662_v18, %v16660_v39 }
 0x919   :  { %v5145_v28 = vadd.f32 %v5144_v37, %v5124_v16  ;;  %v16692_v16 = vpop.permute.xlu0 %5347 }
 0x91b   :  { %v5039_v32 = vpop.f32.mrf.mxu0  ;;  %v5146_v23 = vadd.f32 %v5145_v28, %v5125_v8 }
 0x91c   :  { %v4970_v57 = vpop.f32.mrf.mxu3  ;;  %v4993_v59 = vpop.f32.mrf.mxu2 }
 0x91d   :  { %v16670_v10 = vadd.f32 %v4993_v59, %v4970_v57  ;;  %v5016_v61 = vpop.f32.mrf.mxu1  ;;  %v11158_v59 = vpop.eup %11157 }
 0x91e   :  { %v16680_v38 = vadd.f32 %v5039_v32, %v5016_v61  ;;  %v5163_v30 = vmul.f32 800.0, %v11158_v59  ;;  %vm5167_vm11 = vweird.f32 %v11158_v59 }
 0x91f   :  { %v5135_v13 = vmul.f32 %v16650_v55, %v16670_v10 }
 0x920   :  { %v5136_v40 = vmul.f32 %v16662_v18, %v16680_v38  ;;  %v5164_v33 = vsub.f32 1.0, %v5163_v30 }
 0x921   :  { %v5157_v2 = vadd.f32 %v5156_v22, %v5135_v13 }
 0x922   :  { %v5165_v29 = vmul.f32 %v11158_v59, %v5164_v33 }
 0x923   :  { %v5158_v12 = vadd.f32 %v5157_v2, %v5136_v40 }
 0x924   :  { %v5082_v0 = vpop.f32.mrf.mxu3  ;;  %v5166_v37 = vadd.f32 %v11158_v59, %v5165_v29 }
 0x926   :  { %v16694_v49 = vsel %vm5167_vm11, %v11158_v59, %v5166_v37 }
 0x928   :  { %v5059_v58 = vpop.f32.mrf.mxu2 }
 0x929   :  { %v16676_v25 = vadd.f32 %v5082_v0, %v5059_v58 }
 0x92b   :  { %v5126_v47 = vmul.f32 %v16672_v41, %v16676_v25 }
 0x92c   :  { %v5085_v36 = vpop.f32.mrf.mxu3 }
 0x92d   :  { %v5147_v14 = vadd.f32 %v5146_v23, %v5126_v47 }
 0x92f   :  { %5148 = vadd.xlane.f32.xlu0 %v5147_v14 }
 0x930   :  { %v5062_v48 = vpop.f32.mrf.mxu2 }
 0x931   :  { %v16686_v5 = vadd.f32 %v5085_v36, %v5062_v48 }
 0x933   :  { %v5137_v57 = vmul.f32 %v16672_v41, %v16686_v5 }
 0x935   :  { %v5159_v44 = vadd.f32 %v5158_v12, %v5137_v57 }
 0x937   :  { %5160 = vadd.xlane.f32.xlu2 %v5159_v44 }
 0x9a2   :  { %v5149_v0 = vpop.xlane.xlu0 %5148 }
 0x9a3   :  { %v5169_v28 = vmul.f32 %v16694_v49, %v5149_v0 }
 0x9a5   :  { %v16700_v8 = vsub.f32 %v16577_v34, %v5169_v28  ;;  %v16703_v32 = vsub.f32 %v16581_v27, %v5169_v28  ;;  %v16706_v61 = vsub.f32 %v16585_v3, %v5169_v28  ;;  %v16709_v58 = vsub.f32 %v16595_v45, %v5169_v28 }
 0x9a6   :  { %v16716_v23 = vsub.f32 %v16603_v6, %v5169_v28  ;;  %v16724_v47 = vsub.f32 %v16617_v31, %v5169_v28  ;;  %v16729_v14 = vsub.f32 %v16625_v19, %v5169_v28  ;;  %v16738_v48 = vsub.f32 %v16640_v20, %v5169_v28 }
 0x9a7   :  { %v5193_v7 = vmul.f32 %v16700_v8, %v16700_v8  ;;  %v5194_v35 = vmul.f32 %v16703_v32, %v16703_v32  ;;  %v5195_v34 = vmul.f32 %v16706_v61, %v16706_v61  ;;  %v5196_v22 = vmul.f32 %v16709_v58, %v16709_v58 }
 0x9a8   :  { %v5197_v6 = vmul.f32 %v16716_v23, %v16716_v23  ;;  %v5198_v12 = vmul.f32 %v16724_v47, %v16724_v47  ;;  %v16750_v63 = vsub.f32 %v16648_v17, %v5169_v28  ;;  %v5200_v17 = vmul.f32 %v16738_v48, %v16738_v48 }
 0x9a9   :  { %v5215_v13 = vmul.f32 %v5193_v7, %v16579_v60  ;;  %v5216_v3 = vmul.f32 %v5194_v35, %v16583_v52  ;;  %v5217_v36 = vmul.f32 %v5195_v34, %v16587_v9  ;;  %v5218_v19 = vmul.f32 %v5196_v22, %v16597_v15 }
 0x9aa   :  { %v5161_v27 = vpop.xlane.xlu2 %5160  ;;  %v5220_v29 = vmul.f32 %v5198_v12, %v16619_v42  ;;  %v5201_v35 = vmul.f32 %v16750_v63, %v16750_v63 }
 0x9ab   :  { %v5170_v45 = vmul.f32 %v16694_v49, %v5161_v27  ;;  %v5237_v2 = vadd.f32 %v5216_v3, %v5215_v13 }
 0x9ad   :  { %v16735_v40 = vsub.f32 %v16599_v26, %v5170_v45  ;;  %v16741_v31 = vsub.f32 %v16601_v4, %v5170_v45  ;;  %v5238_v57 = vadd.f32 %v5237_v2, %v5217_v36  ;;  %v16747_v44 = vsub.f32 %v16607_v62, %v5170_v45 }
 0x9ae   :  { %v5199_v26 = vmul.f32 %v16729_v14, %v16729_v14  ;;  %v5219_v4 = vmul.f32 %v5197_v6, %v16605_v50  ;;  %v16758_v30 = vsub.f32 %v16623_v56, %v5170_v45  ;;  %v16763_v62 = vsub.f32 %v16660_v39, %v5169_v28 }
 0x9af   :  { %v5204_v20 = vmul.f32 %v16735_v40, %v16735_v40  ;;  %v5239_v59 = vadd.f32 %v5238_v57, %v5218_v19  ;;  %v5205_v33 = vmul.f32 %v16741_v31, %v16741_v31  ;;  %v16769_v0 = vsub.f32 %v16629_v21, %v5170_v45 }
 0x9b0   :  { %v5206_v7 = vmul.f32 %v16747_v44, %v16747_v44  ;;  %v16774_v56 = vsub.f32 %v16676_v25, %v5169_v28  ;;  %v5221_v27 = vmul.f32 %v5199_v26, %v16627_v11  ;;  %v16782_v3 = vsub.f32 %v16646_v51, %v5170_v45 }
 0x9b1   :  { %v5240_v37 = vadd.f32 %v5239_v59, %v5219_v4  ;;  %v5226_v39 = vmul.f32 %v5204_v20, %v16579_v60  ;;  %v5227_v34 = vmul.f32 %v5205_v33, %v16583_v52  ;;  %v5207_v21 = vmul.f32 %v16758_v30, %v16758_v30 }
 0x9b2   :  { %v5202_v25 = vmul.f32 %v16763_v62, %v16763_v62  ;;  %v5222_v28 = vmul.f32 %v5200_v17, %v16642_v43  ;;  %v16790_v22 = vsub.f32 %v16654_v46, %v5170_v45  ;;  %v5208_v52 = vmul.f32 %v16769_v0, %v16769_v0 }
 0x9b3   :  { %v5241_v13 = vadd.f32 %v5240_v37, %v5220_v29  ;;  %v5228_v6 = vmul.f32 %v5206_v7, %v16587_v9  ;;  %v5249_v36 = vadd.f32 %v5227_v34, %v5226_v39  ;;  %v5203_v51 = vmul.f32 %v16774_v56, %v16774_v56 }
 0x9b4   :  { %v5223_v2 = vmul.f32 %v5201_v35, %v16650_v55  ;;  %v16799_v12 = vsub.f32 %v16666_v24, %v5170_v45  ;;  %v5209_v46 = vmul.f32 %v16782_v3, %v16782_v3  ;;  %v5229_v57 = vmul.f32 %v5207_v21, %v16597_v15 }
 0x9b5   :  { %v5242_v60 = vadd.f32 %v5241_v13, %v5221_v27  ;;  %v5250_v26 = vadd.f32 %v5249_v36, %v5228_v6  ;;  %v5224_v20 = vmul.f32 %v5202_v25, %v16662_v18  ;;  %v16806_v9 = vsub.f32 %v16670_v10, %v5170_v45  ;;  %v16832_v6 = vpop.permute.xlu1 %5317 }
 0x9b6   :  { %v5210_v59 = vmul.f32 %v16790_v22, %v16790_v22  ;;  %v5230_v33 = vmul.f32 %v5208_v52, %v16605_v50  ;;  %v5225_v17 = vmul.f32 %v5203_v51, %v16672_v41  ;;  %v16813_v29 = vsub.f32 %v16680_v38, %v5170_v45 }
 0x9b7   :  { %v5243_v19 = vadd.f32 %v5242_v60, %v5222_v28  ;;  %v5251_v24 = vadd.f32 %v5250_v26, %v5229_v57  ;;  %v5211_v15 = vmul.f32 %v16799_v12, %v16799_v12  ;;  %v5231_v7 = vmul.f32 %v5209_v46, %v16619_v42 }
 0x9b8   :  { %v16819_v35 = vsub.f32 %v16686_v5, %v5170_v45  ;;  %v5212_v50 = vmul.f32 %v16806_v9, %v16806_v9  ;;  %v5232_v34 = vmul.f32 %v5210_v59, %v16627_v11  ;;  %v5213_v38 = vmul.f32 %v16813_v29, %v16813_v29 }
 0x9b9   :  { %v5244_v4 = vadd.f32 %v5243_v19, %v5223_v2  ;;  %v5252_v10 = vadd.f32 %v5251_v24, %v5230_v33  ;;  %v5233_v13 = vmul.f32 %v5211_v15, %v16642_v43 }
 0x9ba   :  { %v5214_v42 = vmul.f32 %v16819_v35, %v16819_v35  ;;  %v5234_v5 = vmul.f32 %v5212_v50, %v16650_v55  ;;  %v5235_v25 = vmul.f32 %v5213_v38, %v16662_v18 }
 0x9bb   :  { %v5245_v37 = vadd.f32 %v5244_v4, %v5224_v20  ;;  %v5253_v27 = vadd.f32 %v5252_v10, %v5231_v7 }
 0x9bc   :  { %v5236_v60 = vmul.f32 %v5214_v42, %v16672_v41 }
 0x9bd   :  { %v5246_v39 = vadd.f32 %v5245_v37, %v5225_v17  ;;  %v5254_v21 = vadd.f32 %v5253_v27, %v5232_v34 }
 0x9bf   :  { %5247 = vadd.xlane.f32.xlu1 %v5246_v39  ;;  %v5255_v45 = vadd.f32 %v5254_v21, %v5233_v13 }
 0x9c1   :  { %v5256_v28 = vadd.f32 %v5255_v45, %v5234_v5 }
 0x9c3   :  { %v5257_v11 = vadd.f32 %v5256_v28, %v5235_v25 }
 0x9c5   :  { %v5258_v52 = vadd.f32 %v5257_v11, %v5236_v60 }
 0x9c7   :  { %5259 = vadd.xlane.f32.xlu0 %v5258_v52 }
 0xa32   :  { %v5248_v36 = vpop.xlane.xlu1 %5247 }
 0xa33   :  { %v5261_v43 = vmul.f32 %v5248_v36, %v16694_v49 }
 0xa35   :  { %v5263_v51 = vadd.f32 1e-05, %v5261_v43 }
 0xa37   :  { %11159 = vrsqrt.f32 %v5263_v51  ;;  %vm5271_vm12 = vweird.f32 %v5263_v51 }
 0xa3a   :  { %v5260_v2 = vpop.xlane.xlu0 %5259 }
 0xa3b   :  { %v5262_v55 = vmul.f32 %v5260_v2, %v16694_v49 }
 0xa3d   :  { %v11160_v19 = vpop.eup %11159  ;;  %v5264_v57 = vadd.f32 1e-05, %v5262_v55 }
 0xa3e   :  { %v5266_v46 = vmul.f32 %v11160_v19, %v5263_v51  ;;  %vm5272_vm13 = vweird.f32 %v11160_v19 }
 0xa3f   :  { %11161 = vrsqrt.f32 %v5264_v57  ;;  %vm5273_vm15 = vmor %vm5271_vm12, %vm5272_vm13  ;;  %vm5281_vm9 = vweird.f32 %v5264_v57 }
 0xa40   :  { %v5267_v18 = vmul.f32 %v11160_v19, %v5266_v46 }
 0xa42   :  { %v5268_v26 = vmul.f32 0.5, %v5267_v18 }
 0xa44   :  { %v5269_v41 = vsub.f32 1.5, %v5268_v26 }
 0xa45   :  { %v11162_v4 = vpop.eup %11161 }
 0xa46   :  { %v5270_v20 = vmul.f32 %v11160_v19, %v5269_v41  ;;  %v5276_v33 = vmul.f32 %v11162_v4, %v5264_v57  ;;  %vm5282_vm14 = vweird.f32 %v11162_v4 }
 0xa47   :  { %vm5283_vm10 = vmor %vm5281_vm9, %vm5282_vm14 }
 0xa48   :  { %v16836_v59 = vsel %vm5273_vm15, %v11160_v19, %v5270_v20  ;;  %v5277_v15 = vmul.f32 %v11162_v4, %v5276_v33 }
 0xa49   :  { %v5287_v24 = vmul.f32 %v16836_v59, %v16706_v61  ;;  %v5286_v49 = vmul.f32 %v16836_v59, %v16703_v32  ;;  %v5285_v17 = vmul.f32 %v16836_v59, %v16700_v8  ;;  %v5290_v37 = vmul.f32 %v16836_v59, %v16724_v47 }
 0xa4a   :  { %v5289_v7 = vmul.f32 %v16836_v59, %v16716_v23  ;;  %v5288_v10 = vmul.f32 %v16836_v59, %v16709_v58  ;;  %v5293_v39 = vmul.f32 %v16836_v59, %v16750_v63  ;;  %v5278_v50 = vmul.f32 0.5, %v5277_v15 }
 0xa4b   :  { %v5322_v61 = vmul.f32 %v16690_v1, %v5287_v24  ;;  %v5321_v32 = vmul.f32 %v16690_v1, %v5286_v49  ;;  %v5320_v8 = vmul.f32 %v16690_v1, %v5285_v17  ;;  %v5325_v34 = vmul.f32 %v16690_v1, %v5290_v37 }
 0xa4c   :  { %v5324_v27 = vmul.f32 %v16690_v1, %v5289_v7  ;;  %v5323_v23 = vmul.f32 %v16690_v1, %v5288_v10  ;;  %v5328_v58 = vmul.f32 %v16690_v1, %v5293_v39  ;;  %v5279_v38 = vsub.f32 1.5, %v5278_v50 }
 0xa4d   :  { %v5357_v47 = vadd.f32 %v16692_v16, %v5322_v61  ;;  %v5356_v63 = vadd.f32 %v16692_v16, %v5321_v32  ;;  %v5355_v21 = vadd.f32 %v16692_v16, %v5320_v8  ;;  %v16863_v42 = vadd.f32 %v16692_v16, %v5325_v34 }
 0xa4e   :  { %v5280_v13 = vmul.f32 %v11162_v4, %v5279_v38  ;;  %v16866_v5 = vadd.f32 %v16692_v16, %v5324_v27  ;;  %v16869_v45 = vadd.f32 %v16692_v16, %v5323_v23  ;;  %v16872_v25 = vadd.f32 %v16692_v16, %v5328_v58 }
 0xa4f   :  { %vm5379_vm11 = vcmp.gt.f32.partialorder %v5357_v47, 0.0  ;;  %v5401_v60 = vmul.f32 0.2, %v5357_v47  ;;  %vm5378_vm13 = vcmp.gt.f32.partialorder %v5356_v63, 0.0  ;;  %v5400_v11 = vmul.f32 0.2, %v5356_v63 }
 0xa50   :  { %v16874_v28 = vsel %vm5283_vm10, %v11162_v4, %v5280_v13  ;;  %vm5377_vm12 = vcmp.gt.f32.partialorder %v5355_v21, 0.0  ;;  %v5399_v2 = vmul.f32 0.2, %v5355_v21  ;;  %vm5382_vm15 = vcmp.gt.f32.partialorder %v16863_v42, 0.0 }
 0xa51   :  { %v5298_v52 = vmul.f32 %v16874_v28, %v16747_v44  ;;  %v5297_v36 = vmul.f32 %v16874_v28, %v16741_v31  ;;  %v5296_v43 = vmul.f32 %v16874_v28, %v16735_v40  ;;  %v5301_v51 = vmul.f32 %v16874_v28, %v16782_v3 }
 0xa52   :  { %v5300_v19 = vmul.f32 %v16874_v28, %v16769_v0  ;;  %v5299_v55 = vmul.f32 %v16874_v28, %v16758_v30  ;;  %v16894_v40 = vsel %vm5379_vm11, %v5357_v47, %v5401_v60  ;;  %v16897_v3 = vsel %vm5378_vm13, %v5356_v63, %v5400_v11 }
 0xa53   :  { %v5333_v46 = vmul.f32 %v16832_v6, %v5298_v52  ;;  %v5332_v44 = vmul.f32 %v16832_v6, %v5297_v36  ;;  %v5331_v31 = vmul.f32 %v16832_v6, %v5296_v43  ;;  %v5336_v57 = vmul.f32 %v16832_v6, %v5301_v51  ;;  %21142 = vst [vmem:[#allocation9_spill] sm:$0xff] %v16894_v40 }
 0xa54   :  { %v5335_v0 = vmul.f32 %v16832_v6, %v5300_v19  ;;  %v5334_v30 = vmul.f32 %v16832_v6, %v5299_v55  ;;  %v16906_v4 = vsel %vm5377_vm12, %v5355_v21, %v5399_v2  ;;  %v5404_v33 = vmul.f32 0.2, %v16863_v42 }
 0xa55   :  { %v5368_v18 = vadd.f32 %v16696_v53, %v5333_v46  ;;  %v5367_v26 = vadd.f32 %v16696_v53, %v5332_v44  ;;  %v5366_v41 = vadd.f32 %v16696_v53, %v5331_v31  ;;  %v5371_v20 = vadd.f32 %v16696_v53, %v5336_v57 }
 0xa56   :  { %v5370_v24 = vadd.f32 %v16696_v53, %v5335_v0  ;;  %v5304_v49 = vmul.f32 %v16874_v28, %v16806_v9  ;;  %v5369_v10 = vadd.f32 %v16696_v53, %v5334_v30  ;;  %v5403_v32 = vmul.f32 0.2, %v16866_v5 }
 0xa57   :  { %vm5390_vm14 = vcmp.gt.f32.partialorder %v5368_v18, 0.0  ;;  %v5412_v17 = vmul.f32 0.2, %v5368_v18  ;;  %vm5389_vm9 = vcmp.gt.f32.partialorder %v5367_v26, 0.0  ;;  %v5411_v37 = vmul.f32 0.2, %v5367_v26 }
 0xa58   :  { %vm5388_vm10 = vcmp.gt.f32.partialorder %v5366_v41, 0.0  ;;  %v5410_v15 = vmul.f32 0.2, %v5366_v41  ;;  %v5415_v7 = vmul.f32 0.2, %v5371_v20  ;;  %vm5393_vm11 = vcmp.gt.f32.partialorder %v5371_v20, 0.0 }
 0xa59   :  { %v16913_v39 = vsel %vm5390_vm14, %v5368_v18, %v5412_v17  ;;  %v16915_v61 = vsel %vm5389_vm9, %v5367_v26, %v5411_v37  ;;  %v5339_v34 = vmul.f32 %v16832_v6, %v5304_v49  ;;  %vm5381_vm13 = vcmp.gt.f32.partialorder %v16866_v5, 0.0 }
 0xa5a   :  { %21143 = vst [vmem:[#allocation5_spill] sm:$0xff] %v16913_v39  ;;  %v16920_v50 = vpack.i.bf16 %v16913_v39, %v16894_v40  ;;  %v16924_v9 = vpack.i.bf16 %v16915_v61, %v16897_v3  ;;  %v16926_v8 = vsel %vm5388_vm10, %v5366_v41, %v5410_v15  ;;  %v5414_v27 = vmul.f32 0.2, %v5370_v24 }
 0xa5b   :  { %v16931_v47 = vpack.i.bf16 %v16926_v8, %v16906_v4  ;;  %v5402_v23 = vmul.f32 0.2, %v16869_v45  ;;  %v16939_v58 = vsel %vm5393_vm11, %v5371_v20, %v5415_v7  ;;  %vm5392_vm12 = vcmp.gt.f32.partialorder %v5370_v24, 0.0 }
 0xa5c   :  { %10276 = vrot.lane.b32.xlu2 %v16920_v50, %s11231_s13  ;;  %10271 = vrot.lane.b32.xlu1 %v16924_v9, %s11231_s13  ;;  %21144 = vst [vmem:[#allocation20_spill] sm:$0xff] %v16939_v58  ;;  %vm5380_vm14 = vcmp.gt.f32.partialorder %v16869_v45, 0.0  ;;  %v5413_v38 = vmul.f32 0.2, %v5369_v10  ;;  %vm5391_vm9 = vcmp.gt.f32.partialorder %v5369_v10, 0.0  ;;  %v5292_v63 = vmul.f32 %v16836_v59, %v16738_v48 }
 0xa5d   :  { %10266 = vrot.lane.b32.xlu0 %v16931_v47, %s11231_s13  ;;  %v5303_v13 = vmul.f32 %v16874_v28, %v16799_v12  ;;  %v5291_v21 = vmul.f32 %v16836_v59, %v16729_v14  ;;  %v16953_v60 = vsel %vm5382_vm15, %v16863_v42, %v5404_v33  ;;  %v16956_v11 = vsel %vm5381_vm13, %v16866_v5, %v5403_v32 }
 0xa5e   :  { %21145 = vst [vmem:[#allocation16_spill] sm:$0xff] %v16953_v60  ;;  %v5374_v52 = vadd.f32 %v16696_v53, %v5339_v34  ;;  %v5302_v36 = vmul.f32 %v16874_v28, %v16790_v22  ;;  %v16961_v48 = vsel %vm5392_vm12, %v5370_v24, %v5414_v27  ;;  %v16964_v12 = vsel %vm5380_vm14, %v16869_v45, %v5402_v23 }
 0xa5f   :  { %21146 = vst [vmem:[#allocation22_spill] sm:$0xff] %v16956_v11  ;;  %v5327_v14 = vmul.f32 %v16690_v1, %v5292_v63  ;;  %v5338_v43 = vmul.f32 %v16832_v6, %v5303_v13  ;;  %v16970_v42 = vpack.i.bf16 %v16939_v58, %v16953_v60  ;;  %v16972_v5 = vsel %vm5391_vm9, %v5369_v10, %v5413_v38 }
 0xa60   :  { %21147 = vst [vmem:[#allocation28_spill] sm:$0xff] %v16961_v48  ;;  %v5326_v51 = vmul.f32 %v16690_v1, %v5291_v21  ;;  %v5337_v2 = vmul.f32 %v16832_v6, %v5302_v36  ;;  %v5295_v45 = vmul.f32 %v16836_v59, %v16774_v56  ;;  %v5306_v55 = vmul.f32 %v16874_v28, %v16819_v35 }
 0xa61   :  { %21148 = vst [vmem:[#allocation39_spill] sm:$0xff] %v16964_v12  ;;  %v5362_v22 = vadd.f32 %v16692_v16, %v5327_v14  ;;  %v5373_v19 = vadd.f32 %v16696_v53, %v5338_v43  ;;  %v16984_v46 = vpack.i.bf16 %v16961_v48, %v16956_v11  ;;  %v5418_v44 = vmul.f32 0.2, %v5374_v52 }
 0xa62   :  { %21149 = vst [vmem:[#allocation10_spill] sm:$0xff] %v16972_v5  ;;  %v5361_v31 = vadd.f32 %v16692_v16, %v5326_v51  ;;  %v5372_v57 = vadd.f32 %v16696_v53, %v5337_v2  ;;  %v16990_v0 = vpack.i.bf16 %v16972_v5, %v16964_v12  ;;  %vm5396_vm15 = vcmp.gt.f32.partialorder %v5374_v52, 0.0 }
 0xa63   :  { %v5417_v30 = vmul.f32 0.2, %v5373_v19  ;;  %vm5385_vm10 = vcmp.gt.f32.partialorder %v16872_v25, 0.0  ;;  %v5407_v56 = vmul.f32 0.2, %v16872_v25  ;;  %vm5395_vm11 = vcmp.gt.f32.partialorder %v5373_v19, 0.0 }
 0xa64   :  { %10291 = vrot.lane.b32.xlu2 %v16970_v42, %s11231_s13  ;;  %10286 = vrot.lane.b32.xlu1 %v16984_v46, %s11231_s13  ;;  %v5416_v35 = vmul.f32 0.2, %v5372_v57  ;;  %v5406_v18 = vmul.f32 0.2, %v5362_v22  ;;  %vm5394_vm13 = vcmp.gt.f32.partialorder %v5372_v57, 0.0  ;;  %v5330_v26 = vmul.f32 %v16690_v1, %v5295_v45 }
 0xa65   :  { %10281 = vrot.lane.b32.xlu0 %v16990_v0, %s11231_s13  ;;  %v5341_v41 = vmul.f32 %v16832_v6, %v5306_v55  ;;  %v17002_v20 = vsel %vm5396_vm15, %v5374_v52, %v5418_v44  ;;  %vm5384_vm12 = vcmp.gt.f32.partialorder %v5362_v22, 0.0  ;;  %v5405_v33 = vmul.f32 0.2, %v5361_v31 }
 0xa66   :  { %21150 = vst [vmem:[#allocation46_spill] sm:$0xff] %v17002_v20  ;;  %v5294_v24 = vmul.f32 %v16836_v59, %v16763_v62  ;;  %v17006_v49 = vsel %vm5395_vm11, %v5373_v19, %v5417_v30  ;;  %vm5383_vm14 = vcmp.gt.f32.partialorder %v5361_v31, 0.0  ;;  %v17012_v37 = vsel %vm5385_vm10, %v16872_v25, %v5407_v56 }
 0xa67   :  { %21151 = vst [vmem:[#allocation24_spill] sm:$0xff] %v17006_v49  ;;  %v5376_v17 = vadd.f32 %v16696_v53, %v5341_v41  ;;  %v17014_v15 = vsel %vm5394_vm13, %v5372_v57, %v5416_v35  ;;  %v5305_v7 = vmul.f32 %v16874_v28, %v16813_v29  ;;  %v17021_v62 = vpack.i.bf16 %v17002_v20, %v17012_v37 }
 0xa68   :  { %21152 = vst [vmem:[#allocation26_spill] sm:$0xff] %v17012_v37  ;;  %v5329_v10 = vmul.f32 %v16690_v1, %v5294_v24  ;;  %v17023_v59 = vsel %vm5384_vm12, %v5362_v22, %v5406_v18  ;;  %v5365_v32 = vadd.f32 %v16692_v16, %v5330_v26  ;;  %v17030_v25 = vsel %vm5383_vm14, %v5361_v31, %v5405_v33 }
 0xa69   :  { %21153 = vst [vmem:[#allocation13_spill] sm:$0xff] %v17014_v15  ;;  %v17028_v34 = vpack.i.bf16 %v17006_v49, %v17023_v59  ;;  %v5340_v27 = vmul.f32 %v16832_v6, %v5305_v7  ;;  %v17036_v1 = vpack.i.bf16 %v17014_v15, %v17030_v25  ;;  %v5420_v28 = vmul.f32 0.2, %v5376_v17 }
 0xa6a   :  { %21154 = vst [vmem:[#allocation18_spill] sm:$0xff] %v17023_v59  ;;  %v5364_v29 = vadd.f32 %v16692_v16, %v5329_v10  ;;  %vm5398_vm9 = vcmp.gt.f32.partialorder %v5376_v17, 0.0  ;;  %v5409_v6 = vmul.f32 0.2, %v5365_v32  ;;  %vm5387_vm15 = vcmp.gt.f32.partialorder %v5365_v32, 0.0 }
 0xa6b   :  { %21155 = vst [vmem:[#allocation25_spill] sm:$0xff] %v17030_v25  ;;  %v5375_v23 = vadd.f32 %v16696_v53, %v5340_v27  ;;  %v17045_v63 = vsel %vm5398_vm9, %v5376_v17, %v5420_v28  ;;  %v10600_v10 = vpack.i.bf16 %v16897_v3, %v16906_v4  ;;  %v10610_v28 = vpack.i.bf16 %v16964_v12, %v16972_v5 }
 0xa6c   :  { %10306 = vrot.lane.b32.xlu2 %v17021_v62, %s11231_s13  ;;  %10301 = vrot.lane.b32.xlu1 %v17028_v34, %s11231_s13  ;;  %v5408_v16 = vmul.f32 0.2, %v5364_v29  ;;  %21156 = vst [vmem:[#allocation23_spill] sm:$0xff] %v17045_v63  ;;  %vm5386_vm11 = vcmp.gt.f32.partialorder %v5364_v29, 0.0  ;;  %v17049_v21 = vsel %vm5387_vm15, %v5365_v32, %v5409_v6  ;;  %v10605_v32 = vpack.i.bf16 %v16894_v40, %v16913_v39 }
 0xa6d   :  { %10296 = vrot.lane.b32.xlu0 %v17036_v1, %s11231_s13  ;;  %vm5397_vm10 = vcmp.gt.f32.partialorder %v5375_v23, 0.0  ;;  %v5419_v38 = vmul.f32 0.2, %v5375_v23  ;;  %21158 = vst [vmem:[#allocation31_spill] sm:$0xff] %v17049_v21  ;;  %v17053_v52 = vpack.i.bf16 %v17045_v63, %v17049_v21 }
 0xa6e   :  { %v17055_v53 = vsel %vm5386_vm11, %v5364_v29, %v5408_v16 }
 0xa6f   :  { %v17047_v13 = vsel %vm5397_vm10, %v5375_v23, %v5419_v38  ;;  %21159 = vst [vmem:[#allocation7_spill] sm:$0xff] %v17055_v53  ;;  %v10630_v38 = vpack.i.bf16 %v16953_v60, %v16939_v58 }
 0xa70   :  { %21157 = vst [vmem:[#allocation11_spill] sm:$0xff] %v17047_v13  ;;  %v17059_v36 = vpack.i.bf16 %v17047_v13, %v17055_v53 }
 0xa74   :  { %10316 = vrot.lane.b32.xlu1 %v17053_v52, %s11231_s13  ;;  %10321 = vrot.lane.b32.xlu2 %v16931_v47, %s11232_s24 }
 0xa75   :  { %10311 = vrot.lane.b32.xlu0 %v17059_v36, %s11231_s13 }
 0xa7c   :  { %10331 = vrot.lane.b32.xlu1 %v16920_v50, %s11232_s24  ;;  %10336 = vrot.lane.b32.xlu2 %v16990_v0, %s11232_s24 }
 0xa7d   :  { %10326 = vrot.lane.b32.xlu0 %v16924_v9, %s11232_s24 }
 0xa84   :  { %10346 = vrot.lane.b32.xlu1 %v16970_v42, %s11232_s24  ;;  %10351 = vrot.lane.b32.xlu2 %v17036_v1, %s11232_s24 }
 0xa85   :  { %10341 = vrot.lane.b32.xlu0 %v16984_v46, %s11232_s24 }
 0xa8c   :  { %10361 = vrot.lane.b32.xlu1 %v17021_v62, %s11232_s24  ;;  %10366 = vrot.lane.b32.xlu2 %v17059_v36, %s11232_s24 }
 0xa8d   :  { %10356 = vrot.lane.b32.xlu0 %v17028_v34, %s11232_s24 }
 0xa94   :  { %10376 = vrot.lane.b32.xlu1 %v16931_v47, %s11233_s25  ;;  %10381 = vrot.lane.b32.xlu2 %v16924_v9, %s11233_s25 }
 0xa95   :  { %10371 = vrot.lane.b32.xlu0 %v17053_v52, %s11232_s24 }
 0xa9c   :  { %10391 = vrot.lane.b32.xlu1 %v16990_v0, %s11233_s25  ;;  %10396 = vrot.lane.b32.xlu2 %v16984_v46, %s11233_s25 }
 0xa9d   :  { %10386 = vrot.lane.b32.xlu0 %v16920_v50, %s11233_s25 }
 0xaa4   :  { %10406 = vrot.lane.b32.xlu1 %v17036_v1, %s11233_s25  ;;  %10411 = vrot.lane.b32.xlu2 %v17028_v34, %s11233_s25 }
 0xaa5   :  { %10401 = vrot.lane.b32.xlu0 %v16970_v42, %s11233_s25 }
 0xaac   :  { %10421 = vrot.lane.b32.xlu1 %v17059_v36, %s11233_s25  ;;  %10426 = vrot.lane.b32.xlu2 %v17053_v52, %s11233_s25 }
 0xaad   :  { %10416 = vrot.lane.b32.xlu0 %v17021_v62, %s11233_s25 }
 0xab4   :  { %10436 = vrot.lane.b32.xlu1 %v16924_v9, %s11234_s26  ;;  %10441 = vrot.lane.b32.xlu2 %v16920_v50, %s11234_s26 }
 0xab5   :  { %10431 = vrot.lane.b32.xlu0 %v16931_v47, %s11234_s26 }
 0xab6   :  { %v17115_v14 = vpop.permute.xlu2 %10276 }
 0xabc   :  { %10451 = vrot.lane.b32.xlu1 %v16984_v46, %s11234_s26  ;;  %10456 = vrot.lane.b32.xlu2 %v16970_v42, %s11234_s26 }
 0xabd   :  { %10446 = vrot.lane.b32.xlu0 %v16990_v0, %s11234_s26 }
 0xabe   :  { %v17123_v43 = vpop.permute.xlu2 %10291 }
 0xabf   :  { %21160 = vst [vmem:[#allocation21_spill] sm:$0xff] %v17123_v43 }
 0xac4   :  { %10466 = vrot.lane.b32.xlu1 %v17028_v34, %s11234_s26  ;;  %10471 = vrot.lane.b32.xlu2 %v17021_v62, %s11234_s26 }
 0xac5   :  { %10461 = vrot.lane.b32.xlu0 %v17036_v1, %s11234_s26 }
 0xac6   :  { %v17131_v51 = vpop.permute.xlu2 %10306 }
 0xac7   :  { %21161 = vst [vmem:[#allocation19_spill] sm:$0xff] %v17131_v51 }
 0xacc   :  { %10481 = vrot.lane.b32.xlu1 %v17053_v52, %s11234_s26  ;;  %10486 = vrot.lane.b32.xlu2 %v16931_v47, %s11235_s27 }
 0xacd   :  { %10476 = vrot.lane.b32.xlu0 %v17059_v36, %s11234_s26 }
 0xace   :  { %v17139_v2 = vpop.permute.xlu1 %10271  ;;  %v17141_v22 = vpop.permute.xlu2 %10321 }
 0xacf   :  { %v17143_v19 = vpop.permute.xlu0 %10266 }
 0xad4   :  { %10496 = vrot.lane.b32.xlu1 %v16920_v50, %s11235_s27  ;;  %10501 = vrot.lane.b32.xlu2 %v16990_v0, %s11235_s27 }
 0xad5   :  { %10491 = vrot.lane.b32.xlu0 %v16924_v9, %s11235_s27 }
 0xad6   :  { %v17151_v45 = vpop.permute.xlu1 %10286  ;;  %v17153_v55 = vpop.permute.xlu2 %10336 }
 0xad7   :  { %21162 = vst [vmem:[#allocation3_spill] sm:$0xff] %v17151_v45  ;;  %v17155_v44 = vpop.permute.xlu0 %10281 }
 0xadc   :  { %10511 = vrot.lane.b32.xlu1 %v16970_v42, %s11235_s27  ;;  %10516 = vrot.lane.b32.xlu2 %v17036_v1, %s11235_s27 }
 0xadd   :  { %10506 = vrot.lane.b32.xlu0 %v16984_v46, %s11235_s27 }
 0xade   :  { %v17163_v31 = vpop.permute.xlu1 %10301  ;;  %v17165_v57 = vpop.permute.xlu2 %10351 }
 0xadf   :  { %21163 = vst [vmem:[#allocation6_spill] sm:$0xff] %v17163_v31  ;;  %v17167_v30 = vpop.permute.xlu0 %10296 }
 0xae0   :  { %21164 = vst [vmem:[#allocation14_spill] sm:$0xff] %v17165_v57 }
 0xae1   :  { %21165 = vst [vmem:[#allocation8_spill] sm:$0xff] %v17167_v30 }
 0xae4   :  { %10526 = vrot.lane.b32.xlu1 %v17021_v62, %s11235_s27  ;;  %10531 = vrot.lane.b32.xlu2 %v17059_v36, %s11235_s27 }
 0xae5   :  { %10521 = vrot.lane.b32.xlu0 %v17028_v34, %s11235_s27 }
 0xae6   :  { %v17175_v56 = vpop.permute.xlu1 %10316  ;;  %v17177_v35 = vpop.permute.xlu2 %10366 }
 0xae7   :  { %21166 = vst [vmem:[#allocation17_spill] sm:$0xff] %v17175_v56  ;;  %v17179_v18 = vpop.permute.xlu0 %10311  ;;  %v10640_v56 = vpack.i.bf16 %v17030_v25, %v17014_v15  ;;  %v10670_v25 = vpack.i.bf16 %v17055_v53, %v17047_v13 }
 0xae8   :  { %21167 = vst [vmem:[#allocation41_spill] sm:$0xff] %v17177_v35 }
 0xae9   :  { %21168 = vst [vmem:[#allocation33_spill] sm:$0xff] %v17179_v18  ;;  %v10650_v18 = vpack.i.bf16 %v17023_v59, %v17006_v49  ;;  %v8901_v49 = vld [vmem:[%s20405_s5 + $0x30] sm:$0xff] }
 0xaec   :  { %10541 = vrot.lane.b32.xlu1 %v16931_v47, %s11236_s28  ;;  %10546 = vrot.lane.b32.xlu2 %v16924_v9, %s11236_s28 }
 0xaed   :  { %10536 = vrot.lane.b32.xlu0 %v17053_v52, %s11235_s27 }
 0xaee   :  { %v17187_v26 = vpop.permute.xlu1 %10331  ;;  %v17189_v41 = vpop.permute.xlu2 %10381 }
 0xaef   :  { %v17191_v33 = vpop.permute.xlu0 %10326 }
 0xaf4   :  { %10556 = vrot.lane.b32.xlu1 %v16990_v0, %s11236_s28  ;;  %10561 = vrot.lane.b32.xlu2 %v16984_v46, %s11236_s28 }
 0xaf5   :  { %10551 = vrot.lane.b32.xlu0 %v16920_v50, %s11236_s28 }
 0xaf6   :  { %v17199_v47 = vpop.permute.xlu1 %10346  ;;  %v17201_v9 = vpop.permute.xlu2 %10396 }
 0xaf7   :  { %21169 = vst [vmem:[#allocation30_spill] sm:$0xff] %v17199_v47  ;;  %v17203_v24 = vpop.permute.xlu0 %10341 }
 0xafc   :  { %10571 = vrot.lane.b32.xlu1 %v17036_v1, %s11236_s28  ;;  %10576 = vrot.lane.b32.xlu2 %v17028_v34, %s11236_s28  ;;  %v10595_v34 = vpack.i.bf16 %v16915_v61, %v16926_v8  ;;  %v10620_v1 = vpack.i.bf16 %v16956_v11, %v16961_v48 }
 0xafd   :  { %10566 = vrot.lane.b32.xlu0 %v16970_v42, %s11236_s28 }
 0xafe   :  { %v17211_v0 = vpop.permute.xlu1 %10361  ;;  %v17213_v46 = vpop.permute.xlu2 %10411 }
 0xaff   :  { %21170 = vst [vmem:[#allocation36_spill] sm:$0xff] %v17211_v0  ;;  %v17215_v50 = vpop.permute.xlu0 %10356 }
 0xb00   :  { %21171 = vst [vmem:[#allocation35_spill] sm:$0xff] %v17213_v46 }
 0xb01   :  { %21172 = vst [vmem:[#allocation15_spill] sm:$0xff] %v17215_v50 }
 0xb04   :  { %10586 = vrot.lane.b32.xlu1 %v17059_v36, %s11236_s28  ;;  %10591 = vrot.lane.b32.xlu2 %v17053_v52, %s11236_s28 }
 0xb05   :  { %10581 = vrot.lane.b32.xlu0 %v17021_v62, %s11236_s28 }
 0xb06   :  { %v17223_v17 = vpop.permute.xlu1 %10376  ;;  %v17225_v7 = vpop.permute.xlu2 %10426 }
 0xb07   :  { %21173 = vst [vmem:[#allocation43_spill] sm:$0xff] %v17225_v7  ;;  %v17227_v42 = vpop.permute.xlu0 %10371 }
 0xb08   :  { %21174 = vst [vmem:[#allocation42_spill] sm:$0xff] %v17227_v42  ;;  %v10660_v42 = vpack.i.bf16 %v17012_v37, %v17002_v20 }
 0xb0c   :  { %10601 = vrot.lane.b32.xlu1 %v10600_v10, %s11237_s29  ;;  %10606 = vrot.lane.b32.xlu2 %v10605_v32, %s11237_s29 }
 0xb0d   :  { %10596 = vrot.lane.b32.xlu0 %v10595_v34, %s11237_s29 }
 0xb0e   :  { %v17238_v62 = vpop.permute.xlu1 %10391  ;;  %v17240_v27 = vpop.permute.xlu2 %10441 }
 0xb0f   :  { %v17242_v29 = vpop.permute.xlu0 %10386 }
 0xb14   :  { %10621 = vrot.lane.b32.xlu1 %v10620_v1, %s11237_s29  ;;  %10626 = vrot.lane.b32.xlu2 %v10595_v34, %s11238_s30 }
 0xb15   :  { %10611 = vrot.lane.b32.xlu0 %v10610_v28, %s11237_s29 }
 0xb16   :  { %v17251_v23 = vpop.permute.xlu1 %10406  ;;  %v17253_v6 = vpop.permute.xlu2 %10456 }
 0xb17   :  { %21175 = vst [vmem:[#allocation47_spill] sm:$0xff] %v17251_v23  ;;  %v17255_v16 = vpop.permute.xlu0 %10401 }
 0xb18   :  { %21176 = vst [vmem:[#allocation32_spill] sm:$0xff] %v17253_v6 }
 0xb19   :  { %21177 = vst [vmem:[#allocation38_spill] sm:$0xff] %v17255_v16 }
 0xb1c   :  { %10631 = vrot.lane.b32.xlu1 %v10630_v38, %s11237_s29  ;;  %10636 = vrot.lane.b32.xlu2 %v10605_v32, %s11238_s30 }
 0xb1d   :  { %10616 = vrot.lane.b32.xlu0 %v10600_v10, %s11238_s30 }
 0xb1e   :  { %v17262_v52 = vpop.permute.xlu1 %10421  ;;  %v10472_v36 = vpop.permute.xlu2 %10471 }
 0xb1f   :  { %21178 = vst [vmem:[#allocation27_spill] sm:$0xff] %v17262_v52  ;;  %v17264_v34 = vpop.permute.xlu0 %10416  ;;  %v10680_v52 = vpack.i.bf16 %v17049_v21, %v17045_v63  ;;  %v10474_v20 = vunpack.i.h.bf16 %v10472_v36 }
 0xb20   :  { %21179 = vst [vmem:[#allocation45_spill] sm:$0xff] %v17264_v34 }
 0xb24   :  { %10646 = vrot.lane.b32.xlu1 %v10610_v28, %s11238_s30  ;;  %10651 = vrot.lane.b32.xlu2 %v10650_v18, %s11237_s29 }
 0xb25   :  { %10641 = vrot.lane.b32.xlu0 %v10640_v56, %s11237_s29 }
 0xb26   :  { %v17273_v32 = vpop.permute.xlu1 %10436  ;;  %v17275_v10 = vpop.permute.xlu2 %10486 }
 0xb27   :  { %v17277_v35 = vpop.permute.xlu0 %10431 }
 0xb2c   :  { %10661 = vrot.lane.b32.xlu1 %v10660_v42, %s11237_s29  ;;  %10666 = vrot.lane.b32.xlu2 %v10630_v38, %s11238_s30 }
 0xb2d   :  { %10656 = vrot.lane.b32.xlu0 %v10620_v1, %s11238_s30 }
 0xb2e   :  { %v17284_v28 = vpop.permute.xlu1 %10451  ;;  %v17286_v7 = vpop.permute.xlu2 %10501 }
 0xb2f   :  { %v17288_v59 = vpop.permute.xlu0 %10446  ;;  %v20649_v48 = vunpack.i.h.bf16 %v17286_v7 }
 0xb34   :  { %10676 = vrot.lane.b32.xlu1 %v10640_v56, %s11238_s30  ;;  %10681 = vrot.lane.b32.xlu2 %v10680_v52, %s11237_s29 }
 0xb35   :  { %10671 = vrot.lane.b32.xlu0 %v10670_v25, %s11237_s29 }
 0xb36   :  { %v17297_v38 = vpop.permute.xlu1 %10466  ;;  %v17299_v1 = vpop.permute.xlu2 %10516 }
 0xb37   :  { %21180 = vst [vmem:[#allocation12_spill] sm:$0xff] %v17297_v38  ;;  %v17301_v37 = vpop.permute.xlu0 %10461  ;;  %v20637_v56 = vunpack.i.h.bf16 %v17297_v38  ;;  %v20638_v13 = vunpack.i.l.bf16 %v17297_v38  ;;  %v10519_v43 = vunpack.i.h.bf16 %v17299_v1 }
 0xb38   :  { %21181 = vst [vmem:[#allocation29_spill] sm:$0xff] %v17301_v37 }
 0xb3c   :  { %10691 = vrot.lane.b32.xlu1 %v10660_v42, %s11238_s30  ;;  %10696 = vrot.lane.b32.xlu2 %v10670_v25, %s11238_s30  ;;  %v8899_v42 = vld [vmem:[%s20404_s4 + $0x30] sm:$0xff]  ;;  %v10473_v25 = vunpack.i.l.bf16 %v10472_v36 }
 0xb3d   :  { %10686 = vrot.lane.b32.xlu0 %v10650_v18, %s11238_s30  ;;  %v17320_v18 = vsel %vm387_vm3, %v20637_v56, %v10474_v20 }
 0xb3e   :  { %v10482_v21 = vpop.permute.xlu1 %10481  ;;  %v17306_v63 = vpop.permute.xlu2 %10531  ;;  %21182 = vst [vmem:[#allocation34_spill] sm:$0xff] %v17320_v18  ;;  %v17326_v15 = vsel %vm387_vm3, %v20638_v13, %v10473_v25  ;;  %v8900_v13 = vld [vmem:[%s20404_s4 + $0x38] sm:$0xff] }
 0xb3f   :  { %v10477_v53 = vpop.permute.xlu0 %10476  ;;  %21183 = vst [vmem:[#allocation4_spill] sm:$0xff] %v17326_v15  ;;  %v10484_v36 = vunpack.i.h.bf16 %v10482_v21  ;;  %v10483_v0 = vunpack.i.l.bf16 %v10482_v21  ;;  %v10533_v16 = vunpack.i.l.bf16 %v17306_v63 }
 0xb40   :  { %v10479_v50 = vunpack.i.h.bf16 %v10477_v53  ;;  %v10478_v46 = vunpack.i.l.bf16 %v10477_v53 }
 0xb42   :  { %v17346_v15 = vsel %vm387_vm3, %v10479_v50, %v10484_v36  ;;  %v17350_v21 = vsel %vm387_vm3, %v10473_v25, %v10478_v46  ;;  %v17354_v53 = vsel %vm387_vm3, %v10478_v46, %v10483_v0 }
 0xb43   :  { %21185 = vst [vmem:[#allocation40_spill] sm:$0xff] %v17346_v15 }
 0xb44   :  { %7143 = vperm.xlu1 %9382, %v8901_v49   ;;  %7108 = vperm.xlu2 %9383, %v8899_v42   ;;  %v20639_v49 = vunpack.i.h.bf16 %v17277_v35  ;;  %21186 = vst [vmem:[#allocation37_spill] sm:$0xff] %v17350_v21 }
 0xb45   :  { %10701 = vrot.lane.b32.xlu0 %v10680_v52, %s11238_s30  ;;  %v17342_v52 = vsel %vm387_vm3, %v10474_v20, %v10479_v50  ;;  %21187 = vst [vmem:[#allocation48_spill] sm:$0xff] %v17354_v53  ;;  %v21189_v20 = vunpack.i.l.bf16 %v17277_v35 }
 0xb46   :  { %v17329_v51 = vpop.permute.xlu1 %10496  ;;  %v17331_v31 = vpop.permute.xlu2 %10546  ;;  %21184 = vst [vmem:[#allocation44_spill] sm:$0xff] %v17342_v52  ;;  %v17360_v42 = vsel %vm387_vm3, %v10484_v36, %v20639_v49  ;;  %v10489_v36 = vunpack.i.h.bf16 %v17275_v10  ;;  %v10488_v49 = vunpack.i.l.bf16 %v17275_v10 }
 0xb47   :  { %v17333_v56 = vpop.permute.xlu0 %10491  ;;  %21188 = vst [vmem:[#allocation49_spill] sm:$0xff] %v17360_v42  ;;  %v17366_v50 = vsel %vm387_vm3, %v10483_v0, %v21189_v20  ;;  %v10498_v21 = vunpack.i.l.bf16 %v17329_v51  ;;  %v10503_v42 = vunpack.i.l.bf16 %v17286_v7 }
 0xb48   :  { %21190 = vst [vmem:[#allocation50_spill] sm:$0xff] %v17366_v50  ;;  %v20643_v46 = vunpack.i.h.bf16 %v17333_v56  ;;  %v10493_v53 = vunpack.i.l.bf16 %v17333_v56 }
 0xb49   :  { %v17395_v10 = vsel %vm476_vm2, %v10498_v21, %v10503_v42 }
 0xb4a   :  { %v17383_v0 = vsel %vm476_vm2, %v10489_v36, %v20643_v46  ;;  %v17387_v20 = vsel %vm476_vm2, %v10488_v49, %v10493_v53  ;;  %v17391_v50 = vsel %vm476_vm2, %v10493_v53, %v10498_v21  ;;  %v10518_v53 = vunpack.i.l.bf16 %v17299_v1 }
 0xb4d   :  { %7113 = vperm.xlu0 %9384, %v8900_v13   ;;  %v8902_v13 = vld [vmem:[%s20405_s5 + $0x38] sm:$0xff] }
 0xb4e   :  { %v10512_v15 = vpop.permute.xlu1 %10511  ;;  %v17368_v25 = vpop.permute.xlu2 %10561 }
 0xb4f   :  { %v10507_v52 = vpop.permute.xlu0 %10506  ;;  %v10514_v11 = vunpack.i.h.bf16 %v10512_v15  ;;  %v10513_v58 = vunpack.i.l.bf16 %v10512_v15 }
 0xb50   :  { %v10509_v18 = vunpack.i.h.bf16 %v10507_v52  ;;  %v10508_v46 = vunpack.i.l.bf16 %v10507_v52 }
 0xb51   :  { %v17418_v15 = vsel %vm476_vm2, %v10514_v11, %v10519_v43 }
 0xb52   :  { %v17406_v21 = vsel %vm476_vm2, %v20649_v48, %v10509_v18  ;;  %v17414_v52 = vsel %vm476_vm2, %v10509_v18, %v10514_v11  ;;  %21192 = vst [vmem:[#allocation52_spill] sm:$0xff] %v17418_v15  ;;  %v17422_v1 = vsel %vm476_vm2, %v10508_v46, %v10513_v58  ;;  %v17426_v48 = vsel %vm476_vm2, %v10513_v58, %v10518_v53 }
 0xb53   :  { %21191 = vst [vmem:[#allocation51_spill] sm:$0xff] %v17414_v52  ;;  %v10534_v11 = vunpack.i.h.bf16 %v17306_v63 }
 0xb54   :  { %21193 = vst [vmem:[#allocation53_spill] sm:$0xff] %v17422_v1 }
 0xb55   :  { %7148 = vperm.xlu0 %9384, %v8902_v13   ;;  %v17410_v13 = vsel %vm476_vm2, %v10503_v42, %v10508_v46  ;;  %21194 = vst [vmem:[#allocation54_spill] sm:$0xff] %v17426_v48 }
 0xb56   :  { %v10527_v60 = vpop.permute.xlu1 %10526  ;;  %v17397_v34 = vpop.permute.xlu2 %10576 }
 0xb57   :  { %v10522_v38 = vpop.permute.xlu0 %10521  ;;  %v10529_v57 = vunpack.i.h.bf16 %v10527_v60  ;;  %v10528_v47 = vunpack.i.l.bf16 %v10527_v60  ;;  %v21210_v37 = vunpack.i.h.bf16 %v17397_v34 }
 0xb58   :  { %v10524_v18 = vunpack.i.h.bf16 %v10522_v38  ;;  %v10523_v23 = vunpack.i.l.bf16 %v10522_v38 }
 0xb59   :  { %v17452_v38 = vsel %vm476_vm2, %v10529_v57, %v10534_v11  ;;  %v17456_v63 = vsel %vm476_vm2, %v10528_v47, %v10533_v16 }
 0xb5a   :  { %v17436_v46 = vsel %vm476_vm2, %v10519_v43, %v10524_v18  ;;  %v17440_v58 = vsel %vm476_vm2, %v10524_v18, %v10529_v57  ;;  %v17444_v40 = vsel %vm476_vm2, %v10518_v53, %v10523_v23  ;;  %v17448_v60 = vsel %vm476_vm2, %v10523_v23, %v10528_v47  ;;  %21199 = vst [vmem:[#allocation59_spill] sm:$0xff] %v17452_v38 }
 0xb5b   :  { %21195 = vst [vmem:[#allocation55_spill] sm:$0xff] %v17436_v46 }
 0xb5c   :  { %21196 = vst [vmem:[#allocation56_spill] sm:$0xff] %v17440_v58 }
 0xb5d   :  { %21197 = vst [vmem:[#allocation57_spill] sm:$0xff] %v17444_v40 }
 0xb5e   :  { %v17428_v30 = vpop.permute.xlu1 %10541  ;;  %v17430_v42 = vpop.permute.xlu2 %10591  ;;  %21198 = vst [vmem:[#allocation58_spill] sm:$0xff] %v17448_v60 }
 0xb5f   :  { %v10537_v12 = vpop.permute.xlu0 %10536  ;;  %21200 = vst [vmem:[#allocation60_spill] sm:$0xff] %v17456_v63  ;;  %v10544_v43 = vunpack.i.h.bf16 %v17428_v30  ;;  %v10594_v40 = vunpack.i.h.bf16 %v17430_v42  ;;  %v10593_v23 = vunpack.i.l.bf16 %v17430_v42  ;;  %v21204_v38 = vunpack.i.l.bf16 %v17428_v30 }
 0xb60   :  { %v10539_v60 = vunpack.i.h.bf16 %v10537_v12  ;;  %v10538_v46 = vunpack.i.l.bf16 %v10537_v12 }
 0xb61   :  { %v17478_v18 = vsel %vm565_vm1, %v10594_v40, %v10544_v43  ;;  %v17484_v42 = vsel %vm565_vm1, %v10593_v23, %v21204_v38 }
 0xb62   :  { %v17470_v47 = vsel %vm476_vm2, %v10534_v11, %v10539_v60  ;;  %v17474_v63 = vsel %vm476_vm2, %v10533_v16, %v10538_v46  ;;  %21203 = vst [vmem:[#allocation63_spill] sm:$0xff] %v17478_v18  ;;  %v17488_v12 = vsel %vm476_vm2, %v10539_v60, %v10489_v36  ;;  %v17492_v11 = vsel %vm476_vm2, %v10538_v46, %v10488_v49 }
 0xb63   :  { %21201 = vst [vmem:[#allocation61_spill] sm:$0xff] %v17470_v47 }
 0xb64   :  { %21202 = vst [vmem:[#allocation62_spill] sm:$0xff] %v17474_v63 }
 0xb65   :  { %21205 = vst [vmem:[#allocation64_spill] sm:$0xff] %v17484_v42 }
 0xb66   :  { %v17460_v58 = vpop.permute.xlu1 %10556  ;;  %v17462_v53 = vpop.permute.xlu2 %10606  ;;  %21206 = vst [vmem:[#allocation65_spill] sm:$0xff] %v17488_v12 }
 0xb67   :  { %v17466_v57 = vpop.permute.xlu0 %10551  ;;  %21207 = vst [vmem:[#allocation66_spill] sm:$0xff] %v17492_v11  ;;  %v20666_v1 = vunpack.i.l.bf16 %v17462_v53 }
 0xb6e   :  { %v17494_v16 = vpop.permute.xlu1 %10571  ;;  %v17496_v63 = vpop.permute.xlu2 %10626 }
 0xb6f   :  { %21208 = vst [vmem:[#allocation67_spill] sm:$0xff] %v17496_v63  ;;  %v10629_v18 = vunpack.i.h.bf16 %v17496_v63  ;;  %v20659_v47 = vunpack.i.l.bf16 %v17496_v63  ;;  %v17500_v48 = vpop.permute.xlu0 %10566 }
 0xb71   :  { %v6149_v36 = vsel %vm743_vm7, %v20659_v47, %v10629_v18 }
 0xb72   :  { %6415 = vmatpush.msrb.mxu1 %v6149_v36 }
 0xb76   :  { %v10587_v60 = vpop.permute.xlu1 %10586  ;;  %v17506_v38 = vpop.permute.xlu2 %10636 }
 0xb77   :  { %v20662_v49 = vunpack.i.l.bf16 %v17506_v38  ;;  %v10582_v46 = vpop.permute.xlu0 %10581  ;;  %v10589_v12 = vunpack.i.h.bf16 %v10587_v60  ;;  %v10588_v15 = vunpack.i.l.bf16 %v10587_v60 }
 0xb78   :  { %v10584_v63 = vunpack.i.h.bf16 %v10582_v46  ;;  %v10583_v5 = vunpack.i.l.bf16 %v10582_v46 }
 0xb79   :  { %v6147_v11 = vsel %vm743_vm7, %v10629_v18, %v20662_v49  ;;  %v10549_v18 = vunpack.i.h.bf16 %v17331_v31  ;;  %v10548_v49 = vunpack.i.l.bf16 %v17331_v31  ;;  %v21215_v31 = vunpack.i.l.bf16 %v17466_v57 }
 0xb7a   :  { %6461 = vmatpush.msra.mxu2 %v6147_v11  ;;  %v17544_v46 = vsel %vm565_vm1, %v21210_v37, %v10584_v63  ;;  %v17566_v37 = vsel %vm565_vm1, %v10583_v5, %v10588_v15 }
 0xb7e   :  { %v17513_v42 = vpop.permute.xlu1 %10601 }
 0xb7f   :  { %v10604_v47 = vunpack.i.h.bf16 %v17513_v42  ;;  %v17517_v39 = vpop.permute.xlu0 %10596  ;;  %v21209_v45 = vunpack.i.l.bf16 %v17513_v42 }
 0xb80   :  { %v10599_v6 = vunpack.i.h.bf16 %v17517_v39  ;;  %v20665_v52 = vunpack.i.l.bf16 %v17517_v39 }
 0xb81   :  { %v6060_v11 = vsel %vm654_vm0, %v21209_v45, %v10604_v47  ;;  %v21212_v45 = vunpack.i.h.bf16 %v17462_v53 }
 0xb82   :  { %v6061_v36 = vsel %vm654_vm0, %v20665_v52, %v10599_v6  ;;  %v6059_v60 = vsel %vm654_vm0, %v10599_v6, %v20666_v1  ;;  %v21211_v52 = vunpack.i.l.bf16 %v17397_v34  ;;  %v17554_v1 = vsel %vm565_vm1, %v10584_v63, %v10589_v12 }
 0xb83   :  { %6378 = vmatpush.msra.mxu0 %v6061_v36  ;;  %6424 = vmatpush.msrb.mxu3 %v6059_v60  ;;  %v6058_v36 = vsel %vm654_vm0, %v10604_v47, %v21212_v45  ;;  %v17562_v60 = vsel %vm565_vm1, %v10589_v12, %v10594_v40  ;;  %v20669_v63 = vunpack.i.h.bf16 %v17329_v51  ;;  %v5973_v47 = vsel %vm565_vm1, %v10544_v43, %v10549_v18 }
 0xb84   :  { %v17550_v6 = vsel %vm565_vm1, %v21211_v52, %v10583_v5  ;;  %v17570_v52 = vsel %vm565_vm1, %v10588_v15, %v10593_v23  ;;  %v21213_v40 = vunpack.i.h.bf16 %v17466_v57  ;;  %v21214_v23 = vunpack.i.l.bf16 %v17428_v30 }
 0xb85   :  { %6379 = vmatpush.msra.mxu0 %v6060_v11  ;;  %6425 = vmatpush.msrb.mxu3 %v6058_v36  ;;  %v5970_v43 = vsel %vm565_vm1, %v10548_v49, %v21215_v31  ;;  %v21216_v45 = vunpack.i.h.bf16 %v17333_v56  ;;  %v10438_v30 = vunpack.i.l.bf16 %v17273_v32  ;;  %v10384_v56 = vunpack.i.h.bf16 %v17189_v41 }
 0xb86   :  { %v5971_v12 = vsel %vm565_vm1, %v10549_v18, %v21213_v40  ;;  %v17582_v15 = vpop.permute.xlu1 %10621  ;;  %v5972_v11 = vsel %vm565_vm1, %v21214_v23, %v10548_v49  ;;  %v10439_v18 = vunpack.i.h.bf16 %v17273_v32  ;;  %v20670_v49 = vunpack.i.h.bf16 %v17223_v17 }
 0xb87   :  { %v17580_v5 = vpop.permute.xlu0 %10611  ;;  %6380 = vmatpush.msra.mxu0 %v5973_v47  ;;  %6426 = vmatpush.msrb.mxu3 %v5971_v12  ;;  %v5883_v36 = vsel %vm476_vm2, %v21216_v45, %v20669_v63  ;;  %v20668_v47 = vunpack.i.h.bf16 %v17240_v27  ;;  %v20667_v40 = vunpack.i.l.bf16 %v17240_v27  ;;  %v21217_v12 = vunpack.i.h.bf16 %v17277_v35 }
 0xb88   :  { %v10389_v23 = vunpack.i.h.bf16 %v17242_v29  ;;  %v10613_v45 = vunpack.i.l.bf16 %v17580_v5 }
 0xb89   :  { %6381 = vmatpush.msra.mxu0 %v5972_v11  ;;  %6427 = vmatpush.msrb.mxu3 %v5970_v43  ;;  %v5797_v32 = vsel %vm387_vm3, %v21217_v12, %v10439_v18  ;;  %v10639_v11 = vunpack.i.h.bf16 %v17506_v38  ;;  %v5794_v43 = vsel %vm387_vm3, %v10438_v30, %v20667_v40  ;;  %v10614_v40 = vunpack.i.h.bf16 %v17580_v5 }
 0xb8a   :  { %v5707_v5 = vsel %vm298_vm4, %v10384_v56, %v10389_v23 }
 0xb8b   :  { %6382 = vmatpush.msra.mxu0 %v17383_v0  ;;  %6428 = vmatpush.msrb.mxu3 %v5883_v36  ;;  %v5795_v0 = vsel %vm387_vm3, %v10439_v18, %v20668_v47  ;;  %v20673_v18 = vunpack.i.l.bf16 %v17582_v15 }
 0xb8d   :  { %6383 = vmatpush.msra.mxu0 %v17387_v20  ;;  %6429 = vmatpush.msrb.mxu3 %v17391_v50  ;;  %v21218_v50 = vunpack.i.l.bf16 %v17277_v35  ;;  %v20672_v35 = vunpack.i.l.bf16 %v17223_v17 }
 0xb8e   :  { %v17640_v47 = vpop.permute.xlu1 %10631 }
 0xb8f   :  { %v17617_v31 = vpop.permute.xlu0 %10616  ;;  %6384 = vmatpush.msra.mxu0 %v5797_v32  ;;  %6430 = vmatpush.msrb.mxu3 %v5795_v0  ;;  %v5796_v20 = vsel %vm387_vm3, %v21218_v50, %v10438_v30  ;;  %v20674_v0 = vunpack.i.l.bf16 %v17242_v29  ;;  %v5709_v30 = vsel %vm298_vm4, %v20670_v49, %v10384_v56  ;;  %v10383_v49 = vunpack.i.l.bf16 %v17189_v41 }
 0xb90   :  { %v10619_v36 = vunpack.i.h.bf16 %v17617_v31  ;;  %v20671_v12 = vunpack.i.l.bf16 %v17617_v31  ;;  %v10329_v32 = vunpack.i.h.bf16 %v17191_v33  ;;  %v10559_v50 = vunpack.i.h.bf16 %v17460_v58 }
 0xb91   :  { %6385 = vmatpush.msra.mxu0 %v5796_v20  ;;  %6431 = vmatpush.msrb.mxu3 %v5794_v43  ;;  %v10334_v43 = vunpack.i.h.bf16 %v17187_v26  ;;  %v10328_v56 = vunpack.i.l.bf16 %v17191_v33  ;;  %v21220_v33 = vunpack.i.h.bf16 %v17462_v53 }
 0xb92   :  { %v6148_v63 = vsel %vm743_vm7, %v20671_v12, %v10619_v36  ;;  %v6146_v20 = vsel %vm743_vm7, %v10619_v36, %v10639_v11  ;;  %v10324_v12 = vunpack.i.h.bf16 %v17141_v22  ;;  %v21219_v36 = vunpack.i.l.bf16 %v17462_v53 }
 0xb93   :  { %6386 = vmatpush.msra.mxu0 %v5709_v30  ;;  %6416 = vmatpush.msrb.mxu1 %v6148_v63  ;;  %v6055_v63 = vsel %vm654_vm0, %v10613_v45, %v20673_v18  ;;  %v10333_v30 = vunpack.i.l.bf16 %v17187_v26  ;;  %v10323_v18 = vunpack.i.l.bf16 %v17141_v22  ;;  %v5619_v53 = vsel %vm209_vm5, %v10329_v32, %v10334_v43  ;;  %v21308_v22 = vld [vmem:[#allocation31_spill] sm:$0xff] }
 0xb94   :  { %6432 = vmatpush.msrb.mxu3 %v5707_v5  ;;  %6462 = vmatpush.msra.mxu2 %v6146_v20  ;;  %v6057_v41 = vsel %vm654_vm0, %v21219_v36, %v10613_v45  ;;  %v5708_v20 = vsel %vm298_vm4, %v20672_v35, %v10383_v49  ;;  %v5706_v5 = vsel %vm298_vm4, %v10383_v49, %v20674_v0  ;;  %v10564_v36 = vunpack.i.h.bf16 %v17368_v25 }
 0xb95   :  { %6470 = vmatpush.msra.mxu1 %v6057_v41  ;;  %v10558_v45 = vunpack.i.l.bf16 %v17460_v58  ;;  %6387 = vmatpush.msra.mxu0 %v5708_v20  ;;  %v6056_v41 = vsel %vm654_vm0, %v21220_v33, %v10614_v40  ;;  %v10269_v49 = vunpack.i.h.bf16 %v17143_v19  ;;  %v5621_v58 = vsel %vm209_vm5, %v10324_v12, %v10329_v32 }
 0xb96   :  { %6516 = vmatpush.msrb.mxu2 %v6055_v63  ;;  %6433 = vmatpush.msrb.mxu3 %v5706_v5  ;;  %v21221_v63 = vunpack.i.h.bf16 %v17582_v15  ;;  %v10563_v20 = vunpack.i.l.bf16 %v17368_v25  ;;  %v5967_v33 = vsel %vm565_vm1, %v10559_v50, %v10564_v36  ;;  %v10268_v32 = vunpack.i.l.bf16 %v17143_v19 }
 0xb97   :  { %6471 = vmatpush.msra.mxu1 %v6056_v41  ;;  %v17689_v0 = vpop.permute.xlu0 %10641  ;;  %6388 = vmatpush.msra.mxu0 %v5621_v58  ;;  %v10273_v41 = vunpack.i.l.bf16 %v17139_v2  ;;  %v5618_v58 = vsel %vm209_vm5, %v10328_v56, %v10333_v30 }
 0xb98   :  { %v6054_v35 = vsel %vm654_vm0, %v10614_v40, %v21221_v63  ;;  %v10279_v40 = vunpack.i.h.bf16 %v17115_v14  ;;  %6434 = vmatpush.msrb.mxu3 %v5619_v53  ;;  %v5620_v63 = vsel %vm209_vm5, %v10323_v18, %v10328_v56 }
 0xb99   :  { %6517 = vmatpush.msrb.mxu2 %v6054_v35  ;;  %v21222_v35 = vunpack.i.h.bf16 %v17466_v57  ;;  %6389 = vmatpush.msra.mxu0 %v5620_v63 }
 0xb9a   :  { %6435 = vmatpush.msrb.mxu3 %v5618_v58  ;;  %v10449_v58 = vunpack.i.h.bf16 %v17288_v59 }
 0xb9b   :  { %v5969_v5 = vsel %vm565_vm1, %v21222_v35, %v10559_v50  ;;  %6518 = vmatpush.msrb.mxu2 %v5967_v33  ;;  %v21223_v50 = vunpack.i.l.bf16 %v17466_v57  ;;  %v5966_v35 = vsel %vm565_vm1, %v10558_v45, %v10563_v20  ;;  %v21224_v33 = vunpack.i.h.bf16 %v17139_v2 }
 0xb9c   :  { %6472 = vmatpush.msra.mxu1 %v5969_v5  ;;  %v10278_v5 = vunpack.i.l.bf16 %v17115_v14  ;;  %v5532_v2 = vsel %vm120_vm6, %v10268_v32, %v10273_v41 }
 0xb9d   :  { %v5968_v53 = vsel %vm565_vm1, %v21223_v50, %v10558_v45  ;;  %6519 = vmatpush.msrb.mxu2 %v5966_v35  ;;  %v5533_v56 = vsel %vm120_vm6, %v10269_v49, %v21224_v33  ;;  %v21225_v57 = vmov %v21224_v33  ;;  %v10454_v45 = vunpack.i.h.bf16 %v17284_v28  ;;  %v10647_v50 = vpop.permute.xlu1 %10646 }
 0xb9e   :  { %6473 = vmatpush.msra.mxu1 %v5968_v53  ;;  %v5531_v63 = vsel %vm120_vm6, %v21225_v57, %v10279_v40  ;;  %6390 = vmatpush.msra.mxu0 %v5533_v56  ;;  %v21226_v53 = vunpack.i.h.bf16 %v17286_v7  ;;  %v21227_v35 = vunpack.i.h.bf16 %v17329_v51  ;;  %v5530_v56 = vsel %vm120_vm6, %v10273_v41, %v10278_v5 }
 0xb9f   :  { %6436 = vmatpush.msrb.mxu3 %v5531_v63  ;;  %6520 = vmatpush.msrb.mxu2 %v17406_v21  ;;  %v10448_v51 = vunpack.i.l.bf16 %v17288_v59  ;;  %v10648_v7 = vunpack.i.l.bf16 %v10647_v50  ;;  %v17760_v21 = vpop.permute.xlu0 %10656  ;;  %v10453_v57 = vunpack.i.l.bf16 %v17284_v28  ;;  %v21228_v41 = vunpack.i.h.bf16 %v17240_v27 }
 0xba0   :  { %v5881_v33 = vsel %vm476_vm2, %v21227_v35, %v21226_v53  ;;  %6391 = vmatpush.msra.mxu0 %v5532_v2  ;;  %v10658_v63 = vunpack.i.l.bf16 %v17760_v21  ;;  %v10649_v53 = vunpack.i.h.bf16 %v10647_v50  ;;  %v21229_v35 = vunpack.i.l.bf16 %v17240_v27 }
 0xba1   :  { %6474 = vmatpush.msra.mxu1 %v5881_v33  ;;  %6437 = vmatpush.msrb.mxu3 %v5530_v56  ;;  %v5793_v59 = vsel %vm387_vm3, %v21228_v41, %v10449_v58  ;;  %v21230_v2 = vunpack.i.l.bf16 %v17506_v38  ;;  %v10633_v56 = vunpack.i.l.bf16 %v17640_v47  ;;  %v5790_v27 = vsel %vm387_vm3, %v10448_v51, %v10453_v57 }
 0xba2   :  { %6521 = vmatpush.msrb.mxu2 %v17410_v13  ;;  %6392 = vmatpush.msra.mxu0 %v16926_v8  ;;  %v17777_v13 = vld [vmem:[%s20403_s2 + $0x60] sm:$0xff]  ;;  %v17782_v8 = vld [vmem:[%s20403_s2 + $0x68] sm:$0xff]  ;;  %v5792_v33 = vsel %vm387_vm3, %v21229_v35, %v10448_v51  ;;  %v10399_v41 = vunpack.i.h.bf16 %v17201_v9  ;;  %v10344_v35 = vunpack.i.h.bf16 %v17203_v24  ;;  %v10339_v38 = vunpack.i.h.bf16 %v17153_v55 }
 0xba3   :  { %6475 = vmatpush.msra.mxu1 %v17395_v10  ;;  %6438 = vmatpush.msrb.mxu3 %v16915_v61  ;;  %v5791_v10 = vsel %vm387_vm3, %v10449_v58, %v10454_v45  ;;  %v10394_v61 = vunpack.i.h.bf16 %v17238_v62  ;;  %v10659_v58 = vunpack.i.h.bf16 %v17760_v21  ;;  %v6145_v50 = vsel %vm743_vm7, %v21230_v2, %v10648_v7 }
 0xba4   :  { %6522 = vmatpush.msrb.mxu2 %v5791_v10  ;;  %6393 = vmatpush.msra.mxu0 %v16906_v4  ;;  %v10393_v4 = vunpack.i.l.bf16 %v17238_v62  ;;  %v10634_v62 = vunpack.i.h.bf16 %v17640_v47  ;;  %v6144_v10 = vsel %vm743_vm7, %v10639_v11, %v10649_v53  ;;  %v10569_v11 = vunpack.i.h.bf16 %v17500_v48 }
 0xba5   :  { %6476 = vmatpush.msra.mxu1 %v5793_v59  ;;  %6439 = vmatpush.msrb.mxu3 %v16897_v3  ;;  %v6143_v3 = vsel %vm743_vm7, %v10648_v7, %v10658_v63  ;;  %v10643_v59 = vunpack.i.l.bf16 %v17689_v0  ;;  %v10398_v7 = vunpack.i.l.bf16 %v17201_v9  ;;  %v5705_v51 = vsel %vm298_vm4, %v10389_v23, %v10394_v61 }
 0xba6   :  { %6440 = vmatmul.f32.vlgmr.msrb.gmra.mxu3 %v17777_v13  ;;  %8877 = vmatmul.msk.f32.vlgmr.msra.gmra.mxu2 %vm986_vm8, %v17782_v8  ;;  %v5703_v47 = vsel %vm298_vm4, %v10394_v61, %v10399_v41  ;;  %v6142_v23 = vsel %vm743_vm7, %v10649_v53, %v10659_v58  ;;  %v21231_v2 = vunpack.i.l.bf16 %v17582_v15 }
 0xba7   :  { %6477 = vmatpush.msra.mxu1 %v5792_v33  ;;  %6507 = vmatpush.msrb.mxu0 %v6145_v50  ;;  %v10644_v33 = vunpack.i.h.bf16 %v17689_v0  ;;  %v5702_v53 = vsel %vm298_vm4, %v10393_v4, %v10398_v7  ;;  %v18008_v21 = vpop.permute.xlu0 %10671 }
 0xba8   :  { %6523 = vmatpush.msrb.mxu2 %v5790_v27  ;;  %6394 = vmatmul.f32.vlgmr.msra.gmra.mxu0 %v17777_v13  ;;  %v6053_v50 = vsel %vm654_vm0, %v21231_v2, %v10633_v56  ;;  %v6051_v27 = vsel %vm654_vm0, %v10633_v56, %v10643_v59  ;;  %v17867_v56 = vld [vmem:[%s20403_s2 + $0x70] sm:$0xff]  ;;  %v10338_v2 = vunpack.i.l.bf16 %v17153_v55  ;;  %v10284_v55 = vunpack.i.h.bf16 %v17155_v44 }
 0xba9   :  { %8875 = vmatmul.msk.f32.vlgmr.msrb.gmra.mxu1 %vm986_vm8, %v17782_v8  ;;  %6553 = vmatpush.msra.mxu3 %v6143_v3  ;;  %v21232_v3 = vunpack.i.l.bf16 %v17242_v29  ;;  %v17854_v29 = vpop.permute.xlu1 %10661 }
 0xbaa   :  { %6478 = vmatpush.msra.mxu1 %v5705_v51  ;;  %6508 = vmatpush.msrb.mxu0 %v6144_v10  ;;  %v10343_v51 = vunpack.i.l.bf16 %v17203_v24  ;;  %v10574_v10 = vunpack.i.h.bf16 %v17494_v16 }
 0xbab   :  { %6524 = vmatpush.msrb.mxu2 %v5703_v47  ;;  %6554 = vmatpush.msra.mxu3 %v6142_v23  ;;  %v5704_v61 = vsel %vm298_vm4, %v21232_v3, %v10393_v4  ;;  %v21233_v47 = vunpack.i.h.bf16 %v17582_v15  ;;  %v5617_v4 = vsel %vm209_vm5, %v10334_v43, %v10339_v38  ;;  %v5615_v15 = vsel %vm209_vm5, %v10339_v38, %v10344_v35  ;;  %v17883_v3 = vld [vmem:[%s20403_s2 + $0x78] sm:$0xff] }
 0xbac   :  { %6562 = vmatpush.msra.mxu0 %v6053_v50  ;;  %6479 = vmatpush.msra.mxu1 %v5704_v61  ;;  %v17870_v50 = vpop.permute.xlu2 %10651  ;;  %v6050_v43 = vsel %vm654_vm0, %v10634_v62, %v10644_v33  ;;  %v10568_v61 = vunpack.i.l.bf16 %v17500_v48  ;;  %v5965_v38 = vsel %vm565_vm1, %v10564_v36, %v10569_v11  ;;  %v10283_v48 = vunpack.i.l.bf16 %v17155_v44 }
 0xbad   :  { %6525 = vmatpush.msrb.mxu2 %v5702_v53  ;;  %6608 = vmatpush.msrb.mxu3 %v6051_v27  ;;  %v6052_v23 = vsel %vm654_vm0, %v21233_v47, %v10634_v62  ;;  %v21234_v53 = vld [vmem:[#allocation3_spill] sm:$0xff]  ;;  %v10573_v62 = vunpack.i.l.bf16 %v17494_v16  ;;  %v5616_v47 = vsel %vm209_vm5, %v10333_v30, %v10338_v2  ;;  %v5614_v36 = vsel %vm209_vm5, %v10338_v2, %v10343_v51 }
 0xbae   :  { %6563 = vmatpush.msra.mxu0 %v6052_v23  ;;  %6480 = vmatpush.msra.mxu1 %v5617_v4  ;;  %v10289_v27 = vunpack.i.h.bf16 %v21234_v53  ;;  %v5963_v23 = vsel %vm565_vm1, %v10569_v11, %v10574_v10  ;;  %v10288_v26 = vunpack.i.l.bf16 %v21234_v53  ;;  %v5964_v44 = vsel %vm565_vm1, %v10563_v20, %v10568_v61  ;;  %v21236_v2 = vld [vmem:[#allocation51_spill] sm:$0xff]  ;;  %v21258_v53 = vld [vmem:[#allocation20_spill] sm:$0xff] }
 0xbaf   :  { %6526 = vmatpush.msrb.mxu2 %v5615_v15  ;;  %6609 = vmatpush.msrb.mxu3 %v6050_v43  ;;  %v5529_v30 = vsel %vm120_vm6, %v10279_v40, %v10284_v55  ;;  %v5962_v25 = vsel %vm565_vm1, %v10568_v61, %v10573_v62  ;;  %v5528_v20 = vsel %vm120_vm6, %v10278_v5, %v10283_v48  ;;  %v21235_v40 = vld [vmem:[#allocation29_spill] sm:$0xff]  ;;  %v21237_v43 = vld [vmem:[#allocation32_spill] sm:$0xff]  ;;  %v21253_v16 = vld [vmem:[#allocation55_spill] sm:$0xff] }
 0xbb0   :  { %6564 = vmatpush.msra.mxu0 %v5965_v38  ;;  %6443 = vmatmul.f32.gmra.mxu3 %v17867_v56  ;;  %v5527_v11 = vsel %vm120_vm6, %v10284_v55, %v10289_v27  ;;  %v10464_v4 = vunpack.i.h.bf16 %v21235_v40  ;;  %v5526_v15 = vsel %vm120_vm6, %v10283_v48, %v10288_v26  ;;  %v10459_v55 = vunpack.i.h.bf16 %v21237_v43  ;;  %v21238_v38 = vld [vmem:[#allocation52_spill] sm:$0xff]  ;;  %v21240_v5 = vld [vmem:[#allocation5_spill] sm:$0xff] }
 0xbb1   :  { %8878 = vmatmul.msk.f32.gmra.mxu2 %vm986_vm8, %v17883_v3  ;;  %6481 = vmatpush.msra.mxu1 %v5616_v47  ;;  %v17940_v61 = vpop.permute.xlu1 %10676  ;;  %v21239_v47 = vld [vmem:[#allocation53_spill] sm:$0xff] }
 0xbb2   :  { %6527 = vmatpush.msrb.mxu2 %v5614_v36  ;;  %6610 = vmatpush.msrb.mxu3 %v5963_v23  ;;  %v21241_v36 = vld [vmem:[#allocation10_spill] sm:$0xff]  ;;  %v5789_v48 = vsel %vm387_vm3, %v10454_v45, %v10459_v55  ;;  %v21246_v45 = vld [vmem:[#allocation47_spill] sm:$0xff] }
 0xbb3   :  { %6397 = vmatmul.f32.gmra.mxu0 %v17867_v56  ;;  %8876 = vmatmul.msk.f32.gmra.mxu1 %vm986_vm8, %v17883_v3  ;;  %v21242_v23 = vld [vmem:[#allocation54_spill] sm:$0xff] }
 0xbb4   :  { %6565 = vmatpush.msra.mxu0 %v5964_v44  ;;  %6482 = vmatpush.msra.mxu1 %v5529_v30  ;;  %v10667_v14 = vpop.permute.xlu2 %10666  ;;  %v10463_v44 = vunpack.i.l.bf16 %v21235_v40  ;;  %v10678_v30 = vunpack.i.l.bf16 %v17940_v61 }
 0xbb5   :  { %6528 = vmatpush.msrb.mxu2 %v5527_v11  ;;  %6611 = vmatpush.msrb.mxu3 %v5962_v25  ;;  %v21243_v11 = vld [vmem:[#allocation9_spill] sm:$0xff]  ;;  %v5787_v25 = vsel %vm387_vm3, %v10459_v55, %v10464_v4  ;;  %v10663_v55 = vunpack.i.l.bf16 %v17854_v29 }
 0xbb6   :  { %6566 = vmatpush.msra.mxu0 %v21236_v2  ;;  %6483 = vmatpush.msra.mxu1 %v5528_v20  ;;  %v10458_v20 = vunpack.i.l.bf16 %v21237_v43  ;;  %v21244_v2 = vld [vmem:[#allocation38_spill] sm:$0xff] }
 0xbb7   :  { %6529 = vmatpush.msrb.mxu2 %v5526_v15  ;;  %6612 = vmatpush.msrb.mxu3 %v21238_v38  ;;  %v10404_v15 = vunpack.i.h.bf16 %v21244_v2  ;;  %v10668_v38 = vunpack.i.l.bf16 %v10667_v14 }
 0xbb8   :  { %6567 = vmatpush.msra.mxu0 %v21239_v47  ;;  %6484 = vmatpush.msra.mxu1 %v21240_v5  ;;  %v21245_v47 = vld [vmem:[#allocation39_spill] sm:$0xff]  ;;  %v10409_v5 = vunpack.i.h.bf16 %v21246_v45  ;;  %v5788_v43 = vsel %vm387_vm3, %v10453_v57, %v10458_v20  ;;  %v5786_v28 = vsel %vm387_vm3, %v10458_v20, %v10463_v44  ;;  %v10653_v57 = vunpack.i.l.bf16 %v17870_v50 }
 0xbb9   :  { %6530 = vmatpush.msrb.mxu2 %v21241_v36  ;;  %6613 = vmatpush.msrb.mxu3 %v21242_v23  ;;  %v10679_v36 = vunpack.i.h.bf16 %v17940_v61  ;;  %v10669_v23 = vunpack.i.h.bf16 %v10667_v14  ;;  %v10403_v14 = vunpack.i.l.bf16 %v21244_v2  ;;  %v5701_v2 = vsel %vm298_vm4, %v10399_v41, %v10404_v15 }
 0xbba   :  { %6568 = vmatpush.msra.mxu0 %v5789_v48  ;;  %6485 = vmatpush.msra.mxu1 %v21243_v11  ;;  %v6141_v48 = vsel %vm743_vm7, %v10658_v63, %v10668_v38  ;;  %v10408_v11 = vunpack.i.l.bf16 %v21246_v45  ;;  %v10664_v63 = vunpack.i.h.bf16 %v17854_v29  ;;  %v10654_v41 = vunpack.i.h.bf16 %v17870_v50 }
 0xbbb   :  { %6531 = vmatpush.msrb.mxu2 %v21245_v47  ;;  %6614 = vmatpush.msrb.mxu3 %v5787_v25  ;;  %v6139_v25 = vsel %vm743_vm7, %v10668_v38, %v10678_v30  ;;  %v6140_v38 = vsel %vm743_vm7, %v10659_v58, %v10669_v23  ;;  %v21247_v47 = vld [vmem:[#allocation30_spill] sm:$0xff]  ;;  %v6138_v20 = vsel %vm743_vm7, %v10669_v23, %v10679_v36 }
 0xbbc   :  { %6486 = vmatmul.f32.vlgmr.msra.gmra.mxu1 %v17777_v13  ;;  %8879 = vmatmul.msk.f32.vlgmr.msrb.gmra.mxu0 %vm986_vm8, %v17782_v8  ;;  %v6049_v58 = vsel %vm654_vm0, %v10643_v59, %v10653_v57  ;;  %v6047_v23 = vsel %vm654_vm0, %v10653_v57, %v10663_v55  ;;  %v5700_v50 = vsel %vm298_vm4, %v10398_v7, %v10403_v14  ;;  %v10348_v57 = vunpack.i.l.bf16 %v21247_v47 }
 0xbbd   :  { %6532 = vmatmul.f32.vlgmr.msrb.gmra.mxu2 %v17777_v13  ;;  %8881 = vmatmul.msk.f32.vlgmr.msra.gmra.mxu3 %vm986_vm8, %v17782_v8  ;;  %v6048_v59 = vsel %vm654_vm0, %v10644_v33, %v10654_v41  ;;  %v6046_v9 = vsel %vm654_vm0, %v10654_v41, %v10664_v63  ;;  %v21249_v33 = vunpack.i.h.bf16 %v17397_v34 }
 0xbbe   :  { %6569 = vmatpush.msra.mxu0 %v5788_v43  ;;  %6599 = vmatpush.msrb.mxu1 %v6141_v48  ;;  %v10349_v43 = vunpack.i.h.bf16 %v21247_v47  ;;  %v5699_v48 = vsel %vm298_vm4, %v10404_v15, %v10409_v5  ;;  %v5698_v15 = vsel %vm298_vm4, %v10403_v14, %v10408_v11 }
 0xbbf   :  { %6645 = vmatpush.msra.mxu2 %v6139_v25  ;;  %6615 = vmatpush.msrb.mxu3 %v5786_v28  ;;  %v21248_v25 = vld [vmem:[#allocation14_spill] sm:$0xff]  ;;  %v5961_v14 = vsel %vm565_vm1, %v10574_v10, %v21249_v33  ;;  %v5612_v10 = vsel %vm209_vm5, %v10343_v51, %v10348_v57  ;;  %v10687_v51 = vpop.permute.xlu0 %10686 }
 0xbc0   :  { %6570 = vmatpush.msra.mxu0 %v5701_v2  ;;  %6600 = vmatpush.msrb.mxu1 %v6140_v38  ;;  %v10354_v28 = vunpack.i.h.bf16 %v21248_v25  ;;  %v5613_v7 = vsel %vm209_vm5, %v10344_v35, %v10349_v43  ;;  %v10353_v2 = vunpack.i.l.bf16 %v21248_v25  ;;  %v21250_v38 = vld [vmem:[#allocation8_spill] sm:$0xff]  ;;  %v21251_v35 = vld [vmem:[#allocation21_spill] sm:$0xff]  ;;  %v21261_v33 = vld [vmem:[#allocation34_spill] sm:$0xff] }
 0xbc1   :  { %6646 = vmatpush.msra.mxu2 %v6138_v20  ;;  %6616 = vmatpush.msrb.mxu3 %v5699_v48  ;;  %v10299_v47 = vunpack.i.h.bf16 %v21250_v38  ;;  %v10298_v20 = vunpack.i.l.bf16 %v21250_v38  ;;  %v21252_v48 = vunpack.i.l.bf16 %v17397_v34  ;;  %v21275_v38 = vld [vmem:[#allocation13_spill] sm:$0xff] }
 0xbc2   :  { %6654 = vmatpush.msra.mxu1 %v6049_v58  ;;  %6571 = vmatpush.msra.mxu0 %v5700_v50  ;;  %v5611_v0 = vsel %vm209_vm5, %v10349_v43, %v10354_v28  ;;  %v10294_v43 = vunpack.i.h.bf16 %v21251_v35  ;;  %v10293_v58 = vunpack.i.l.bf16 %v21251_v35  ;;  %v10688_v50 = vunpack.i.l.bf16 %v10687_v51  ;;  %v21262_v35 = vld [vmem:[#allocation22_spill] sm:$0xff] }
 0xbc3   :  { %6700 = vmatpush.msrb.mxu2 %v6047_v23  ;;  %6617 = vmatpush.msrb.mxu3 %v5698_v15  ;;  %v5960_v41 = vsel %vm565_vm1, %v10573_v62, %v21252_v48  ;;  %v21254_v62 = vld [vmem:[#allocation56_spill] sm:$0xff]  ;;  %v18095_v23 = vpop.permute.xlu1 %10691  ;;  %v21255_v15 = vld [vmem:[#allocation57_spill] sm:$0xff] }
 0xbc4   :  { %6655 = vmatpush.msra.mxu1 %v6048_v59  ;;  %6572 = vmatpush.msra.mxu0 %v5613_v7  ;;  %v5525_v24 = vsel %vm120_vm6, %v10289_v27, %v10294_v43  ;;  %v5523_v34 = vsel %vm120_vm6, %v10294_v43, %v10299_v47  ;;  %v5522_v27 = vsel %vm120_vm6, %v10293_v58, %v10298_v20  ;;  %v21256_v59 = vld [vmem:[#allocation58_spill] sm:$0xff]  ;;  %v21263_v43 = vld [vmem:[#allocation45_spill] sm:$0xff]  ;;  %v21264_v48 = vld [vmem:[#allocation16_spill] sm:$0xff] }
 0xbc5   :  { %6701 = vmatpush.msrb.mxu2 %v6046_v9  ;;  %6618 = vmatpush.msrb.mxu3 %v5611_v0  ;;  %v21257_v9 = vld [vmem:[#allocation28_spill] sm:$0xff]  ;;  %v10693_v0 = vunpack.i.l.bf16 %v18095_v23  ;;  %v10418_v40 = vunpack.i.l.bf16 %v21263_v43 }
 0xbc6   :  { %6656 = vmatpush.msra.mxu1 %v5961_v14  ;;  %8880 = vmatmul.msk.f32.gmra.mxu0 %vm986_vm8, %v17883_v3  ;;  %v10689_v14 = vunpack.i.h.bf16 %v10687_v51  ;;  %v18127_v51 = vpop.permute.xlu2 %10681 }
 0xbc7   :  { %6702 = vmatpush.msrb.mxu2 %v17544_v46  ;;  %6489 = vmatmul.f32.gmra.mxu1 %v17867_v56  ;;  %v5610_v46 = vsel %vm209_vm5, %v10348_v57, %v10353_v2  ;;  %v21259_v57 = vld [vmem:[#allocation12_spill] sm:$0xff] }
 0xbc8   :  { %6535 = vmatmul.f32.gmra.mxu2 %v17867_v56  ;;  %8882 = vmatmul.msk.f32.gmra.mxu3 %vm986_vm8, %v17883_v3 }
 0xbc9   :  { %6573 = vmatpush.msra.mxu0 %v5612_v10  ;;  %6619 = vmatpush.msrb.mxu3 %v5610_v46  ;;  %v10419_v10 = vunpack.i.h.bf16 %v21263_v43  ;;  %v10694_v46 = vunpack.i.h.bf16 %v18095_v23  ;;  %v21287_v23 = vld [vmem:[#allocation41_spill] sm:$0xff] }
 0xbca   :  { %6657 = vmatpush.msra.mxu1 %v5960_v41  ;;  %6703 = vmatpush.msrb.mxu2 %v17550_v6  ;;  %v5524_v6 = vsel %vm120_vm6, %v10288_v26, %v10293_v58  ;;  %v21260_v26 = vunpack.i.h.bf16 %v21259_v57  ;;  %v6137_v58 = vsel %vm743_vm7, %v10678_v30, %v10688_v50  ;;  %v21268_v30 = vld [vmem:[#allocation15_spill] sm:$0xff] }
 0xbcb   :  { %6574 = vmatpush.msra.mxu0 %v5525_v24  ;;  %6620 = vmatpush.msrb.mxu3 %v5523_v34  ;;  %v21266_v24 = vld [vmem:[#allocation35_spill] sm:$0xff] }
 0xbcc   :  { %6658 = vmatpush.msra.mxu1 %v21253_v16  ;;  %6704 = vmatpush.msrb.mxu2 %v21254_v62  ;;  %v5785_v7 = vsel %vm387_vm3, %v10464_v4, %v21260_v26  ;;  %v21265_v4 = vunpack.i.l.bf16 %v21259_v57  ;;  %v10414_v34 = vunpack.i.h.bf16 %v21266_v24  ;;  %v10673_v16 = vunpack.i.l.bf16 %v18008_v21 }
 0xbcd   :  { %6575 = vmatpush.msra.mxu0 %v5524_v6  ;;  %6621 = vmatpush.msrb.mxu3 %v5522_v27  ;;  %v10413_v62 = vunpack.i.l.bf16 %v21266_v24  ;;  %v21267_v6 = vld [vmem:[#allocation4_spill] sm:$0xff]  ;;  %v10359_v27 = vunpack.i.h.bf16 %v21268_v30  ;;  %v10683_v57 = vunpack.i.l.bf16 %v18127_v51  ;;  %v10358_v26 = vunpack.i.l.bf16 %v21268_v30 }
 0xbce   :  { %6659 = vmatpush.msra.mxu1 %v21255_v15  ;;  %6705 = vmatpush.msrb.mxu2 %v21256_v59  ;;  %v5784_v41 = vsel %vm387_vm3, %v10463_v44, %v21265_v4  ;;  %v6135_v44 = vsel %vm743_vm7, %v10688_v50, %v10693_v0  ;;  %v10674_v15 = vunpack.i.h.bf16 %v18008_v21  ;;  %v5697_v59 = vsel %vm298_vm4, %v10409_v5, %v10414_v34  ;;  %v21278_v30 = vld [vmem:[#allocation44_spill] sm:$0xff] }
 0xbcf   :  { %6576 = vmatpush.msra.mxu0 %v21257_v9  ;;  %6622 = vmatpush.msrb.mxu3 %v21258_v53  ;;  %v6136_v9 = vsel %vm743_vm7, %v10679_v36, %v10689_v14  ;;  %v21269_v53 = vld [vmem:[#allocation36_spill] sm:$0xff]  ;;  %v5695_v21 = vsel %vm298_vm4, %v10414_v34, %v10419_v10  ;;  %v6134_v5 = vsel %vm743_vm7, %v10689_v14, %v10694_v46  ;;  %v21272_v34 = vld [vmem:[#allocation59_spill] sm:$0xff] }
 0xbd0   :  { %6660 = vmatpush.msra.mxu1 %v5785_v7  ;;  %6706 = vmatpush.msrb.mxu2 %v21261_v33  ;;  %v10364_v50 = vunpack.i.h.bf16 %v21269_v53  ;;  %v6045_v61 = vsel %vm654_vm0, %v10663_v55, %v10673_v16  ;;  %v5696_v36 = vsel %vm298_vm4, %v10408_v11, %v10413_v62  ;;  %v10684_v7 = vunpack.i.h.bf16 %v18127_v51  ;;  %v21291_v51 = vld [vmem:[#allocation33_spill] sm:$0xff] }
 0xbd1   :  { %6577 = vmatpush.msra.mxu0 %v21262_v35  ;;  %8883 = vmatmul.msk.f32.vlgmr.msrb.gmra.mxu1 %vm986_vm8, %v17782_v8  ;;  %v5694_v33 = vsel %vm298_vm4, %v10413_v62, %v10418_v40  ;;  %v6043_v55 = vsel %vm654_vm0, %v10673_v16, %v10683_v57  ;;  %v10363_v45 = vunpack.i.l.bf16 %v21269_v53  ;;  %v6044_v11 = vsel %vm654_vm0, %v10664_v63, %v10674_v15  ;;  %v21273_v16 = vld [vmem:[#allocation61_spill] sm:$0xff]  ;;  %v10697_v62 = vpop.permute.xlu2 %10696 }
 0xbd2   :  { %6578 = vmatmul.f32.vlgmr.msra.gmra.mxu0 %v17777_v13  ;;  %6623 = vmatpush.msrb.mxu3 %v21264_v48  ;;  %v5609_v14 = vsel %vm209_vm5, %v10354_v28, %v10359_v27  ;;  %v5607_v35 = vsel %vm209_vm5, %v10359_v27, %v10364_v50  ;;  %v6042_v29 = vsel %vm654_vm0, %v10674_v15, %v10684_v7  ;;  %v21270_v48 = vld [vmem:[#allocation6_spill] sm:$0xff]  ;;  %v21279_v27 = vld [vmem:[#allocation25_spill] sm:$0xff]  ;;  %v21280_v15 = vld [vmem:[#allocation27_spill] sm:$0xff] }
 0xbd3   :  { %6661 = vmatpush.msra.mxu1 %v5784_v41  ;;  %6691 = vmatpush.msrb.mxu0 %v6137_v58  ;;  %v10304_v4 = vunpack.i.h.bf16 %v21270_v48  ;;  %v5608_v63 = vsel %vm209_vm5, %v10353_v2, %v10358_v26  ;;  %v10303_v28 = vunpack.i.l.bf16 %v21270_v48  ;;  %v5606_v41 = vsel %vm209_vm5, %v10358_v26, %v10363_v45  ;;  %v21271_v58 = vld [vmem:[#allocation19_spill] sm:$0xff]  ;;  %v21294_v53 = vld [vmem:[#allocation65_spill] sm:$0xff] }
 0xbd4   :  { %6707 = vmatpush.msrb.mxu2 %v21267_v6  ;;  %6624 = vmatmul.f32.vlgmr.msrb.gmra.mxu3 %v17777_v13  ;;  %v10308_v2 = vunpack.i.l.bf16 %v21271_v58  ;;  %v21276_v6 = vld [vmem:[#allocation24_spill] sm:$0xff]  ;;  %v10699_v26 = vunpack.i.h.bf16 %v10697_v62 }
 0xbd5   :  { %8885 = vmatmul.msk.f32.vlgmr.msra.gmra.mxu2 %vm986_vm8, %v17782_v8  ;;  %6737 = vmatpush.msra.mxu3 %v6135_v44  ;;  %v5521_v25 = vsel %vm120_vm6, %v10299_v47, %v10304_v4  ;;  %v5520_v24 = vsel %vm120_vm6, %v10298_v20, %v10303_v28  ;;  %v18234_v47 = vpop.permute.xlu0 %10701  ;;  %v21277_v20 = vld [vmem:[#allocation62_spill] sm:$0xff] }
 0xbd6   :  { %6662 = vmatpush.msra.mxu1 %v5697_v59  ;;  %6692 = vmatpush.msrb.mxu0 %v6136_v9  ;;  %v10703_v44 = vunpack.i.l.bf16 %v18234_v47  ;;  %v10424_v59 = vunpack.i.h.bf16 %v21280_v15  ;;  %v10698_v9 = vunpack.i.l.bf16 %v10697_v62 }
 0xbd7   :  { %6708 = vmatpush.msrb.mxu2 %v5695_v21  ;;  %6738 = vmatpush.msra.mxu3 %v6134_v5  ;;  %v21281_v21 = vld [vmem:[#allocation18_spill] sm:$0xff]  ;;  %v21282_v5 = vld [vmem:[#allocation40_spill] sm:$0xff] }
 0xbd8   :  { %6746 = vmatpush.msra.mxu0 %v6045_v61  ;;  %6663 = vmatpush.msra.mxu1 %v5696_v36  ;;  %v10704_v61 = vunpack.i.h.bf16 %v18234_v47  ;;  %v10423_v36 = vunpack.i.l.bf16 %v21280_v15  ;;  %v5693_v48 = vsel %vm298_vm4, %v10419_v10, %v10424_v59 }
 0xbd9   :  { %6709 = vmatpush.msrb.mxu2 %v5694_v33  ;;  %6792 = vmatpush.msrb.mxu3 %v6043_v55  ;;  %v6133_v33 = vsel %vm743_vm7, %v10693_v0, %v10698_v9  ;;  %v21283_v55 = vld [vmem:[#allocation43_spill] sm:$0xff]  ;;  %v6132_v0 = vsel %vm743_vm7, %v10694_v46, %v10699_v26  ;;  %v21288_v46 = vunpack.i.l.bf16 %v17517_v39  ;;  %v21289_v39 = vunpack.i.l.bf16 %v17513_v42 }
 0xbda   :  { %6747 = vmatpush.msra.mxu0 %v6044_v11  ;;  %6664 = vmatpush.msra.mxu1 %v5609_v14  ;;  %v10429_v11 = vunpack.i.h.bf16 %v21283_v55  ;;  %v21284_v14 = vld [vmem:[#allocation37_spill] sm:$0xff]  ;;  %v10368_v42 = vunpack.i.l.bf16 %v21287_v23 }
 0xbdb   :  { %6710 = vmatpush.msrb.mxu2 %v5607_v35  ;;  %6793 = vmatpush.msrb.mxu3 %v6042_v29  ;;  %v6131_v35 = vsel %vm743_vm7, %v10698_v9, %v10703_v44  ;;  %v21285_v29 = vld [vmem:[#allocation48_spill] sm:$0xff]  ;;  %v6062_v43 = vsel %vm654_vm0, %v10684_v7, %v21289_v39  ;;  %v21292_v7 = vld [vmem:[#allocation63_spill] sm:$0xff]  ;;  %v21295_v9 = vld [vmem:[#allocation66_spill] sm:$0xff] }
 0xbdc   :  { %6748 = vmatpush.msra.mxu0 %v17554_v1  ;;  %8884 = vmatmul.msk.f32.gmra.mxu1 %vm986_vm8, %v17883_v3  ;;  %v10309_v1 = vunpack.i.h.bf16 %v21271_v58  ;;  %v5691_v10 = vsel %vm298_vm4, %v10424_v59, %v10429_v11  ;;  %v21299_v58 = vld [vmem:[#allocation26_spill] sm:$0xff] }
 0xbdd   :  { %6581 = vmatmul.f32.gmra.mxu0 %v17867_v56  ;;  %6665 = vmatpush.msra.mxu1 %v5608_v63  ;;  %v21286_v63 = vld [vmem:[#allocation42_spill] sm:$0xff] }
 0xbde   :  { %6711 = vmatpush.msrb.mxu2 %v5606_v41  ;;  %6794 = vmatpush.msrb.mxu3 %v17562_v60  ;;  %v5519_v60 = vsel %vm120_vm6, %v10304_v4, %v10309_v1  ;;  %v10428_v4 = vunpack.i.l.bf16 %v21283_v55  ;;  %v6130_v41 = vsel %vm743_vm7, %v10699_v26, %v10704_v61 }
 0xbdf   :  { %6627 = vmatmul.f32.gmra.mxu3 %v17867_v56  ;;  %8886 = vmatmul.msk.f32.gmra.mxu2 %vm986_vm8, %v17883_v3 }
 0xbe0   :  { %6749 = vmatpush.msra.mxu0 %v17566_v37  ;;  %6666 = vmatpush.msra.mxu1 %v5521_v25  ;;  %v5518_v37 = vsel %vm120_vm6, %v10303_v28, %v10308_v2  ;;  %v10374_v28 = vunpack.i.h.bf16 %v21286_v63  ;;  %v10369_v25 = vunpack.i.h.bf16 %v21287_v23 }
 0xbe1   :  { %6712 = vmatpush.msrb.mxu2 %v5519_v60  ;;  %6795 = vmatpush.msrb.mxu3 %v17570_v52  ;;  %v21274_v52 = vld [vmem:[#allocation60_spill] sm:$0xff]  ;;  %v6063_v60 = vsel %vm654_vm0, %v10683_v57, %v21288_v46 }
 0xbe2   :  { %6750 = vmatpush.msra.mxu0 %v21272_v34  ;;  %6667 = vmatpush.msra.mxu1 %v5520_v24  ;;  %v5692_v24 = vsel %vm298_vm4, %v10418_v40, %v10423_v36  ;;  %v5690_v34 = vsel %vm298_vm4, %v10423_v36, %v10428_v4  ;;  %v5605_v40 = vsel %vm209_vm5, %v10364_v50, %v10369_v25  ;;  %v21301_v36 = vld [vmem:[#allocation67_spill] sm:$0xff] }
 0xbe3   :  { %6713 = vmatpush.msrb.mxu2 %v5518_v37  ;;  %6796 = vmatpush.msrb.mxu3 %v21273_v16  ;;  %v10373_v37 = vunpack.i.l.bf16 %v21286_v63  ;;  %v5603_v57 = vsel %vm209_vm5, %v10369_v25, %v10374_v28  ;;  %v21290_v16 = vld [vmem:[#allocation17_spill] sm:$0xff]  ;;  %v21302_v26 = vunpack.i.l.bf16 %v21301_v36 }
 0xbe4   :  { %6751 = vmatpush.msra.mxu0 %v21274_v52  ;;  %6668 = vmatpush.msra.mxu1 %v21275_v38  ;;  %v10319_v62 = vunpack.i.h.bf16 %v21290_v16  ;;  %v10314_v52 = vunpack.i.h.bf16 %v21291_v51  ;;  %v10318_v50 = vunpack.i.l.bf16 %v21290_v16  ;;  %v10313_v38 = vunpack.i.l.bf16 %v21291_v51 }
 0xbe5   :  { %6714 = vmatpush.msrb.mxu2 %v21276_v6  ;;  %6797 = vmatpush.msrb.mxu3 %v21277_v20  ;;  %v5604_v6 = vsel %vm209_vm5, %v10363_v45, %v10368_v42  ;;  %v5602_v20 = vsel %vm209_vm5, %v10368_v42, %v10373_v37 }
 0xbe6   :  { %6752 = vmatpush.msra.mxu0 %v21278_v30  ;;  %6669 = vmatpush.msra.mxu1 %v21279_v27  ;;  %v21293_v30 = vld [vmem:[#allocation64_spill] sm:$0xff]  ;;  %v5517_v27 = vsel %vm120_vm6, %v10309_v1, %v10314_v52  ;;  %v5515_v15 = vsel %vm120_vm6, %v10314_v52, %v10319_v62  ;;  %v5516_v45 = vsel %vm120_vm6, %v10308_v2, %v10313_v38  ;;  %v21296_v1 = vld [vmem:[#allocation46_spill] sm:$0xff]  ;;  %v21300_v2 = vld [vmem:[#allocation7_spill] sm:$0xff] }
 0xbe7   :  { %6715 = vmatpush.msrb.mxu2 %v21281_v21  ;;  %6798 = vmatpush.msrb.mxu3 %v21282_v5  ;;  %v5514_v59 = vsel %vm120_vm6, %v10313_v38, %v10318_v50  ;;  %v21297_v21 = vld [vmem:[#allocation11_spill] sm:$0xff]  ;;  %v21298_v5 = vld [vmem:[#allocation49_spill] sm:$0xff]  ;;  %v5534_v47 = vsel %vm120_vm6, %v10318_v50, %v10268_v32 }
 0xbe8   :  { %6670 = vmatmul.f32.vlgmr.msra.gmra.mxu1 %v17777_v13  ;;  %8887 = vmatmul.msk.f32.vlgmr.msrb.gmra.mxu0 %vm986_vm8, %v17782_v8 }
 0xbe9   :  { %6716 = vmatmul.f32.vlgmr.msrb.gmra.mxu2 %v17777_v13  ;;  %8889 = vmatmul.msk.f32.vlgmr.msra.gmra.mxu3 %vm986_vm8, %v17782_v8 }
 0xbea   :  { %6753 = vmatpush.msra.mxu0 %v21284_v14  ;;  %6783 = vmatpush.msrb.mxu1 %v6133_v33  ;;  %v6151_v33 = vsel %vm743_vm7, %v10703_v44, %v21302_v26  ;;  %v21303_v14 = vld [vmem:[#allocation50_spill] sm:$0xff]  ;;  %v21306_v44 = vunpack.i.l.bf16 %v17223_v17 }
 0xbeb   :  { %6829 = vmatpush.msra.mxu2 %v6131_v35  ;;  %6799 = vmatpush.msrb.mxu3 %v21285_v29  ;;  %v21304_v35 = vunpack.i.h.bf16 %v17223_v17  ;;  %v5622_v17 = vsel %vm209_vm5, %v10373_v37, %v10323_v18 }
 0xbec   :  { %6754 = vmatpush.msra.mxu0 %v5693_v48  ;;  %6784 = vmatpush.msrb.mxu1 %v6132_v0  ;;  %v21305_v48 = vunpack.i.l.bf16 %v17617_v31  ;;  %v5623_v31 = vsel %vm209_vm5, %v10374_v28, %v10324_v12  ;;  %v5535_v12 = vsel %vm120_vm6, %v10319_v62, %v10269_v49 }
 0xbed   :  { %6830 = vmatpush.msra.mxu2 %v6130_v41  ;;  %6800 = vmatpush.msrb.mxu3 %v5691_v10  ;;  %v5711_v29 = vsel %vm298_vm4, %v10429_v11, %v21304_v35  ;;  %v5710_v41 = vsel %vm298_vm4, %v10428_v4, %v21306_v44 }
 0xbee   :  { %6838 = vmatpush.msra.mxu1 %v6063_v60  ;;  %6755 = vmatpush.msra.mxu0 %v5692_v24  ;;  %v6150_v0 = vsel %vm743_vm7, %v10704_v61, %v21305_v48  ;;  %v21307_v61 = vld [vmem:[#allocation23_spill] sm:$0xff] }
 0xbef   :  { %6801 = vmatpush.msrb.mxu3 %v5690_v34 }
 0xbf0   :  { %6839 = vmatpush.msra.mxu1 %v6062_v43  ;;  %6756 = vmatpush.msra.mxu0 %v5605_v40 }
 0xbf1   :  { %6802 = vmatpush.msrb.mxu3 %v5603_v57  ;;  %6673 = vmatmul.f32.gmra.mxu1 %v17867_v56 }
 0xbf2   :  { %6840 = vmatpush.msra.mxu1 %v21292_v7  ;;  %8888 = vmatmul.msk.f32.gmra.mxu0 %vm986_vm8, %v17883_v3  ;;  %v8897_v7 = vld [vmem:[%s20406_s6 + $0x3] ss:$4 sm:$0xff] }
 0xbf3   :  { %6719 = vmatmul.f32.gmra.mxu2 %v17867_v56  ;;  %8890 = vmatmul.msk.f32.gmra.mxu3 %vm986_vm8, %v17883_v3  ;;  %v18420_v38 = vperm.slane %v8897_v7, 1  ;;  %v18442_v36 = vperm.slane %v8897_v7, 4 }
 0xbf4   :  { %6757 = vmatpush.msra.mxu0 %v5604_v6  ;;  %6803 = vmatpush.msrb.mxu3 %v5602_v20  ;;  %v18424_v20 = vperm.slane %v8897_v7, 0 }
 0xbf5   :  { %6841 = vmatpush.msra.mxu1 %v21293_v30 }
 0xbf6   :  { %6758 = vmatpush.msra.mxu0 %v5517_v27  ;;  %6804 = vmatpush.msrb.mxu3 %v5515_v15  ;;  %v18428_v27 = vperm.slane %v8897_v7, 2 }
 0xbf7   :  { %6842 = vmatpush.msra.mxu1 %v21294_v53 }
 0xbf8   :  { %6759 = vmatpush.msra.mxu0 %v5516_v45  ;;  %6805 = vmatpush.msrb.mxu3 %v5514_v59 }
 0xbf9   :  { %6843 = vmatpush.msra.mxu1 %v21295_v9 }
 0xbfa   :  { %6760 = vmatpush.msra.mxu0 %v21296_v1  ;;  %6806 = vmatpush.msrb.mxu3 %v21297_v21  ;;  %v18434_v21 = vperm.slane %v8897_v7, 3 }
 0xbfb   :  { %6844 = vmatpush.msra.mxu1 %v21298_v5  ;;  %8893 = vmatmul.msk.f32.vlgmr.msra.gmra.mxu2 %vm986_vm8, %v17782_v8 }
 0xbfc   :  { %6761 = vmatpush.msra.mxu0 %v21299_v58  ;;  %8891 = vmatmul.msk.f32.vlgmr.msrb.gmra.mxu1 %vm986_vm8, %v17782_v8 }
 0xbfd   :  { %6762 = vmatmul.f32.vlgmr.msra.gmra.mxu0 %v17777_v13  ;;  %6807 = vmatpush.msrb.mxu3 %v21300_v2 }
 0xbfe   :  { %6845 = vmatpush.msra.mxu1 %v21303_v14  ;;  %6875 = vmatpush.msrb.mxu0 %v6151_v33 }
 0xbff   :  { %6808 = vmatmul.f32.vlgmr.msrb.gmra.mxu3 %v17777_v13 }
 0xc00   :  { %6846 = vmatpush.msra.mxu1 %v5711_v29  ;;  %6876 = vmatpush.msrb.mxu0 %v6150_v0  ;;  %v18450_v29 = vperm.slane %v8897_v7, 5 }
 0xc02   :  { %6847 = vmatpush.msra.mxu1 %v5710_v41 }
 0xc03   :  { %8894 = vmatmul.msk.f32.gmra.mxu2 %vm986_vm8, %v17883_v3 }
 0xc04   :  { %6848 = vmatpush.msra.mxu1 %v5623_v31 }
 0xc05   :  { %6765 = vmatmul.f32.gmra.mxu0 %v17867_v56  ;;  %8892 = vmatmul.msk.f32.gmra.mxu1 %vm986_vm8, %v17883_v3 }
 0xc06   :  { %6849 = vmatpush.msra.mxu1 %v5622_v17  ;;  %v18460_v17 = vperm.slane %v8897_v7, 6 }
 0xc07   :  { %6811 = vmatmul.f32.gmra.mxu3 %v17867_v56 }
 0xc08   :  { %6850 = vmatpush.msra.mxu1 %v5535_v12 }
 0xc0a   :  { %6851 = vmatpush.msra.mxu1 %v5534_v47 }
 0xc0c   :  { %6852 = vmatpush.msra.mxu1 %v21307_v61 }
 0xc0d   :  { %8895 = vmatmul.msk.f32.vlgmr.msrb.gmra.mxu0 %vm986_vm8, %v17782_v8 }
 0xc0e   :  { %6853 = vmatpush.msra.mxu1 %v21308_v22  ;;  %v8898_v22 = vld [vmem:[%s20406_s6 + $0x23] ss:$4 sm:$0x7] }
 0xc0f   :  { %6854 = vmatmul.f32.vlgmr.msra.gmra.mxu1 %v17777_v13 }
 0xc15   :  { %8896 = vmatmul.msk.f32.gmra.mxu0 %vm986_vm8, %v17883_v3 }
 0xc17   :  { %6857 = vmatmul.f32.gmra.mxu1 %v17867_v56 }
 0xc25   :  { %v6395_v19 = vpop.f32.mrf.mxu0 }
 0xc26   :  { %v6418_v18 = vpop.f32.mrf.mxu1 }
 0xc27   :  { %v18422_v6 = vadd.f32 %v6418_v18, %v6395_v19 }
 0xc29   :  { %v6464_v32 = vpop.f32.mrf.mxu2  ;;  %v6441_v11 = vpop.f32.mrf.mxu3  ;;  %v6912_v5 = vmul.f32 %v18424_v20, %v18422_v6 }
 0xc2a   :  { %v18418_v50 = vadd.f32 %v6464_v32, %v6441_v11  ;;  %v18473_v11 = vperm.slane %v8897_v7, 7 }
 0xc2c   :  { %v6913_v9 = vmul.f32 %v18420_v38, %v18418_v50 }
 0xc2e   :  { %v6934_v33 = vadd.f32 %v6913_v9, %v6912_v5 }
 0xc30   :  { %v6421_v49 = vpop.f32.mrf.mxu1  ;;  %v6398_v55 = vpop.f32.mrf.mxu0 }
 0xc31   :  { %v18452_v48 = vadd.f32 %v6421_v49, %v6398_v55 }
 0xc33   :  { %v6444_v10 = vpop.f32.mrf.mxu3 }
 0xc34   :  { %v6467_v28 = vpop.f32.mrf.mxu2 }
 0xc35   :  { %v18444_v26 = vadd.f32 %v6467_v28, %v6444_v10 }
 0xc37   :  { %v6924_v47 = vmul.f32 %v18420_v38, %v18444_v26 }
 0xc39   :  { %v6487_v4 = vpop.f32.mrf.mxu1  ;;  %v6510_v63 = vpop.f32.mrf.mxu0 }
 0xc3a   :  { %v18426_v30 = vadd.f32 %v6510_v63, %v6487_v4  ;;  %v6923_v63 = vmul.f32 %v18424_v20, %v18452_v48 }
 0xc3c   :  { %v6914_v58 = vmul.f32 %v18428_v27, %v18426_v30 }
 0xc3e   :  { %v6935_v44 = vadd.f32 %v6934_v33, %v6914_v58  ;;  %v18509_v58 = vperm.slane %v8898_v22, 2 }
 0xc40   :  { %v6533_v25 = vpop.f32.mrf.mxu2  ;;  %v6556_v46 = vpop.f32.mrf.mxu3 }
 0xc41   :  { %v18432_v1 = vadd.f32 %v6556_v46, %v6533_v25  ;;  %v18485_v46 = vperm.slane %v8898_v22, 0 }
 0xc43   :  { %v6513_v23 = vpop.f32.mrf.mxu0  ;;  %v6915_v14 = vmul.f32 %v18434_v21, %v18432_v1 }
 0xc44   :  { %v6490_v8 = vpop.f32.mrf.mxu1 }
 0xc45   :  { %v18454_v0 = vadd.f32 %v6513_v23, %v6490_v8  ;;  %v6936_v49 = vadd.f32 %v6935_v44, %v6915_v14 }
 0xc47   :  { %v6925_v28 = vmul.f32 %v18428_v27, %v18454_v0 }
 0xc4b   :  { %v6536_v24 = vpop.f32.mrf.mxu2  ;;  %v6559_v3 = vpop.f32.mrf.mxu3 }
 0xc4c   :  { %v18464_v61 = vadd.f32 %v6559_v3, %v6536_v24 }
 0xc4e   :  { %v6602_v13 = vpop.f32.mrf.mxu1 }
 0xc4f   :  { %v6579_v60 = vpop.f32.mrf.mxu0 }
 0xc50   :  { %v18440_v2 = vadd.f32 %v6602_v13, %v6579_v60  ;;  %v6946_v13 = vadd.f32 %v6924_v47, %v6923_v63  ;;  %v6926_v60 = vmul.f32 %v18434_v21, %v18464_v61 }
 0xc52   :  { %v6916_v41 = vmul.f32 %v18442_v36, %v18440_v2 }
 0xc54   :  { %v6937_v8 = vadd.f32 %v6936_v49, %v6916_v41 }
 0xc57   :  { %v6625_v37 = vpop.f32.mrf.mxu3 }
 0xc58   :  { %v6648_v34 = vpop.f32.mrf.mxu2 }
 0xc59   :  { %v6605_v56 = vpop.f32.mrf.mxu1  ;;  %v18448_v35 = vadd.f32 %v6648_v34, %v6625_v37  ;;  %v18495_v37 = vperm.slane %v8898_v22, 1 }
 0xc5a   :  { %v6582_v39 = vpop.f32.mrf.mxu0 }
 0xc5b   :  { %v6917_v55 = vmul.f32 %v18450_v29, %v18448_v35  ;;  %v18479_v10 = vadd.f32 %v6605_v56, %v6582_v39  ;;  %v6947_v39 = vadd.f32 %v6946_v13, %v6925_v28 }
 0xc5d   :  { %v6938_v3 = vadd.f32 %v6937_v8, %v6917_v55 }
 0xc62   :  { %v6651_v43 = vpop.f32.mrf.mxu2  ;;  %v6628_v57 = vpop.f32.mrf.mxu3 }
 0xc63   :  { %v18489_v24 = vadd.f32 %v6651_v43, %v6628_v57  ;;  %v6948_v43 = vadd.f32 %v6947_v39, %v6926_v60  ;;  %v11243_v39 = vmov 648.0  }
 0xc64   :  { %11163 = vrcp.f32 %v11243_v39 }
 0xc65   :  { %v6671_v40 = vpop.f32.mrf.mxu1  ;;  %v6694_v16 = vpop.f32.mrf.mxu0  ;;  %v6928_v57 = vmul.f32 %v18450_v29, %v18489_v24 }
 0xc66   :  { %v18458_v31 = vadd.f32 %v6694_v16, %v6671_v40  ;;  %v6927_v40 = vmul.f32 %v18442_v36, %v18479_v10 }
 0xc68   :  { %v6918_v23 = vmul.f32 %v18460_v17, %v18458_v31  ;;  %v6949_v33 = vadd.f32 %v6948_v43, %v6927_v40 }
 0xc6a   :  { %v6939_v16 = vadd.f32 %v6938_v3, %v6918_v23  ;;  %v6950_v47 = vadd.f32 %v6949_v33, %v6928_v57  ;;  %v11164_v40 = vpop.eup %11163  ;;  %v18531_v57 = vpop.permute.xlu1 %7143 }
 0xc6b   :  { %vm6963_vm13 = vweird.f32 %v11164_v40 }
 0xc6c   :  { %v6717_v62 = vpop.f32.mrf.mxu2  ;;  %v6740_v51 = vpop.f32.mrf.mxu3 }
 0xc6d   :  { %v18471_v32 = vadd.f32 %v6740_v51, %v6717_v62 }
 0xc6e   :  { %v6674_v42 = vpop.f32.mrf.mxu1 }
 0xc6f   :  { %v6697_v52 = vpop.f32.mrf.mxu0  ;;  %v6919_v34 = vmul.f32 %v18473_v11, %v18471_v32 }
 0xc70   :  { %v18499_v62 = vadd.f32 %v6697_v52, %v6674_v42 }
 0xc72   :  { %v6929_v14 = vmul.f32 %v18460_v17, %v18499_v62 }
 0xc74   :  { %v6951_v49 = vadd.f32 %v6950_v47, %v6929_v14 }
 0xc76   :  { %v6720_v15 = vpop.f32.mrf.mxu2  ;;  %v6743_v45 = vpop.f32.mrf.mxu3 }
 0xc79   :  { %v6786_v53 = vpop.f32.mrf.mxu1 }
 0xc7a   :  { %v6763_v59 = vpop.f32.mrf.mxu0 }
 0xc7b   :  { %v18483_v25 = vadd.f32 %v6786_v53, %v6763_v59  ;;  %v6940_v53 = vadd.f32 %v6939_v16, %v6919_v34  ;;  %v18505_v59 = vadd.f32 %v6743_v45, %v6720_v15  ;;  %v6959_v16 = vmul.f32 648.0, %v11164_v40 }
 0xc7d   :  { %v6920_v51 = vmul.f32 %v18485_v46, %v18483_v25  ;;  %v6930_v15 = vmul.f32 %v18473_v11, %v18505_v59 }
 0xc7e   :  { %v6832_v12 = vpop.f32.mrf.mxu2 }
 0xc7f   :  { %v6941_v44 = vadd.f32 %v6940_v53, %v6920_v51  ;;  %v6960_v51 = vsub.f32 1.0, %v6959_v16 }
 0xc81   :  { %v6961_v43 = vmul.f32 %v11164_v40, %v6960_v51 }
 0xc82   :  { %v6809_v18 = vpop.f32.mrf.mxu3  ;;  %v6766_v19 = vpop.f32.mrf.mxu0 }
 0xc83   :  { %v6789_v4 = vpop.f32.mrf.mxu1  ;;  %v18493_v56 = vadd.f32 %v6832_v12, %v6809_v18 }
 0xc84   :  { %v18513_v41 = vadd.f32 %v6789_v4, %v6766_v19  ;;  %v6952_v19 = vadd.f32 %v6951_v49, %v6930_v15 }
 0xc85   :  { %v6921_v9 = vmul.f32 %v18495_v37, %v18493_v56 }
 0xc86   :  { %v6835_v5 = vpop.f32.mrf.mxu2  ;;  %v6931_v55 = vmul.f32 %v18485_v46, %v18513_v41 }
 0xc87   :  { %v6942_v45 = vadd.f32 %v6941_v44, %v6921_v9  ;;  %v18535_v9 = vpop.permute.xlu2 %7108 }
 0xc88   :  { %v6953_v23 = vadd.f32 %v6952_v19, %v6931_v55 }
 0xc8a   :  { %v6878_v7 = vpop.f32.mrf.mxu0  ;;  %v6812_v42 = vpop.f32.mrf.mxu3 }
 0xc8b   :  { %v18519_v18 = vadd.f32 %v6835_v5, %v6812_v42 }
 0xc8c   :  { %v6855_v52 = vpop.f32.mrf.mxu1 }
 0xc8d   :  { %v18515_v12 = vadd.f32 %v6878_v7, %v6855_v52  ;;  %v6932_v4 = vmul.f32 %v18495_v37, %v18519_v18  ;;  %v6962_v7 = vadd.f32 %v11164_v40, %v6961_v43 }
 0xc8f   :  { %v6922_v22 = vmul.f32 %v18509_v58, %v18515_v12  ;;  %v6954_v60 = vadd.f32 %v6953_v23, %v6932_v4  ;;  %v18533_v53 = vsel %vm6963_vm13, %v11164_v40, %v6962_v7 }
 0xc91   :  { %v6943_v63 = vadd.f32 %v6942_v45, %v6922_v22 }
 0xc92   :  { %v6881_v28 = vpop.f32.mrf.mxu0 }
 0xc93   :  { %6944 = vadd.xlane.f32.xlu1 %v6943_v63 }
 0xc94   :  { %v6858_v8 = vpop.f32.mrf.mxu1 }
 0xc95   :  { %v18527_v13 = vadd.f32 %v6881_v28, %v6858_v8 }
 0xc97   :  { %v6933_v3 = vmul.f32 %v18509_v58, %v18527_v13 }
 0xc99   :  { %v6955_v34 = vadd.f32 %v6954_v60, %v6933_v3 }
 0xc9b   :  { %6956 = vadd.xlane.f32.xlu2 %v6955_v34 }
 0xd06   :  { %v6945_v5 = vpop.xlane.xlu1 %6944 }
 0xd07   :  { %v6965_v33 = vmul.f32 %v18533_v53, %v6945_v5 }
 0xd09   :  { %v18539_v42 = vsub.f32 %v18422_v6, %v6965_v33  ;;  %v18542_v52 = vsub.f32 %v18418_v50, %v6965_v33  ;;  %v18545_v14 = vsub.f32 %v18426_v30, %v6965_v33  ;;  %v18548_v44 = vsub.f32 %v18432_v1, %v6965_v33 }
 0xd0a   :  { %v18555_v45 = vsub.f32 %v18440_v2, %v6965_v33  ;;  %v18563_v49 = vsub.f32 %v18448_v35, %v6965_v33  ;;  %v18568_v63 = vsub.f32 %v18458_v31, %v6965_v33  ;;  %v18577_v8 = vsub.f32 %v18471_v32, %v6965_v33 }
 0xd0b   :  { %v6989_v47 = vmul.f32 %v18539_v42, %v18539_v42  ;;  %v6990_v15 = vmul.f32 %v18542_v52, %v18542_v52  ;;  %v6991_v6 = vmul.f32 %v18545_v14, %v18545_v14  ;;  %v6992_v55 = vmul.f32 %v18548_v44, %v18548_v44 }
 0xd0c   :  { %v6993_v2 = vmul.f32 %v18555_v45, %v18555_v45  ;;  %v6994_v23 = vmul.f32 %v18563_v49, %v18563_v49  ;;  %v18589_v34 = vsub.f32 %v18483_v25, %v6965_v33  ;;  %v6996_v25 = vmul.f32 %v18577_v8, %v18577_v8 }
 0xd0d   :  { %v7011_v22 = vmul.f32 %v6989_v47, %v18424_v20  ;;  %v7012_v30 = vmul.f32 %v6990_v15, %v18420_v38  ;;  %v7013_v28 = vmul.f32 %v6991_v6, %v18428_v27  ;;  %v7014_v31 = vmul.f32 %v6992_v55, %v18434_v21 }
 0xd0e   :  { %v6957_v50 = vpop.xlane.xlu2 %6956  ;;  %v7016_v51 = vmul.f32 %v6994_v23, %v18450_v29  ;;  %v6997_v47 = vmul.f32 %v18589_v34, %v18589_v34 }
 0xd0f   :  { %v6966_v1 = vmul.f32 %v18533_v53, %v6957_v50  ;;  %v7033_v19 = vadd.f32 %v7012_v30, %v7011_v22 }
 0xd11   :  { %v18574_v4 = vsub.f32 %v18452_v48, %v6966_v1  ;;  %v18580_v35 = vsub.f32 %v18444_v26, %v6966_v1  ;;  %v7034_v60 = vadd.f32 %v7033_v19, %v7013_v28  ;;  %v18586_v3 = vsub.f32 %v18454_v0, %v6966_v1 }
 0xd12   :  { %v6995_v48 = vmul.f32 %v18568_v63, %v18568_v63  ;;  %v7015_v26 = vmul.f32 %v6993_v2, %v18442_v36  ;;  %v18597_v40 = vsub.f32 %v18464_v61, %v6966_v1  ;;  %v18602_v0 = vsub.f32 %v18493_v56, %v6965_v33 }
 0xd13   :  { %v7000_v32 = vmul.f32 %v18574_v4, %v18574_v4  ;;  %v7035_v39 = vadd.f32 %v7034_v60, %v7014_v31  ;;  %v7001_v16 = vmul.f32 %v18580_v35, %v18580_v35  ;;  %v18608_v7 = vsub.f32 %v18479_v10, %v6966_v1 }
 0xd14   :  { %v7002_v5 = vmul.f32 %v18586_v3, %v18586_v3  ;;  %v18613_v61 = vsub.f32 %v18515_v12, %v6965_v33  ;;  %v7017_v6 = vmul.f32 %v6995_v48, %v18460_v17  ;;  %v18621_v22 = vsub.f32 %v18489_v24, %v6966_v1 }
 0xd15   :  { %v7036_v43 = vadd.f32 %v7035_v39, %v7015_v26  ;;  %v7022_v56 = vmul.f32 %v7000_v32, %v18424_v20  ;;  %v7023_v15 = vmul.f32 %v7001_v16, %v18420_v38  ;;  %v7003_v10 = vmul.f32 %v18597_v40, %v18597_v40 }
 0xd16   :  { %v6998_v12 = vmul.f32 %v18602_v0, %v18602_v0  ;;  %v7018_v33 = vmul.f32 %v6996_v25, %v18473_v11  ;;  %v18629_v30 = vsub.f32 %v18499_v62, %v6966_v1  ;;  %v7004_v38 = vmul.f32 %v18608_v7, %v18608_v7 }
 0xd17   :  { %v7037_v50 = vadd.f32 %v7036_v43, %v7016_v51  ;;  %v7024_v55 = vmul.f32 %v7002_v5, %v18428_v27  ;;  %v7045_v2 = vadd.f32 %v7023_v15, %v7022_v56  ;;  %v6999_v24 = vmul.f32 %v18613_v61, %v18613_v61 }
 0xd18   :  { %v7019_v28 = vmul.f32 %v6997_v47, %v18485_v46  ;;  %v18638_v19 = vsub.f32 %v18505_v59, %v6966_v1  ;;  %v7005_v62 = vmul.f32 %v18621_v22, %v18621_v22  ;;  %v7025_v31 = vmul.f32 %v7003_v10, %v18434_v21 }
 0xd19   :  { %v7038_v20 = vadd.f32 %v7037_v50, %v7017_v6  ;;  %v7046_v60 = vadd.f32 %v7045_v2, %v7024_v55  ;;  %v7020_v48 = vmul.f32 %v6998_v12, %v18495_v37  ;;  %v18645_v27 = vsub.f32 %v18513_v41, %v6966_v1 }
 0xd1a   :  { %v7006_v26 = vmul.f32 %v18629_v30, %v18629_v30  ;;  %v7026_v39 = vmul.f32 %v7004_v38, %v18442_v36  ;;  %v7021_v16 = vmul.f32 %v6999_v24, %v18509_v58  ;;  %v18652_v25 = vsub.f32 %v18519_v18, %v6966_v1  ;;  %v18671_v38 = vpop.permute.xlu0 %7113 }
 0xd1b   :  { %v7039_v23 = vadd.f32 %v7038_v20, %v7018_v33  ;;  %v7047_v59 = vadd.f32 %v7046_v60, %v7025_v31  ;;  %v7007_v21 = vmul.f32 %v18638_v19, %v18638_v19  ;;  %v7027_v43 = vmul.f32 %v7005_v62, %v18450_v29 }
 0xd1c   :  { %v18658_v5 = vsub.f32 %v18527_v13, %v6966_v1  ;;  %v7008_v36 = vmul.f32 %v18645_v27, %v18645_v27  ;;  %v7028_v56 = vmul.f32 %v7006_v26, %v18460_v17  ;;  %v7009_v18 = vmul.f32 %v18652_v25, %v18652_v25 }
 0xd1d   :  { %v7040_v32 = vadd.f32 %v7039_v23, %v7019_v28  ;;  %v7048_v41 = vadd.f32 %v7047_v59, %v7026_v39  ;;  %v7029_v6 = vmul.f32 %v7007_v21, %v18473_v11 }
 0xd1e   :  { %v7010_v29 = vmul.f32 %v18658_v5, %v18658_v5  ;;  %v7030_v13 = vmul.f32 %v7008_v36, %v18485_v46  ;;  %v7031_v10 = vmul.f32 %v7009_v18, %v18495_v37 }
 0xd1f   :  { %v7041_v51 = vadd.f32 %v7040_v32, %v7020_v48  ;;  %v7049_v15 = vadd.f32 %v7048_v41, %v7027_v43 }
 0xd20   :  { %v7032_v33 = vmul.f32 %v7010_v29, %v18509_v58 }
 0xd21   :  { %v7042_v47 = vadd.f32 %v7041_v51, %v7021_v16  ;;  %v7050_v50 = vadd.f32 %v7049_v15, %v7028_v56 }
 0xd22   :  { %v18673_v55 = vpop.permute.xlu0 %7148 }
 0xd23   :  { %7043 = vadd.xlane.f32.xlu0 %v7042_v47  ;;  %v7051_v1 = vadd.f32 %v7050_v50, %v7029_v6 }
 0xd25   :  { %v7052_v12 = vadd.f32 %v7051_v1, %v7030_v13 }
 0xd27   :  { %v7053_v17 = vadd.f32 %v7052_v12, %v7031_v10 }
 0xd29   :  { %v7054_v20 = vadd.f32 %v7053_v17, %v7032_v33 }
 0xd2b   :  { %7055 = vadd.xlane.f32.xlu1 %v7054_v20 }
 0xd96   :  { %v7044_v11 = vpop.xlane.xlu0 %7043 }
 0xd97   :  { %v7057_v2 = vmul.f32 %v7044_v11, %v18533_v53 }
 0xd99   :  { %v7059_v24 = vadd.f32 1e-05, %v7057_v2 }
 0xd9b   :  { %11165 = vrsqrt.f32 %v7059_v24  ;;  %vm7067_vm14 = vweird.f32 %v7059_v24 }
 0xd9e   :  { %v7056_v28 = vpop.xlane.xlu1 %7055 }
 0xd9f   :  { %v7058_v23 = vmul.f32 %v7056_v28, %v18533_v53 }
 0xda1   :  { %v11166_v46 = vpop.eup %11165  ;;  %v7060_v62 = vadd.f32 1e-05, %v7058_v23 }
 0xda2   :  { %v7062_v37 = vmul.f32 %v11166_v46, %v7059_v24  ;;  %vm7068_vm12 = vweird.f32 %v11166_v46 }
 0xda3   :  { %11167 = vrsqrt.f32 %v7060_v62  ;;  %vm7069_vm9 = vmor %vm7067_vm14, %vm7068_vm12  ;;  %vm7077_vm13 = vweird.f32 %v7060_v62 }
 0xda4   :  { %v7063_v31 = vmul.f32 %v11166_v46, %v7062_v37 }
 0xda6   :  { %v7064_v58 = vmul.f32 0.5, %v7063_v31 }
 0xda8   :  { %v7065_v60 = vsub.f32 1.5, %v7064_v58 }
 0xda9   :  { %v11168_v32 = vpop.eup %11167 }
 0xdaa   :  { %v7066_v48 = vmul.f32 %v11166_v46, %v7065_v60  ;;  %v7072_v39 = vmul.f32 %v11168_v32, %v7060_v62  ;;  %vm7078_vm11 = vweird.f32 %v11168_v32 }
 0xdab   :  { %vm7079_vm12 = vmor %vm7077_vm13, %vm7078_vm11 }
 0xdac   :  { %v18677_v26 = vsel %vm7069_vm9, %v11166_v46, %v7066_v48  ;;  %v7073_v21 = vmul.f32 %v11168_v32, %v7072_v39 }
 0xdad   :  { %v7081_v59 = vmul.f32 %v18677_v26, %v18539_v42  ;;  %v7082_v53 = vmul.f32 %v18677_v26, %v18542_v52  ;;  %v7083_v16 = vmul.f32 %v18677_v26, %v18545_v14  ;;  %v7084_v51 = vmul.f32 %v18677_v26, %v18548_v44 }
 0xdae   :  { %v7074_v56 = vmul.f32 0.5, %v7073_v21  ;;  %v7085_v14 = vmul.f32 %v18677_v26, %v18555_v45  ;;  %v7086_v6 = vmul.f32 %v18677_v26, %v18563_v49 }
 0xdaf   :  { %v7116_v43 = vmul.f32 %v18535_v9, %v7081_v59  ;;  %v7117_v41 = vmul.f32 %v18535_v9, %v7082_v53  ;;  %v7118_v47 = vmul.f32 %v18535_v9, %v7083_v16  ;;  %v7119_v36 = vmul.f32 %v18535_v9, %v7084_v51 }
 0xdb0   :  { %v7075_v15 = vsub.f32 1.5, %v7074_v56  ;;  %v7120_v45 = vmul.f32 %v18535_v9, %v7085_v14  ;;  %v7121_v33 = vmul.f32 %v18535_v9, %v7086_v6 }
 0xdb1   :  { %v7151_v42 = vadd.f32 %v18531_v57, %v7116_v43  ;;  %v7152_v52 = vadd.f32 %v18531_v57, %v7117_v41  ;;  %v7153_v44 = vadd.f32 %v18531_v57, %v7118_v47  ;;  %v7154_v18 = vadd.f32 %v18531_v57, %v7119_v36 }
 0xdb2   :  { %v7076_v13 = vmul.f32 %v11168_v32, %v7075_v15  ;;  %v7155_v11 = vadd.f32 %v18531_v57, %v7120_v45  ;;  %v7156_v2 = vadd.f32 %v18531_v57, %v7121_v33  ;;  %v7088_v43 = vmul.f32 %v18677_v26, %v18577_v8 }
 0xdb3   :  { %vm7173_vm15 = vcmp.gt.f32.partialorder %v7151_v42, 0.0  ;;  %vm7174_vm10 = vcmp.gt.f32.partialorder %v7152_v52, 0.0  ;;  %v7195_v50 = vmul.f32 0.2, %v7151_v42  ;;  %v7196_v29 = vmul.f32 0.2, %v7152_v52 }
 0xdb4   :  { %v7197_v49 = vmul.f32 0.2, %v7153_v44  ;;  %v7198_v17 = vmul.f32 0.2, %v7154_v18  ;;  %v18707_v20 = vsel %vm7079_vm12, %v11168_v32, %v7076_v13  ;;  %vm7175_vm14 = vcmp.gt.f32.partialorder %v7153_v44, 0.0 }
 0xdb5   :  { %v18699_v1 = vsel %vm7173_vm15, %v7151_v42, %v7195_v50  ;;  %v18701_v10 = vsel %vm7174_vm10, %v7152_v52, %v7196_v29  ;;  %vm7176_vm9 = vcmp.gt.f32.partialorder %v7154_v18, 0.0  ;;  %v7093_v46 = vmul.f32 %v18707_v20, %v18580_v35 }
 0xdb6   :  { %v10710_v12 = vpack.i.bf16 %v18701_v10, %v18699_v1  ;;  %v18714_v24 = vsel %vm7175_vm14, %v7153_v44, %v7197_v49  ;;  %v18716_v28 = vsel %vm7176_vm9, %v7154_v18, %v7198_v17  ;;  %v7092_v23 = vmul.f32 %v18707_v20, %v18574_v4 }
 0xdb7   :  { %21309 = vst [vmem:[#allocation3_spill] sm:$0xff] %v18714_v24  ;;  %v18724_v37 = vpack.i.bf16 %v18716_v28, %v18714_v24  ;;  %v7199_v62 = vmul.f32 0.2, %v7155_v11  ;;  %v7200_v31 = vmul.f32 0.2, %v7156_v2  ;;  %v7128_v58 = vmul.f32 %v18671_v38, %v7093_v46 }
 0xdb8   :  { %10711 = vrot.lane.b32.xlu0 %v10710_v12, %s11236_s28  ;;  %10716 = vrot.lane.b32.xlu2 %v10710_v12, %s11235_s27  ;;  %21310 = vst [vmem:[#allocation29_spill] sm:$0xff] %v18716_v28  ;;  %v7127_v60 = vmul.f32 %v18671_v38, %v7092_v23  ;;  %vm7177_vm15 = vcmp.gt.f32.partialorder %v7155_v11, 0.0  ;;  %vm7178_vm10 = vcmp.gt.f32.partialorder %v7156_v2, 0.0  ;;  %v7094_v4 = vmul.f32 %v18707_v20, %v18586_v3 }
 0xdb9   :  { %10706 = vrot.lane.b32.xlu1 %v10710_v12, %s11237_s29  ;;  %v7096_v35 = vmul.f32 %v18707_v20, %v18608_v7  ;;  %v7095_v48 = vmul.f32 %v18707_v20, %v18597_v40  ;;  %v18740_v32 = vsel %vm7177_vm15, %v7155_v11, %v7199_v62  ;;  %v18742_v39 = vsel %vm7178_vm10, %v7156_v2, %v7200_v31 }
 0xdba   :  { %21311 = vst [vmem:[#allocation51_spill] sm:$0xff] %v18740_v32  ;;  %v7163_v59 = vadd.f32 %v18673_v55, %v7128_v58  ;;  %v7162_v53 = vadd.f32 %v18673_v55, %v7127_v60  ;;  %v7129_v16 = vmul.f32 %v18671_v38, %v7094_v4  ;;  %v18749_v51 = vpack.i.bf16 %v18742_v39, %v18740_v32 }
 0xdbb   :  { %21312 = vst [vmem:[#allocation32_spill] sm:$0xff] %v18742_v39  ;;  %v7131_v3 = vmul.f32 %v18671_v38, %v7096_v35  ;;  %v7130_v7 = vmul.f32 %v18671_v38, %v7095_v48  ;;  %v7099_v47 = vmul.f32 %v18707_v20, %v18638_v19  ;;  %v7098_v14 = vmul.f32 %v18707_v20, %v18629_v30 }
 0xdbc   :  { %v7207_v21 = vmul.f32 0.2, %v7163_v59  ;;  %v7206_v40 = vmul.f32 0.2, %v7162_v53  ;;  %vm7185_vm11 = vcmp.gt.f32.partialorder %v7163_v59, 0.0  ;;  %vm7184_vm13 = vcmp.gt.f32.partialorder %v7162_v53, 0.0 }
 0xdbd   :  { %v7164_v41 = vadd.f32 %v18673_v55, %v7129_v16  ;;  %v7166_v36 = vadd.f32 %v18673_v55, %v7131_v3  ;;  %v7165_v56 = vadd.f32 %v18673_v55, %v7130_v7  ;;  %v7097_v8 = vmul.f32 %v18707_v20, %v18621_v22 }
 0xdbe   :  { %v18765_v42 = vsel %vm7185_vm11, %v7163_v59, %v7207_v21  ;;  %v18767_v52 = vsel %vm7184_vm13, %v7162_v53, %v7206_v40  ;;  %v7123_v15 = vmul.f32 %v18535_v9, %v7088_v43  ;;  %v7134_v18 = vmul.f32 %v18671_v38, %v7099_v47 }
 0xdbf   :  { %v7208_v44 = vmul.f32 0.2, %v7164_v41  ;;  %v7087_v19 = vmul.f32 %v18677_v26, %v18568_v63  ;;  %v18779_v6 = vpack.i.bf16 %v18765_v42, %v18701_v10  ;;  %v18783_v50 = vpack.i.bf16 %v18767_v52, %v18699_v1 }
 0xdc0   :  { %10726 = vrot.lane.b32.xlu0 %v18724_v37, %s11236_s28  ;;  %10731 = vrot.lane.b32.xlu2 %v18724_v37, %s11235_s27  ;;  %v7210_v30 = vmul.f32 0.2, %v7166_v36  ;;  %v7209_v29 = vmul.f32 0.2, %v7165_v56  ;;  %vm7186_vm12 = vcmp.gt.f32.partialorder %v7164_v41, 0.0  ;;  %vm7188_vm14 = vcmp.gt.f32.partialorder %v7166_v36, 0.0 }
 0xdc1   :  { %10721 = vrot.lane.b32.xlu1 %v18724_v37, %s11237_s29  ;;  %vm7187_vm9 = vcmp.gt.f32.partialorder %v7165_v56, 0.0  ;;  %v7133_v22 = vmul.f32 %v18671_v38, %v7098_v14  ;;  %v7132_v63 = vmul.f32 %v18671_v38, %v7097_v8  ;;  %v7122_v13 = vmul.f32 %v18535_v9, %v7087_v19 }
 0xdc2   :  { %v18794_v45 = vsel %vm7186_vm12, %v7164_v41, %v7208_v44  ;;  %v18798_v33 = vsel %vm7187_vm9, %v7165_v56, %v7209_v29  ;;  %v7158_v49 = vadd.f32 %v18531_v57, %v7123_v15  ;;  %v7169_v17 = vadd.f32 %v18673_v55, %v7134_v18 }
 0xdc3   :  { %21313 = vst [vmem:[#allocation52_spill] sm:$0xff] %v18794_v45  ;;  %v7168_v11 = vadd.f32 %v18673_v55, %v7133_v22  ;;  %v7102_v2 = vmul.f32 %v18707_v20, %v18658_v5  ;;  %v7101_v46 = vmul.f32 %v18707_v20, %v18652_v25  ;;  %v7167_v23 = vadd.f32 %v18673_v55, %v7132_v63 }
 0xdc4   :  { %21315 = vst [vmem:[#allocation5_spill] sm:$0xff] %v18798_v33  ;;  %v7100_v62 = vmul.f32 %v18707_v20, %v18645_v27  ;;  %v18812_v31 = vpack.i.bf16 %v18794_v45, %v18714_v24  ;;  %v7157_v58 = vadd.f32 %v18531_v57, %v7122_v13  ;;  %v7091_v60 = vmul.f32 %v18677_v26, %v18613_v61 }
 0xdc5   :  { %v7090_v5 = vmul.f32 %v18677_v26, %v18602_v0  ;;  %v18825_v4 = vpack.i.bf16 %v18798_v33, %v18716_v28  ;;  %v7202_v27 = vmul.f32 0.2, %v7158_v49  ;;  %v7089_v20 = vmul.f32 %v18677_v26, %v18589_v34 }
 0xdc6   :  { %v7213_v35 = vmul.f32 0.2, %v7169_v17  ;;  %v7212_v48 = vmul.f32 0.2, %v7168_v11  ;;  %v7137_v59 = vmul.f32 %v18671_v38, %v7102_v2  ;;  %v7136_v61 = vmul.f32 %v18671_v38, %v7101_v46 }
 0xdc7   :  { %v7211_v0 = vmul.f32 0.2, %v7167_v23  ;;  %vm7191_vm15 = vcmp.gt.f32.partialorder %v7169_v17, 0.0  ;;  %vm7190_vm10 = vcmp.gt.f32.partialorder %v7168_v11, 0.0  ;;  %v7135_v53 = vmul.f32 %v18671_v38, %v7100_v62 }
 0xdc8   :  { %10741 = vrot.lane.b32.xlu0 %v18749_v51, %s11237_s29  ;;  %10746 = vrot.lane.b32.xlu2 %v18749_v51, %s11236_s28  ;;  %vm7189_vm11 = vcmp.gt.f32.partialorder %v7167_v23, 0.0  ;;  %v7201_v34 = vmul.f32 0.2, %v7157_v58  ;;  %v7126_v26 = vmul.f32 %v18535_v9, %v7091_v60  ;;  %v7125_v16 = vmul.f32 %v18535_v9, %v7090_v5 }
 0xdc9   :  { %10736 = vrot.lane.b32.xlu1 %v10710_v12, %s11238_s30  ;;  %v18796_v12 = vsel %vm7188_vm14, %v7166_v36, %v7210_v30  ;;  %vm7180_vm13 = vcmp.gt.f32.partialorder %v7158_v49, 0.0  ;;  %vm7179_vm12 = vcmp.gt.f32.partialorder %v7157_v58, 0.0  ;;  %v7124_v3 = vmul.f32 %v18535_v9, %v7089_v20 }
 0xdca   :  { %21314 = vst [vmem:[#allocation53_spill] sm:$0xff] %v18796_v12  ;;  %v18821_v25 = vpack.i.bf16 %v18796_v12, %v18740_v32  ;;  %v18841_v7 = vsel %vm7191_vm15, %v7169_v17, %v7213_v35  ;;  %v18843_v21 = vsel %vm7190_vm10, %v7168_v11, %v7212_v48  ;;  %v7172_v40 = vadd.f32 %v18673_v55, %v7137_v59 }
 0xdcb   :  { %21316 = vst [vmem:[#allocation10_spill] sm:$0xff] %v18841_v7  ;;  %v7171_v38 = vadd.f32 %v18673_v55, %v7136_v61  ;;  %v18847_v43 = vsel %vm7189_vm11, %v7167_v23, %v7211_v0  ;;  %v7170_v41 = vadd.f32 %v18673_v55, %v7135_v53  ;;  %v18850_v47 = vsel %vm7180_vm13, %v7158_v49, %v7202_v27 }
 0xdcc   :  { %21317 = vst [vmem:[#allocation54_spill] sm:$0xff] %v18843_v21  ;;  %v18852_v36 = vsel %vm7179_vm12, %v7157_v58, %v7201_v34  ;;  %v7161_v56 = vadd.f32 %v18531_v57, %v7126_v26  ;;  %v7160_v9 = vadd.f32 %v18531_v57, %v7125_v16  ;;  %v10790_v14 = vpack.i.bf16 %v18841_v7, %v18850_v47 }
 0xdcd   :  { %21318 = vst [vmem:[#allocation9_spill] sm:$0xff] %v18847_v43  ;;  %v18860_v8 = vpack.i.bf16 %v18843_v21, %v18852_v36  ;;  %v7159_v15 = vadd.f32 %v18531_v57, %v7124_v3  ;;  %v18865_v55 = vpack.i.bf16 %v18847_v43, %v18742_v39  ;;  %v7216_v44 = vmul.f32 0.2, %v7172_v40 }
 0xdce   :  { %21319 = vst [vmem:[#allocation38_spill] sm:$0xff] %v18850_v47  ;;  %v7215_v18 = vmul.f32 0.2, %v7171_v38  ;;  %v7214_v19 = vmul.f32 0.2, %v7170_v41  ;;  %vm7194_vm14 = vcmp.gt.f32.partialorder %v7172_v40, 0.0  ;;  %v10955_v0 = vpack.i.bf16 %v18765_v42, %v18767_v52 }
 0xdcf   :  { %21320 = vst [vmem:[#allocation39_spill] sm:$0xff] %v18852_v36  ;;  %vm7193_vm9 = vcmp.gt.f32.partialorder %v7171_v38, 0.0  ;;  %vm7192_vm15 = vcmp.gt.f32.partialorder %v7170_v41, 0.0  ;;  %v7205_v30 = vmul.f32 0.2, %v7161_v56  ;;  %vm7183_vm10 = vcmp.gt.f32.partialorder %v7161_v56, 0.0 }
 0xdd0   :  { %10761 = vrot.lane.b32.xlu0 %v18779_v6, %s11231_s13  ;;  %10756 = vrot.lane.b32.xlu2 %v18783_v50, %s11231_s13  ;;  %v7204_v57 = vmul.f32 0.2, %v7160_v9  ;;  %v7203_v29 = vmul.f32 0.2, %v7159_v15  ;;  %vm7182_vm11 = vcmp.gt.f32.partialorder %v7160_v9, 0.0  ;;  %vm7181_vm13 = vcmp.gt.f32.partialorder %v7159_v15, 0.0 }
 0xdd1   :  { %10751 = vrot.lane.b32.xlu1 %v18749_v51, %s11235_s27  ;;  %v18872_v22 = vsel %vm7194_vm14, %v7172_v40, %v7216_v44  ;;  %v18874_v63 = vsel %vm7193_vm9, %v7171_v38, %v7215_v18  ;;  %v18876_v13 = vsel %vm7192_vm15, %v7170_v41, %v7214_v19  ;;  %v18878_v49 = vsel %vm7183_vm10, %v7161_v56, %v7205_v30 }
 0xdd2   :  { %21321 = vst [vmem:[#allocation47_spill] sm:$0xff] %v18872_v22  ;;  %v18880_v17 = vsel %vm7182_vm11, %v7160_v9, %v7204_v57  ;;  %v18882_v11 = vsel %vm7181_vm13, %v7159_v15, %v7203_v29  ;;  %v10805_v2 = vpack.i.bf16 %v18872_v22, %v18878_v49  ;;  %v18982_v53 = vpack.i.bf16 %v18798_v33, %v18794_v45 }
 0xdd3   :  { %21322 = vst [vmem:[#allocation30_spill] sm:$0xff] %v18874_v63  ;;  %v10800_v46 = vpack.i.bf16 %v18874_v63, %v18880_v17  ;;  %v10795_v23 = vpack.i.bf16 %v18876_v13, %v18882_v11 }
 0xdd4   :  { %21323 = vst [vmem:[#allocation14_spill] sm:$0xff] %v18876_v13 }
 0xdd5   :  { %21324 = vst [vmem:[#allocation8_spill] sm:$0xff] %v18878_v49 }
 0xdd6   :  { %21325 = vst [vmem:[#allocation21_spill] sm:$0xff] %v18880_v17 }
 0xdd7   :  { %21326 = vst [vmem:[#allocation55_spill] sm:$0xff] %v18882_v11 }
 0xdd8   :  { %10776 = vrot.lane.b32.xlu0 %v18821_v25, %s11231_s13  ;;  %10771 = vrot.lane.b32.xlu2 %v18825_v4, %s11231_s13 }
 0xdd9   :  { %10766 = vrot.lane.b32.xlu1 %v18812_v31, %s11231_s13 }
 0xde0   :  { %10791 = vrot.lane.b32.xlu0 %v10790_v14, %s11231_s13  ;;  %10786 = vrot.lane.b32.xlu2 %v18860_v8, %s11231_s13 }
 0xde1   :  { %10781 = vrot.lane.b32.xlu1 %v18865_v55, %s11231_s13 }
 0xde8   :  { %10806 = vrot.lane.b32.xlu0 %v10805_v2, %s11231_s13  ;;  %10801 = vrot.lane.b32.xlu2 %v10800_v46, %s11231_s13 }
 0xde9   :  { %10796 = vrot.lane.b32.xlu1 %v10795_v23, %s11231_s13 }
 0xdf0   :  { %10821 = vrot.lane.b32.xlu0 %v18812_v31, %s11232_s24  ;;  %10816 = vrot.lane.b32.xlu2 %v18779_v6, %s11232_s24 }
 0xdf1   :  { %10811 = vrot.lane.b32.xlu1 %v18783_v50, %s11232_s24 }
 0xdf8   :  { %10836 = vrot.lane.b32.xlu0 %v18865_v55, %s11232_s24  ;;  %10831 = vrot.lane.b32.xlu2 %v18821_v25, %s11232_s24 }
 0xdf9   :  { %10826 = vrot.lane.b32.xlu1 %v18825_v4, %s11232_s24 }
 0xe00   :  { %10851 = vrot.lane.b32.xlu0 %v10795_v23, %s11232_s24  ;;  %10846 = vrot.lane.b32.xlu2 %v10790_v14, %s11232_s24 }
 0xe01   :  { %10841 = vrot.lane.b32.xlu1 %v18860_v8, %s11232_s24 }
 0xe08   :  { %10866 = vrot.lane.b32.xlu0 %v18783_v50, %s11233_s25  ;;  %10861 = vrot.lane.b32.xlu2 %v10805_v2, %s11232_s24 }
 0xe09   :  { %10856 = vrot.lane.b32.xlu1 %v10800_v46, %s11232_s24 }
 0xe10   :  { %10881 = vrot.lane.b32.xlu0 %v18825_v4, %s11233_s25  ;;  %10876 = vrot.lane.b32.xlu2 %v18812_v31, %s11233_s25 }
 0xe11   :  { %10871 = vrot.lane.b32.xlu1 %v18779_v6, %s11233_s25 }
 0xe12   :  { %v18919_v62 = vpop.permute.xlu2 %10716 }
 0xe13   :  { %21327 = vst [vmem:[#allocation56_spill] sm:$0xff] %v18919_v62  ;;  %v20682_v27 = vunpack.i.h.bf16 %v18919_v62 }
 0xe18   :  { %10896 = vrot.lane.b32.xlu0 %v18860_v8, %s11233_s25  ;;  %10891 = vrot.lane.b32.xlu2 %v18865_v55, %s11233_s25 }
 0xe19   :  { %10886 = vrot.lane.b32.xlu1 %v18821_v25, %s11233_s25 }
 0xe1a   :  { %v18927_v58 = vpop.permute.xlu2 %10731 }
 0xe1b   :  { %v20675_v5 = vunpack.i.l.bf16 %v18927_v58 }
 0xe20   :  { %10911 = vrot.lane.b32.xlu0 %v10800_v46, %s11233_s25  ;;  %10906 = vrot.lane.b32.xlu2 %v10795_v23, %s11233_s25 }
 0xe21   :  { %10901 = vrot.lane.b32.xlu1 %v10790_v14, %s11233_s25 }
 0xe22   :  { %v18932_v60 = vpop.permute.xlu2 %10746 }
 0xe23   :  { %v20676_v56 = vunpack.i.l.bf16 %v18932_v60 }
 0xe28   :  { %10926 = vrot.lane.b32.xlu0 %v18779_v6, %s11234_s26  ;;  %10921 = vrot.lane.b32.xlu2 %v18783_v50, %s11234_s26  ;;  %v18953_v6 = vsel %vm476_vm2, %v20682_v27, %v20675_v5 }
 0xe29   :  { %10916 = vrot.lane.b32.xlu1 %v10805_v2, %s11233_s25 }
 0xe2a   :  { %v18941_v20 = vpop.permute.xlu0 %10711  ;;  %v18943_v35 = vpop.permute.xlu2 %10756 }
 0xe2b   :  { %v18945_v48 = vpop.permute.xlu1 %10706  ;;  %v20683_v3 = vunpack.i.h.bf16 %v18941_v20  ;;  %v20686_v23 = vunpack.i.h.bf16 %v18943_v35  ;;  %v20685_v5 = vunpack.i.l.bf16 %v18943_v35 }
 0xe2c   :  { %21328 = vst [vmem:[#allocation57_spill] sm:$0xff] %v18945_v48  ;;  %v20684_v40 = vunpack.i.h.bf16 %v18945_v48 }
 0xe30   :  { %10941 = vrot.lane.b32.xlu0 %v18821_v25, %s11234_s26  ;;  %10936 = vrot.lane.b32.xlu2 %v18825_v4, %s11234_s26 }
 0xe31   :  { %10931 = vrot.lane.b32.xlu1 %v18812_v31, %s11234_s26 }
 0xe32   :  { %v18961_v50 = vpop.permute.xlu0 %10726  ;;  %v18963_v59 = vpop.permute.xlu2 %10771 }
 0xe33   :  { %v18965_v61 = vpop.permute.xlu1 %10721  ;;  %v20677_v34 = vunpack.i.l.bf16 %v18961_v50  ;;  %v20678_v16 = vunpack.i.h.bf16 %v18961_v50 }
 0xe34   :  { %v20679_v26 = vunpack.i.l.bf16 %v18965_v61  ;;  %v20680_v30 = vunpack.i.h.bf16 %v18965_v61 }
 0xe35   :  { %v19020_v15 = vsel %vm565_vm1, %v20678_v16, %v20676_v56 }
 0xe36   :  { %v19004_v14 = vsel %vm654_vm0, %v20684_v40, %v20679_v26 }
 0xe38   :  { %10956 = vrot.lane.b32.xlu0 %v10955_v0, %s11237_s29  ;;  %10951 = vrot.lane.b32.xlu2 %v18860_v8, %s11234_s26  ;;  %v19012_v8 = vsel %vm565_vm1, %v20683_v3, %v20677_v34 }
 0xe39   :  { %10946 = vrot.lane.b32.xlu1 %v18865_v55, %s11234_s26  ;;  %v19024_v55 = vpack.i.bf16 %v18850_v47, %v18852_v36 }
 0xe3a   :  { %v18974_v25 = vpop.permute.xlu0 %10741  ;;  %v18976_v31 = vpop.permute.xlu2 %10786 }
 0xe3b   :  { %v18978_v4 = vpop.permute.xlu1 %10736  ;;  %v20681_v44 = vunpack.i.l.bf16 %v18974_v25  ;;  %v10788_v28 = vunpack.i.l.bf16 %v18976_v31 }
 0xe3d   :  { %v19042_v29 = vsel %vm654_vm0, %v20680_v30, %v20681_v44  ;;  %v19078_v44 = vpack.i.bf16 %v18880_v17, %v18882_v11 }
 0xe40   :  { %10981 = vrot.lane.b32.xlu0 %v18982_v53, %s11237_s29  ;;  %10961 = vrot.lane.b32.xlu2 %v10955_v0, %s11236_s28 }
 0xe41   :  { %10966 = vrot.lane.b32.xlu1 %v10955_v0, %s11235_s27 }
 0xe42   :  { %v10762_v38 = vpop.permute.xlu0 %10761  ;;  %v18993_v41 = vpop.permute.xlu2 %10801 }
 0xe43   :  { %v18996_v9 = vpop.permute.xlu1 %10751  ;;  %v10764_v2 = vunpack.i.h.bf16 %v10762_v38  ;;  %v10763_v46 = vunpack.i.l.bf16 %v10762_v38  ;;  %v20689_v38 = vunpack.i.h.bf16 %v18927_v58 }
 0xe45   :  { %v19066_v26 = vsel %vm120_vm6, %v20685_v5, %v10763_v46 }
 0xe48   :  { %11001 = vrot.lane.b32.xlu0 %v19024_v55, %s11235_s27  ;;  %10976 = vrot.lane.b32.xlu2 %v19024_v55, %s11237_s29 }
 0xe49   :  { %10971 = vrot.lane.b32.xlu1 %v18724_v37, %s11238_s30  ;;  %v20688_v37 = vunpack.i.l.bf16 %v18996_v9 }
 0xe4a   :  { %v10777_v18 = vpop.permute.xlu0 %10776  ;;  %v19033_v19 = vpop.permute.xlu2 %10816 }
 0xe4b   :  { %v10767_v57 = vpop.permute.xlu1 %10766  ;;  %v19074_v30 = vsel %vm476_vm2, %v20689_v38, %v20688_v37  ;;  %v10779_v40 = vunpack.i.h.bf16 %v10777_v18  ;;  %v10778_v5 = vunpack.i.l.bf16 %v10777_v18  ;;  %v10774_v37 = vunpack.i.h.bf16 %v18963_v59 }
 0xe4c   :  { %v10769_v27 = vunpack.i.h.bf16 %v10767_v57  ;;  %v10768_v3 = vunpack.i.l.bf16 %v10767_v57  ;;  %v10773_v38 = vunpack.i.l.bf16 %v18963_v59 }
 0xe4d   :  { %v19103_v11 = vsel %vm120_vm6, %v10774_v37, %v10779_v40 }
 0xe4e   :  { %v19091_v57 = vsel %vm120_vm6, %v10764_v2, %v10769_v27  ;;  %v19099_v18 = vsel %vm120_vm6, %v10769_v27, %v10774_v37  ;;  %21330 = vst [vmem:[#allocation28_spill] sm:$0xff] %v19103_v11  ;;  %v19107_v59 = vsel %vm120_vm6, %v10768_v3, %v10773_v38 }
 0xe4f   :  { %21329 = vst [vmem:[#allocation58_spill] sm:$0xff] %v19099_v18 }
 0xe50   :  { %11006 = vrot.lane.b32.xlu0 %v18749_v51, %s11238_s30  ;;  %10986 = vrot.lane.b32.xlu2 %v18982_v53, %s11236_s28  ;;  %v19060_v51 = vsel %vm120_vm6, %v20686_v23, %v10764_v2  ;;  %21331 = vst [vmem:[#allocation20_spill] sm:$0xff] %v19107_v59  ;;  %v19111_v2 = vsel %vm120_vm6, %v10773_v38, %v10778_v5 }
 0xe51   :  { %10991 = vrot.lane.b32.xlu1 %v18982_v53, %s11235_s27  ;;  %21332 = vst [vmem:[#allocation12_spill] sm:$0xff] %v19111_v2 }
 0xe52   :  { %v10792_v56 = vpop.permute.xlu0 %10791  ;;  %v19053_v34 = vpop.permute.xlu2 %10831 }
 0xe53   :  { %v10782_v16 = vpop.permute.xlu1 %10781  ;;  %v10794_v27 = vunpack.i.h.bf16 %v10792_v56  ;;  %v10793_v37 = vunpack.i.l.bf16 %v10792_v56 }
 0xe54   :  { %v10784_v39 = vunpack.i.h.bf16 %v10782_v16  ;;  %v10783_v32 = vunpack.i.l.bf16 %v10782_v16 }
 0xe56   :  { %v19131_v24 = vsel %vm120_vm6, %v10779_v40, %v10784_v39  ;;  %v19143_v33 = vsel %vm120_vm6, %v10783_v32, %v10788_v28  ;;  %v19151_v40 = vsel %vm120_vm6, %v10788_v28, %v10793_v37  ;;  %v10804_v28 = vunpack.i.h.bf16 %v18993_v41 }
 0xe57   :  { %21333 = vst [vmem:[#allocation34_spill] sm:$0xff] %v19131_v24 }
 0xe58   :  { %11016 = vrot.lane.b32.xlu0 %v10955_v0, %s11238_s30  ;;  %11011 = vrot.lane.b32.xlu2 %v19078_v44, %s11237_s29  ;;  %v19095_v0 = vsel %vm120_vm6, %v10763_v46, %v10768_v3  ;;  %v19115_v46 = vpack.i.bf16 %v18847_v43, %v18796_v12  ;;  %v10789_v43 = vunpack.i.h.bf16 %v18976_v31  ;;  %v19135_v12 = vsel %vm120_vm6, %v10778_v5, %v10783_v32 }
 0xe59   :  { %10996 = vrot.lane.b32.xlu1 %v19024_v55, %s11236_s28  ;;  %21334 = vst [vmem:[#allocation22_spill] sm:$0xff] %v19135_v12  ;;  %v19155_v5 = vpack.i.bf16 %v18841_v7, %v18843_v21  ;;  %v10803_v21 = vunpack.i.l.bf16 %v18993_v41 }
 0xe5a   :  { %v10807_v23 = vpop.permute.xlu0 %10806  ;;  %v19085_v36 = vpop.permute.xlu2 %10846  ;;  %v19139_v56 = vsel %vm120_vm6, %v10784_v39, %v10789_v43  ;;  %21336 = vst [vmem:[#allocation16_spill] sm:$0xff] %v19143_v33  ;;  %v19147_v31 = vsel %vm120_vm6, %v10789_v43, %v10794_v27 }
 0xe5b   :  { %v10797_v17 = vpop.permute.xlu1 %10796  ;;  %21335 = vst [vmem:[#allocation45_spill] sm:$0xff] %v19139_v56  ;;  %v10809_v32 = vunpack.i.h.bf16 %v10807_v23  ;;  %v10808_v39 = vunpack.i.l.bf16 %v10807_v23  ;;  %v10849_v2 = vunpack.i.h.bf16 %v19085_v36 }
 0xe5c   :  { %21337 = vst [vmem:[#allocation35_spill] sm:$0xff] %v19147_v31  ;;  %v10799_v45 = vunpack.i.h.bf16 %v10797_v17  ;;  %v10798_v33 = vunpack.i.l.bf16 %v10797_v17 }
 0xe5d   :  { %21338 = vst [vmem:[#allocation4_spill] sm:$0xff] %v19151_v40  ;;  %v19187_v41 = vsel %vm120_vm6, %v10804_v28, %v10809_v32 }
 0xe5e   :  { %v19171_v56 = vsel %vm120_vm6, %v10794_v27, %v10799_v45  ;;  %v19179_v17 = vsel %vm120_vm6, %v10793_v37, %v10798_v33  ;;  %v19183_v23 = vsel %vm120_vm6, %v10798_v33, %v10803_v21  ;;  %21343 = vst [vmem:[#allocation59_spill] sm:$0xff] %v19187_v41  ;;  %v19191_v27 = vsel %vm120_vm6, %v10803_v21, %v10808_v39 }
 0xe5f   :  { %21339 = vst [vmem:[#allocation15_spill] sm:$0xff] %v19171_v56  ;;  %v21345_v56 = vunpack.i.h.bf16 %v18943_v35  ;;  %v21347_v37 = vunpack.i.l.bf16 %v18943_v35 }
 0xe60   :  { %11036 = vrot.lane.b32.xlu0 %v19115_v46, %s11235_s27  ;;  %11021 = vrot.lane.b32.xlu2 %v19115_v46, %s11237_s29  ;;  %21341 = vst [vmem:[#allocation6_spill] sm:$0xff] %v19179_v17 }
 0xe61   :  { %11026 = vrot.lane.b32.xlu1 %v19115_v46, %s11236_s28  ;;  %21342 = vst [vmem:[#allocation19_spill] sm:$0xff] %v19183_v23  ;;  %v19203_v33 = vsel %vm120_vm6, %v10808_v39, %v21347_v37  ;;  %v10819_v39 = vunpack.i.h.bf16 %v19033_v19 }
 0xe62   :  { %v19123_v3 = vpop.permute.xlu0 %10821  ;;  %v19125_v38 = vpop.permute.xlu2 %10861  ;;  %21344 = vst [vmem:[#allocation61_spill] sm:$0xff] %v19191_v27 }
 0xe63   :  { %v10812_v16 = vpop.permute.xlu1 %10811  ;;  %21348 = vst [vmem:[#allocation13_spill] sm:$0xff] %v19203_v33  ;;  %v10824_v21 = vunpack.i.h.bf16 %v19123_v3  ;;  %v20703_v35 = vunpack.i.h.bf16 %v19125_v38 }
 0xe64   :  { %v10814_v41 = vunpack.i.h.bf16 %v10812_v16  ;;  %v10813_v23 = vunpack.i.l.bf16 %v10812_v16  ;;  %v10818_v16 = vunpack.i.l.bf16 %v19033_v19 }
 0xe66   :  { %v19222_v27 = vsel %vm209_vm5, %v10814_v41, %v10819_v39  ;;  %v19240_v19 = vsel %vm209_vm5, %v20703_v35, %v10814_v41 }
 0xe67   :  { %21349 = vst [vmem:[#allocation24_spill] sm:$0xff] %v19240_v19 }
 0xe68   :  { %11046 = vrot.lane.b32.xlu0 %v19155_v5, %s11237_s29  ;;  %11041 = vrot.lane.b32.xlu2 %v18982_v53, %s11238_s30  ;;  %v19175_v53 = vsel %vm120_vm6, %v10799_v45, %v10804_v28  ;;  %v19197_v45 = vsel %vm120_vm6, %v10809_v32, %v21345_v56  ;;  %v11065_v28 = vpack.i.bf16 %v18850_v47, %v18841_v7  ;;  %v10823_v56 = vunpack.i.l.bf16 %v19123_v3 }
 0xe69   :  { %11031 = vrot.lane.b32.xlu1 %v19078_v44, %s11236_s28  ;;  %21340 = vst [vmem:[#allocation36_spill] sm:$0xff] %v19175_v53  ;;  %v19226_v3 = vsel %vm209_vm5, %v10813_v23, %v10818_v16  ;;  %v19230_v32 = vsel %vm209_vm5, %v10819_v39, %v10824_v21  ;;  %v21350_v47 = vunpack.i.l.bf16 %v19125_v38  ;;  %v19250_v39 = vpack.i.bf16 %v18874_v63, %v18876_v13  ;;  %v21488_v54 = vld [vmem:[#allocation61_spill] sm:$0xff] }
 0xe6a   :  { %v19164_v43 = vpop.permute.xlu0 %10836  ;;  %v19166_v40 = vpop.permute.xlu2 %10876  ;;  %21346 = vst [vmem:[#allocation60_spill] sm:$0xff] %v19197_v45 }
 0xe6b   :  { %v10827_v31 = vpop.permute.xlu1 %10826  ;;  %v19246_v7 = vsel %vm209_vm5, %v21350_v47, %v10813_v23  ;;  %v10839_v41 = vunpack.i.h.bf16 %v19164_v43  ;;  %v10834_v47 = vunpack.i.h.bf16 %v19053_v34 }
 0xe6c   :  { %21351 = vst [vmem:[#allocation62_spill] sm:$0xff] %v19246_v7  ;;  %v10829_v17 = vunpack.i.h.bf16 %v10827_v31  ;;  %v10828_v35 = vunpack.i.l.bf16 %v10827_v31  ;;  %v10833_v7 = vunpack.i.l.bf16 %v19053_v34 }
 0xe6d   :  { %v19276_v31 = vsel %vm209_vm5, %v10834_v47, %v10839_v41 }
 0xe6e   :  { %21352 = vst [vmem:[#allocation44_spill] sm:$0xff] %v19276_v31  ;;  %v19280_v13 = vsel %vm209_vm5, %v10823_v56, %v10828_v35  ;;  %v19284_v34 = vsel %vm209_vm5, %v10828_v35, %v10833_v7 }
 0xe6f   :  { %21353 = vst [vmem:[#allocation25_spill] sm:$0xff] %v19280_v13 }
 0xe70   :  { %11051 = vrot.lane.b32.xlu0 %v19155_v5, %s11236_s28  ;;  %11061 = vrot.lane.b32.xlu2 %v19155_v5, %s11235_s27  ;;  %21354 = vst [vmem:[#allocation27_spill] sm:$0xff] %v19284_v34 }
 0xe71   :  { %11066 = vrot.lane.b32.xlu1 %v11065_v28, %s11234_s26  ;;  %v19234_v28 = vsel %vm209_vm5, %v10818_v16, %v10823_v56  ;;  %v10838_v16 = vunpack.i.l.bf16 %v19164_v43  ;;  %v19272_v43 = vsel %vm209_vm5, %v10829_v17, %v10834_v47 }
 0xe72   :  { %v10852_v37 = vpop.permute.xlu0 %10851  ;;  %v19218_v33 = vpop.permute.xlu2 %10891 }
 0xe73   :  { %v10842_v45 = vpop.permute.xlu1 %10841  ;;  %v10853_v47 = vunpack.i.l.bf16 %v10852_v37 }
 0xe74   :  { %v10844_v53 = vunpack.i.h.bf16 %v10842_v45  ;;  %v10843_v12 = vunpack.i.l.bf16 %v10842_v45 }
 0xe76   :  { %v19304_v45 = vsel %vm209_vm5, %v10839_v41, %v10844_v53  ;;  %v19308_v24 = vsel %vm209_vm5, %v10838_v16, %v10843_v12 }
 0xe77   :  { %21357 = vst [vmem:[#allocation43_spill] sm:$0xff] %v19304_v45 }
 0xe78   :  { %11056 = vrot.lane.b32.xlu0 %v19078_v44, %s11235_s27  ;;  %11071 = vrot.lane.b32.xlu2 %v19115_v46, %s11238_s30  ;;  %v19268_v46 = vsel %vm209_vm5, %v10824_v21, %v10829_v17  ;;  %v19288_v21 = vsel %vm209_vm5, %v10833_v7, %v10838_v16  ;;  %v10854_v17 = vunpack.i.h.bf16 %v10852_v37  ;;  %v10848_v7 = vunpack.i.l.bf16 %v19085_v36  ;;  %21358 = vst [vmem:[#allocation37_spill] sm:$0xff] %v19308_v24 }
 0xe79   :  { %11076 = vrot.lane.b32.xlu1 %v19250_v39, %s11237_s29  ;;  %21355 = vst [vmem:[#allocation18_spill] sm:$0xff] %v19288_v21  ;;  %v19312_v37 = vsel %vm209_vm5, %v10844_v53, %v10849_v2  ;;  %v11110_v16 = vpack.i.bf16 %v18878_v49, %v18872_v22 }
 0xe7a   :  { %v19261_v23 = vpop.permute.xlu0 %10866  ;;  %v19263_v63 = vpop.permute.xlu2 %10906  ;;  %21359 = vst [vmem:[#allocation48_spill] sm:$0xff] %v19312_v37  ;;  %v19316_v11 = vsel %vm209_vm5, %v10849_v2, %v10854_v17  ;;  %v19320_v36 = vsel %vm209_vm5, %v10843_v12, %v10848_v7  ;;  %v19324_v41 = vsel %vm209_vm5, %v10848_v7, %v10853_v47  ;;  %v10893_v37 = vunpack.i.l.bf16 %v19218_v33 }
 0xe7b   :  { %v10857_v19 = vpop.permute.xlu1 %10856  ;;  %21360 = vst [vmem:[#allocation42_spill] sm:$0xff] %v19316_v11  ;;  %v10909_v13 = vunpack.i.h.bf16 %v19263_v63 }
 0xe7c   :  { %21361 = vst [vmem:[#allocation41_spill] sm:$0xff] %v19320_v36  ;;  %v10859_v24 = vunpack.i.h.bf16 %v10857_v19  ;;  %v10858_v45 = vunpack.i.l.bf16 %v10857_v19  ;;  %v21365_v19 = vunpack.i.h.bf16 %v19125_v38 }
 0xe7d   :  { %21362 = vst [vmem:[#allocation17_spill] sm:$0xff] %v19324_v41 }
 0xe7e   :  { %v19337_v7 = vsel %vm209_vm5, %v10854_v17, %v10859_v24  ;;  %v19341_v49 = vsel %vm209_vm5, %v10853_v47, %v10858_v45  ;;  %v19347_v22 = vsel %vm209_vm5, %v10859_v24, %v21365_v19  ;;  %v20708_v24 = vunpack.i.h.bf16 %v19166_v40 }
 0xe7f   :  { %21363 = vst [vmem:[#allocation33_spill] sm:$0xff] %v19337_v7 }
 0xe80   :  { %11081 = vrot.lane.b32.xlu0 %v19250_v39, %s11236_s28  ;;  %11091 = vrot.lane.b32.xlu2 %v19250_v39, %s11235_s27  ;;  %21364 = vst [vmem:[#allocation63_spill] sm:$0xff] %v19341_v49 }
 0xe81   :  { %11096 = vrot.lane.b32.xlu1 %v19250_v39, %s11234_s26  ;;  %21366 = vst [vmem:[#allocation64_spill] sm:$0xff] %v19347_v22 }
 0xe82   :  { %v10882_v56 = vpop.permute.xlu0 %10881  ;;  %v19296_v35 = vpop.permute.xlu2 %10921 }
 0xe83   :  { %21356 = vst [vmem:[#allocation40_spill] sm:$0xff] %v19296_v35  ;;  %v19300_v59 = vpop.permute.xlu1 %10871  ;;  %v10884_v17 = vunpack.i.h.bf16 %v10882_v56  ;;  %v10883_v47 = vunpack.i.l.bf16 %v10882_v56 }
 0xe88   :  { %11086 = vrot.lane.b32.xlu0 %v19078_v44, %s11234_s26  ;;  %11101 = vrot.lane.b32.xlu2 %v19155_v5, %s11238_s30  ;;  %v21367_v5 = vunpack.i.l.bf16 %v19125_v38  ;;  %v20709_v38 = vunpack.i.l.bf16 %v19166_v40 }
 0xe89   :  { %11111 = vrot.lane.b32.xlu1 %v11110_v16, %s11237_s29 }
 0xe8a   :  { %v10897_v2 = vpop.permute.xlu0 %10896  ;;  %v19333_v12 = vpop.permute.xlu2 %10936  ;;  %v19353_v41 = vsel %vm209_vm5, %v10858_v45, %v21367_v5  ;;  %v19367_v45 = vsel %vm298_vm4, %v20708_v24, %v10884_v17 }
 0xe8b   :  { %v10887_v53 = vpop.permute.xlu1 %10886  ;;  %21368 = vst [vmem:[#allocation65_spill] sm:$0xff] %v19353_v41  ;;  %v10894_v41 = vunpack.i.h.bf16 %v19218_v33  ;;  %v10899_v24 = vunpack.i.h.bf16 %v10897_v2  ;;  %v10898_v22 = vunpack.i.l.bf16 %v10897_v2  ;;  %v8169_v33 = vld [vmem:[%s20407_s3 + $0x8] sm:$0xff] }
 0xe8c   :  { %v10889_v56 = vunpack.i.h.bf16 %v10887_v53  ;;  %v10888_v5 = vunpack.i.l.bf16 %v10887_v53 }
 0xe8e   :  { %v19392_v53 = vsel %vm298_vm4, %v10889_v56, %v10894_v41  ;;  %v19399_v2 = vsel %vm298_vm4, %v10883_v47, %v10888_v5 }
 0xe90   :  { %11116 = vrot.lane.b32.xlu0 %v11110_v16, %s11236_s28  ;;  %11106 = vrot.lane.b32.xlu2 %v19024_v55, %s11238_s30  ;;  %v19373_v55 = vsel %vm298_vm4, %v20709_v38, %v10883_v47 }
 0xe91   :  { %11121 = vrot.lane.b32.xlu1 %v11110_v16, %s11235_s27 }
 0xe92   :  { %v10912_v49 = vpop.permute.xlu0 %10911  ;;  %v19359_v36 = vpop.permute.xlu2 %10951 }
 0xe93   :  { %21369 = vst [vmem:[#allocation66_spill] sm:$0xff] %v19359_v36  ;;  %v10902_v19 = vpop.permute.xlu1 %10901  ;;  %v19414_v36 = vsel %vm298_vm4, %v10893_v37, %v10898_v22  ;;  %v10914_v47 = vunpack.i.h.bf16 %v10912_v49  ;;  %v10913_v21 = vunpack.i.l.bf16 %v10912_v49 }
 0xe94   :  { %v10904_v18 = vunpack.i.h.bf16 %v10902_v19  ;;  %v10903_v34 = vunpack.i.l.bf16 %v10902_v19 }
 0xe95   :  { %v19435_v49 = vsel %vm298_vm4, %v10909_v13, %v10914_v47 }
 0xe96   :  { %21374 = vst [vmem:[#allocation7_spill] sm:$0xff] %v19435_v49  ;;  %v19439_v19 = vsel %vm298_vm4, %v10898_v22, %v10903_v34 }
 0xe97   :  { %21375 = vst [vmem:[#allocation67_spill] sm:$0xff] %v19439_v19 }
 0xe98   :  { %11131 = vrot.lane.b32.xlu0 %v19250_v39, %s11238_s30  ;;  %11126 = vrot.lane.b32.xlu2 %v11110_v16, %s11234_s26  ;;  %v19388_v39 = vsel %vm298_vm4, %v10884_v17, %v10889_v56  ;;  %v19406_v17 = vsel %vm298_vm4, %v10888_v5, %v10893_v37  ;;  %v19410_v56 = vsel %vm298_vm4, %v10894_v41, %v10899_v24  ;;  %v10908_v41 = vunpack.i.l.bf16 %v19263_v63 }
 0xe99   :  { %11136 = vrot.lane.b32.xlu1 %v19078_v44, %s11238_s30  ;;  %v8168_v44 = vld [vmem:[%s20407_s3] sm:$0xff]  ;;  %21371 = vst [vmem:[#allocation11_spill] sm:$0xff] %v19410_v56  ;;  %v19427_v37 = vsel %vm298_vm4, %v10899_v24, %v10904_v18 }
 0xe9a   :  { %v19381_v7 = vpop.permute.xlu0 %10926  ;;  %v19383_v11 = vpop.permute.xlu2 %10961  ;;  %21372 = vst [vmem:[#allocation49_spill] sm:$0xff] %v19427_v37  ;;  %v19443_v63 = vsel %vm298_vm4, %v10903_v34, %v10908_v41  ;;  %v19447_v24 = vsel %vm298_vm4, %v10908_v41, %v10913_v21  ;;  %v10869_v34 = vunpack.i.h.bf16 %v19261_v23 }
 0xe9b   :  { %21370 = vst [vmem:[#allocation46_spill] sm:$0xff] %v19383_v11  ;;  %v10917_v38 = vpop.permute.xlu1 %10916 }
 0xe9c   :  { %21376 = vst [vmem:[#allocation50_spill] sm:$0xff] %v19443_v63  ;;  %v10868_v63 = vunpack.i.l.bf16 %v19261_v23 }
 0xe9d   :  { %21377 = vst [vmem:[#allocation23_spill] sm:$0xff] %v19447_v24 }
 0xea0   :  { %8172 = vperm.xlu0 %9384, %v8168_v44   ;;  %11141 = vrot.lane.b32.xlu2 %v11110_v16, %s11238_s30  ;;  %v19431_v16 = vsel %vm298_vm4, %v10904_v18, %v10909_v13  ;;  %v10919_v44 = vunpack.i.h.bf16 %v10917_v38 }
 0xea1   :  { %8177 = vperm.xlu1 %9382, %v8169_v33   ;;  %21373 = vst [vmem:[#allocation26_spill] sm:$0xff] %v19431_v16  ;;  %v10918_v33 = vunpack.i.l.bf16 %v10917_v38  ;;  %v10964_v38 = vunpack.i.h.bf16 %v19383_v11 }
 0xea2   :  { %v19418_v5 = vpop.permute.xlu0 %10941  ;;  %v19420_v31 = vpop.permute.xlu2 %10976  ;;  %v19462_v41 = vsel %vm298_vm4, %v10914_v47, %v10919_v44  ;;  %v19476_v23 = vsel %vm298_vm4, %v10919_v44, %v10869_v34 }
 0xea3   :  { %v19423_v56 = vpop.permute.xlu1 %10931  ;;  %21379 = vst [vmem:[#allocation68_spill] sm:$0xff] %v19462_v41  ;;  %v19472_v37 = vsel %vm298_vm4, %v10913_v21, %v10918_v33  ;;  %v19480_v47 = vsel %vm298_vm4, %v10918_v33, %v10868_v63  ;;  %v21383_v41 = vunpack.i.h.bf16 %v18945_v48  ;;  %v21385_v21 = vunpack.i.l.bf16 %v19383_v11 }
 0xea4   :  { %21380 = vst [vmem:[#allocation69_spill] sm:$0xff] %v19472_v37  ;;  %v21387_v37 = vunpack.i.l.bf16 %v18941_v20 }
 0xea5   :  { %21381 = vst [vmem:[#allocation70_spill] sm:$0xff] %v19476_v23  ;;  %v7769_v44 = vsel %vm565_vm1, %v21385_v21, %v10964_v38 }
 0xea6   :  { %21382 = vst [vmem:[#allocation71_spill] sm:$0xff] %v19480_v47  ;;  %v21386_v47 = vunpack.i.h.bf16 %v18941_v20 }
 0xeaa   :  { %v19449_v18 = vpop.permute.xlu0 %10956  ;;  %v19451_v16 = vpop.permute.xlu2 %10986 }
 0xeab   :  { %21378 = vst [vmem:[#allocation31_spill] sm:$0xff] %v19449_v18  ;;  %v10959_v49 = vunpack.i.h.bf16 %v19449_v18  ;;  %v20712_v22 = vunpack.i.l.bf16 %v19449_v18  ;;  %v19456_v19 = vpop.permute.xlu1 %10946  ;;  %v21384_v18 = vunpack.i.l.bf16 %v18945_v48  ;;  %v10929_v48 = vunpack.i.h.bf16 %v19381_v7 }
 0xead   :  { %v7857_v13 = vsel %vm654_vm0, %v20712_v22, %v10959_v49  ;;  %v7856_v22 = vsel %vm654_vm0, %v21384_v18, %v21383_v41  ;;  %v7768_v18 = vsel %vm565_vm1, %v21387_v37, %v21386_v47 }
 0xeae   :  { %8186 = vmatpush.msrb.mxu2 %v7857_v13 }
 0xeb0   :  { %8187 = vmatpush.msrb.mxu2 %v7856_v22  ;;  %v20718_v22 = vunpack.i.l.bf16 %v18919_v62 }
 0xeb2   :  { %v19493_v13 = vpop.permute.xlu0 %10981  ;;  %v19495_v23 = vpop.permute.xlu2 %11011  ;;  %8188 = vmatpush.msrb.mxu2 %v7769_v44  ;;  %v21388_v44 = vunpack.i.h.bf16 %v18919_v62  ;;  %v21390_v62 = vunpack.i.h.bf16 %v19296_v35 }
 0xeb3   :  { %v20715_v33 = vunpack.i.l.bf16 %v19493_v13  ;;  %v19498_v24 = vpop.permute.xlu1 %10966 }
 0xeb4   :  { %v10969_v41 = vunpack.i.h.bf16 %v19498_v24  ;;  %v20716_v21 = vunpack.i.l.bf16 %v19498_v24  ;;  %8189 = vmatpush.msrb.mxu2 %v7768_v18  ;;  %v10928_v18 = vunpack.i.l.bf16 %v19381_v7 }
 0xeb5   :  { %v7855_v11 = vsel %vm654_vm0, %v10959_v49, %v20715_v33  ;;  %v7680_v49 = vsel %vm476_vm2, %v20718_v22, %v21388_v44  ;;  %v21389_v33 = vunpack.i.l.bf16 %v19451_v16  ;;  %v7593_v44 = vsel %vm387_vm3, %v21390_v62, %v10929_v48 }
 0xeb6   :  { %v7681_v37 = vsel %vm476_vm2, %v20716_v21, %v10969_v41  ;;  %8232 = vmatpush.msra.mxu0 %v7855_v11  ;;  %v20719_v21 = vunpack.i.l.bf16 %v19296_v35  ;;  %v20720_v62 = vunpack.i.l.bf16 %v19495_v23 }
 0xeb7   :  { %8190 = vmatpush.msrb.mxu2 %v7681_v37  ;;  %v7767_v11 = vsel %vm565_vm1, %v10964_v38, %v21389_v33  ;;  %v10874_v37 = vunpack.i.h.bf16 %v19300_v59 }
 0xeb8   :  { %8233 = vmatpush.msra.mxu0 %v19004_v14  ;;  %v7592_v38 = vsel %vm387_vm3, %v20719_v21, %v10928_v18 }
 0xeb9   :  { %8191 = vmatpush.msrb.mxu2 %v7680_v49  ;;  %v10873_v49 = vunpack.i.l.bf16 %v19300_v59  ;;  %v7505_v33 = vsel %vm298_vm4, %v10869_v34, %v10874_v37  ;;  %v20721_v59 = vunpack.i.h.bf16 %v19420_v31  ;;  %v20723_v34 = vunpack.i.h.bf16 %v19423_v56 }
 0xeba   :  { %v19534_v7 = vpop.permute.xlu0 %11001  ;;  %v19536_v47 = vpop.permute.xlu2 %11021  ;;  %8234 = vmatpush.msra.mxu0 %v7767_v11 }
 0xebb   :  { %v19542_v14 = vpop.permute.xlu1 %10971  ;;  %8192 = vmatpush.msrb.mxu2 %v7593_v44  ;;  %v7504_v11 = vsel %vm298_vm4, %v10868_v63, %v10873_v49  ;;  %v19570_v63 = vsel %vm654_vm0, %v20721_v59, %v20720_v62 }
 0xebc   :  { %8235 = vmatpush.msra.mxu0 %v19012_v8 }
 0xebd   :  { %8193 = vmatpush.msrb.mxu2 %v7592_v38 }
 0xebf   :  { %8194 = vmatpush.msrb.mxu2 %v7505_v33  ;;  %v10744_v33 = vunpack.i.h.bf16 %v18974_v25 }
 0xec1   :  { %8195 = vmatpush.msrb.mxu2 %v7504_v11 }
 0xec2   :  { %v19556_v44 = vpop.permute.xlu0 %11006  ;;  %v19558_v22 = vpop.permute.xlu2 %11041 }
 0xec3   :  { %v19560_v21 = vpop.permute.xlu1 %10991  ;;  %8196 = vmatpush.msrb.mxu2 %v19222_v27  ;;  %v20726_v27 = vunpack.i.l.bf16 %v19423_v56  ;;  %v21392_v35 = vunpack.i.h.bf16 %v19558_v22 }
 0xec4   :  { %v20722_v8 = vunpack.i.l.bf16 %v19560_v21 }
 0xec5   :  { %8197 = vmatpush.msrb.mxu2 %v19226_v3  ;;  %v11043_v3 = vunpack.i.l.bf16 %v19558_v22 }
 0xec6   :  { %v7679_v38 = vsel %vm476_vm2, %v10969_v41, %v20722_v8  ;;  %v7591_v41 = vsel %vm387_vm3, %v10929_v48, %v20723_v34  ;;  %v19602_v8 = vld [vmem:[%s20403_s2 + $0x80] sm:$0xff]  ;;  %v10973_v34 = vunpack.i.l.bf16 %v19542_v14 }
 0xec7   :  { %8198 = vmatpush.msrb.mxu2 %v19060_v51  ;;  %8236 = vmatpush.msra.mxu0 %v7679_v38  ;;  %v10739_v51 = vunpack.i.h.bf16 %v18978_v4  ;;  %v7590_v38 = vsel %vm387_vm3, %v10928_v18, %v20726_v27  ;;  %v7941_v18 = vsel %vm743_vm7, %v11043_v3, %v21392_v35  ;;  %v21393_v27 = vunpack.i.h.bf16 %v19166_v40 }
 0xec8   :  { %v21395_v35 = vunpack.i.h.bf16 %v19542_v14 }
 0xec9   :  { %8199 = vmatpush.msrb.mxu2 %v19066_v26  ;;  %8237 = vmatpush.msra.mxu0 %v18953_v6  ;;  %v11023_v26 = vunpack.i.l.bf16 %v19536_v47 }
 0xeca   :  { %v19584_v11 = vpop.permute.xlu0 %11016  ;;  %v19596_v59 = vpop.permute.xlu2 %11061 }
 0xecb   :  { %v11019_v62 = vunpack.i.h.bf16 %v19584_v11  ;;  %v19594_v6 = vpop.permute.xlu1 %10996  ;;  %8200 = vmatpush.msrb.mxu2 %v18767_v52  ;;  %8238 = vmatpush.msra.mxu0 %v7591_v41  ;;  %v21391_v52 = vunpack.i.l.bf16 %v19584_v11 }
 0xecd   :  { %8201 = vmatpush.msrb.mxu2 %v18699_v1  ;;  %8239 = vmatpush.msra.mxu0 %v7590_v38  ;;  %v7945_v41 = vsel %vm743_vm7, %v21391_v52, %v11019_v62  ;;  %v7943_v48 = vsel %vm743_vm7, %v11019_v62, %v11043_v3  ;;  %v7503_v1 = vsel %vm298_vm4, %v10874_v37, %v21393_v27  ;;  %v10984_v38 = vunpack.i.h.bf16 %v19493_v13 }
 0xece   :  { %8202 = vmatmul.f32.vlgmr.msrb.gmra.mxu2 %v19602_v8  ;;  %8223 = vmatpush.msra.mxu3 %v7945_v41  ;;  %v21394_v52 = vunpack.i.l.bf16 %v18978_v4  ;;  %v7940_v3 = vsel %vm743_vm7, %v10973_v34, %v21395_v35  ;;  %v21396_v37 = vunpack.i.l.bf16 %v19166_v40  ;;  %v19645_v41 = vld [vmem:[%s20403_s2 + $0x88] sm:$0xff] }
 0xecf   :  { %8315 = vmatpush.msra.mxu2 %v7941_v18  ;;  %8240 = vmatpush.msra.mxu0 %v7503_v1  ;;  %v21397_v18 = vunpack.i.h.bf16 %v19536_v47  ;;  %v7851_v40 = vsel %vm654_vm0, %v10984_v38, %v11023_v26 }
 0xed0   :  { %v7944_v62 = vsel %vm743_vm7, %v21394_v52, %v10739_v51  ;;  %8269 = vmatpush.msrb.mxu1 %v7943_v48  ;;  %v7502_v27 = vsel %vm298_vm4, %v10873_v49, %v21396_v37  ;;  %v7942_v48 = vsel %vm743_vm7, %v10739_v51, %v10973_v34  ;;  %v10989_v52 = vunpack.i.h.bf16 %v19451_v16 }
 0xed1   :  { %8224 = vmatpush.msra.mxu3 %v7944_v62  ;;  %8316 = vmatpush.msra.mxu2 %v7940_v3  ;;  %v7849_v1 = vsel %vm654_vm0, %v11023_v26, %v21397_v18  ;;  %v21398_v62 = vunpack.i.l.bf16 %v19493_v13  ;;  %v21399_v3 = vunpack.i.l.bf16 %v18974_v25  ;;  %v10749_v18 = vunpack.i.h.bf16 %v18932_v60 }
 0xed2   :  { %8241 = vmatpush.msra.mxu0 %v7502_v27  ;;  %8270 = vmatpush.msrb.mxu1 %v7942_v48  ;;  %v19655_v49 = vpop.permute.xlu0 %11036  ;;  %v19680_v37 = vpop.permute.xlu2 %11071  ;;  %v21400_v27 = vunpack.i.h.bf16 %v18965_v61  ;;  %v21401_v48 = vunpack.i.l.bf16 %v18965_v61  ;;  %v10994_v61 = vunpack.i.h.bf16 %v19560_v21 }
 0xed3   :  { %8370 = vmatpush.msrb.mxu2 %v7849_v1  ;;  %8907 = vmatmul.msk.f32.vlgmr.msra.gmra.mxu3 %vm986_vm8, %v19645_v41  ;;  %v7853_v34 = vsel %vm654_vm0, %v21398_v62, %v10984_v38  ;;  %v19664_v51 = vpop.permute.xlu1 %11026  ;;  %v7848_v13 = vsel %vm654_vm0, %v21399_v3, %v10744_v33  ;;  %v19678_v38 = vld [vmem:[%s20403_s2 + $0x90] sm:$0xff]  ;;  %v21402_v62 = vunpack.i.l.bf16 %v19451_v16  ;;  %v21403_v3 = vunpack.i.h.bf16 %v18961_v50 }
 0xed4   :  { %8324 = vmatpush.msra.mxu1 %v7851_v40  ;;  %8278 = vmatpush.msrb.mxu3 %v7853_v34  ;;  %v11029_v35 = vunpack.i.h.bf16 %v19664_v51  ;;  %v11028_v26 = vunpack.i.l.bf16 %v19664_v51  ;;  %v11038_v34 = vunpack.i.l.bf16 %v19655_v49  ;;  %v21404_v16 = vunpack.i.l.bf16 %v18961_v50 }
 0xed5   :  { %8242 = vmatpush.msra.mxu0 %v19230_v32  ;;  %8371 = vmatpush.msrb.mxu2 %v7848_v13  ;;  %v7852_v32 = vsel %vm654_vm0, %v21401_v48, %v21400_v27  ;;  %v10754_v13 = vunpack.i.h.bf16 %v18996_v9  ;;  %v21406_v50 = vunpack.i.l.bf16 %v19560_v21  ;;  %v11063_v51 = vunpack.i.l.bf16 %v19596_v59 }
 0xed6   :  { %8325 = vmatpush.msra.mxu1 %v19042_v29  ;;  %8279 = vmatpush.msrb.mxu3 %v7852_v32  ;;  %v7763_v1 = vsel %vm565_vm1, %v10989_v52, %v11028_v26  ;;  %v7761_v40 = vsel %vm565_vm1, %v11028_v26, %v11029_v35  ;;  %v7765_v29 = vsel %vm565_vm1, %v21402_v62, %v10989_v52  ;;  %v19709_v26 = vld [vmem:[%s20403_s2 + $0x98] sm:$0xff]  ;;  %v10939_v62 = vunpack.i.h.bf16 %v19333_v12 }
 0xed7   :  { %8243 = vmatpush.msra.mxu0 %v19234_v28  ;;  %8205 = vmatmul.f32.gmra.mxu2 %v19678_v38  ;;  %v11039_v28 = vunpack.i.h.bf16 %v19655_v49  ;;  %v7764_v52 = vsel %vm565_vm1, %v21404_v16, %v21403_v3  ;;  %v21407_v3 = vunpack.i.h.bf16 %v18927_v58  ;;  %v21408_v16 = vunpack.i.l.bf16 %v18927_v58 }
 0xed8   :  { %8326 = vmatpush.msra.mxu1 %v7763_v1  ;;  %8280 = vmatpush.msrb.mxu3 %v7765_v29  ;;  %v11073_v1 = vunpack.i.l.bf16 %v19680_v37  ;;  %v10949_v29 = vunpack.i.h.bf16 %v19456_v19  ;;  %v11074_v49 = vunpack.i.h.bf16 %v19680_v37 }
 0xed9   :  { %8244 = vmatpush.msra.mxu0 %v19091_v57  ;;  %8372 = vmatpush.msrb.mxu2 %v7761_v40  ;;  %v21405_v57 = vunpack.i.l.bf16 %v18932_v60  ;;  %v7675_v40 = vsel %vm476_vm2, %v10994_v61, %v11038_v34  ;;  %v7673_v21 = vsel %vm476_vm2, %v11038_v34, %v11039_v28  ;;  %v21409_v34 = vunpack.i.l.bf16 %v18996_v9  ;;  %v21422_v60 = vld [vmem:[#allocation66_spill] sm:$0xff] }
 0xeda   :  { %8327 = vmatpush.msra.mxu1 %v19020_v15  ;;  %8281 = vmatpush.msrb.mxu3 %v7764_v52  ;;  %v19726_v48 = vpop.permute.xlu0 %11046  ;;  %v7677_v15 = vsel %vm476_vm2, %v21406_v50, %v10994_v61  ;;  %v11008_v61 = vunpack.i.l.bf16 %v19556_v44  ;;  %v19763_v58 = vpop.permute.xlu2 %11091  ;;  %v21410_v50 = vunpack.i.h.bf16 %v19423_v56 }
 0xedb   :  { %8245 = vmatpush.msra.mxu0 %v19095_v0  ;;  %v7760_v27 = vsel %vm565_vm1, %v21405_v57, %v10749_v18  ;;  %8908 = vmatmul.msk.f32.gmra.mxu3 %vm986_vm8, %v19709_v26  ;;  %v19734_v32 = vpop.permute.xlu1 %11031  ;;  %v10944_v0 = vunpack.i.h.bf16 %v19418_v5  ;;  %v7672_v52 = vsel %vm476_vm2, %v21409_v34, %v10754_v13  ;;  %v10943_v57 = vunpack.i.l.bf16 %v19418_v5 }
 0xedc   :  { %8373 = vmatpush.msrb.mxu2 %v7760_v27  ;;  %8282 = vmatpush.msrb.mxu3 %v7677_v15  ;;  %v10948_v27 = vunpack.i.l.bf16 %v19456_v19  ;;  %v10938_v15 = vunpack.i.l.bf16 %v19333_v12  ;;  %v21411_v5 = vunpack.i.h.bf16 %v19558_v22  ;;  %v21412_v22 = vunpack.i.l.bf16 %v19423_v56 }
 0xedd   :  { %8246 = vmatpush.msra.mxu0 %v18765_v42  ;;  %8328 = vmatpush.msra.mxu1 %v7675_v40  ;;  %v7676_v42 = vsel %vm476_vm2, %v21408_v16, %v21407_v3  ;;  %v11048_v40 = vunpack.i.l.bf16 %v19726_v48  ;;  %v7585_v12 = vsel %vm387_vm3, %v10944_v0, %v10949_v29  ;;  %v10978_v3 = vunpack.i.l.bf16 %v19420_v31 }
 0xede   :  { %8374 = vmatpush.msrb.mxu2 %v7673_v21  ;;  %8283 = vmatpush.msrb.mxu3 %v7676_v42  ;;  %v7587_v21 = vsel %vm387_vm3, %v10939_v62, %v10944_v0  ;;  %v7588_v16 = vsel %vm387_vm3, %v21412_v22, %v10938_v15  ;;  %v7586_v0 = vsel %vm387_vm3, %v10938_v15, %v10943_v57  ;;  %v21420_v15 = vld [vmem:[#allocation28_spill] sm:$0xff] }
 0xedf   :  { %8247 = vmatpush.msra.mxu0 %v18701_v10  ;;  %8329 = vmatpush.msra.mxu1 %v19074_v30  ;;  %v7589_v10 = vsel %vm387_vm3, %v21410_v50, %v10939_v62  ;;  %v7939_v30 = vsel %vm743_vm7, %v21411_v5, %v11073_v1  ;;  %v21413_v62 = vunpack.i.h.bf16 %v19542_v14  ;;  %v7584_v56 = vsel %vm387_vm3, %v10943_v57, %v10948_v27  ;;  %v21419_v57 = vld [vmem:[#allocation58_spill] sm:$0xff] }
 0xee0   :  { %8375 = vmatpush.msrb.mxu2 %v7672_v52  ;;  %8248 = vmatmul.f32.vlgmr.msra.gmra.mxu0 %v19602_v8  ;;  %v21414_v14 = vunpack.i.h.bf16 %v19536_v47  ;;  %v7846_v47 = vsel %vm654_vm0, %v10744_v33, %v10978_v3  ;;  %v21416_v33 = vld [vmem:[#allocation25_spill] sm:$0xff]  ;;  %v7671_v5 = vsel %vm476_vm2, %v11039_v28, %v11063_v51 }
 0xee1   :  { %8284 = vmatpush.msrb.mxu3 %v7589_v10  ;;  %8361 = vmatpush.msrb.mxu0 %v7939_v30  ;;  %v7938_v42 = vsel %vm743_vm7, %v21413_v62, %v11008_v61  ;;  %v21421_v30 = vld [vmem:[#allocation34_spill] sm:$0xff] }
 0xee2   :  { %8330 = vmatpush.msra.mxu1 %v7587_v21  ;;  %8376 = vmatpush.msrb.mxu2 %v7585_v12  ;;  %v19798_v34 = vpop.permute.xlu0 %11051  ;;  %v7847_v50 = vsel %vm654_vm0, %v21414_v14, %v11048_v40  ;;  %v19835_v25 = vpop.permute.xlu2 %11101  ;;  %v21423_v21 = vld [vmem:[#allocation20_spill] sm:$0xff]  ;;  %v21428_v14 = vld [vmem:[#allocation53_spill] sm:$0xff] }
 0xee3   :  { %8909 = vmatmul.msk.f32.vlgmr.msrb.gmra.mxu1 %vm986_vm8, %v19645_v41  ;;  %8285 = vmatpush.msrb.mxu3 %v7588_v16  ;;  %v19806_v52 = vpop.permute.xlu1 %11066  ;;  %v11053_v10 = vunpack.i.l.bf16 %v19798_v34  ;;  %v21424_v12 = vld [vmem:[#allocation12_spill] sm:$0xff]  ;;  %v21425_v16 = vld [vmem:[#allocation22_spill] sm:$0xff] }
 0xee4   :  { %8362 = vmatpush.msrb.mxu0 %v7938_v42  ;;  %8331 = vmatpush.msra.mxu1 %v7586_v0  ;;  %v21426_v42 = vld [vmem:[#allocation52_spill] sm:$0xff]  ;;  %v21427_v0 = vld [vmem:[#allocation5_spill] sm:$0xff] }
 0xee5   :  { %8377 = vmatpush.msrb.mxu2 %v7584_v56  ;;  %8286 = vmatpush.msrb.mxu3 %v19367_v45  ;;  %v7759_v45 = vsel %vm565_vm1, %v11029_v35, %v11053_v10  ;;  %v21417_v35 = vld [vmem:[#allocation27_spill] sm:$0xff]  ;;  %v11103_v56 = vunpack.i.l.bf16 %v19835_v25 }
 0xee6   :  { %8416 = vmatpush.msra.mxu0 %v7847_v50  ;;  %8911 = vmatmul.msk.f32.vlgmr.msra.gmra.mxu2 %vm986_vm8, %v19645_v41 }
 0xee7   :  { %8332 = vmatpush.msra.mxu1 %v19388_v39  ;;  %8378 = vmatpush.msrb.mxu2 %v19392_v53  ;;  %v10998_v39 = vunpack.i.l.bf16 %v19594_v6  ;;  %v21415_v53 = vld [vmem:[#allocation44_spill] sm:$0xff]  ;;  %v7935_v37 = vsel %vm743_vm7, %v11074_v49, %v11103_v56 }
 0xee8   :  { %8417 = vmatpush.msra.mxu0 %v7846_v47  ;;  %8287 = vmatpush.msrb.mxu3 %v19373_v55  ;;  %v11009_v47 = vunpack.i.h.bf16 %v19556_v44 }
 0xee9   :  { %8333 = vmatpush.msra.mxu1 %v19399_v2  ;;  %8379 = vmatpush.msrb.mxu2 %v19406_v17  ;;  %v11003_v17 = vunpack.i.l.bf16 %v19534_v7 }
 0xeea   :  { %8251 = vmatmul.f32.gmra.mxu0 %v19678_v38  ;;  %8288 = vmatpush.msrb.mxu3 %v19268_v46  ;;  %v19841_v55 = vpop.permute.xlu0 %11056  ;;  %v21418_v46 = vld [vmem:[#allocation18_spill] sm:$0xff]  ;;  %v19883_v62 = vpop.permute.xlu2 %11106 }
 0xeeb   :  { %8334 = vmatpush.msra.mxu1 %v19272_v43  ;;  %8380 = vmatpush.msrb.mxu2 %v21415_v53  ;;  %v19844_v2 = vpop.permute.xlu1 %11076  ;;  %v7758_v43 = vsel %vm565_vm1, %v10749_v18, %v10998_v39  ;;  %v10954_v18 = vunpack.i.h.bf16 %v21422_v60  ;;  %v7670_v22 = vsel %vm476_vm2, %v10754_v13, %v11003_v17  ;;  %v10953_v13 = vunpack.i.l.bf16 %v21422_v60  ;;  %v21429_v53 = vld [vmem:[#allocation3_spill] sm:$0xff]  ;;  %v21441_v60 = vld [vmem:[#allocation49_spill] sm:$0xff] }
 0xeec   :  { %8418 = vmatpush.msra.mxu0 %v7759_v45  ;;  %8910 = vmatmul.msk.f32.gmra.mxu1 %vm986_vm8, %v19709_v26  ;;  %v11104_v45 = vunpack.i.h.bf16 %v19835_v25  ;;  %v11079_v19 = vunpack.i.h.bf16 %v19844_v2  ;;  %v21447_v25 = vld [vmem:[#allocation48_spill] sm:$0xff] }
 0xeed   :  { %8289 = vmatpush.msrb.mxu3 %v21416_v33  ;;  %8335 = vmatpush.msra.mxu1 %v21417_v35  ;;  %v7583_v9 = vsel %vm387_vm3, %v10949_v29, %v10954_v18  ;;  %v21430_v33 = vld [vmem:[#allocation29_spill] sm:$0xff]  ;;  %v11108_v35 = vunpack.i.l.bf16 %v19883_v62  ;;  %v21431_v29 = vld [vmem:[#allocation51_spill] sm:$0xff] }
 0xeee   :  { %8381 = vmatpush.msrb.mxu2 %v21418_v46  ;;  %8419 = vmatpush.msra.mxu0 %v7758_v43  ;;  %v7937_v46 = vsel %vm743_vm7, %v11073_v1, %v11074_v49  ;;  %v7582_v43 = vsel %vm387_vm3, %v10948_v27, %v10953_v13  ;;  %v7933_v1 = vsel %vm743_vm7, %v11103_v56, %v11104_v45  ;;  %v21432_v49 = vld [vmem:[#allocation11_spill] sm:$0xff] }
 0xeef   :  { %8290 = vmatpush.msrb.mxu3 %v21419_v57  ;;  %8912 = vmatmul.msk.f32.gmra.mxu2 %vm986_vm8, %v19709_v26  ;;  %v11049_v57 = vunpack.i.h.bf16 %v19726_v48  ;;  %v7936_v27 = vsel %vm743_vm7, %v11008_v61, %v11009_v47 }
 0xef0   :  { %8336 = vmatpush.msra.mxu1 %v21420_v15  ;;  %8382 = vmatpush.msrb.mxu2 %v21421_v30  ;;  %v11109_v15 = vunpack.i.h.bf16 %v19883_v62  ;;  %v7934_v30 = vsel %vm743_vm7, %v11009_v47, %v11108_v35  ;;  %v21435_v47 = vunpack.i.l.bf16 %v19495_v23 }
 0xef1   :  { %8420 = vmatpush.msra.mxu0 %v7671_v5  ;;  %8291 = vmatpush.msrb.mxu3 %v21423_v21  ;;  %v11078_v5 = vunpack.i.l.bf16 %v19844_v2  ;;  %v7845_v44 = vsel %vm654_vm0, %v11048_v40, %v11049_v57  ;;  %v21433_v40 = vunpack.i.h.bf16 %v19420_v31 }
 0xef2   :  { %8337 = vmatpush.msra.mxu1 %v21424_v12  ;;  %8383 = vmatpush.msrb.mxu2 %v21425_v16  ;;  %v19881_v28 = vpop.permute.xlu0 %11081  ;;  %v11014_v12 = vunpack.i.h.bf16 %v19495_v23  ;;  %v7932_v61 = vsel %vm743_vm7, %v11108_v35, %v11109_v15  ;;  %v21436_v35 = vld [vmem:[#allocation37_spill] sm:$0xff] }
 0xef3   :  { %8421 = vmatpush.msra.mxu0 %v7670_v22  ;;  %8292 = vmatpush.msrb.mxu3 %v21426_v42  ;;  %v19896_v50 = vpop.permute.xlu1 %11096  ;;  %v11054_v22 = vunpack.i.h.bf16 %v19798_v34  ;;  %v7843_v16 = vsel %vm654_vm0, %v11049_v57, %v11078_v5  ;;  %v11084_v42 = vunpack.i.h.bf16 %v19881_v28  ;;  %v7841_v48 = vsel %vm654_vm0, %v11078_v5, %v11079_v19 }
 0xef4   :  { %8338 = vmatpush.msra.mxu1 %v21427_v0  ;;  %8384 = vmatpush.msrb.mxu2 %v21428_v14  ;;  %v11083_v0 = vunpack.i.l.bf16 %v19881_v28  ;;  %v10999_v14 = vunpack.i.h.bf16 %v19594_v6  ;;  %v7840_v31 = vsel %vm654_vm0, %v21435_v47, %v11014_v12  ;;  %v11094_v57 = vunpack.i.h.bf16 %v19763_v58  ;;  %v21440_v47 = vld [vmem:[#allocation32_spill] sm:$0xff] }
 0xef5   :  { %8422 = vmatpush.msra.mxu0 %v7583_v9  ;;  %8293 = vmatpush.msrb.mxu3 %v21429_v53  ;;  %v7844_v9 = vsel %vm654_vm0, %v10978_v3, %v21433_v40  ;;  %v7757_v3 = vsel %vm565_vm1, %v11053_v10, %v11054_v22  ;;  %v11033_v53 = vunpack.i.l.bf16 %v19734_v32  ;;  %v11093_v10 = vunpack.i.l.bf16 %v19763_v58 }
 0xef6   :  { %8339 = vmatpush.msra.mxu1 %v21430_v33  ;;  %8294 = vmatmul.f32.vlgmr.msrb.gmra.mxu3 %v19602_v8  ;;  %v11064_v33 = vunpack.i.h.bf16 %v19596_v59  ;;  %v7753_v34 = vsel %vm565_vm1, %v11083_v0, %v11084_v42  ;;  %v7756_v5 = vsel %vm565_vm1, %v10998_v39, %v10999_v14  ;;  %v21473_v58 = vunpack.i.l.bf16 %v18941_v20 }
 0xef7   :  { %8385 = vmatpush.msrb.mxu2 %v21431_v29  ;;  %8407 = vmatpush.msra.mxu3 %v7937_v46  ;;  %v7755_v29 = vsel %vm565_vm1, %v11054_v22, %v11083_v0  ;;  %v21437_v22 = vld [vmem:[#allocation45_spill] sm:$0xff]  ;;  %v7665_v59 = vsel %vm476_vm2, %v11093_v10, %v11094_v57  ;;  %v11069_v0 = vunpack.i.h.bf16 %v19806_v52 }
 0xef8   :  { %8423 = vmatpush.msra.mxu0 %v7582_v43  ;;  %8340 = vmatmul.f32.vlgmr.msra.gmra.mxu1 %v19602_v8  ;;  %v11004_v43 = vunpack.i.h.bf16 %v19534_v7  ;;  %v7669_v39 = vsel %vm476_vm2, %v11063_v51, %v11064_v33 }
 0xef9   :  { %8913 = vmatmul.msk.f32.vlgmr.msrb.gmra.mxu0 %vm986_vm8, %v19645_v41  ;;  %8386 = vmatmul.f32.vlgmr.msrb.gmra.mxu2 %v19602_v8 }
 0xefa   :  { %8453 = vmatpush.msrb.mxu1 %v7935_v37  ;;  %8499 = vmatpush.msra.mxu2 %v7933_v1  ;;  %v19935_v21 = vpop.permute.xlu0 %11086  ;;  %v11058_v37 = vunpack.i.l.bf16 %v19841_v55  ;;  %v7754_v1 = vsel %vm565_vm1, %v10999_v14, %v11033_v53  ;;  %v7668_v51 = vsel %vm476_vm2, %v11003_v17, %v11004_v43 }
 0xefb   :  { %8408 = vmatpush.msra.mxu3 %v7936_v27  ;;  %8424 = vmatpush.msra.mxu0 %v21432_v49  ;;  %v19963_v56 = vpop.permute.xlu1 %11111  ;;  %v11068_v27 = vunpack.i.l.bf16 %v19806_v52  ;;  %v7667_v49 = vsel %vm476_vm2, %v11064_v33, %v11093_v10  ;;  %v11088_v14 = vunpack.i.l.bf16 %v19935_v21  ;;  %v21443_v10 = vld [vmem:[#allocation7_spill] sm:$0xff] }
 0xefc   :  { %8454 = vmatpush.msrb.mxu1 %v7934_v30  ;;  %8500 = vmatpush.msra.mxu2 %v7932_v61  ;;  %v11059_v30 = vunpack.i.h.bf16 %v19841_v55  ;;  %v11098_v61 = vunpack.i.l.bf16 %v19896_v50 }
 0xefd   :  { %8462 = vmatpush.msrb.mxu3 %v7845_v44  ;;  %8425 = vmatpush.msra.mxu0 %v19414_v36  ;;  %v21434_v36 = vld [vmem:[#allocation43_spill] sm:$0xff]  ;;  %v11099_v44 = vunpack.i.h.bf16 %v19896_v50  ;;  %v7581_v52 = vsel %vm387_vm3, %v10954_v18, %v11068_v27  ;;  %v7580_v18 = vsel %vm387_vm3, %v10953_v13, %v11069_v0  ;;  %v7578_v33 = vsel %vm387_vm3, %v11069_v0, %v11088_v14  ;;  %v21455_v0 = vld [vmem:[#allocation36_spill] sm:$0xff] }
 0xefe   :  { %8508 = vmatpush.msra.mxu1 %v7843_v16  ;;  %8554 = vmatpush.msrb.mxu2 %v7841_v48  ;;  %v21438_v16 = vld [vmem:[#allocation16_spill] sm:$0xff]  ;;  %v7666_v48 = vsel %vm476_vm2, %v11004_v43, %v11058_v37  ;;  %v7664_v7 = vsel %vm476_vm2, %v11058_v37, %v11059_v30  ;;  %v21444_v43 = vld [vmem:[#allocation67_spill] sm:$0xff] }
 0xeff   :  { %8463 = vmatpush.msrb.mxu3 %v7844_v9  ;;  %8426 = vmatpush.msra.mxu0 %v21434_v36  ;;  %v11089_v9 = vunpack.i.h.bf16 %v19935_v21  ;;  %v21439_v36 = vld [vmem:[#allocation9_spill] sm:$0xff] }
 0xf00   :  { %8509 = vmatpush.msra.mxu1 %v19570_v63  ;;  %8555 = vmatpush.msrb.mxu2 %v7840_v31  ;;  %v11034_v63 = vunpack.i.h.bf16 %v19734_v32  ;;  %v7579_v31 = vsel %vm387_vm3, %v11068_v27, %v11098_v61  ;;  %v21449_v27 = vld [vmem:[#allocation33_spill] sm:$0xff] }
 0xf01   :  { %8464 = vmatpush.msrb.mxu3 %v7757_v3  ;;  %8427 = vmatpush.msra.mxu0 %v21436_v35  ;;  %v7577_v3 = vsel %vm387_vm3, %v11098_v61, %v11099_v44  ;;  %v7576_v35 = vsel %vm387_vm3, %v11088_v14, %v11089_v9  ;;  %v21452_v61 = vld [vmem:[#allocation63_spill] sm:$0xff]  ;;  %v21480_v21 = vld [vmem:[#allocation69_spill] sm:$0xff] }
 0xf02   :  { %8297 = vmatmul.f32.gmra.mxu3 %v19678_v38  ;;  %8510 = vmatpush.msra.mxu1 %v7755_v29  ;;  %v19990_v46 = vpop.permute.xlu0 %11116  ;;  %v7752_v6 = vsel %vm565_vm1, %v11033_v53, %v11034_v63  ;;  %v20075_v29 = vpop.permute.xlu2 %11126 }
 0xf03   :  { %8556 = vmatpush.msrb.mxu2 %v7753_v34  ;;  %8343 = vmatmul.f32.gmra.mxu1 %v19678_v38  ;;  %v20032_v40 = vpop.permute.xlu1 %11121  ;;  %v21442_v34 = vld [vmem:[#allocation26_spill] sm:$0xff]  ;;  %v11118_v2 = vunpack.i.l.bf16 %v19990_v46  ;;  %v11119_v23 = vunpack.i.h.bf16 %v19990_v46 }
 0xf04   :  { %8914 = vmatmul.msk.f32.gmra.mxu0 %vm986_vm8, %v19709_v26  ;;  %8389 = vmatmul.f32.gmra.mxu2 %v19678_v38  ;;  %v11124_v28 = vunpack.i.h.bf16 %v20032_v40 }
 0xf05   :  { %8465 = vmatpush.msrb.mxu3 %v7756_v5  ;;  %8428 = vmatpush.msra.mxu0 %v21437_v22  ;;  %v21445_v5 = vld [vmem:[#allocation50_spill] sm:$0xff]  ;;  %v7751_v46 = vsel %vm565_vm1, %v11084_v42, %v11118_v2  ;;  %v7750_v42 = vsel %vm565_vm1, %v11034_v63, %v11119_v23 }
 0xf06   :  { %8511 = vmatpush.msra.mxu1 %v7754_v1  ;;  %8557 = vmatpush.msrb.mxu2 %v7752_v6  ;;  %v21446_v1 = vld [vmem:[#allocation23_spill] sm:$0xff]  ;;  %v21450_v6 = vld [vmem:[#allocation41_spill] sm:$0xff] }
 0xf07   :  { %8466 = vmatpush.msrb.mxu3 %v7669_v39  ;;  %8429 = vmatpush.msra.mxu0 %v21438_v16  ;;  %v21451_v39 = vld [vmem:[#allocation17_spill] sm:$0xff]  ;;  %v21453_v16 = vld [vmem:[#allocation35_spill] sm:$0xff] }
 0xf08   :  { %8512 = vmatpush.msra.mxu1 %v7667_v49  ;;  %8558 = vmatpush.msrb.mxu2 %v7665_v59  ;;  %v11113_v49 = vunpack.i.l.bf16 %v19963_v56  ;;  %v11114_v59 = vunpack.i.h.bf16 %v19963_v56 }
 0xf09   :  { %8467 = vmatpush.msrb.mxu3 %v7668_v51  ;;  %8430 = vmatpush.msra.mxu0 %v21439_v36  ;;  %v21454_v51 = vld [vmem:[#allocation15_spill] sm:$0xff]  ;;  %v21456_v36 = vld [vmem:[#allocation4_spill] sm:$0xff] }
 0xf0a   :  { %8513 = vmatpush.msra.mxu1 %v7666_v48  ;;  %8559 = vmatpush.msrb.mxu2 %v7664_v7  ;;  %v20045_v17 = vpop.permute.xlu0 %11131  ;;  %v11142_v14 = vpop.permute.xlu2 %11141  ;;  %v7839_v56 = vsel %vm654_vm0, %v11079_v19, %v11113_v49  ;;  %v21463_v19 = vld [vmem:[#allocation38_spill] sm:$0xff] }
 0xf0b   :  { %8468 = vmatpush.msrb.mxu3 %v7581_v52  ;;  %8431 = vmatpush.msra.mxu0 %v21440_v47  ;;  %v11133_v53 = vunpack.i.l.bf16 %v20045_v17  ;;  %v11137_v37 = vpop.permute.xlu1 %11136  ;;  %v11134_v7 = vunpack.i.h.bf16 %v20045_v17  ;;  %v21457_v52 = vld [vmem:[#allocation6_spill] sm:$0xff]  ;;  %v21458_v47 = vld [vmem:[#allocation19_spill] sm:$0xff]  ;;  %v11143_v62 = vunpack.i.l.bf16 %v11142_v14  ;;  %v7838_v17 = vsel %vm654_vm0, %v11014_v12, %v11114_v59 }
 0xf0c   :  { %8915 = vmatmul.msk.f32.vlgmr.msra.gmra.mxu3 %vm986_vm8, %v19645_v41  ;;  %8514 = vmatpush.msra.mxu1 %v7579_v31  ;;  %v11138_v22 = vunpack.i.l.bf16 %v11137_v37  ;;  %v21459_v31 = vld [vmem:[#allocation54_spill] sm:$0xff] }
 0xf0d   :  { %8560 = vmatpush.msrb.mxu2 %v7577_v3  ;;  %8432 = vmatmul.f32.vlgmr.msra.gmra.mxu0 %v19602_v8  ;;  %v7931_v13 = vsel %vm743_vm7, %v11104_v45, %v11133_v53  ;;  %v21448_v45 = vld [vmem:[#allocation42_spill] sm:$0xff]  ;;  %v7927_v12 = vsel %vm743_vm7, %v11134_v7, %v11143_v62 }
 0xf0e   :  { %8469 = vmatpush.msrb.mxu3 %v7580_v18  ;;  %8515 = vmatpush.msra.mxu1 %v7578_v33  ;;  %v7930_v48 = vsel %vm743_vm7, %v11109_v15, %v11138_v22  ;;  %v21460_v15 = vld [vmem:[#allocation10_spill] sm:$0xff]  ;;  %v11139_v18 = vunpack.i.h.bf16 %v11137_v37  ;;  %v21462_v33 = vld [vmem:[#allocation39_spill] sm:$0xff] }
 0xf0f   :  { %8561 = vmatpush.msrb.mxu2 %v7576_v35  ;;  %8917 = vmatmul.msk.f32.vlgmr.msrb.gmra.mxu1 %vm986_vm8, %v19645_v41  ;;  %v21461_v3 = vld [vmem:[#allocation14_spill] sm:$0xff]  ;;  %v7929_v35 = vsel %vm743_vm7, %v11133_v53, %v11134_v7  ;;  %v21484_v7 = vld [vmem:[#allocation65_spill] sm:$0xff] }
 0xf10   :  { %8470 = vmatpush.msrb.mxu3 %v21441_v60  ;;  %8919 = vmatmul.msk.f32.vlgmr.msra.gmra.mxu2 %vm986_vm8, %v19645_v41  ;;  %v11144_v60 = vunpack.i.h.bf16 %v11142_v14  ;;  %v7928_v53 = vsel %vm743_vm7, %v11138_v22, %v11139_v18  ;;  %v21482_v14 = vld [vmem:[#allocation64_spill] sm:$0xff] }
 0xf11   :  { %8516 = vmatpush.msra.mxu1 %v21442_v34  ;;  %8562 = vmatpush.msrb.mxu2 %v21443_v10  ;;  %v21465_v34 = vunpack.i.l.bf16 %v19584_v11 }
 0xf12   :  { %8471 = vmatpush.msrb.mxu3 %v21444_v43  ;;  %8545 = vmatpush.msrb.mxu0 %v7931_v13  ;;  %v21464_v13 = vld [vmem:[#allocation55_spill] sm:$0xff]  ;;  %v11123_v43 = vunpack.i.l.bf16 %v20032_v40  ;;  %v7926_v11 = vsel %vm743_vm7, %v11139_v18, %v11144_v60  ;;  %v21495_v18 = vld [vmem:[#allocation8_spill] sm:$0xff] }
 0xf13   :  { %8517 = vmatpush.msra.mxu1 %v21445_v5  ;;  %8563 = vmatpush.msrb.mxu2 %v21446_v1  ;;  %v7947_v10 = vsel %vm743_vm7, %v11143_v62, %v21465_v34  ;;  %v21466_v5 = vld [vmem:[#allocation31_spill] sm:$0xff]  ;;  %v21491_v62 = vld [vmem:[#allocation60_spill] sm:$0xff] }
 0xf14   :  { %8472 = vmatpush.msrb.mxu3 %v21447_v25  ;;  %8546 = vmatpush.msrb.mxu0 %v7930_v48  ;;  %v21467_v37 = vunpack.i.l.bf16 %v21466_v5  ;;  %v21468_v25 = vunpack.i.l.bf16 %v18978_v4  ;;  %v11128_v4 = vunpack.i.l.bf16 %v20075_v29  ;;  %v7663_v40 = vsel %vm476_vm2, %v11094_v57, %v11123_v43  ;;  %v8725_v5 = vld [vmem:[%s20408_s1 + $0x58] sm:$0xff] }
 0xf15   :  { %8916 = vmatmul.msk.f32.gmra.mxu3 %vm986_vm8, %v19709_v26  ;;  %8518 = vmatpush.msra.mxu1 %v21448_v45  ;;  %v7770_v57 = vsel %vm565_vm1, %v11119_v23, %v21473_v58  ;;  %v8714_v23 = vld [vmem:[%s20408_s1] sm:$0xff] }
 0xf16   :  { %8564 = vmatpush.msrb.mxu2 %v21449_v27  ;;  %8435 = vmatmul.f32.gmra.mxu0 %v19678_v38  ;;  %v7859_v1 = vsel %vm654_vm0, %v11113_v49, %v21467_v37  ;;  %v7946_v45 = vsel %vm743_vm7, %v11144_v60, %v21468_v25  ;;  %v21469_v27 = vld [vmem:[#allocation57_spill] sm:$0xff]  ;;  %v7662_v49 = vsel %vm476_vm2, %v11059_v30, %v11124_v28  ;;  %v21474_v30 = vunpack.i.l.bf16 %v19498_v24  ;;  %v8715_v37 = vld [vmem:[%s20408_s1 + $0x8] sm:$0xff] }
 0xf17   :  { %8473 = vmatpush.msrb.mxu3 %v21450_v6  ;;  %8519 = vmatpush.msra.mxu1 %v21451_v39  ;;  %v21470_v22 = vunpack.i.l.bf16 %v21469_v27  ;;  %v21471_v39 = vld [vmem:[#allocation46_spill] sm:$0xff]  ;;  %v7575_v55 = vsel %vm387_vm3, %v11099_v44, %v11128_v4  ;;  %v21477_v44 = vld [vmem:[#allocation68_spill] sm:$0xff] }
 0xf18   :  { %8565 = vmatpush.msrb.mxu2 %v21452_v61  ;;  %8918 = vmatmul.msk.f32.gmra.mxu1 %vm986_vm8, %v19709_v26  ;;  %v21472_v32 = vunpack.i.l.bf16 %v21471_v39  ;;  %v11129_v61 = vunpack.i.h.bf16 %v20075_v29  ;;  %v7683_v20 = vsel %vm476_vm2, %v11123_v43, %v21474_v30 }
 0xf19   :  { %8474 = vmatpush.msrb.mxu3 %v21453_v16  ;;  %8920 = vmatmul.msk.f32.gmra.mxu2 %vm986_vm8, %v19709_v26  ;;  %v7858_v6 = vsel %vm654_vm0, %v11114_v59, %v21470_v22  ;;  %v21475_v16 = vld [vmem:[#allocation56_spill] sm:$0xff] }
 0xf1a   :  { %8520 = vmatpush.msra.mxu1 %v21454_v51  ;;  %8566 = vmatpush.msrb.mxu2 %v21455_v0  ;;  %v7771_v63 = vsel %vm565_vm1, %v11118_v2, %v21472_v32  ;;  %v7574_v29 = vsel %vm387_vm3, %v11089_v9, %v11129_v61  ;;  %v21476_v59 = vunpack.i.l.bf16 %v21475_v16  ;;  %v21478_v51 = vld [vmem:[#allocation40_spill] sm:$0xff] }
 0xf1b   :  { %8475 = vmatpush.msrb.mxu3 %v21456_v36  ;;  %8600 = vmatpush.msra.mxu0 %v7839_v56  ;;  %v21479_v24 = vunpack.i.h.bf16 %v21478_v51  ;;  %v21481_v9 = vunpack.i.l.bf16 %v21478_v51  ;;  %v21483_v36 = vld [vmem:[#allocation70_spill] sm:$0xff]  ;;  %v21487_v56 = vld [vmem:[#allocation24_spill] sm:$0xff] }
 0xf1c   :  { %8521 = vmatpush.msra.mxu1 %v21457_v52  ;;  %8567 = vmatpush.msrb.mxu2 %v21458_v47  ;;  %v7682_v50 = vsel %vm476_vm2, %v11124_v28, %v21476_v59  ;;  %v21485_v52 = vld [vmem:[#allocation71_spill] sm:$0xff] }
 0xf1d   :  { %8476 = vmatpush.msrb.mxu3 %v21459_v31  ;;  %8601 = vmatpush.msra.mxu0 %v7838_v17  ;;  %v7595_v0 = vsel %vm387_vm3, %v11128_v4, %v21479_v24  ;;  %v7594_v48 = vsel %vm387_vm3, %v11129_v61, %v21481_v9  ;;  %v21486_v47 = vld [vmem:[#allocation59_spill] sm:$0xff]  ;;  %v21490_v31 = vld [vmem:[#allocation30_spill] sm:$0xff]  ;;  %v8716_v24 = vld [vmem:[%s20408_s1 + $0x10] sm:$0xff] }
 0xf1e   :  { %8522 = vmatpush.msra.mxu1 %v21460_v15  ;;  %8568 = vmatpush.msrb.mxu2 %v21461_v3  ;;  %v21492_v15 = vld [vmem:[#allocation21_spill] sm:$0xff]  ;;  %v21494_v17 = vld [vmem:[#allocation47_spill] sm:$0xff] }
 0xf1f   :  { %8477 = vmatpush.msrb.mxu3 %v21462_v33  ;;  %8921 = vmatmul.msk.f32.vlgmr.msrb.gmra.mxu0 %vm986_vm8, %v19645_v41  ;;  %v21493_v3 = vld [vmem:[#allocation13_spill] sm:$0xff]  ;;  %v20244_v33 = vpop.permute.xlu0 %8172  ;;  %v8726_v4 = vld [vmem:[%s20408_s1 + $0x60] sm:$0xff] }
 0xf20   :  { %8478 = vmatmul.f32.vlgmr.msrb.gmra.mxu3 %v19602_v8  ;;  %8523 = vmatpush.msra.mxu1 %v21463_v19 }
 0xf21   :  { %8569 = vmatpush.msrb.mxu2 %v21464_v13  ;;  %8591 = vmatpush.msra.mxu3 %v7929_v35  ;;  %v20247_v13 = vpop.permute.xlu1 %8177 }
 0xf22   :  { %8524 = vmatmul.f32.vlgmr.msra.gmra.mxu1 %v19602_v8  ;;  %8570 = vmatmul.f32.vlgmr.msrb.gmra.mxu2 %v19602_v8 }
 0xf23   :  { %8637 = vmatpush.msrb.mxu1 %v7927_v12  ;;  %8683 = vmatpush.msra.mxu2 %v7947_v10 }
 0xf24   :  { %8592 = vmatpush.msra.mxu3 %v7928_v53  ;;  %8602 = vmatpush.msra.mxu0 %v7751_v46 }
 0xf25   :  { %8638 = vmatpush.msrb.mxu1 %v7926_v11  ;;  %8684 = vmatpush.msra.mxu2 %v7946_v45 }
 0xf26   :  { %8646 = vmatpush.msrb.mxu3 %v7859_v1  ;;  %8603 = vmatpush.msra.mxu0 %v7750_v42 }
 0xf27   :  { %8922 = vmatmul.msk.f32.gmra.mxu0 %vm986_vm8, %v19709_v26 }
 0xf28   :  { %8647 = vmatpush.msrb.mxu3 %v7858_v6  ;;  %8604 = vmatpush.msra.mxu0 %v7663_v40 }
 0xf29   :  { %8481 = vmatmul.f32.gmra.mxu3 %v19678_v38 }
 0xf2a   :  { %8648 = vmatpush.msrb.mxu3 %v7771_v63  ;;  %8527 = vmatmul.f32.gmra.mxu1 %v19678_v38 }
 0xf2b   :  { %8573 = vmatmul.f32.gmra.mxu2 %v19678_v38  ;;  %8605 = vmatpush.msra.mxu0 %v7662_v49 }
 0xf2c   :  { %8649 = vmatpush.msrb.mxu3 %v7770_v57 }
 0xf2d   :  { %8606 = vmatpush.msra.mxu0 %v7575_v55 }
 0xf2e   :  { %8650 = vmatpush.msrb.mxu3 %v7683_v20 }
 0xf2f   :  { %8607 = vmatpush.msra.mxu0 %v7574_v29  ;;  %v8717_v29 = vld [vmem:[%s20408_s1 + $0x18] sm:$0xff] }
 0xf30   :  { %8651 = vmatpush.msrb.mxu3 %v7682_v50 }
 0xf31   :  { %8608 = vmatpush.msra.mxu0 %v21477_v44  ;;  %8923 = vmatmul.msk.f32.vlgmr.msra.gmra.mxu3 %vm986_vm8, %v19645_v41 }
 0xf32   :  { %8652 = vmatpush.msrb.mxu3 %v7595_v0  ;;  %8925 = vmatmul.msk.f32.vlgmr.msrb.gmra.mxu1 %vm986_vm8, %v19645_v41 }
 0xf33   :  { %8609 = vmatpush.msra.mxu0 %v21480_v21  ;;  %8927 = vmatmul.msk.f32.vlgmr.msra.gmra.mxu2 %vm986_vm8, %v19645_v41  ;;  %v21489_v41 = vld [vmem:[#allocation62_spill] sm:$0xff] }
 0xf34   :  { %8653 = vmatpush.msrb.mxu3 %v7594_v48 }
 0xf35   :  { %8610 = vmatpush.msra.mxu0 %v21482_v14 }
 0xf36   :  { %8654 = vmatpush.msrb.mxu3 %v21483_v36 }
 0xf37   :  { %8611 = vmatpush.msra.mxu0 %v21484_v7 }
 0xf38   :  { %8655 = vmatpush.msrb.mxu3 %v21485_v52  ;;  %v8728_v52 = vld [vmem:[%s20408_s1 + $0x70] sm:$0xff] }
 0xf39   :  { %8612 = vmatpush.msra.mxu0 %v21486_v47  ;;  %8924 = vmatmul.msk.f32.gmra.mxu3 %vm986_vm8, %v19709_v26 }
 0xf3a   :  { %8656 = vmatpush.msrb.mxu3 %v21487_v56  ;;  %8926 = vmatmul.msk.f32.gmra.mxu1 %vm986_vm8, %v19709_v26 }
 0xf3b   :  { %8613 = vmatpush.msra.mxu0 %v21488_v54  ;;  %8928 = vmatmul.msk.f32.gmra.mxu2 %vm986_vm8, %v19709_v26 }
 0xf3c   :  { %8657 = vmatpush.msrb.mxu3 %v21489_v41 }
 0xf3d   :  { %8614 = vmatpush.msra.mxu0 %v21490_v31 }
 0xf3e   :  { %8658 = vmatpush.msrb.mxu3 %v21491_v62 }
 0xf3f   :  { %8615 = vmatpush.msra.mxu0 %v21492_v15  ;;  %v8727_v15 = vld [vmem:[%s20408_s1 + $0x68] sm:$0xff] }
 0xf40   :  { %8659 = vmatpush.msrb.mxu3 %v21493_v3  ;;  %8616 = vmatmul.f32.vlgmr.msra.gmra.mxu0 %v19602_v8 }
 0xf42   :  { %8660 = vmatpush.msrb.mxu3 %v21494_v17 }
 0xf44   :  { %8661 = vmatpush.msrb.mxu3 %v21495_v18 }
 0xf45   :  { %8662 = vmatmul.f32.vlgmr.msrb.gmra.mxu3 %v19602_v8 }
 0xf48   :  { %8619 = vmatmul.f32.gmra.mxu0 %v19678_v38 }
 0xf4d   :  { %8665 = vmatmul.f32.gmra.mxu3 %v19678_v38 }
 0xf51   :  { %v8203_v26 = vpop.f32.mrf.mxu2 }
 0xf52   :  { %v8204_v2 = vadd.f32 %v8203_v26, %v20244_v33 }
 0xf56   :  { %v8226_v19 = vpop.f32.mrf.mxu3 }
 0xf57   :  { %v8227_v35 = vadd.f32 %v8226_v19, %v8204_v2 }
 0xf59   :  { %11169 = vtanh.f32 %v8227_v35 }
 0xf5a   :  { %v8206_v60 = vpop.f32.mrf.mxu2 }
 0xf5b   :  { %v8207_v8 = vadd.f32 %v8206_v60, %v20247_v13  ;;  %v8719_v60 = vld [vmem:[%s20408_s1 + $0x28] sm:$0xff] }
 0xf5d   :  { %v8249_v12 = vpop.f32.mrf.mxu0 }
 0xf5e   :  { %v8250_v38 = vadd.f32 %v8249_v12, %v20244_v33  ;;  %v8229_v34 = vpop.f32.mrf.mxu3 }
 0xf5f   :  { %v11170_v10 = vpop.eup %11169  ;;  %v8230_v53 = vadd.f32 %v8229_v34, %v8207_v8 }
 0xf60   :  { %v8272_v43 = vpop.f32.mrf.mxu1  ;;  %v8736_v46 = vadd.f32 %v11170_v10, %v8714_v23 }
 0xf61   :  { %v8273_v11 = vadd.f32 %v8272_v43, %v8250_v38  ;;  %11171 = vtanh.f32 %v8230_v53  ;;  %v8718_v38 = vld [vmem:[%s20408_s1 + $0x20] sm:$0xff] }
 0xf62   :  { %8758 = vst [vmem:[%s20409_s7] sm:$0xff] %v8736_v46 }
 0xf63   :  { %11173 = vtanh.f32 %v8273_v11 }
 0xf67   :  { %v8252_v1 = vpop.f32.mrf.mxu0  ;;  %v11172_v25 = vpop.eup %11171 }
 0xf68   :  { %v8253_v45 = vadd.f32 %v8252_v1, %v20247_v13  ;;  %v8747_v42 = vadd.f32 %v11172_v25, %v8725_v5  ;;  %v8730_v1 = vld [vmem:[%s20408_s1 + $0x80] sm:$0xff] }
 0xf69   :  { %v11174_v28 = vpop.eup %11173  ;;  %v8275_v22 = vpop.f32.mrf.mxu1 }
 0xf6a   :  { %v8737_v27 = vadd.f32 %v11174_v28, %v8715_v37  ;;  %8769 = vst [vmem:[%s20409_s7 + $0x58] sm:$0xff] %v8747_v42  ;;  %v8276_v6 = vadd.f32 %v8275_v22, %v8253_v45  ;;  %v8318_v32 = vpop.f32.mrf.mxu2  ;;  %v8729_v28 = vld [vmem:[%s20408_s1 + $0x78] sm:$0xff] }
 0xf6c   :  { %8759 = vst [vmem:[%s20409_s7 + $0x8] sm:$0xff] %v8737_v27  ;;  %11175 = vtanh.f32 %v8276_v6 }
 0xf72   :  { %v11176_v40 = vpop.eup %11175  ;;  %v8321_v20 = vpop.f32.mrf.mxu2 }
 0xf73   :  { %v8748_v39 = vadd.f32 %v11176_v40, %v8726_v4 }
 0xf75   :  { %8770 = vst [vmem:[%s20409_s7 + $0x60] sm:$0xff] %v8748_v39  ;;  %v8341_v63 = vpop.f32.mrf.mxu1 }
 0xf76   :  { %v8342_v49 = vadd.f32 %v8341_v63, %v20244_v33  ;;  %v8364_v58 = vpop.f32.mrf.mxu0 }
 0xf78   :  { %v8365_v57 = vadd.f32 %v8364_v58, %v8342_v49 }
 0xf79   :  { %v8295_v61 = vpop.f32.mrf.mxu3 }
 0xf7a   :  { %11177 = vtanh.f32 %v8365_v57  ;;  %v8296_v55 = vadd.f32 %v8295_v61, %v20244_v33  ;;  %v8721_v57 = vld [vmem:[%s20408_s1 + $0x38] sm:$0xff] }
 0xf7c   :  { %v8319_v30 = vadd.f32 %v8318_v32, %v8296_v55  ;;  %v8387_v36 = vpop.f32.mrf.mxu2 }
 0xf7d   :  { %v8388_v62 = vadd.f32 %v8387_v36, %v20244_v33 }
 0xf7e   :  { %11179 = vtanh.f32 %v8319_v30 }
 0xf80   :  { %v11178_v16 = vpop.eup %11177  ;;  %v8344_v59 = vpop.f32.mrf.mxu1 }
 0xf81   :  { %v8367_v50 = vpop.f32.mrf.mxu0  ;;  %v8739_v44 = vadd.f32 %v11178_v16, %v8717_v29  ;;  %v8345_v51 = vadd.f32 %v8344_v59, %v20247_v13  ;;  %v8720_v16 = vld [vmem:[%s20408_s1 + $0x30] sm:$0xff] }
 0xf83   :  { %8761 = vst [vmem:[%s20409_s7 + $0x18] sm:$0xff] %v8739_v44  ;;  %v8368_v0 = vadd.f32 %v8367_v50, %v8345_v51 }
 0xf84   :  { %v11180_v21 = vpop.eup %11179 }
 0xf85   :  { %v8298_v9 = vpop.f32.mrf.mxu3  ;;  %v8738_v48 = vadd.f32 %v11180_v21, %v8716_v24  ;;  %11181 = vtanh.f32 %v8368_v0  ;;  %v8732_v21 = vld [vmem:[%s20408_s1 + $0x90] sm:$0xff] }
 0xf86   :  { %v8299_v14 = vadd.f32 %v8298_v9, %v20247_v13 }
 0xf87   :  { %8760 = vst [vmem:[%s20409_s7 + $0x10] sm:$0xff] %v8738_v48  ;;  %v8390_v19 = vpop.f32.mrf.mxu2 }
 0xf88   :  { %v8322_v7 = vadd.f32 %v8321_v20, %v8299_v14  ;;  %v8391_v10 = vadd.f32 %v8390_v19, %v20247_v13 }
 0xf8a   :  { %11183 = vtanh.f32 %v8322_v7  ;;  %v8433_v47 = vpop.f32.mrf.mxu0  ;;  %v8731_v7 = vld [vmem:[%s20408_s1 + $0x88] sm:$0xff] }
 0xf8b   :  { %v11182_v56 = vpop.eup %11181  ;;  %v8434_v54 = vadd.f32 %v8433_v47, %v20244_v33 }
 0xf8c   :  { %v8750_v41 = vadd.f32 %v11182_v56, %v8728_v52  ;;  %v8456_v31 = vpop.f32.mrf.mxu1 }
 0xf8d   :  { %v8457_v3 = vadd.f32 %v8456_v31, %v8434_v54  ;;  %v8722_v31 = vld [vmem:[%s20408_s1 + $0x40] sm:$0xff] }
 0xf8e   :  { %8772 = vst [vmem:[%s20409_s7 + $0x70] sm:$0xff] %v8750_v41 }
 0xf8f   :  { %v8410_v17 = vpop.f32.mrf.mxu3  ;;  %11185 = vtanh.f32 %v8457_v3 }
 0xf90   :  { %v11184_v18 = vpop.eup %11183  ;;  %v8411_v26 = vadd.f32 %v8410_v17, %v8388_v62 }
 0xf91   :  { %v8749_v2 = vadd.f32 %v11184_v18, %v8727_v15 }
 0xf92   :  { %11187 = vtanh.f32 %v8411_v26 }
 0xf93   :  { %8771 = vst [vmem:[%s20409_s7 + $0x68] sm:$0xff] %v8749_v2  ;;  %v8436_v35 = vpop.f32.mrf.mxu0  ;;  %v8502_v37 = vpop.f32.mrf.mxu2 }
 0xf94   :  { %v8437_v23 = vadd.f32 %v8436_v35, %v20247_v13  ;;  %v8733_v35 = vld [vmem:[%s20408_s1 + $0x98] sm:$0xff] }
 0xf95   :  { %v8459_v8 = vpop.f32.mrf.mxu1  ;;  %v11186_v12 = vpop.eup %11185 }
 0xf96   :  { %v8460_v34 = vadd.f32 %v8459_v8, %v8437_v23  ;;  %v8741_v53 = vadd.f32 %v11186_v12, %v8719_v60 }
 0xf98   :  { %v11188_v43 = vpop.eup %11187  ;;  %11189 = vtanh.f32 %v8460_v34  ;;  %v8413_v46 = vpop.f32.mrf.mxu3  ;;  %8763 = vst [vmem:[%s20409_s7 + $0x28] sm:$0xff] %v8741_v53 }
 0xf99   :  { %v8740_v11 = vadd.f32 %v11188_v43, %v8718_v38  ;;  %v8414_v5 = vadd.f32 %v8413_v46, %v8391_v10  ;;  %v8723_v38 = vld [vmem:[%s20408_s1 + $0x48] sm:$0xff] }
 0xf9b   :  { %8762 = vst [vmem:[%s20409_s7 + $0x20] sm:$0xff] %v8740_v11  ;;  %11191 = vtanh.f32 %v8414_v5 }
 0xf9c   :  { %v8548_v6 = vpop.f32.mrf.mxu0  ;;  %v8505_v32 = vpop.f32.mrf.mxu2 }
 0xf9e   :  { %v11190_v25 = vpop.eup %11189 }
 0xf9f   :  { %v8752_v45 = vadd.f32 %v11190_v25, %v8730_v1  ;;  %v8525_v42 = vpop.f32.mrf.mxu1  ;;  %v8734_v1 = vld [vmem:[%s20408_s1 + $0xa0] sm:$0xff] }
 0xfa0   :  { %v8526_v27 = vadd.f32 %v8525_v42, %v20244_v33 }
 0xfa1   :  { %v11192_v22 = vpop.eup %11191  ;;  %8774 = vst [vmem:[%s20409_s7 + $0x80] sm:$0xff] %v8752_v45 }
 0xfa2   :  { %v8751_v4 = vadd.f32 %v11192_v22, %v8729_v28  ;;  %v8549_v40 = vadd.f32 %v8548_v6, %v8526_v27  ;;  %v8724_v27 = vld [vmem:[%s20408_s1 + $0x50] sm:$0xff] }
 0xfa3   :  { %v8479_v39 = vpop.f32.mrf.mxu3 }
 0xfa4   :  { %8773 = vst [vmem:[%s20409_s7 + $0x78] sm:$0xff] %v8751_v4  ;;  %11193 = vtanh.f32 %v8549_v40  ;;  %v8480_v63 = vadd.f32 %v8479_v39, %v20244_v33  ;;  %v8551_v55 = vpop.f32.mrf.mxu0  ;;  %v8735_v40 = vld [vmem:[%s20408_s1 + $0xa8] sm:$0xff] }
 0xfa5   :  { %v8571_v51 = vpop.f32.mrf.mxu2 }
 0xfa6   :  { %v8503_v49 = vadd.f32 %v8502_v37, %v8480_v63  ;;  %v8572_v48 = vadd.f32 %v8571_v51, %v20244_v33 }
 0xfa7   :  { %v8528_v58 = vpop.f32.mrf.mxu1 }
 0xfa8   :  { %11195 = vtanh.f32 %v8503_v49  ;;  %v8529_v61 = vadd.f32 %v8528_v58, %v20247_v13 }
 0xfaa   :  { %v11194_v30 = vpop.eup %11193  ;;  %v8552_v20 = vadd.f32 %v8551_v55, %v8529_v61 }
 0xfab   :  { %v8743_v29 = vadd.f32 %v11194_v30, %v8721_v57 }
 0xfac   :  { %11197 = vtanh.f32 %v8552_v20  ;;  %v8482_v59 = vpop.f32.mrf.mxu3 }
 0xfad   :  { %8765 = vst [vmem:[%s20409_s7 + $0x38] sm:$0xff] %v8743_v29  ;;  %v8483_v50 = vadd.f32 %v8482_v59, %v20247_v13 }
 0xfae   :  { %v11196_v44 = vpop.eup %11195  ;;  %v8574_v54 = vpop.f32.mrf.mxu2 }
 0xfaf   :  { %v8742_v24 = vadd.f32 %v11196_v44, %v8720_v16  ;;  %v8506_v0 = vadd.f32 %v8505_v32, %v8483_v50  ;;  %v8575_v41 = vadd.f32 %v8574_v54, %v20247_v13  ;;  %v8640_v62 = vpop.f32.mrf.mxu1 }
 0xfb1   :  { %8764 = vst [vmem:[%s20409_s7 + $0x30] sm:$0xff] %v8742_v24  ;;  %11199 = vtanh.f32 %v8506_v0 }
 0xfb2   :  { %v11198_v9 = vpop.eup %11197 }
 0xfb3   :  { %v8754_v14 = vadd.f32 %v11198_v9, %v8732_v21 }
 0xfb4   :  { %v8594_v36 = vpop.f32.mrf.mxu3 }
 0xfb5   :  { %8776 = vst [vmem:[%s20409_s7 + $0x90] sm:$0xff] %v8754_v14  ;;  %v8595_v52 = vadd.f32 %v8594_v36, %v8572_v48 }
 0xfb6   :  { %v8686_v10 = vpop.f32.mrf.mxu2 }
 0xfb7   :  { %v11200_v47 = vpop.eup %11199  ;;  %11201 = vtanh.f32 %v8595_v52  ;;  %v8643_v8 = vpop.f32.mrf.mxu1 }
 0xfb8   :  { %v8753_v56 = vadd.f32 %v11200_v47, %v8731_v7 }
 0xfba   :  { %8775 = vst [vmem:[%s20409_s7 + $0x88] sm:$0xff] %v8753_v56 }
 0xfbc   :  { %v8597_v15 = vpop.f32.mrf.mxu3 }
 0xfbd   :  { %v11202_v3 = vpop.eup %11201  ;;  %v8598_v17 = vadd.f32 %v8597_v15, %v8575_v41  ;;  %v8617_v18 = vpop.f32.mrf.mxu0 }
 0xfbe   :  { %v8744_v26 = vadd.f32 %v11202_v3, %v8722_v31  ;;  %v8618_v2 = vadd.f32 %v8617_v18, %v20244_v33  ;;  %v8689_v28 = vpop.f32.mrf.mxu2 }
 0xfbf   :  { %11203 = vtanh.f32 %v8598_v17 }
 0xfc0   :  { %8766 = vst [vmem:[%s20409_s7 + $0x40] sm:$0xff] %v8744_v26  ;;  %v8641_v19 = vadd.f32 %v8640_v62, %v8618_v2 }
 0xfc2   :  { %11205 = vtanh.f32 %v8641_v19 }
 0xfc5   :  { %v11204_v60 = vpop.eup %11203  ;;  %v8620_v23 = vpop.f32.mrf.mxu0 }
 0xfc6   :  { %v8755_v12 = vadd.f32 %v11204_v60, %v8733_v35  ;;  %v8621_v34 = vadd.f32 %v8620_v23, %v20247_v13 }
 0xfc8   :  { %v11206_v53 = vpop.eup %11205  ;;  %8777 = vst [vmem:[%s20409_s7 + $0x98] sm:$0xff] %v8755_v12  ;;  %v8644_v43 = vadd.f32 %v8643_v8, %v8621_v34  ;;  %v8663_v46 = vpop.f32.mrf.mxu3 }
 0xfc9   :  { %v8745_v11 = vadd.f32 %v11206_v53, %v8723_v38  ;;  %v8664_v5 = vadd.f32 %v8663_v46, %v20244_v33 }
 0xfca   :  { %11207 = vtanh.f32 %v8644_v43 }
 0xfcb   :  { %8767 = vst [vmem:[%s20409_s7 + $0x48] sm:$0xff] %v8745_v11  ;;  %v8687_v37 = vadd.f32 %v8686_v10, %v8664_v5 }
 0xfcd   :  { %11209 = vtanh.f32 %v8687_v37 }
 0xfd0   :  { %v11208_v25 = vpop.eup %11207  ;;  %v8666_v45 = vpop.f32.mrf.mxu3 }
 0xfd1   :  { %v8756_v42 = vadd.f32 %v11208_v25, %v8734_v1  ;;  %v8667_v33 = vadd.f32 %v8666_v45, %v20247_v13 }
 0xfd3   :  { %v11210_v22 = vpop.eup %11209  ;;  %8778 = vst [vmem:[%s20409_s7 + $0xa0] sm:$0xff] %v8756_v42  ;;  %v8690_v6 = vadd.f32 %v8689_v28, %v8667_v33 }
 0xfd4   :  { %v8746_v4 = vadd.f32 %v11210_v22, %v8724_v27 }
 0xfd5   :  { %11211 = vtanh.f32 %v8690_v6 }
 0xfd6   :  { %8768 = vst [vmem:[%s20409_s7 + $0x50] sm:$0xff] %v8746_v4 }
 0xfdb   :  { %v11212_v39 = vpop.eup %11211 }
 0xfdc   :  { %v8757_v32 = vadd.f32 %v11212_v39, %v8735_v40 }
 0xfde   :  { %8779 = vst [vmem:[%s20409_s7 + $0xa8] sm:$0xff] %v8757_v32 }

</bundles_post_ra>
